<compile_context>
chip_gen: v5e
topology: v5e:2x2
jax: 0.10.0
libtpu: 0.0.40
codegen_flags: <defaults>
</compile_context>

<pallas_src>
import math
import numpy as np

import jax
import jax.numpy as jnp
from jax.experimental import pallas as pl
from jax.experimental.pallas import tpu as pltpu


def _pe_random_kernel(params_ref, coords_ref, out_ref):
    # params_ref: (2F, 3) f32 -- col 0: 2*pi*G[0] (dup'd), col 1: 2*pi*G[1]
    #             (dup'd), col 2: phase {0, pi/2}.  Resident in VMEM.
    # coords_ref: (2, TN) f32 -- row 0: cx in [-1, 1], row 1: cy in [-1, 1]
    # out_ref   : (2F, TN) f32
    gx = params_ref[:, 0:1]          # (2F, 1)
    gy = params_ref[:, 1:2]          # (2F, 1)
    ph = params_ref[:, 2:3]          # (2F, 1)
    cx = coords_ref[0:1, :]          # (1, TN)
    cy = coords_ref[1:2, :]          # (1, TN)

    # Outer-product broadcasts -> (2F, TN); single transcendental pass.
    angle = gx * cx + gy * cy + ph
    out_ref[...] = jnp.sin(angle)


def _choose_tile_n(n, max_tile=8192):
    """Largest spatial tile: full N if small, else a multiple-of-128 divisor."""
    if n <= max_tile:
        return n
    t = max_tile - (max_tile % 128)
    while t >= 128:
        if n % t == 0:
            return t
        t -= 128
    return n  # fallback: single block


def position_embedding_random(x, gaussian_matrix, *, num_pos_feats=64):
    """Pallas implementation of PositionEmbeddingRandom.forward.

    x:                (B, C, H, W) array (NCHW, like PyTorch) -- shape only.
    gaussian_matrix:  (2, num_pos_feats) float32 buffer (already scaled).
    Returns:          (B, 2*num_pos_feats, H, W) float32, matching PyTorch.
    """
    B, _, H, W = x.shape
    F = num_pos_feats
    assert gaussian_matrix.shape == (2, F)
    two_pi = 2.0 * math.pi

    # Per-channel gains at full 2F = 128 width, with 2*pi folded in, plus the
    # sin/cos phase so the kernel needs only one sin pass.
    g = gaussian_matrix.astype(jnp.float32)
    gx = jnp.concatenate([g[0], g[0]]) * two_pi                       # (2F,)
    gy = jnp.concatenate([g[1], g[1]]) * two_pi                       # (2F,)
    phase = jnp.concatenate([jnp.zeros((F,), jnp.float32),
                             jnp.full((F,), 0.5 * math.pi, jnp.float32)])
    params = jnp.stack([gx, gy, phase], axis=1)                       # (2F, 3)

    # Normalized grid coords mapped to [-1, 1], flattened row-major (y major):
    # r = i*W + j  ->  cx[r] = 2*(j+0.5)/W - 1,  cy[r] = 2*(i+0.5)/H - 1.
    xs = 2.0 * ((jnp.arange(W, dtype=jnp.float32) + 0.5) / W) - 1.0
    ys = 2.0 * ((jnp.arange(H, dtype=jnp.float32) + 0.5) / H) - 1.0
    cx = jnp.tile(xs, H)                                              # (N,)
    cy = jnp.repeat(ys, W)                                            # (N,)
    coords = jnp.stack([cx, cy], axis=0)                              # (2, N)

    N = H * W
    TN = _choose_tile_n(N)
    grid = (N // TN,)

    pe_flat = pl.pallas_call(
        _pe_random_kernel,
        out_shape=jax.ShapeDtypeStruct((2 * F, N), jnp.float32),
        grid_spec=pltpu.PrefetchScalarGridSpec(
            num_scalar_prefetch=0,
            grid=grid,
            in_specs=[
                # Constant block index -> stays resident in VMEM across steps.
                pl.BlockSpec((2 * F, 3), lambda n: (0, 0)),
                pl.BlockSpec((2, TN), lambda n: (0, n)),
            ],
            out_specs=pl.BlockSpec((2 * F, TN), lambda n: (0, n)),
        ),
        compiler_params=pltpu.CompilerParams(
            dimension_semantics=("parallel",)),
    )(params, coords)

    # Row-major metadata reshape (no data movement), then batch broadcast —
    # matches pe.permute(2,0,1).unsqueeze(0).repeat(b,1,1,1).
    pe = pe_flat.reshape(2 * F, H, W)
    return jnp.broadcast_to(pe[None], (B, 2 * F, H, W))


def _reference(x, gaussian_matrix):
    """Pure-JAX port of PositionEmbeddingRandom.forward, used as ground truth."""
    b, _, h, w = x.shape
    grid = jnp.ones((h, w), jnp.float32)
    y_embed = (jnp.cumsum(grid, axis=0) - 0.5) / h
    x_embed = (jnp.cumsum(grid, axis=1) - 0.5) / w
    coords = jnp.stack([x_embed, y_embed], axis=-1)                   # (h, w, 2)
    coords = 2.0 * coords - 1.0
    coords = coords @ gaussian_matrix.astype(jnp.float32)             # (h, w, F)
    coords = 2.0 * np.pi * coords
    pe = jnp.concatenate([jnp.sin(coords), jnp.cos(coords)], axis=-1)  # (h,w,2F)
    pe = jnp.transpose(pe, (2, 0, 1))                                  # (2F,h,w)
    return jnp.broadcast_to(pe[None], (b,) + pe.shape)


if __name__ == "__main__":
    key = jax.random.PRNGKey(0)
    kx, kg = jax.random.split(key)

    B, C, H, W = 2, 4, 16, 16
    F = 64
    scale = 1.0  # PyTorch: scale=None -> 1.0

    x = jax.random.normal(kx, (B, C, H, W), dtype=jnp.float32)  # shape only
    gaussian_matrix = scale * jax.random.normal(kg, (2, F), dtype=jnp.float32)

    pos = position_embedding_random(x, gaussian_matrix, num_pos_feats=F)
    pos = jax.block_until_ready(pos)

    ref = _reference(x, gaussian_matrix)
    assert pos.shape == (B, 2 * F, H, W)
    np.testing.assert_allclose(np.asarray(pos), np.asarray(ref),
                               rtol=1e-5, atol=2e-5)

    print("KERNEL_OK")
</pallas_src>

<mosaic_0001>
module attributes {stable_mosaic.version = 11 : i64} {
  func.func @_pe_random_kernel(%arg0: i32, %arg1: memref<128x3xf32, #tpu.memory_space<vmem>>, %arg2: memref<2x256xf32, #tpu.memory_space<vmem>>, %arg3: memref<128x256xf32, #tpu.memory_space<vmem>>) attributes {dimension_semantics = [#tpu.dimension_semantics<parallel>], iteration_bounds = array<i64: 1>, scalar_prefetch = 0 : i64, scratch_operands = 0 : i64, tpu.core_type = #tpu.core_type<tc>, window_params = [{pipeline_mode = #tpu.pipeline_mode<synchronous>, transform_indices = @transform_0, window_bounds = array<i64: 128, 3>}, {transform_indices = @transform_1, window_bounds = array<i64: 2, 256>}, {transform_indices = @transform_2, window_bounds = array<i64: 128, 256>}]} {
    %c0 = arith.constant 0 : index
    %c0_0 = arith.constant 0 : index
    %0 = vector.load %arg1[%c0, %c0_0] : memref<128x3xf32, #tpu.memory_space<vmem>>, vector<128x1xf32>
    %c0_1 = arith.constant 0 : index
    %c1 = arith.constant 1 : index
    %1 = vector.load %arg1[%c0_1, %c1] : memref<128x3xf32, #tpu.memory_space<vmem>>, vector<128x1xf32>
    %c0_2 = arith.constant 0 : index
    %c2 = arith.constant 2 : index
    %2 = vector.load %arg1[%c0_2, %c2] : memref<128x3xf32, #tpu.memory_space<vmem>>, vector<128x1xf32>
    %c0_3 = arith.constant 0 : index
    %c0_4 = arith.constant 0 : index
    %3 = vector.load %arg2[%c0_3, %c0_4] : memref<2x256xf32, #tpu.memory_space<vmem>>, vector<1x256xf32>
    %c1_5 = arith.constant 1 : index
    %c0_6 = arith.constant 0 : index
    %4 = vector.load %arg2[%c1_5, %c0_6] : memref<2x256xf32, #tpu.memory_space<vmem>>, vector<1x256xf32>
    %5 = vector.broadcast %0 : vector<128x1xf32> to vector<128x256xf32>
    %6 = vector.broadcast %3 : vector<1x256xf32> to vector<128x256xf32>
    %7 = arith.mulf %5, %6 : vector<128x256xf32>
    %8 = vector.broadcast %1 : vector<128x1xf32> to vector<128x256xf32>
    %9 = vector.broadcast %4 : vector<1x256xf32> to vector<128x256xf32>
    %10 = arith.mulf %8, %9 : vector<128x256xf32>
    %11 = arith.addf %7, %10 : vector<128x256xf32>
    %12 = vector.broadcast %2 : vector<128x1xf32> to vector<128x256xf32>
    %13 = arith.addf %11, %12 : vector<128x256xf32>
    %14 = math.sin %13 : vector<128x256xf32>
    %c0_7 = arith.constant 0 : index
    %c0_8 = arith.constant 0 : index
    %15 = vector.load %arg3[%c0_7, %c0_8] : memref<128x256xf32, #tpu.memory_space<vmem>>, vector<128x256xf32>
    tpu.vector_store %arg3[%c0_7, %c0_8], %14 {strides = array<i32>} : memref<128x256xf32, #tpu.memory_space<vmem>>, vector<128x256xf32>,
    return
  }
  func.func @transform_0(%arg0: i32) -> (i32, i32) {
    %c0_i32 = arith.constant 0 : i32
    %c0_i32_0 = arith.constant 0 : i32
    %c0_i32_1 = arith.constant 0 : i32
    return %c0_i32, %c0_i32_0 : i32, i32
  }
  func.func @transform_1(%arg0: i32) -> (i32, i32) {
    %c0_i32 = arith.constant 0 : i32
    %c0_i32_0 = arith.constant 0 : i32
    return %c0_i32, %arg0 : i32, i32
  }
  func.func @transform_2(%arg0: i32) -> (i32, i32) {
    %c0_i32 = arith.constant 0 : i32
    %c0_i32_0 = arith.constant 0 : i32
    return %c0_i32, %arg0 : i32, i32
  }
}

</mosaic_0001>

<bundles_post_ra>
// kernel: tpu_custom_call.1
= control target key start
LH: loop header
LB: loop body
LE: loop exit
PB: predicated region body
PF: predicated region fallthrough
CT: control target
= control target key end

     0   :  { %v9583_v3 = vmov 0   ;;  %s9565_s0 = inlined_call_operand.vmem [shape: f32[128,3], index: 0, kind: input, shape index: {}]   ;;  %s9566_s1 = inlined_call_operand.vmem [shape: f32[2,256], index: 1, kind: input, shape index: {}]   ;;  %s9567_s2 = inlined_call_operand.hbm [shape: f32[128,256], index: 2, kind: output, shape index: {}]  }
   0x1   :  { %v5561_v0 = vld [vmem:[%s9565_s0 + $0x20] sm:$0xff]  ;;  %v14_v1 = vld [vmem:[%s9565_s0 + $0x10] sm:$0xff]  ;;  %5498 = vset.pattern.permute.xlu2 %v9583_v3  ;;  %5497 = vset.pattern.permute.xlu1 %v9583_v3 }
   0x2   :  { %v12_v2 = vld [vmem:[%s9565_s0] sm:$0xff]  ;;  %5496 = vset.pattern.permute.xlu0 %v9583_v3  ;;  %53 = vperm.xlu2 %5498, %v5561_v0  }
   0x3   :  { %43 = vperm.xlu1 %5497, %v14_v1   ;;  %33 = vperm.xlu0 %5496, %v12_v2  }
   0x4   :  { %7 = vsyncpa [#allocation3], 0  ;;  %v17_v4 = vld [vmem:[%s9565_s0 + $0x28] sm:$0xff]  ;;  %v15_v5 = vld [vmem:[%s9565_s0 + $0x18] sm:$0xff]  ;;  %v5532_v17 = vmov 1   ;;  %v5533_v18 = vmov 2  }
   0x5   :  { %v13_v6 = vld [vmem:[%s9565_s0 + $0x8] sm:$0xff]  ;;  %v20_v7 = vld [vmem:[%s9565_s0 + $0x40] sm:$0xff]  ;;  %v19_v8 = vld [vmem:[%s9565_s0 + $0x38] sm:$0xff]  ;;  %s5375_s19 = sshll.u32 %s9567_s2, 4  ;;  %s5541_s20 = smov 256   ;;  %s5376_s19 = int_to_ptr.hbm [resolvable:$true] %s5375_s19 }
   0x6   :  { %v18_v9 = vld [vmem:[%s9565_s0 + $0x30] sm:$0xff]  ;;  %v23_v10 = vld [vmem:[%s9565_s0 + $0x58] sm:$0xff]  ;;  %v21_v12 = vld [vmem:[%s9565_s0 + $0x48] sm:$0xff]  ;;  %s5542_s21 = smov 16  }
   0x7   :  { %v22_v11 = vld [vmem:[%s9565_s0 + $0x50] sm:$0xff]  ;;  %v25_v14 = vld [vmem:[%s9565_s0 + $0x68] sm:$0xff]  ;;  %v24_v15 = vld [vmem:[%s9565_s0 + $0x60] sm:$0xff] }
   0x8   :  { %v26_v13 = vld [vmem:[%s9565_s0 + $0x70] sm:$0xff]  ;;  %v27_v16 = vld [vmem:[%s9565_s0 + $0x78] sm:$0xff]  ;;  %v28_v28 = vld [vmem:[%s9566_s1] ss:$2 sm:$0x3] }
   0x9   :  { %v5387_v29 = vld [vmem:[%s9566_s1 + $0x1] ss:$2 sm:$0x3]  ;;  %v5636_v30 = vperm.slane %v28_v28, 0  ;;  %v5638_v31 = vperm.slane %v28_v28, 1  ;;  %s5540_s1 = smov [#allocation2]  }
   0xa   :  { %58 = vperm.xlu2 %5498, %v17_v4   ;;  %v5640_v32 = vperm.slane %v5387_v29, 0  ;;  %v5642_v33 = vperm.slane %v5387_v29, 1  ;;  %v9572_v29 = vmov 683565275   ;;  %s5373_s16 = sshll.u32 %s5540_s1, 4  ;;  %s5374_s16 = int_to_ptr.vmem [resolvable:$true] %s5373_s16 }
   0xb   :  { %48 = vperm.xlu1 %5497, %v15_v5   ;;  %38 = vperm.xlu0 %5496, %v13_v6  }
  0x12   :  { %73 = vperm.xlu2 %5498, %v20_v7  }
  0x13   :  { %68 = vperm.xlu1 %5497, %v19_v8   ;;  %63 = vperm.xlu0 %5496, %v18_v9  }
  0x1a   :  { %88 = vperm.xlu2 %5498, %v23_v10  }
  0x1b   :  { %83 = vperm.xlu1 %5497, %v22_v11   ;;  %78 = vperm.xlu0 %5496, %v21_v12  }
  0x22   :  { %103 = vperm.xlu2 %5498, %v26_v13  }
  0x23   :  { %98 = vperm.xlu1 %5497, %v25_v14   ;;  %93 = vperm.xlu0 %5496, %v24_v15  }
  0x2a   :  { %5500 = vset.pattern.permute.xlu2 %v5532_v17 }
  0x2b   :  { %5499 = vset.pattern.permute.xlu1 %v5532_v17  ;;  %108 = vperm.xlu0 %5496, %v27_v16  }
  0x2c   :  { %153 = vperm.xlu2 %5500, %v13_v6   ;;  %149 = vperm.xlu1 %5499, %v12_v2  }
  0x33   :  { %5501 = vset.pattern.permute.xlu0 %v5532_v17 }
  0x34   :  { %165 = vperm.xlu2 %5500, %v5561_v0   ;;  %161 = vperm.xlu1 %5499, %v15_v5  }
  0x35   :  { %157 = vperm.xlu0 %5501, %v14_v1  }
  0x3c   :  { %173 = vperm.xlu2 %5500, %v18_v9   ;;  %169 = vperm.xlu1 %5499, %v17_v4  }
  0x3d   :  { %177 = vperm.xlu0 %5501, %v19_v8  }
  0x44   :  { %185 = vperm.xlu2 %5500, %v21_v12   ;;  %181 = vperm.xlu1 %5499, %v20_v7  }
  0x45   :  { %189 = vperm.xlu0 %5501, %v22_v11  }
  0x4c   :  { %197 = vperm.xlu2 %5500, %v24_v15   ;;  %193 = vperm.xlu1 %5499, %v23_v10  }
  0x4d   :  { %201 = vperm.xlu0 %5501, %v25_v14  }
  0x54   :  { %209 = vperm.xlu2 %5500, %v27_v16   ;;  %205 = vperm.xlu1 %5499, %v26_v13  }
  0x55   :  { %5502 = vset.pattern.permute.xlu0 %v5533_v18 }
  0x56   :  { %282 = vperm.xlu0 %5502, %v12_v2  }
  0x5c   :  { %5504 = vset.pattern.permute.xlu2 %v5533_v18  ;;  %5503 = vset.pattern.permute.xlu1 %v5533_v18  ;;  %v54_v19 = vpop.permute.xlu2 %53 }
  0x5d   :  { %290 = vperm.xlu2 %5504, %v14_v1   ;;  %286 = vperm.xlu1 %5503, %v13_v6   ;;  %v124_v35 = vmul.f32 %v5636_v30, %v54_v19  ;;  %v125_v36 = vmul.f32 %v5638_v31, %v54_v19 }
  0x5e   :  { %302 = vperm.xlu0 %5502, %v17_v4  }
  0x64   :  { %v5613_v20 = vpop.permute.xlu2 %58 }
  0x65   :  { %298 = vperm.xlu2 %5504, %v5561_v0   ;;  %294 = vperm.xlu1 %5503, %v15_v5  }
  0x66   :  { %314 = vperm.xlu0 %5502, %v20_v7  }
  0x6c   :  { %v5616_v21 = vpop.permute.xlu2 %73 }
  0x6d   :  { %9602 = vst [vmem:[#allocation5_spill] sm:$0xff] %v5616_v21  ;;  %310 = vperm.xlu2 %5504, %v19_v8   ;;  %306 = vperm.xlu1 %5503, %v18_v9  }
  0x6e   :  { %326 = vperm.xlu0 %5502, %v23_v10  }
  0x74   :  { %v5618_v22 = vpop.permute.xlu2 %88 }
  0x75   :  { %9603 = vst [vmem:[#allocation6_spill] sm:$0xff] %v5618_v22  ;;  %322 = vperm.xlu2 %5504, %v22_v11   ;;  %318 = vperm.xlu1 %5503, %v21_v12   ;;  %v5620_v23 = vpop.permute.xlu0 %33  ;;  %v44_v49 = vpop.permute.xlu1 %43 }
  0x76   :  { %338 = vperm.xlu0 %5502, %v26_v13   ;;  %v120_v52 = vmul.f32 %v5636_v30, %v44_v49  ;;  %v121_v53 = vmul.f32 %v5638_v31, %v44_v49 }
  0x7c   :  { %v5622_v24 = vpop.permute.xlu2 %103 }
  0x7d   :  { %9604 = vst [vmem:[#allocation7_spill] sm:$0xff] %v5622_v24  ;;  %334 = vperm.xlu2 %5504, %v25_v14   ;;  %330 = vperm.xlu1 %5503, %v24_v15   ;;  %v5624_v25 = vpop.permute.xlu0 %38 }
  0x85   :  { %342 = vperm.xlu1 %5503, %v27_v16   ;;  %v5628_v27 = vpop.permute.xlu0 %63 }
  0x86   :  { %v5626_v26 = vpop.permute.xlu2 %153  ;;  %9605 = vst [vmem:[#allocation8_spill] sm:$0xff] %v5628_v27 }
  0x8d   :  { %v5648_v39 = vpop.permute.xlu0 %78 }
  0x8e   :  { %v166_v34 = vpop.permute.xlu2 %165  ;;  %9606 = vst [vmem:[#allocation9_spill] sm:$0xff] %v5648_v39 }
  0x8f   :  { %v225_v37 = vmul.f32 %v5640_v32, %v166_v34  ;;  %v226_v38 = vmul.f32 %v5642_v33, %v166_v34 }
  0x91   :  { %v257_v40 = vadd.f32 %v225_v37, %v124_v35  ;;  %v5650_v41 = vadd.f32 %v226_v38, %v125_v36  ;;  %v9569_v35 = vmov 2475754826  }
  0x95   :  { %v5654_v43 = vpop.permute.xlu0 %93 }
  0x96   :  { %v5652_v42 = vpop.permute.xlu2 %173  ;;  %9608 = vst [vmem:[#allocation11_spill] sm:$0xff] %v5654_v43 }
  0x97   :  { %9607 = vst [vmem:[#allocation10_spill] sm:$0xff] %v5652_v42 }
  0x9d   :  { %v5658_v45 = vpop.permute.xlu0 %108 }
  0x9e   :  { %v5656_v44 = vpop.permute.xlu2 %185  ;;  %9610 = vst [vmem:[#allocation13_spill] sm:$0xff] %v5658_v45 }
  0x9f   :  { %9609 = vst [vmem:[#allocation12_spill] sm:$0xff] %v5656_v44 }
  0xa6   :  { %v5660_v46 = vpop.permute.xlu2 %197 }
  0xa7   :  { %9611 = vst [vmem:[#allocation14_spill] sm:$0xff] %v5660_v46  ;;  %v158_v48 = vpop.permute.xlu0 %157 }
  0xa8   :  { %v221_v50 = vmul.f32 %v5640_v32, %v158_v48  ;;  %v222_v51 = vmul.f32 %v5642_v33, %v158_v48  ;;  %v9574_v48 = vmov 2131351028  }
  0xaa   :  { %v253_v54 = vadd.f32 %v221_v50, %v120_v52  ;;  %v254_v55 = vadd.f32 %v222_v51, %v121_v53  ;;  %v9579_v51 = vmov 2102212464   ;;  %v9581_v53 = vmov 920167782  }
  0xae   :  { %v5662_v47 = vpop.permute.xlu2 %209 }
  0xaf   :  { %9612 = vst [vmem:[#allocation15_spill] sm:$0xff] %v5662_v47 }
  0xb7   :  { %v291_v56 = vpop.permute.xlu2 %290 }
  0xb8   :  { %v5668_v57 = vadd.f32 %v291_v56, %v253_v54  ;;  %v5670_v58 = vadd.f32 %v291_v56, %v254_v55  ;;  %v9576_v56 = vmov 1326507024  }
  0xba   :  { %v9571_v59 = vand.u32 2147483647, %v5668_v57  ;;  %v1000_v60 = vand.u32 2139095040, %v5668_v57  ;;  %v9568_v61 = vand.u32 2147483647, %v5670_v58  ;;  %v1155_v62 = vand.u32 2139095040, %v5670_v58 }
  0xbc   :  { %v1001_v63 = vshrl.u32 %v1000_v60, 23  ;;  %v1004_v0 = vand.u32 8388607, %v9571_v59  ;;  %v1156_v1 = vshrl.u32 %v1155_v62, 23  ;;  %v1159_v2 = vand.u32 8388607, %v9568_v61 }
  0xbe   :  { %v5400_v4 = vadd.s32 4294967169, %v1001_v63  ;;  %v1005_v5 = vor.u32 8388608, %v1004_v0  ;;  %v5403_v6 = vadd.s32 4294967169, %v1156_v1  ;;  %v1160_v8 = vor.u32 8388608, %v1159_v2 }
  0xbf   :  { %v5682_v12 = vpop.permute.xlu2 %298 }
  0xc0   :  { %v1007_v7 = vadd.s32 1, %v5400_v4  ;;  %v1162_v9 = vadd.s32 1, %v5403_v6  ;;  %v5680_v10 = vshll.u32 %v1005_v5, 8  ;;  %v5684_v15 = vshll.u32 %v1160_v8, 8 }
  0xc1   :  { %v5692_v19 = vadd.f32 %v5682_v12, %v257_v40 }
  0xc2   :  { %vm1008_vm0 = vcmp.gt.s32.totalorder %v1007_v7, 0  ;;  %vm1163_vm1 = vcmp.gt.s32.totalorder %v1162_v9, 0  ;;  %v5687_v17 = vand.u32 65535, %v5680_v10  ;;  %v1047_v37 = vshrl.u32 %v5680_v10, 16 }
  0xc3   :  { %v1009_v11 = vsel %vm1008_vm0, %v1007_v7, 0  ;;  %v1164_v14 = vsel %vm1163_vm1, %v1162_v9, 0 }
  0xc4   :  { %v1011_v13 = vand.u32 31, %v1009_v11  ;;  %v5689_v18 = vand.u32 31, %v1164_v14  ;;  %v5694_v28 = vshrl.u32 %v1009_v11, 5 }
  0xc6   :  { %v1012_v16 = vsub.s32 32, %v1011_v13  ;;  %v1014_v34 = vshll.u32 %v9572_v29, %v1011_v13  ;;  %v1017_v36 = vshll.u32 %v9569_v35, %v1011_v13  ;;  %v1020_v50 = vshll.u32 %v9574_v48, %v1011_v13 }
  0xc7   :  { %v1023_v52 = vshll.u32 %v9579_v51, %v1011_v13  ;;  %v1026_v55 = vshll.u32 %v9581_v53, %v1011_v13  ;;  %v5708_v1 = vsub.s32 32, %v5689_v18  ;;  %vm1029_vm2 = vcmp.lt.s32.totalorder %v5694_v28, 1 }
  0xc8   :  { %v1015_v38 = vshrl.u32 %v9569_v35, %v1012_v16  ;;  %v1018_v49 = vshrl.u32 %v9574_v48, %v1012_v16  ;;  %v1021_v40 = vshrl.u32 %v9579_v51, %v1012_v16  ;;  %v1024_v54 = vshrl.u32 %v9581_v53, %v1012_v16 }
  0xc9   :  { %v1027_v60 = vshrl.u32 %v9576_v56, %v1012_v16  ;;  %vm1030_vm3 = vcmp.lt.s32.totalorder %v5694_v28, 2  ;;  %v1013_v5 = vshrl.u32 %v9572_v29, %v1012_v16  ;;  %vm1032_vm4 = vcmp.lt.s32.totalorder %v5694_v28, 4 }
  0xca   :  { %v1016_v62 = vor.u32 %v1015_v38, %v1014_v34  ;;  %v1019_v63 = vor.u32 %v1018_v49, %v1017_v36  ;;  %v1022_v0 = vor.u32 %v1021_v40, %v1020_v50  ;;  %v1025_v2 = vor.u32 %v1024_v54, %v1023_v52 }
  0xcb   :  { %v1028_v4 = vor.u32 %v1027_v60, %v1026_v55  ;;  %vm1031_vm5 = vcmp.lt.s32.totalorder %v5694_v28, 3  ;;  %v1169_v11 = vshll.u32 %v9572_v29, %v5689_v18  ;;  %v1170_v36 = vshrl.u32 %v9569_v35, %v5708_v1 }
  0xcc   :  { %v1037_v6 = vsel %vm1029_vm2, %v1016_v62, %v1019_v63  ;;  %v1041_v7 = vsel %vm1029_vm2, %v1019_v63, %v1022_v0  ;;  %v1038_v8 = vsel %vm1032_vm4, %v1025_v2, 920167782  ;;  %v1034_v13 = vsel %vm1032_vm4, %v1022_v0, 2102212464 }
  0xcd   :  { %v1042_v9 = vsel %vm1032_vm4, %v1028_v4, 1326507024  ;;  %v1039_v34 = vsel %vm1031_vm5, %v1022_v0, %v1038_v8  ;;  %v1172_v50 = vshll.u32 %v9569_v35, %v5689_v18  ;;  %v1173_v40 = vshrl.u32 %v9574_v48, %v5708_v1 }
  0xce   :  { %v1043_v16 = vsel %vm1031_vm5, %v1025_v2, %v1042_v9  ;;  %v1040_v38 = vsel %vm1030_vm3, %v1037_v6, %v1039_v34  ;;  %v1033_v0 = vsel %vm1029_vm2, %v1013_v5, %v1016_v62  ;;  %v1035_v2 = vsel %vm1031_vm5, %v1019_v63, %v1034_v13 }
  0xcf   :  { %v1044_v49 = vsel %vm1030_vm3, %v1041_v7, %v1043_v16  ;;  %v1070_v55 = vand.u32 65535, %v1040_v38  ;;  %v1071_v60 = vshrl.u32 %v1040_v38, 16  ;;  %v5739_v4 = vshrl.u32 %v1164_v14, 5 }
  0xd0   :  { %v1048_v52 = vand.u32 65535, %v1044_v49  ;;  %v1049_v54 = vshrl.u32 %v1044_v49, 16  ;;  %v5741_v6 = vor.u32 %v1170_v36, %v1169_v11  ;;  %v5744_v9 = vor.u32 %v1173_v40, %v1172_v50 }
  0xd1   :  { %v1176_v34 = vshrl.u32 %v9579_v51, %v5708_v1  ;;  %v1073_v38 = vmul.u32 %v1071_v60, %v5687_v17  ;;  %v1074_v62 = vmul.u32 %v1070_v55, %v1047_v37  ;;  %v1175_v63 = vshll.u32 %v9574_v48, %v5689_v18 }
  0xd2   :  { %v1051_v7 = vmul.u32 %v1049_v54, %v5687_v17  ;;  %v1052_v8 = vmul.u32 %v1048_v52, %v1047_v37  ;;  %v1050_v16 = vmul.u32 %v1048_v52, %v5687_v17  ;;  %v1053_v14 = vmul.u32 %v1049_v54, %v1047_v37 }
  0xd3   :  { %v1072_v11 = vmul.u32 %v1070_v55, %v5687_v17  ;;  %v1075_v13 = vmul.u32 %v1071_v60, %v1047_v37  ;;  %v1076_v40 = vshll.u32 %v1073_v38, 16  ;;  %v1078_v35 = vshll.u32 %v1074_v62, 16 }
  0xd4   :  { %v1054_v5 = vshll.u32 %v1051_v7, 16  ;;  %v1055_v36 = vshrl.u32 %v1051_v7, 16  ;;  %v1056_v49 = vshll.u32 %v1052_v8, 16  ;;  %v1057_v50 = vshrl.u32 %v1052_v8, 16 }
  0xd5   :  { %v1177_v59 = vor.u32 %v1176_v34, %v1175_v63  ;;  %vm1080_vm7 = vc.u32 %v1072_v11, %v1076_v40  ;;  %v1082_v29 = vadd.s32 %v1076_v40, %v1072_v11  ;;  %v1179_v48 = vshrl.u32 %v9581_v53, %v5708_v1 }
  0xd6   :  { %vm1058_vm6 = vc.u32 %v1050_v16, %v1054_v5  ;;  %v1060_v61 = vadd.s32 %v1054_v5, %v1050_v16  ;;  %v1081_v17 = vsel %vm1080_vm7, 1, %v9583_v3  ;;  %v1178_v37 = vshll.u32 %v9579_v51, %v5689_v18 }
  0xd7   :  { %v1059_v52 = vsel %vm1058_vm6, 1, %v9583_v3  ;;  %v1083_v60 = vadd.s32 %v1081_v17, %v1075_v13  ;;  %vm1084_vm9 = vc.u32 %v1082_v29, %v1078_v35  ;;  %v1181_v7 = vshll.u32 %v9581_v53, %v5689_v18 }
  0xd8   :  { %v1061_v54 = vadd.s32 %v1059_v52, %v1053_v14  ;;  %vm1062_vm8 = vc.u32 %v1060_v61, %v1056_v49  ;;  %v1085_v34 = vsel %vm1084_vm9, 1, %v9583_v3  ;;  %v1180_v16 = vor.u32 %v1179_v48, %v1178_v37 }
  0xd9   :  { %v1063_v55 = vsel %vm1062_vm8, 1, %v9583_v3  ;;  %v1182_v63 = vshrl.u32 %v9576_v56, %v5708_v1  ;;  %v1077_v61 = vshrl.u32 %v1073_v38, 16  ;;  %v1079_v14 = vshrl.u32 %v1074_v62, 16 }
  0xda   :  { %v1065_v8 = vadd.s32 %v1063_v55, %v1061_v54  ;;  %v5765_v5 = vadd.s32 %v1082_v29, %v1078_v35  ;;  %v1087_v11 = vadd.s32 %v1085_v34, %v1083_v60  ;;  %vm1184_vm10 = vcmp.lt.s32.totalorder %v5739_v4, 1 }
  0xdb   :  { %v1183_v40 = vor.u32 %v1182_v63, %v1181_v7  ;;  %vm1187_vm11 = vcmp.lt.s32.totalorder %v5739_v4, 4  ;;  %vm1186_vm12 = vcmp.lt.s32.totalorder %v5739_v4, 3  ;;  %v1192_v18 = vsel %vm1184_vm10, %v5741_v6, %v5744_v9 }
  0xdc   :  { %v1066_v49 = vadd.s32 %v1065_v8, %v1055_v36  ;;  %v1088_v13 = vadd.s32 %v1087_v11, %v1077_v61  ;;  %v1193_v48 = vsel %vm1187_vm11, %v1180_v16, 920167782  ;;  %vm1185_vm13 = vcmp.lt.s32.totalorder %v5739_v4, 2 }
  0xdd   :  { %v1194_v35 = vsel %vm1186_vm12, %v1177_v59, %v1193_v48  ;;  %v1196_v38 = vsel %vm1184_vm10, %v5744_v9, %v1177_v59  ;;  %v1036_v62 = vsel %vm1030_vm3, %v1033_v0, %v1035_v2  ;;  %v1201_v17 = vand.u32 65535, %v5684_v15 }
  0xde   :  { %v5776_v29 = vadd.s32 %v1066_v49, %v1057_v50  ;;  %v1089_v36 = vadd.s32 %v1088_v13, %v1079_v14  ;;  %v1195_v52 = vsel %vm1185_vm13, %v1192_v18, %v1194_v35  ;;  %v1197_v50 = vsel %vm1187_vm11, %v1183_v40, 1326507024 }
  0xdf   :  { %v1198_v54 = vsel %vm1186_vm12, %v1180_v16, %v1197_v50  ;;  %v1225_v37 = vand.u32 65535, %v1195_v52  ;;  %v1202_v0 = vshrl.u32 %v5684_v15, 16  ;;  %v1226_v2 = vshrl.u32 %v1195_v52, 16 }
  0xe0   :  { %vm1092_vm14 = vc.u32 %v5776_v29, %v5765_v5  ;;  %v1093_v55 = vadd.s32 1, %v1089_v36  ;;  %v1199_v28 = vsel %vm1185_vm13, %v1196_v38, %v1198_v54  ;;  %v1090_v60 = vmul.u32 %v5680_v10, %v1036_v62 }
  0xe1   :  { %v1203_v7 = vand.u32 65535, %v1199_v28  ;;  %v1204_v8 = vshrl.u32 %v1199_v28, 16  ;;  %v1228_v63 = vmul.u32 %v1226_v2, %v1201_v17  ;;  %v1229_v61 = vmul.u32 %v1225_v37, %v1202_v0 }
  0xe2   :  { %v1094_v34 = vsel %vm1092_vm14, %v1093_v55, %v1089_v36  ;;  %v1620_v14 = vand.u32 2139095040, %v5692_v19  ;;  %v9613_v11 = vmov 683565275   ;;  %v1189_v18 = vsel %vm1187_vm11, %v1177_v59, 2102212464 }
  0xe3   :  { %v1095_v16 = vadd.s32 %v1094_v34, %v1090_v60  ;;  %v1168_v49 = vshrl.u32 %v9613_v11, %v5708_v1  ;;  %v1206_v40 = vmul.u32 %v1204_v8, %v1201_v17  ;;  %v1207_v13 = vmul.u32 %v1203_v7, %v1202_v0 }
  0xe4   :  { %v1227_v48 = vmul.u32 %v1225_v37, %v1201_v17  ;;  %v1230_v35 = vmul.u32 %v1226_v2, %v1202_v0  ;;  %v1231_v38 = vshll.u32 %v1228_v63, 16  ;;  %v1205_v62 = vmul.u32 %v1203_v7, %v1201_v17 }
  0xe5   :  { %v1096_v10 = vadd.s32 536870912, %v1095_v16  ;;  %v1208_v52 = vmul.u32 %v1204_v8, %v1202_v0  ;;  %v1209_v36 = vshll.u32 %v1206_v40, 16  ;;  %v1211_v50 = vshll.u32 %v1207_v13, 16 }
  0xe6   :  { %v1233_v54 = vshll.u32 %v1229_v61, 16  ;;  %vm1235_vm15 = vc.u32 %v1227_v48, %v1231_v38  ;;  %v1237_v55 = vadd.s32 %v1231_v38, %v1227_v48  ;;  %v9578_v59 = vand.u32 2147483647, %v5692_v19 }
  0xe7   :  { %v1097_v28 = vshrl.u32 %v1096_v10, 30  ;;  %vm1213_vm0 = vc.u32 %v1205_v62, %v1209_v36  ;;  %v1215_v60 = vadd.s32 %v1209_v36, %v1205_v62  ;;  %v1236_v1 = vsel %vm1235_vm15, 1, %v9583_v3 }
  0xe8   :  { %v1214_v34 = vsel %vm1213_vm0, 1, %v9583_v3  ;;  %v1238_v56 = vadd.s32 %v1236_v1, %v1230_v35  ;;  %vm1239_vm1 = vc.u32 %v1237_v55, %v1233_v54  ;;  %v1188_v17 = vsel %vm1184_vm10, %v1168_v49, %v5741_v6 }
  0xe9   :  { %v1098_v37 = vshll.u32 %v1097_v28, 30  ;;  %v1216_v0 = vadd.s32 %v1214_v34, %v1208_v52  ;;  %vm1217_vm2 = vc.u32 %v1215_v60, %v1211_v50  ;;  %v1190_v2 = vsel %vm1186_vm12, %v5744_v9, %v1189_v18 }
  0xea   :  { %v1218_v7 = vsel %vm1217_vm2, 1, %v9583_v3  ;;  %v1240_v8 = vsel %vm1239_vm1, 1, %v9583_v3  ;;  %v1621_v48 = vshrl.u32 %v1620_v14, 23  ;;  %v1210_v38 = vshrl.u32 %v1206_v40, 16 }
  0xeb   :  { %v1099_v35 = vsub.s32 %v1095_v16, %v1098_v37  ;;  %v1220_v10 = vadd.s32 %v1218_v7, %v1216_v0  ;;  %v1242_v62 = vadd.s32 %v1240_v8, %v1238_v56  ;;  %vm999_vm3 = vcmp.lt.s32.totalorder %v5668_v57, 0 }
  0xec   :  { %v1121_v36 = vsub.s32 4, %v1097_v28  ;;  %v1232_v1 = vshrl.u32 %v1228_v63, 16  ;;  %v5412_v6 = vadd.s32 4294967169, %v1621_v48  ;;  %v1212_v52 = vshrl.u32 %v1207_v13, 16 }
  0xed   :  { %vm1100_vm4 = vcmp.lt.s32.totalorder %v1099_v35, 0  ;;  %v1101_v49 = vsub.s32 0, %v1099_v35  ;;  %v1221_v50 = vadd.s32 %v1220_v10, %v1210_v38  ;;  %v1191_v9 = vsel %vm1185_vm13, %v1188_v17, %v1190_v2 }
  0xee   :  { %v1234_v18 = vshrl.u32 %v1229_v61, 16  ;;  %v1243_v60 = vadd.s32 %v1242_v62, %v1232_v1  ;;  %v1627_v34 = vadd.s32 1, %v5412_v6  ;;  %v5820_v40 = vadd.s32 %v1237_v55, %v1233_v54 }
  0xef   :  { %v1102_v14 = vsel %vm1100_vm4, %v1101_v49, %v1099_v35  ;;  %v5818_v16 = vadd.s32 %v1221_v50, %v1212_v52  ;;  %v1624_v56 = vand.u32 8388607, %v9578_v59  ;;  %v1122_v37 = vsel %vm999_vm3, %v1121_v36, %v1097_v28 }
  0xf0   :  { %v1103_v63 = vclz %v1102_v14  ;;  %v1244_v13 = vadd.s32 %v1243_v60, %v1234_v18  ;;  %vm1628_vm5 = vcmp.gt.s32.totalorder %v1627_v34, 0  ;;  %v9614_v4 = vand.u32 2147483647, %v5668_v57 }
  0xf1   :  { %vm1247_vm7 = vc.u32 %v5818_v16, %v5820_v40  ;;  %v1629_v55 = vsel %vm1628_vm5, %v1627_v34, 0  ;;  %v1245_v2 = vmul.u32 %v5684_v15, %v1191_v9  ;;  %v1625_v28 = vor.u32 8388608, %v1624_v56 }
  0xf2   :  { %vm5828_vm6 = vcmp.le.f32.partialorder %v9614_v4, 0.7853982  ;;  %v5401_v17 = vadd.s32 4294967294, %v1103_v63  ;;  %v1248_v54 = vadd.s32 1, %v1244_v13  ;;  %v1631_v7 = vand.u32 31, %v1629_v55 }
  0xf3   :  { %v1124_v0 = vsel %vm5828_vm6, 0, %v1122_v37  ;;  %v5839_v10 = vadd.f32 %v5682_v12, %v5650_v41  ;;  %v1091_v36 = vadd.s32 %v5765_v5, %v5776_v29  ;;  %v5843_v15 = vshrl.u32 %v1629_v55, 5 }
  0xf4   :  { %vm5402_vm8 = vcmp.lt.s32.totalorder %v5401_v17, 0  ;;  %v1249_v8 = vsel %vm1247_vm7, %v1248_v54, %v1244_v13  ;;  %v1632_v62 = vsub.s32 32, %v1631_v7  ;;  %v1141_v49 = vadd.s32 3, %v1124_v0 }
  0xf5   :  { %v1106_v48 = vsel %vm5402_vm8, 0, %v5401_v17  ;;  %v1250_v38 = vadd.s32 %v1249_v8, %v1245_v2  ;;  %v5845_v9 = vshll.u32 %v1625_v28, 8  ;;  %v9617_v34 = vmov 2475754826  }
  0xf6   :  { %v1107_v1 = vsub.s32 32, %v1106_v48  ;;  %v1111_v6 = vsub.s32 4294967266, %v1106_v48  ;;  %v1108_v52 = vshll.u32 %v1099_v35, %v1106_v48  ;;  %v1635_v14 = vshrl.u32 %v9617_v34, %v1632_v62 }
  0xf7   :  { %v1251_v50 = vadd.s32 536870912, %v1250_v38  ;;  %v9618_v56 = vmov 2131351028   ;;  %vm1154_vm9 = vcmp.lt.s32.totalorder %v5670_v58, 0  ;;  %v1634_v5 = vshll.u32 %v9613_v11, %v1631_v7 }
  0xf8   :  { %v1109_v18 = vshrl.u32 %v1091_v36, %v1107_v1  ;;  %v1112_v60 = vadd.s32 127, %v1111_v6  ;;  %v1638_v41 = vshrl.u32 %v9618_v56, %v1632_v62  ;;  %v1637_v29 = vshll.u32 %v9617_v34, %v1631_v7 }
  0xf9   :  { %v1252_v12 = vshrl.u32 %v1251_v50, 30  ;;  %v1641_v35 = vshrl.u32 %v9579_v51, %v1632_v62  ;;  %v1643_v13 = vshll.u32 %v9579_v51, %v1631_v7  ;;  %v1644_v4 = vshrl.u32 %v9581_v53, %v1632_v62 }
  0xfa   :  { %v1110_v63 = vor.u32 %v1109_v18, %v1108_v52  ;;  %v1113_v37 = vshll.u32 %v1112_v60, 23  ;;  %v1640_v54 = vshll.u32 %v9618_v56, %v1631_v7  ;;  %v9619_v55 = vmov 1326507024  }
  0xfb   :  { %v1253_v17 = vshll.u32 %v1252_v12, 30  ;;  %v1647_v0 = vshrl.u32 %v9619_v55, %v1632_v62  ;;  %v9620_v8 = vand.u32 2147483647, %v5670_v58  ;;  %v5864_v36 = vor.u32 %v1635_v14, %v1634_v5 }
  0xfc   :  { %v1114_v28 = vor.u32 4788187, %v1113_v37  ;;  %v5866_v1 = vor.u32 %v1638_v41, %v1637_v29  ;;  %v1645_v6 = vor.u32 %v1644_v4, %v1643_v13  ;;  %v5868_v52 = vand.u32 3, %v1141_v49 }
  0xfd   :  { %vm5860_vm10 = vcmp.le.f32.partialorder %v9620_v8, 0.7853982  ;;  %v5870_v50 = vsub.s32 %v1250_v38, %v1253_v17  ;;  %v1642_v18 = vor.u32 %v1641_v35, %v1640_v54  ;;  %v1646_v60 = vshll.u32 %v9581_v53, %v1631_v7 }
  0xfe   :  { %v1115_v59 = vand.u32 2147483647, %v1114_v28  ;;  %v1117_v37 = vcvt.s32.f32 %v1110_v63  ;;  %v1276_v51 = vsub.s32 4, %v1252_v12  ;;  %vm1649_vm11 = vcmp.lt.s32.totalorder %v5843_v15, 1 }
  0xff   :  { %vm1255_vm12 = vcmp.lt.s32.totalorder %v5870_v50, 0  ;;  %v1256_v14 = vsub.s32 0, %v5870_v50  ;;  %v1648_v5 = vor.u32 %v1647_v0, %v1646_v60  ;;  %vm1652_vm13 = vcmp.lt.s32.totalorder %v5843_v15, 4 }
 0x100   :  { %v1118_v41 = vmul.f32 %v1117_v37, %v1115_v59  ;;  %vm1651_vm14 = vcmp.lt.s32.totalorder %v5843_v15, 3  ;;  %v1657_v7 = vsel %vm1649_vm11, %v5864_v36, %v5866_v1  ;;  %v1658_v38 = vsel %vm1652_vm13, %v1645_v6, 920167782 }
 0x101   :  { %v1257_v49 = vsel %vm1255_vm12, %v1256_v14, %v5870_v50  ;;  %vm1650_vm15 = vcmp.lt.s32.totalorder %v5843_v15, 2  ;;  %v1659_v29 = vsel %vm1651_vm14, %v1642_v18, %v1658_v38  ;;  %v1666_v35 = vand.u32 65535, %v5845_v9 }
 0x102   :  { %v1119_v59 = vxor.u32 2147483648, %v1118_v41  ;;  %v1258_v63 = vclz %v1257_v49  ;;  %v1277_v13 = vsel %vm1154_vm9, %v1276_v51, %v1252_v12  ;;  %v5893_v4 = vsel %vm1650_vm15, %v1657_v7, %v1659_v29 }
 0x103   :  { %v1246_v17 = vadd.s32 %v5820_v40, %v5818_v16  ;;  %v1661_v54 = vsel %vm1649_vm11, %v5866_v1, %v1642_v18  ;;  %v1667_v0 = vshrl.u32 %v5845_v9, 16  ;;  %v5905_v51 = vshrl.u32 %v9613_v11, %v1632_v62 }
 0x104   :  { %v1120_v8 = vsel %vm999_vm3, %v1119_v59, %v1118_v41  ;;  %v5404_v60 = vadd.s32 4294967294, %v1258_v63  ;;  %v1662_v12 = vsel %vm1652_vm13, %v1648_v5, 1326507024  ;;  %v1279_v40 = vsel %vm5860_vm10, 0, %v1277_v13 }
 0x105   :  { %v5912_v16 = vsel %vm5828_vm6, %v5668_v57, %v1120_v8  ;;  %v1663_v37 = vsel %vm1651_vm14, %v1645_v6, %v1662_v12  ;;  %v1690_v14 = vand.u32 65535, %v5893_v4  ;;  %v1691_v41 = vshrl.u32 %v5893_v4, 16 }
 0x106   :  { %v1125_v62 = vmul.f32 %v5912_v16, %v5912_v16  ;;  %vm5405_vm0 = vcmp.lt.s32.totalorder %v5404_v60, 0  ;;  %v1664_v5 = vsel %vm1650_vm15, %v1661_v54, %v1663_v37  ;;  %v5926_v7 = vsel %vm1652_vm13, %v1642_v18, 2102212464 }
 0x107   :  { %v1261_v61 = vsel %vm5405_vm0, 0, %v5404_v60  ;;  %v1668_v38 = vand.u32 65535, %v1664_v5  ;;  %v1669_v49 = vshrl.u32 %v1664_v5, 16  ;;  %v5928_v63 = vadd.s32 3, %v1279_v40 }
 0x108   :  { %v1126_v29 = vmul.f32 -0.001358992, %v1125_v62  ;;  %v1133_v6 = vmul.f32 -0.00019511016, %v1125_v62  ;;  %v1262_v59 = vsub.s32 32, %v1261_v61  ;;  %v1266_v13 = vsub.s32 4294967266, %v1261_v61 }
 0x109   :  { %v1671_v8 = vmul.u32 %v1669_v49, %v1666_v35  ;;  %v1672_v12 = vmul.u32 %v1668_v38, %v1667_v0  ;;  %v1692_v53 = vmul.u32 %v1690_v14, %v1666_v35  ;;  %v5930_v4 = vmul.u32 %v1691_v41, %v1666_v35 }
 0x10a   :  { %v1127_v2 = vadd.f32 0.041655596, %v1126_v29  ;;  %v1134_v54 = vadd.f32 0.008332121, %v1133_v6  ;;  %v1264_v37 = vshrl.u32 %v1246_v17, %v1262_v59  ;;  %v1263_v60 = vshll.u32 %v5870_v50, %v1261_v61 }
 0x10b   :  { %v1267_v18 = vadd.s32 127, %v1266_v13  ;;  %v1670_v28 = vmul.u32 %v1668_v38, %v1666_v35  ;;  %v1674_v3 = vshll.u32 %v1671_v8, 16  ;;  %v1673_v45 = vmul.u32 %v1669_v49, %v1667_v0 }
 0x10c   :  { %v1128_v5 = vmul.f32 %v1127_v2, %v1125_v62  ;;  %v1135_v47 = vmul.f32 %v1134_v54, %v1125_v62  ;;  %v1676_v46 = vshll.u32 %v1672_v12, 16  ;;  %v1265_v40 = vor.u32 %v1264_v37, %v1263_v60 }
 0x10d   :  { %v1268_v43 = vshll.u32 %v1267_v18, 23  ;;  %vm1678_vm1 = vc.u32 %v1670_v28, %v1674_v3  ;;  %v1680_v24 = vadd.s32 %v1674_v3, %v1670_v28  ;;  %v9623_v29 = vmov 0  }
 0x10e   :  { %v1129_v44 = vadd.f32 -0.4999988, %v1128_v5  ;;  %v1136_v39 = vadd.f32 -0.16666654, %v1135_v47  ;;  %v1679_v6 = vsel %vm1678_vm1, 1, %v9623_v29  ;;  %v1694_v17 = vmul.u32 %v1690_v14, %v1667_v0  ;;  %v5939_v47 = vpop.permute.xlu1 %48 }
 0x10f   :  { %vm1144_vm2 = vcmp.eq.s32.totalorder %v5868_v52, 0  ;;  %vm1147_vm3 = vcmp.eq.s32.totalorder %v5868_v52, 2  ;;  %v1269_v50 = vor.u32 4788187, %v1268_v43  ;;  %v1675_v35 = vshrl.u32 %v1671_v8, 16 }
 0x110   :  { %v1681_v61 = vadd.s32 %v1679_v6, %v1673_v45  ;;  %vm1682_vm4 = vc.u32 %v1680_v24, %v1676_v46  ;;  %v1130_v2 = vmul.f32 %v1129_v44, %v1125_v62  ;;  %v1137_v38 = vmul.f32 %v1136_v39, %v1125_v62 }
 0x111   :  { %vm1143_vm5 = vcmp.lt.s32.totalorder %v5868_v52, 2  ;;  %v1683_v49 = vsel %vm1682_vm4, 1, %v9623_v29  ;;  %v1696_v3 = vshll.u32 %v5930_v4, 16  ;;  %vm1140_vm6 = vweird.f32 %v5668_v57 }
 0x112   :  { %v1270_v28 = vand.u32 2147483647, %v1269_v50  ;;  %v1272_v14 = vcvt.s32.f32 %v1265_v40  ;;  %v1685_v59 = vadd.s32 %v1683_v49, %v1681_v61  ;;  %v1695_v13 = vmul.u32 %v1691_v41, %v1667_v0 }
 0x113   :  { %v1131_v43 = vadd.f32 1.0, %v1130_v2  ;;  %v1138_v8 = vadd.f32 1.0, %v1137_v38  ;;  %v1698_v45 = vshll.u32 %v1694_v17, 16  ;;  %vm1700_vm7 = vc.u32 %v1692_v53, %v1696_v3 }
 0x114   :  { %v1273_v24 = vmul.f32 %v1272_v14, %v1270_v28  ;;  %v1686_v39 = vadd.s32 %v1685_v59, %v1675_v35  ;;  %v1701_v44 = vsel %vm1700_vm7, 1, %v9623_v29  ;;  %v1702_v46 = vadd.s32 %v1696_v3, %v1692_v53 }
 0x115   :  { %v1139_v62 = vmul.f32 %v1138_v8, %v5912_v16  ;;  %v1148_v54 = vxor.u32 2147483648, %v1131_v43  ;;  %v1703_v37 = vadd.s32 %v1701_v44, %v1695_v13  ;;  %v9624_v60 = vand.u32 2139095040, %v5839_v10 }
 0x116   :  { %v1274_v5 = vxor.u32 2147483648, %v1273_v24  ;;  %v1653_v0 = vsel %vm1649_vm11, %v5905_v51, %v5864_v36  ;;  %v1677_v41 = vshrl.u32 %v1672_v12, 16  ;;  %vm1704_vm8 = vc.u32 %v1702_v46, %v1698_v45  ;;  %v5975_v59 = vpop.permute.xlu1 %68 }
 0x117   :  { %v1776_v18 = vshrl.u32 %v9624_v60, 23  ;;  %v1145_v40 = vxor.u32 2147483648, %v1139_v62  ;;  %v1655_v53 = vsel %vm1651_vm14, %v5866_v1, %v5926_v7  ;;  %v1705_v16 = vsel %vm1704_vm8, 1, %v9623_v29 }
 0x118   :  { %v1275_v50 = vsel %vm1154_vm9, %v1274_v5, %v1273_v24  ;;  %v5957_v35 = vadd.s32 %v1686_v39, %v1677_v41  ;;  %v1697_v61 = vshrl.u32 %v5930_v4, 16  ;;  %v1707_v2 = vadd.s32 %v1705_v16, %v1703_v37 }
 0x119   :  { %v5415_v6 = vadd.s32 4294967169, %v1776_v18  ;;  %v1146_v36 = vsel %vm1144_vm2, %v1131_v43, %v1145_v40  ;;  %v1149_v51 = vsel %vm1147_vm3, %v1148_v54, %v1139_v62  ;;  %v1278_v1 = vsel %vm5860_vm10, %v5670_v58, %v1275_v50 }
 0x11a   :  { %v1150_v12 = vsel %vm1143_vm5, %v1146_v36, %v1149_v51  ;;  %v1280_v38 = vmul.f32 %v1278_v1, %v1278_v1  ;;  %v1699_v49 = vshrl.u32 %v1694_v17, 16  ;;  %v1708_v3 = vadd.s32 %v1707_v2, %v1697_v61 }
 0x11b   :  { %v1782_v7 = vadd.s32 1, %v5415_v6  ;;  %v1151_v4 = vsel %vm1140_vm6, nan, %v1150_v12  ;;  %v1656_v28 = vsel %vm1650_vm15, %v1653_v0, %v1655_v53  ;;  %v5973_v14 = vadd.s32 %v1702_v46, %v1698_v45 }
 0x11c   :  { %v1281_v48 = vmul.f32 -0.001358992, %v1280_v38  ;;  %v1288_v13 = vmul.f32 -0.00019511016, %v1280_v38  ;;  %5341 = vst [vmem:[#allocation2 + $0x20] sm:$0xff] %v1151_v4  ;;  %v1709_v43 = vadd.s32 %v1708_v3, %v1699_v49  ;;  %v5981_v15 = vmul.f32 %v5636_v30, %v5975_v59 }
 0x11d   :  { %vm1783_vm9 = vcmp.gt.s32.totalorder %v1782_v7, 0  ;;  %vm1712_vm10 = vc.u32 %v5957_v35, %v5973_v14  ;;  %v1710_v45 = vmul.u32 %v5845_v9, %v1656_v28  ;;  %v9625_v39 = vand.u32 2147483647, %v5839_v10 }
 0x11e   :  { %v1784_v52 = vsel %vm1783_vm9, %v1782_v7, 0  ;;  %v1282_v8 = vadd.f32 0.041655596, %v1281_v48  ;;  %v1289_v57 = vadd.f32 0.008332121, %v1288_v13  ;;  %v1713_v24 = vadd.s32 1, %v1709_v43 }
 0x11f   :  { %v1786_v17 = vand.u32 31, %v1784_v52  ;;  %v1779_v44 = vand.u32 8388607, %v9625_v39  ;;  %v1297_v37 = vand.u32 3, %v5928_v63  ;;  %v5989_v5 = vshrl.u32 %v1784_v52, 5 }
 0x120   :  { %v1283_v62 = vmul.f32 %v1282_v8, %v1280_v38  ;;  %v1290_v54 = vmul.f32 %v1289_v57, %v1280_v38  ;;  %v1714_v60 = vsel %vm1712_vm10, %v1713_v24, %v1709_v43  ;;  %v9626_v16 = vmov 920167782  }
 0x121   :  { %v5986_v46 = vsub.s32 32, %v1786_v17  ;;  %v1715_v18 = vadd.s32 %v1714_v60, %v1710_v45  ;;  %v1789_v53 = vshll.u32 %v9613_v11, %v1786_v17  ;;  %v1792_v63 = vshll.u32 %v9617_v34, %v1786_v17 }
 0x122   :  { %v1284_v9 = vadd.f32 -0.4999988, %v1283_v62  ;;  %v1291_v40 = vadd.f32 -0.16666654, %v1290_v54  ;;  %v9627_v61 = vmov 2102212464   ;;  %v1795_v49 = vshll.u32 %v9618_v56, %v1786_v17 }
 0x123   :  { %v1790_v0 = vshrl.u32 %v9617_v34, %v5986_v46  ;;  %v1793_v41 = vshrl.u32 %v9618_v56, %v5986_v46  ;;  %v1799_v6 = vshrl.u32 %v9626_v16, %v5986_v46  ;;  %v1716_v50 = vadd.s32 536870912, %v1715_v18 }
 0x124   :  { %v1796_v2 = vshrl.u32 %v9627_v61, %v5986_v46  ;;  %v1798_v36 = vshll.u32 %v9627_v61, %v1786_v17  ;;  %v1285_v51 = vmul.f32 %v1284_v9, %v1280_v38  ;;  %v1292_v7 = vmul.f32 %v1291_v40, %v1280_v38 }
 0x125   :  { %vm1298_vm11 = vcmp.lt.s32.totalorder %v1297_v37, 2  ;;  %v6002_v12 = vor.u32 %v1790_v0, %v1789_v53  ;;  %v6005_v3 = vshrl.u32 %v1716_v50, 30  ;;  %v6007_v4 = vor.u32 %v1793_v41, %v1792_v63  ;;  %v178_v41 = vpop.permute.xlu0 %177 }
 0x126   :  { %v1800_v28 = vor.u32 %v1799_v6, %v1798_v36  ;;  %v1802_v48 = vshrl.u32 %v9619_v55, %v5986_v46  ;;  %v1286_v13 = vadd.f32 1.0, %v1285_v51  ;;  %v1293_v43 = vadd.f32 1.0, %v1292_v7 }
 0x127   :  { %v1780_v52 = vor.u32 8388608, %v1779_v44  ;;  %v1801_v8 = vshll.u32 %v9626_v16, %v1786_v17  ;;  %vm1299_vm12 = vcmp.eq.s32.totalorder %v1297_v37, 0  ;;  %v1718_v38 = vshll.u32 %v6005_v3, 30 }
 0x128   :  { %v6013_v57 = vor.u32 %v1796_v2, %v1795_v49  ;;  %vm1804_vm13 = vcmp.lt.s32.totalorder %v5989_v5, 1  ;;  %v1294_v24 = vmul.f32 %v1293_v43, %v1278_v1  ;;  %v1303_v45 = vxor.u32 2147483648, %v1286_v13  ;;  %v6056_v43 = vpop.permute.xlu1 %83 }
 0x129   :  { %v1803_v39 = vor.u32 %v1802_v48, %v1801_v8  ;;  %vm1807_vm14 = vcmp.lt.s32.totalorder %v5989_v5, 4  ;;  %vm1302_vm15 = vcmp.eq.s32.totalorder %v1297_v37, 2  ;;  %v6017_v62 = vsub.s32 %v1715_v18, %v1718_v38 }
 0x12a   :  { %v1812_v17 = vsel %vm1804_vm13, %v6002_v12, %v6007_v4  ;;  %v1813_v44 = vsel %vm1807_vm14, %v1800_v28, 920167782  ;;  %v1300_v54 = vxor.u32 2147483648, %v1294_v24  ;;  %vm1805_vm0 = vcmp.lt.s32.totalorder %v5989_v5, 2 }
 0x12b   :  { %vm1806_vm1 = vcmp.lt.s32.totalorder %v5989_v5, 3  ;;  %v6027_v1 = vshll.u32 %v1780_v52, 8  ;;  %v1304_v60 = vsel %vm1302_vm15, %v1303_v45, %v1294_v24  ;;  %vm1720_vm2 = vcmp.lt.s32.totalorder %v6017_v62, 0 }
 0x12c   :  { %v1721_v18 = vsub.s32 0, %v6017_v62  ;;  %v1814_v0 = vsel %vm1806_vm1, %v6013_v57, %v1813_v44  ;;  %v1301_v9 = vsel %vm1299_vm12, %v1286_v13, %v1300_v54  ;;  %v1816_v53 = vsel %vm1804_vm13, %v6007_v4, %v6013_v57 }
 0x12d   :  { %v1815_v40 = vsel %vm1805_vm0, %v1812_v17, %v1814_v0  ;;  %v1817_v6 = vsel %vm1807_vm14, %v1803_v39, 1326507024  ;;  %vm1295_vm3 = vweird.f32 %v5670_v58  ;;  %v1305_v50 = vsel %vm1298_vm11, %v1301_v9, %v1304_v60 }
 0x12e   :  { %v1722_v63 = vsel %vm1720_vm2, %v1721_v18, %v6017_v62  ;;  %v1818_v2 = vsel %vm1806_vm1, %v1800_v28, %v1817_v6  ;;  %v6050_v36 = vmul.f32 %v5638_v31, %v5975_v59  ;;  %v1306_v51 = vsel %vm1295_vm3, nan, %v1305_v50 }
 0x12f   :  { %v1723_v7 = vclz %v1722_v63  ;;  %v1819_v49 = vsel %vm1805_vm0, %v1816_v53, %v1818_v2  ;;  %v231_v48 = vmul.f32 %v5640_v32, %v178_v41  ;;  %5342 = vst [vmem:[#allocation2 + $0x28] sm:$0xff] %v1306_v51  ;;  %v1822_v58 = vshrl.u32 %v6027_v1, 16 }
 0x130   :  { %v1823_v37 = vand.u32 65535, %v1819_v49  ;;  %v1845_v13 = vand.u32 65535, %v1815_v40  ;;  %v1821_v28 = vand.u32 65535, %v6027_v1  ;;  %v1824_v8 = vshrl.u32 %v1819_v49, 16 }
 0x131   :  { %v5413_v52 = vadd.s32 4294967294, %v1723_v7  ;;  %v1846_v59 = vshrl.u32 %v1815_v40, 16  ;;  %v232_v38 = vmul.f32 %v5642_v33, %v178_v41  ;;  %v1711_v24 = vadd.s32 %v5973_v14, %v5957_v35 }
 0x132   :  { %v1788_v45 = vshrl.u32 %v9613_v11, %v5986_v46  ;;  %v1827_v39 = vmul.u32 %v1823_v37, %v1822_v58  ;;  %v1741_v17 = vsub.s32 4, %v6005_v3  ;;  %v1826_v44 = vmul.u32 %v1824_v8, %v1821_v28 }
 0x133   :  { %vm5414_vm4 = vcmp.lt.s32.totalorder %v5413_v52, 0  ;;  %v1848_v54 = vmul.u32 %v1846_v59, %v1821_v28  ;;  %v1825_v18 = vmul.u32 %v1823_v37, %v1821_v28  ;;  %v1847_v0 = vmul.u32 %v1845_v13, %v1821_v28 }
 0x134   :  { %v1726_v60 = vsel %vm5414_vm4, 0, %v5413_v52  ;;  %v1849_v9 = vmul.u32 %v1845_v13, %v1822_v58  ;;  %vm1619_vm5 = vcmp.lt.s32.totalorder %v5692_v19, 0  ;;  %v1828_v53 = vmul.u32 %v1824_v8, %v1822_v58 }
 0x135   :  { %v1727_v40 = vsub.s32 32, %v1726_v60  ;;  %v1731_v41 = vsub.s32 4294967266, %v1726_v60  ;;  %v1829_v6 = vshll.u32 %v1826_v44, 16  ;;  %v1728_v35 = vshll.u32 %v6017_v62, %v1726_v60 }
 0x136   :  { %v1831_v14 = vshll.u32 %v1827_v39, 16  ;;  %v1850_v46 = vmul.u32 %v1846_v59, %v1822_v58  ;;  %v1851_v50 = vshll.u32 %v1848_v54, 16  ;;  %v1853_v49 = vshll.u32 %v1849_v9, 16  ;;  %v6073_v59 = vpop.permute.xlu1 %98 }
 0x137   :  { %v1729_v63 = vshrl.u32 %v1711_v24, %v1727_v40  ;;  %v1732_v2 = vadd.s32 127, %v1731_v41  ;;  %vm1833_vm6 = vc.u32 %v1825_v18, %v1829_v6  ;;  %v1835_v51 = vadd.s32 %v1829_v6, %v1825_v18 }
 0x138   :  { %v1834_v7 = vsel %vm1833_vm6, 1, %v9623_v29  ;;  %vm1855_vm7 = vc.u32 %v1847_v0, %v1851_v50  ;;  %v1857_v37 = vadd.s32 %v1851_v50, %v1847_v0  ;;  %v1809_v62 = vsel %vm1807_vm14, %v6013_v57, 2102212464  ;;  %v311_v0 = vpop.permute.xlu2 %310 }
 0x139   :  { %v1730_v13 = vor.u32 %v1729_v63, %v1728_v35  ;;  %v1733_v52 = vshll.u32 %v1732_v2, 23  ;;  %v1836_v28 = vadd.s32 %v1834_v7, %v1828_v53  ;;  %vm1837_vm8 = vc.u32 %v1835_v51, %v1831_v14 }
 0x13a   :  { %v1838_v58 = vsel %vm1837_vm8, 1, %v9623_v29  ;;  %v1856_v8 = vsel %vm1855_vm7, 1, %v9623_v29  ;;  %vm1859_vm9 = vc.u32 %v1857_v37, %v1853_v49  ;;  %v1830_v60 = vshrl.u32 %v1826_v44, 16 }
 0x13b   :  { %v1734_v24 = vor.u32 4788187, %v1733_v52  ;;  %v1840_v18 = vadd.s32 %v1838_v58, %v1836_v28  ;;  %v1858_v40 = vadd.s32 %v1856_v8, %v1850_v46  ;;  %v1832_v41 = vshrl.u32 %v1827_v39, 16 }
 0x13c   :  { %v1852_v6 = vshrl.u32 %v1848_v54, 16  ;;  %v1860_v53 = vsel %vm1859_vm9, 1, %v9623_v29  ;;  %v263_v35 = vadd.f32 %v231_v48, %v5981_v15  ;;  %v1737_v57 = vcvt.s32.f32 %v1730_v13 }
 0x13d   :  { %v1735_v14 = vand.u32 2147483647, %v1734_v24  ;;  %v1841_v50 = vadd.s32 %v1840_v18, %v1830_v60  ;;  %v1862_v63 = vadd.s32 %v1860_v53, %v1858_v40  ;;  %v1742_v2 = vsel %vm1619_vm5, %v1741_v17, %v6005_v3 }
 0x13e   :  { %v1808_v44 = vsel %vm1804_vm13, %v1788_v45, %v6002_v12  ;;  %v1810_v39 = vsel %vm1806_vm1, %v6007_v4, %v1809_v62  ;;  %v6086_v54 = vadd.f32 %v311_v0, %v263_v35  ;;  %v1854_v48 = vshrl.u32 %v1849_v9, 16  ;;  %v150_v24 = vpop.permute.xlu1 %149 }
 0x13f   :  { %v1738_v46 = vmul.f32 %v1737_v57, %v1735_v14  ;;  %v1842_v15 = vadd.s32 %v1841_v50, %v1832_v41  ;;  %v1863_v51 = vadd.s32 %v1862_v63, %v1852_v6  ;;  %v1861_v7 = vadd.s32 %v1857_v37, %v1853_v49 }
 0x140   :  { %v264_v13 = vadd.f32 %v232_v38, %v6050_v36  ;;  %v9592_v52 = vand.u32 2147483647, %v6086_v54  ;;  %v2550_v3 = vand.u32 2139095040, %v6086_v54  ;;  %v9628_v17 = vand.u32 2147483647, %v5692_v19 }
 0x141   :  { %v1739_v4 = vxor.u32 2147483648, %v1738_v46  ;;  %v1811_v45 = vsel %vm1805_vm0, %v1808_v44, %v1810_v39  ;;  %v1864_v28 = vadd.s32 %v1863_v51, %v1854_v48  ;;  %vm1867_vm11 = vc.u32 %v1842_v15, %v1861_v7 }
 0x142   :  { %vm6093_vm10 = vcmp.le.f32.partialorder %v9628_v17, 0.7853982  ;;  %v6101_v36 = vadd.f32 %v311_v0, %v264_v13  ;;  %v2551_v38 = vshrl.u32 %v2550_v3, 23  ;;  %v2554_v62 = vand.u32 8388607, %v9592_v52 }
 0x143   :  { %v1744_v9 = vsel %vm6093_vm10, 0, %v1742_v2  ;;  %v1740_v49 = vsel %vm1619_vm5, %v1739_v4, %v1738_v46  ;;  %v1868_v37 = vadd.s32 1, %v1864_v28  ;;  %v1865_v58 = vmul.u32 %v6027_v1, %v1811_v45  ;;  %v6131_v2 = vpop.permute.xlu0 %189 }
 0x144   :  { %v6110_v5 = vsel %vm6093_vm10, %v5692_v19, %v1740_v49  ;;  %v5430_v8 = vadd.s32 4294967169, %v2551_v38  ;;  %v1761_v18 = vadd.s32 3, %v1744_v9  ;;  %v6117_v0 = vmul.f32 %v5636_v30, %v5620_v23 }
 0x145   :  { %v1745_v60 = vmul.f32 %v6110_v5, %v6110_v5  ;;  %v1869_v40 = vsel %vm1867_vm11, %v1868_v37, %v1864_v28  ;;  %v2705_v53 = vand.u32 2139095040, %v6101_v36  ;;  %v6122_v35 = vmul.f32 %v5638_v31, %v5620_v23 }
 0x146   :  { %v1870_v41 = vadd.s32 %v1869_v40, %v1865_v58  ;;  %v2557_v6 = vadd.s32 1, %v5430_v8  ;;  %v2555_v57 = vor.u32 8388608, %v2554_v62  ;;  %v6126_v50 = vmul.f32 %v5636_v30, %v6056_v43 }
 0x147   :  { %v1746_v1 = vmul.f32 -0.001358992, %v1745_v60  ;;  %v1753_v14 = vmul.f32 -0.00019511016, %v1745_v60  ;;  %v6129_v63 = vmul.f32 %v5640_v32, %v150_v24  ;;  %v6133_v48 = vand.u32 3, %v1761_v18 }
 0x148   :  { %v1871_v44 = vadd.s32 536870912, %v1870_v41  ;;  %vm2558_vm12 = vcmp.gt.s32.totalorder %v2557_v6, 0  ;;  %v6136_v51 = vmul.f32 %v5642_v33, %v150_v24  ;;  %v2706_v17 = vshrl.u32 %v2705_v53, 23 }
 0x149   :  { %v1747_v39 = vadd.f32 0.041655596, %v1746_v1  ;;  %v1754_v46 = vadd.f32 0.008332121, %v1753_v14  ;;  %v2559_v23 = vsel %vm2558_vm12, %v2557_v6, 0  ;;  %v6140_v12 = vmul.f32 %v5640_v32, %v6131_v2 }
 0x14a   :  { %v1872_v13 = vshrl.u32 %v1871_v44, 30  ;;  %v2561_v3 = vand.u32 31, %v2559_v23  ;;  %v6142_v28 = vshll.u32 %v2555_v57, 8  ;;  %v9631_v9 = vand.u32 2147483647, %v5839_v10 }
 0x14b   :  { %v1748_v4 = vmul.f32 %v1747_v39, %v1745_v60  ;;  %v1755_v45 = vmul.f32 %v1754_v46, %v1745_v60  ;;  %vm1767_vm14 = vcmp.eq.s32.totalorder %v6133_v48, 2  ;;  %vm1774_vm15 = vcmp.lt.s32.totalorder %v5839_v10, 0 }
 0x14c   :  { %vm6146_vm13 = vcmp.le.f32.partialorder %v9631_v9, 0.7853982  ;;  %v1873_v49 = vshll.u32 %v1872_v13, 30  ;;  %v1896_v37 = vsub.s32 4, %v1872_v13  ;;  %v2562_v62 = vsub.s32 32, %v2561_v3 }
 0x14d   :  { %v1749_v58 = vadd.f32 -0.4999988, %v1748_v4  ;;  %v1756_v8 = vadd.f32 -0.16666654, %v1755_v45  ;;  %vm1764_vm0 = vcmp.eq.s32.totalorder %v6133_v48, 0  ;;  %v1866_v24 = vadd.s32 %v1861_v7, %v1842_v15 }
 0x14e   :  { %v6153_v18 = vsub.s32 %v1870_v41, %v1873_v49  ;;  %v6156_v6 = vadd.s32 4294967169, %v2706_v17  ;;  %vm1763_vm1 = vcmp.lt.s32.totalorder %v6133_v48, 2  ;;  %v6159_v14 = vshrl.u32 %v2559_v23, 5 }
 0x14f   :  { %v1750_v53 = vmul.f32 %v1749_v58, %v1745_v60  ;;  %v1757_v1 = vmul.f32 %v1756_v8, %v1745_v60  ;;  %v6162_v57 = vand.u32 65535, %v6142_v28  ;;  %vm1760_vm2 = vweird.f32 %v5692_v19 }
 0x150   :  { %vm1875_vm3 = vcmp.lt.s32.totalorder %v6153_v18, 0  ;;  %v1876_v15 = vsub.s32 0, %v6153_v18  ;;  %v6169_v7 = vsel %vm1774_vm15, %v1896_v37, %v1872_v13  ;;  %v2565_v41 = vshrl.u32 %v9617_v34, %v2562_v62 }
 0x151   :  { %v1751_v60 = vadd.f32 1.0, %v1750_v53  ;;  %v1758_v44 = vadd.f32 1.0, %v1757_v1  ;;  %v2568_v39 = vshrl.u32 %v9618_v56, %v2562_v62  ;;  %v2571_v46 = vshrl.u32 %v9627_v61, %v2562_v62 }
 0x152   :  { %v1877_v23 = vsel %vm1875_vm3, %v1876_v15, %v6153_v18  ;;  %v2564_v17 = vshll.u32 %v9613_v11, %v2561_v3  ;;  %v2567_v4 = vshll.u32 %v9617_v34, %v2561_v3  ;;  %v2574_v45 = vshrl.u32 %v9626_v16, %v2562_v62 }
 0x153   :  { %v1759_v9 = vmul.f32 %v1758_v44, %v6110_v5  ;;  %v1768_v13 = vxor.u32 2147483648, %v1751_v60  ;;  %v1878_v49 = vclz %v1877_v23  ;;  %v2570_v37 = vshll.u32 %v9618_v56, %v2561_v3 }
 0x154   :  { %v1899_v58 = vsel %vm6146_vm13, 0, %v6169_v7  ;;  %v2563_v8 = vshrl.u32 %v9613_v11, %v2562_v62  ;;  %v2566_v53 = vor.u32 %v2565_v41, %v2564_v17  ;;  %v2573_v1 = vshll.u32 %v9627_v61, %v2561_v3 }
 0x155   :  { %v1765_v15 = vxor.u32 2147483648, %v1759_v9  ;;  %v5416_v52 = vadd.s32 4294967294, %v1878_v49  ;;  %v2569_v40 = vor.u32 %v2568_v39, %v2567_v4  ;;  %v2572_v22 = vor.u32 %v2571_v46, %v2570_v37 }
 0x156   :  { %v1769_v5 = vsel %vm1767_vm14, %v1768_v13, %v1759_v9  ;;  %v2575_v44 = vor.u32 %v2574_v45, %v2573_v1  ;;  %v2576_v23 = vshll.u32 %v9626_v16, %v2561_v3  ;;  %v2577_v42 = vshrl.u32 %v9619_v55, %v2562_v62 }
 0x157   :  { %v1766_v7 = vsel %vm1764_vm0, %v1751_v60, %v1765_v15  ;;  %vm5417_vm4 = vcmp.lt.s32.totalorder %v5416_v52, 0  ;;  %vm2579_vm5 = vcmp.lt.s32.totalorder %v6159_v14, 1  ;;  %vm2580_vm6 = vcmp.lt.s32.totalorder %v6159_v14, 2 }
 0x158   :  { %v1770_v41 = vsel %vm1763_vm1, %v1766_v7, %v1769_v5  ;;  %v1881_v39 = vsel %vm5417_vm4, 0, %v5416_v52  ;;  %v2578_v46 = vor.u32 %v2577_v42, %v2576_v23  ;;  %vm2582_vm7 = vcmp.lt.s32.totalorder %v6159_v14, 4 }
 0x159   :  { %v1771_v3 = vsel %vm1760_vm2, nan, %v1770_v41  ;;  %v1882_v17 = vsub.s32 32, %v1881_v39  ;;  %v1886_v62 = vsub.s32 4294967266, %v1881_v39  ;;  %v2584_v60 = vsel %vm2582_vm7, %v2572_v22, 2102212464 }
 0x15a   :  { %v1883_v4 = vshll.u32 %v6153_v18, %v1881_v39  ;;  %5345 = vst [vmem:[#allocation2 + $0x40] sm:$0xff] %v1771_v3  ;;  %vm2581_vm8 = vcmp.lt.s32.totalorder %v6159_v14, 3  ;;  %v2587_v48 = vsel %vm2579_vm5, %v2566_v53, %v2569_v40  ;;  %v2588_v42 = vsel %vm2582_vm7, %v2575_v44, 920167782 }
 0x15b   :  { %v1884_v52 = vshrl.u32 %v1866_v24, %v1882_v17  ;;  %v1887_v45 = vadd.s32 127, %v1886_v62  ;;  %v2589_v19 = vsel %vm2581_vm8, %v2572_v22, %v2588_v42  ;;  %v2591_v9 = vsel %vm2579_vm5, %v2569_v40, %v2572_v22 }
 0x15c   :  { %v2583_v13 = vsel %vm2579_vm5, %v2563_v8, %v2566_v53  ;;  %v2585_v49 = vsel %vm2581_vm8, %v2569_v40, %v2584_v60  ;;  %v2590_v18 = vsel %vm2580_vm6, %v2587_v48, %v2589_v19  ;;  %v2592_v37 = vsel %vm2582_vm7, %v2578_v46, 1326507024 }
 0x15d   :  { %v1885_v1 = vor.u32 %v1884_v52, %v1883_v4  ;;  %v1888_v15 = vshll.u32 %v1887_v45, 23  ;;  %v2593_v5 = vsel %vm2581_vm8, %v2575_v44, %v2592_v37  ;;  %v2620_v23 = vand.u32 65535, %v2590_v18 }
 0x15e   :  { %v2594_v24 = vsel %vm2580_vm6, %v2591_v9, %v2593_v5  ;;  %v2597_v7 = vshrl.u32 %v6142_v28, 16  ;;  %v2621_v22 = vshrl.u32 %v2590_v18, 16  ;;  %v2712_v41 = vadd.s32 1, %v6156_v6 }
 0x15f   :  { %v1889_v8 = vor.u32 4788187, %v1888_v15  ;;  %v2598_v40 = vand.u32 65535, %v2594_v24  ;;  %v2599_v53 = vshrl.u32 %v2594_v24, 16  ;;  %v9634_v39 = vand.u32 2147483647, %v6101_v36 }
 0x160   :  { %v1916_v46 = vadd.s32 3, %v1899_v58  ;;  %v6224_v44 = vsel %vm2580_vm6, %v2583_v13, %v2585_v49  ;;  %v2623_v17 = vmul.u32 %v2621_v22, %v6162_v57  ;;  %v2624_v62 = vmul.u32 %v2620_v23, %v2597_v7 }
 0x161   :  { %v6220_v3 = vand.u32 8388607, %v9634_v39  ;;  %v1890_v60 = vand.u32 2147483647, %v1889_v8  ;;  %v1892_v4 = vcvt.s32.f32 %v1885_v1  ;;  %v2601_v48 = vmul.u32 %v2599_v53, %v6162_v57 }
 0x162   :  { %v2602_v6 = vmul.u32 %v2598_v40, %v2597_v7  ;;  %v2622_v42 = vmul.u32 %v2620_v23, %v6162_v57  ;;  %v2625_v52 = vmul.u32 %v2621_v22, %v2597_v7  ;;  %v2626_v45 = vshll.u32 %v2623_v17, 16 }
 0x163   :  { %vm2713_vm9 = vcmp.gt.s32.totalorder %v2712_v41, 0  ;;  %v1893_v19 = vmul.f32 %v1892_v4, %v1890_v60  ;;  %v2600_v58 = vmul.u32 %v2598_v40, %v6162_v57  ;;  %v2603_v9 = vmul.u32 %v2599_v53, %v2597_v7 }
 0x164   :  { %v2604_v14 = vshll.u32 %v2601_v48, 16  ;;  %v2606_v13 = vshll.u32 %v2602_v6, 16  ;;  %v2628_v49 = vshll.u32 %v2624_v62, 16  ;;  %vm2630_vm10 = vc.u32 %v2622_v42, %v2626_v45 }
 0x165   :  { %v2632_v18 = vadd.s32 %v2626_v45, %v2622_v42  ;;  %v1894_v37 = vxor.u32 2147483648, %v1893_v19  ;;  %v2631_v15 = vsel %vm2630_vm10, 1, %v9623_v29  ;;  %v2714_v24 = vsel %vm2713_vm9, %v2712_v41, 0 }
 0x166   :  { %vm2608_vm11 = vc.u32 %v2600_v58, %v2604_v14  ;;  %v2610_v1 = vadd.s32 %v2604_v14, %v2600_v58  ;;  %v2633_v23 = vadd.s32 %v2631_v15, %v2625_v52  ;;  %v2627_v53 = vshrl.u32 %v2623_v17, 16 }
 0x167   :  { %v2609_v5 = vsel %vm2608_vm11, 1, %v9623_v29  ;;  %vm2634_vm12 = vc.u32 %v2632_v18, %v2628_v49  ;;  %v1895_v57 = vsel %vm1774_vm15, %v1894_v37, %v1893_v19  ;;  %v2605_v4 = vshrl.u32 %v2601_v48, 16 }
 0x168   :  { %v2611_v7 = vadd.s32 %v2609_v5, %v2603_v9  ;;  %vm2612_vm14 = vc.u32 %v2610_v1, %v2606_v13  ;;  %v2635_v22 = vsel %vm2634_vm12, 1, %v9623_v29  ;;  %v1898_v8 = vsel %vm6146_vm13, %v5839_v10, %v1895_v57 }
 0x169   :  { %v2613_v40 = vsel %vm2612_vm14, 1, %v9623_v29  ;;  %v2637_v39 = vadd.s32 %v2635_v22, %v2633_v23  ;;  %v1900_v60 = vmul.f32 %v1898_v8, %v1898_v8  ;;  %v2716_v52 = vand.u32 31, %v2714_v24 }
 0x16a   :  { %v2615_v42 = vadd.s32 %v2613_v40, %v2611_v7  ;;  %v2607_v41 = vshrl.u32 %v2602_v6, 16  ;;  %v2629_v45 = vshrl.u32 %v2624_v62, 16  ;;  %v2710_v19 = vor.u32 8388608, %v6220_v3 }
 0x16b   :  { %v2638_v58 = vadd.s32 %v2637_v39, %v2627_v53  ;;  %v1901_v9 = vmul.f32 -0.001358992, %v1900_v60  ;;  %v1908_v14 = vmul.f32 -0.00019511016, %v1900_v60  ;;  %v6241_v37 = vsub.s32 32, %v2716_v52 }
 0x16c   :  { %v2616_v13 = vadd.s32 %v2615_v42, %v2605_v4  ;;  %v6243_v38 = vand.u32 3, %v1916_v46  ;;  %v6245_v1 = vadd.s32 %v2632_v18, %v2628_v49  ;;  %v2640_v48 = vmul.u32 %v6142_v28, %v6224_v44 }
 0x16d   :  { %v2639_v17 = vadd.s32 %v2638_v58, %v2629_v45  ;;  %v1902_v15 = vadd.f32 0.041655596, %v1901_v9  ;;  %v1909_v5 = vadd.f32 0.008332121, %v1908_v14  ;;  %v2719_v62 = vshll.u32 %v9613_v11, %v2716_v52 }
 0x16e   :  { %v6249_v6 = vadd.s32 %v2616_v13, %v2607_v41  ;;  %v2720_v23 = vshrl.u32 %v9617_v34, %v6241_v37  ;;  %v2722_v57 = vshll.u32 %v9617_v34, %v2716_v52  ;;  %v2723_v46 = vshrl.u32 %v9618_v56, %v6241_v37 }
 0x16f   :  { %v2643_v3 = vadd.s32 1, %v2639_v17  ;;  %v1903_v49 = vmul.f32 %v1902_v15, %v1900_v60  ;;  %v1910_v18 = vmul.f32 %v1909_v5, %v1900_v60  ;;  %v2726_v28 = vshrl.u32 %v9627_v61, %v6241_v37 }
 0x170   :  { %vm2642_vm13 = vc.u32 %v6249_v6, %v6245_v1  ;;  %v6261_v7 = vshrl.u32 %v2714_v24, 5  ;;  %v6263_v22 = vor.u32 %v2720_v23, %v2719_v62  ;;  %v2725_v40 = vshll.u32 %v9618_v56, %v2716_v52 }
 0x171   :  { %v2644_v44 = vsel %vm2642_vm13, %v2643_v3, %v2639_v17  ;;  %v1904_v53 = vadd.f32 -0.4999988, %v1903_v49  ;;  %v1911_v39 = vadd.f32 -0.16666654, %v1910_v18  ;;  %v6266_v42 = vor.u32 %v2723_v46, %v2722_v57 }
 0x172   :  { %v2645_v4 = vadd.s32 %v2644_v44, %v2640_v48  ;;  %v2728_v41 = vshll.u32 %v9627_v61, %v2716_v52  ;;  %v2729_v45 = vshrl.u32 %v9626_v16, %v6241_v37  ;;  %v2731_v58 = vshll.u32 %v9626_v16, %v2716_v52 }
 0x173   :  { %v2732_v24 = vshrl.u32 %v9619_v55, %v6241_v37  ;;  %v1905_v9 = vmul.f32 %v1904_v53, %v1900_v60  ;;  %v1912_v14 = vmul.f32 %v1911_v39, %v1900_v60  ;;  %v2727_v17 = vor.u32 %v2726_v28, %v2725_v40  ;;  %v6303_v53 = vpop.permute.xlu0 %201 }
 0x174   :  { %v2646_v13 = vadd.s32 536870912, %v2645_v4  ;;  %v2730_v15 = vor.u32 %v2729_v45, %v2728_v41  ;;  %vm2734_vm15 = vcmp.lt.s32.totalorder %v6261_v7, 1  ;;  %v6275_v48 = vshll.u32 %v2710_v19, 8 }
 0x175   :  { %v2733_v5 = vor.u32 %v2732_v24, %v2731_v58  ;;  %v1906_v62 = vadd.f32 1.0, %v1905_v9  ;;  %v1913_v3 = vadd.f32 1.0, %v1912_v14  ;;  %vm2737_vm0 = vcmp.lt.s32.totalorder %v6261_v7, 4 }
 0x176   :  { %v6277_v23 = vshrl.u32 %v2646_v13, 30  ;;  %vm2736_vm1 = vcmp.lt.s32.totalorder %v6261_v7, 3  ;;  %v2742_v60 = vsel %vm2734_vm15, %v6263_v22, %v6266_v42  ;;  %v2743_v52 = vsel %vm2737_vm0, %v2730_v15, 920167782 }
 0x177   :  { %v2747_v19 = vsel %vm2737_vm0, %v2733_v5, 1326507024  ;;  %v1914_v57 = vmul.f32 %v1913_v3, %v1898_v8  ;;  %v1923_v46 = vxor.u32 2147483648, %v1906_v62  ;;  %v2746_v18 = vsel %vm2734_vm15, %v6266_v42, %v2727_v17 }
 0x178   :  { %v2648_v49 = vshll.u32 %v6277_v23, 30  ;;  %vm1915_vm2 = vweird.f32 %v5839_v10  ;;  %vm1918_vm3 = vcmp.lt.s32.totalorder %v6243_v38, 2  ;;  %v2744_v28 = vsel %vm2736_vm1, %v2727_v17, %v2743_v52 }
 0x179   :  { %v2748_v44 = vsel %vm2736_vm1, %v2730_v15, %v2747_v19  ;;  %vm1919_vm4 = vcmp.eq.s32.totalorder %v6243_v38, 0  ;;  %v1920_v8 = vxor.u32 2147483648, %v1914_v57  ;;  %vm2735_vm5 = vcmp.lt.s32.totalorder %v6261_v7, 2 }
 0x17a   :  { %v6300_v40 = vsub.s32 %v2645_v4, %v2648_v49  ;;  %vm1922_vm6 = vcmp.eq.s32.totalorder %v6243_v38, 2  ;;  %v2745_v39 = vsel %vm2735_vm5, %v2742_v60, %v2744_v28  ;;  %v2749_v41 = vsel %vm2735_vm5, %v2746_v18, %v2748_v44 }
 0x17b   :  { %v2751_v45 = vand.u32 65535, %v6275_v48  ;;  %v1921_v58 = vsel %vm1919_vm4, %v1906_v62, %v1920_v8  ;;  %v1924_v24 = vsel %vm1922_vm6, %v1923_v46, %v1914_v57  ;;  %v2752_v14 = vshrl.u32 %v6275_v48, 16 }
 0x17c   :  { %vm2650_vm7 = vcmp.lt.s32.totalorder %v6300_v40, 0  ;;  %v2651_v4 = vsub.s32 0, %v6300_v40  ;;  %v1925_v9 = vsel %vm1918_vm3, %v1921_v58, %v1924_v24  ;;  %v2753_v13 = vand.u32 65535, %v2749_v41 }
 0x17d   :  { %v2754_v15 = vshrl.u32 %v2749_v41, 16  ;;  %v1926_v5 = vsel %vm1915_vm2, nan, %v1925_v9  ;;  %v2775_v60 = vand.u32 65535, %v2745_v39  ;;  %v2776_v52 = vshrl.u32 %v2745_v39, 16 }
 0x17e   :  { %v2652_v3 = vsel %vm2650_vm7, %v2651_v4, %v6300_v40  ;;  %v6321_v62 = vmul.f32 %v5642_v33, %v6131_v2  ;;  %5346 = vst [vmem:[#allocation2 + $0x48] sm:$0xff] %v1926_v5  ;;  %v2757_v38 = vmul.u32 %v2753_v13, %v2752_v14  ;;  %v2641_v46 = vadd.s32 %v6245_v1, %v6249_v6 }
 0x17f   :  { %v2653_v19 = vclz %v2652_v3  ;;  %v2756_v57 = vmul.u32 %v2754_v15, %v2751_v45  ;;  %v2718_v49 = vshrl.u32 %v9613_v11, %v6241_v37  ;;  %v2739_v10 = vsel %vm2737_vm0, %v2727_v17, 2102212464 }
 0x180   :  { %v249_v18 = vadd.f32 %v6129_v63, %v6117_v0  ;;  %v2671_v2 = vsub.s32 4, %v6277_v23  ;;  %v2755_v44 = vmul.u32 %v2753_v13, %v2751_v45  ;;  %v2758_v39 = vmul.u32 %v2754_v15, %v2752_v14 }
 0x181   :  { %v5431_v28 = vadd.s32 4294967294, %v2653_v19  ;;  %v2759_v8 = vshll.u32 %v2756_v57, 16  ;;  %v2760_v41 = vshrl.u32 %v2756_v57, 16  ;;  %v2778_v58 = vmul.u32 %v2776_v52, %v2751_v45  ;;  %v283_v19 = vpop.permute.xlu0 %282 }
 0x182   :  { %v2779_v24 = vmul.u32 %v2775_v60, %v2752_v14  ;;  %v2761_v1 = vshll.u32 %v2757_v38, 16  ;;  %v2777_v17 = vmul.u32 %v2775_v60, %v2751_v45  ;;  %v2780_v3 = vmul.u32 %v2776_v52, %v2752_v14 }
 0x183   :  { %vm5432_vm8 = vcmp.lt.s32.totalorder %v5431_v28, 0  ;;  %vm2763_vm9 = vc.u32 %v2755_v44, %v2759_v8  ;;  %v2765_v6 = vadd.s32 %v2759_v8, %v2755_v44  ;;  %v2781_v9 = vshll.u32 %v2778_v58, 16 }
 0x184   :  { %v2656_v37 = vsel %vm5432_vm8, 0, %v5431_v28  ;;  %v2764_v4 = vsel %vm2763_vm9, 1, %v9623_v29  ;;  %v2783_v15 = vshll.u32 %v2779_v24, 16  ;;  %v6336_v60 = vadd.f32 %v283_v19, %v249_v18 }
 0x185   :  { %v2657_v5 = vsub.s32 32, %v2656_v37  ;;  %v2661_v0 = vsub.s32 4294967266, %v2656_v37  ;;  %v2766_v63 = vadd.s32 %v2764_v4, %v2758_v39  ;;  %v2658_v13 = vshll.u32 %v6300_v40, %v2656_v37 }
 0x186   :  { %vm2767_vm10 = vc.u32 %v2765_v6, %v2761_v1  ;;  %vm2785_vm11 = vc.u32 %v2777_v17, %v2781_v9  ;;  %v2787_v8 = vadd.s32 %v2781_v9, %v2777_v17  ;;  %vm2549_vm12 = vcmp.lt.s32.totalorder %v6086_v54, 0 }
 0x187   :  { %v2659_v57 = vshrl.u32 %v2641_v46, %v2657_v5  ;;  %v2662_v27 = vadd.s32 127, %v2661_v0  ;;  %v2768_v21 = vsel %vm2767_vm10, 1, %v9623_v29  ;;  %v2786_v28 = vsel %vm2785_vm11, 1, %v9623_v29 }
 0x188   :  { %v2770_v44 = vadd.s32 %v2768_v21, %v2766_v63  ;;  %v2788_v45 = vadd.s32 %v2786_v28, %v2780_v3  ;;  %v250_v40 = vadd.f32 %v6136_v51, %v6122_v35  ;;  %v2738_v46 = vsel %vm2734_vm15, %v2718_v49, %v6263_v22 }
 0x189   :  { %v2660_v14 = vor.u32 %v2659_v57, %v2658_v13  ;;  %v2663_v52 = vshll.u32 %v2662_v27, 23  ;;  %vm2789_vm14 = vc.u32 %v2787_v8, %v2783_v15  ;;  %v377_v1 = vand.u32 2147483647, %v6336_v60 }
 0x18a   :  { %v2771_v39 = vadd.s32 %v2770_v44, %v2760_v41  ;;  %v2740_v18 = vsel %vm2736_vm1, %v6266_v42, %v2739_v10  ;;  %v2762_v6 = vshrl.u32 %v2757_v38, 16  ;;  %v2790_v37 = vsel %vm2789_vm14, 1, %v9623_v29 }
 0x18b   :  { %v2664_v21 = vor.u32 4788187, %v2663_v52  ;;  %v2672_v27 = vsel %vm2549_vm12, %v2671_v2, %v6277_v23  ;;  %v2782_v35 = vshrl.u32 %v2778_v58, 16  ;;  %v2792_v51 = vadd.s32 %v2790_v37, %v2788_v45 }
 0x18c   :  { %v380_v22 = vand.u32 2139095040, %v6336_v60  ;;  %v2667_v41 = vcvt.s32.f32 %v2660_v14  ;;  %v2772_v4 = vadd.s32 %v2771_v39, %v2762_v6  ;;  %v2784_v17 = vshrl.u32 %v2779_v24, 16 }
 0x18d   :  { %v2665_v49 = vand.u32 2147483647, %v2664_v21  ;;  %v2793_v9 = vadd.s32 %v2792_v51, %v2782_v35  ;;  %v6353_v5 = vadd.f32 %v283_v19, %v250_v40  ;;  %v384_v42 = vand.u32 8388607, %v377_v1 }
 0x18e   :  { %v381_v0 = vshrl.u32 %v380_v22, 23  ;;  %v137_v38 = vmul.f32 %v5638_v31, %v6056_v43  ;;  %v9635_v23 = vand.u32 2147483647, %v6086_v54  ;;  %v2791_v58 = vadd.s32 %v2787_v8, %v2783_v15 }
 0x18f   :  { %v2668_v2 = vmul.f32 %v2667_v41, %v2665_v49  ;;  %v2741_v63 = vsel %vm2735_vm5, %v2738_v46, %v2740_v18  ;;  %v2794_v3 = vadd.s32 %v2793_v9, %v2784_v17  ;;  %v6371_v43 = vadd.f32 %v6140_v12, %v6126_v50 }
 0x190   :  { %vm6361_vm13 = vcmp.le.f32.partialorder %v9635_v23, 0.7853982  ;;  %v5388_v19 = vadd.s32 4294967169, %v381_v0  ;;  %vm2797_vm15 = vc.u32 %v2772_v4, %v2791_v58  ;;  %v6374_v57 = vadd.f32 %v6321_v62, %v137_v38 }
 0x191   :  { %v2674_v24 = vsel %vm6361_vm13, 0, %v2672_v27  ;;  %v2669_v13 = vxor.u32 2147483648, %v2668_v2  ;;  %v2798_v28 = vadd.s32 1, %v2794_v3  ;;  %v385_v44 = vor.u32 8388608, %v384_v42 }
 0x192   :  { %v387_v15 = vadd.s32 1, %v5388_v19  ;;  %v535_v8 = vand.u32 2139095040, %v6353_v5  ;;  %v2795_v45 = vmul.u32 %v6275_v48, %v2741_v63  ;;  %v2691_v12 = vadd.s32 3, %v2674_v24 }
 0x193   :  { %v2670_v7 = vsel %vm2549_vm12, %v2669_v13, %v2668_v2  ;;  %v2799_v52 = vsel %vm2797_vm15, %v2798_v28, %v2794_v3  ;;  %v6383_v39 = vshll.u32 %v385_v44, 8  ;;  %v6387_v48 = vmul.f32 %v5636_v30, %v5624_v25 }
 0x194   :  { %v2673_v14 = vsel %vm6361_vm13, %v6086_v54, %v2670_v7  ;;  %vm388_vm0 = vcmp.gt.s32.totalorder %v387_v15, 0  ;;  %v2800_v62 = vadd.s32 %v2799_v52, %v2795_v45  ;;  %v536_v21 = vshrl.u32 %v535_v8, 23 }
 0x195   :  { %v2675_v50 = vmul.f32 %v2673_v14, %v2673_v14  ;;  %v389_v40 = vsel %vm388_vm0, %v387_v15, 0  ;;  %v6391_v27 = vmul.f32 %v5638_v31, %v5624_v25  ;;  %v6395_v49 = vand.u32 3, %v2691_v12 }
 0x196   :  { %v391_v46 = vand.u32 31, %v389_v40  ;;  %v2801_v37 = vadd.s32 536870912, %v2800_v62  ;;  %v6397_v17 = vadd.s32 %v2791_v58, %v2772_v4  ;;  %v6400_v9 = vand.u32 65535, %v6383_v39 }
 0x197   :  { %v2676_v18 = vmul.f32 -0.001358992, %v2675_v50  ;;  %v2683_v6 = vmul.f32 -0.00019511016, %v2675_v50  ;;  %v9597_v0 = vand.u32 2147483647, %v6353_v5  ;;  %vm2690_vm6 = vweird.f32 %v6086_v54 }
 0x198   :  { %v6393_v35 = vsub.s32 32, %v391_v46  ;;  %v2802_v41 = vshrl.u32 %v2801_v37, 30  ;;  %v5391_v42 = vadd.s32 4294967169, %v536_v21  ;;  %vm2704_vm1 = vcmp.lt.s32.totalorder %v6101_v36, 0 }
 0x199   :  { %v2677_v51 = vadd.f32 0.041655596, %v2676_v18  ;;  %v2684_v22 = vadd.f32 0.008332121, %v2683_v6  ;;  %v6404_v10 = vshrl.u32 %v389_v40, 5  ;;  %v394_v2 = vshll.u32 %v9613_v11, %v391_v46 }
 0x19a   :  { %v2803_v25 = vshll.u32 %v2802_v41, 30  ;;  %v395_v24 = vshrl.u32 %v9617_v34, %v6393_v35  ;;  %v398_v4 = vshrl.u32 %v9618_v56, %v6393_v35  ;;  %v404_v58 = vshrl.u32 %v9626_v16, %v6393_v35 }
 0x19b   :  { %v2678_v38 = vmul.f32 %v2677_v51, %v2675_v50  ;;  %v2685_v23 = vmul.f32 %v2684_v22, %v2675_v50  ;;  %vm2697_vm2 = vcmp.eq.s32.totalorder %v6395_v49, 2  ;;  %v397_v13 = vshll.u32 %v9617_v34, %v391_v46 }
 0x19c   :  { %v6414_v19 = vsub.s32 %v2800_v62, %v2803_v25  ;;  %vm2694_vm3 = vcmp.eq.s32.totalorder %v6395_v49, 0  ;;  %v400_v28 = vshll.u32 %v9618_v56, %v391_v46  ;;  %v401_v44 = vshrl.u32 %v9627_v61, %v6393_v35 }
 0x19d   :  { %v2679_v63 = vadd.f32 -0.4999988, %v2678_v38  ;;  %v2686_v3 = vadd.f32 -0.16666654, %v2685_v23  ;;  %v403_v15 = vshll.u32 %v9627_v61, %v391_v46  ;;  %v407_v8 = vshrl.u32 %v9619_v55, %v6393_v35 }
 0x19e   :  { %vm2693_vm4 = vcmp.lt.s32.totalorder %v6395_v49, 2  ;;  %vm2805_vm5 = vcmp.lt.s32.totalorder %v6414_v19, 0  ;;  %v2806_v52 = vsub.s32 0, %v6414_v19  ;;  %v2826_v12 = vsub.s32 4, %v2802_v41 }
 0x19f   :  { %v2680_v7 = vmul.f32 %v2679_v63, %v2675_v50  ;;  %v2687_v45 = vmul.f32 %v2686_v3, %v2675_v50  ;;  %v396_v62 = vor.u32 %v395_v24, %v394_v2  ;;  %v399_v40 = vor.u32 %v398_v4, %v397_v13 }
 0x1a0   :  { %v405_v21 = vor.u32 %v404_v58, %v403_v15  ;;  %v2807_v37 = vsel %vm2805_vm5, %v2806_v52, %v6414_v19  ;;  %v406_v51 = vshll.u32 %v9626_v16, %v391_v46  ;;  %v402_v50 = vor.u32 %v401_v44, %v400_v28 }
 0x1a1   :  { %v2681_v18 = vadd.f32 1.0, %v2680_v7  ;;  %v2688_v6 = vadd.f32 1.0, %v2687_v45  ;;  %v2808_v22 = vclz %v2807_v37  ;;  %v427_v38 = vshrl.u32 %v6383_v39, 16 }
 0x1a2   :  { %v6431_v23 = vadd.s32 1, %v5391_v42  ;;  %v9638_v3 = vand.u32 2147483647, %v6101_v36  ;;  %v408_v24 = vor.u32 %v407_v8, %v406_v51  ;;  %vm409_vm8 = vcmp.lt.s32.totalorder %v6404_v10, 1 }
 0x1a3   :  { %v2689_v25 = vmul.f32 %v2688_v6, %v2673_v14  ;;  %v2698_v63 = vxor.u32 2147483648, %v2681_v18  ;;  %v5434_v4 = vadd.s32 4294967294, %v2808_v22  ;;  %v6442_v46 = vsel %vm2704_vm1, %v2826_v12, %v2802_v41 }
 0x1a4   :  { %vm6435_vm7 = vcmp.le.f32.partialorder %v9638_v3, 0.7853982  ;;  %vm412_vm9 = vcmp.lt.s32.totalorder %v6404_v10, 4  ;;  %v417_v14 = vsel %vm409_vm8, %v396_v62, %v399_v40  ;;  %vm410_vm10 = vcmp.lt.s32.totalorder %v6404_v10, 2 }
 0x1a5   :  { %v2695_v42 = vxor.u32 2147483648, %v2689_v25  ;;  %vm411_vm11 = vcmp.lt.s32.totalorder %v6404_v10, 3  ;;  %v418_v58 = vsel %vm412_vm9, %v405_v21, 920167782  ;;  %v2699_v13 = vsel %vm2697_vm2, %v2698_v63, %v2689_v25 }
 0x1a6   :  { %vm5435_vm12 = vcmp.lt.s32.totalorder %v5434_v4, 0  ;;  %v419_v41 = vsel %vm411_vm11, %v402_v50, %v418_v58  ;;  %v421_v28 = vsel %vm409_vm8, %v399_v40, %v402_v50  ;;  %v422_v7 = vsel %vm412_vm9, %v408_v24, 1326507024 }
 0x1a7   :  { %v2696_v44 = vsel %vm2694_vm3, %v2681_v18, %v2695_v42  ;;  %v2811_v15 = vsel %vm5435_vm12, 0, %v5434_v4  ;;  %v420_v8 = vsel %vm410_vm10, %v417_v14, %v419_v41  ;;  %v414_v6 = vsel %vm412_vm9, %v402_v50, 2102212464 }
 0x1a8   :  { %v2700_v45 = vsel %vm2693_vm4, %v2696_v44, %v2699_v13  ;;  %v2812_v52 = vsub.s32 32, %v2811_v15  ;;  %v2816_v12 = vsub.s32 4294967266, %v2811_v15  ;;  %v423_v18 = vsel %vm411_vm11, %v405_v21, %v422_v7 }
 0x1a9   :  { %v2701_v37 = vsel %vm2690_vm6, nan, %v2700_v45  ;;  %v450_v51 = vand.u32 65535, %v420_v8  ;;  %v451_v22 = vshrl.u32 %v420_v8, 16  ;;  %v2813_v25 = vshll.u32 %v6414_v19, %v2811_v15 }
 0x1aa   :  { %v2814_v63 = vshrl.u32 %v6397_v17, %v2812_v52  ;;  %v2817_v3 = vadd.s32 127, %v2816_v12  ;;  %5351 = vst [vmem:[#allocation2 + $0x70] sm:$0xff] %v2701_v37  ;;  %v424_v49 = vsel %vm410_vm10, %v421_v28, %v423_v18  ;;  %v393_v50 = vshrl.u32 %v9613_v11, %v6393_v35 }
 0x1ab   :  { %v428_v24 = vand.u32 65535, %v424_v49  ;;  %v429_v54 = vshrl.u32 %v424_v49, 16  ;;  %v453_v4 = vmul.u32 %v451_v22, %v6400_v9  ;;  %v2829_v19 = vsel %vm6435_vm7, 0, %v6442_v46 }
 0x1ac   :  { %v2815_v14 = vor.u32 %v2814_v63, %v2813_v25  ;;  %v2818_v21 = vshll.u32 %v2817_v3, 23  ;;  %v454_v42 = vmul.u32 %v450_v51, %v427_v38  ;;  %v413_v17 = vsel %vm409_vm8, %v393_v50, %v396_v62 }
 0x1ad   :  { %v415_v58 = vsel %vm411_vm11, %v399_v40, %v414_v6  ;;  %v431_v13 = vmul.u32 %v429_v54, %v6400_v9  ;;  %v432_v35 = vmul.u32 %v428_v24, %v427_v38  ;;  %v452_v28 = vmul.u32 %v450_v51, %v6400_v9 }
 0x1ae   :  { %v2819_v41 = vor.u32 4788187, %v2818_v21  ;;  %v455_v44 = vmul.u32 %v451_v22, %v427_v38  ;;  %v456_v15 = vshll.u32 %v453_v4, 16  ;;  %v2822_v8 = vcvt.s32.f32 %v2815_v14 }
 0x1af   :  { %v430_v7 = vmul.u32 %v428_v24, %v6400_v9  ;;  %v433_v45 = vmul.u32 %v429_v54, %v427_v38  ;;  %v434_v46 = vshll.u32 %v431_v13, 16  ;;  %v436_v12 = vshll.u32 %v432_v35, 16 }
 0x1b0   :  { %v2820_v52 = vand.u32 2147483647, %v2819_v41  ;;  %v458_v37 = vshll.u32 %v454_v42, 16  ;;  %vm460_vm14 = vc.u32 %v452_v28, %v456_v15  ;;  %v462_v6 = vadd.s32 %v456_v15, %v452_v28 }
 0x1b1   :  { %vm438_vm13 = vc.u32 %v430_v7, %v434_v46  ;;  %v440_v62 = vadd.s32 %v434_v46, %v430_v7  ;;  %v461_v40 = vsel %vm460_vm14, 1, %v9623_v29  ;;  %vm543_vm15 = vcmp.gt.s32.totalorder %v6431_v23, 0 }
 0x1b2   :  { %v2823_v18 = vmul.f32 %v2822_v8, %v2820_v52  ;;  %v439_v25 = vsel %vm438_vm13, 1, %v9623_v29  ;;  %v463_v51 = vadd.s32 %v461_v40, %v455_v44  ;;  %v457_v9 = vshrl.u32 %v453_v4, 16 }
 0x1b3   :  { %v441_v22 = vadd.s32 %v439_v25, %v433_v45  ;;  %vm442_vm0 = vc.u32 %v440_v62, %v436_v12  ;;  %vm464_vm2 = vc.u32 %v462_v6, %v458_v37  ;;  %v544_v49 = vsel %vm543_vm15, %v6431_v23, 0 }
 0x1b4   :  { %v2824_v38 = vxor.u32 2147483648, %v2823_v18  ;;  %v443_v63 = vsel %vm442_vm0, 1, %v9623_v29  ;;  %v465_v3 = vsel %vm464_vm2, 1, %v9623_v29  ;;  %v435_v50 = vshrl.u32 %v431_v13, 16 }
 0x1b5   :  { %v445_v24 = vadd.s32 %v443_v63, %v441_v22  ;;  %v467_v54 = vadd.s32 %v465_v3, %v463_v51  ;;  %v546_v14 = vand.u32 31, %v544_v49  ;;  %v416_v41 = vsel %vm410_vm10, %v413_v17, %v415_v58 }
 0x1b6   :  { %v2825_v21 = vsel %vm2704_vm1, %v2824_v38, %v2823_v18  ;;  %v437_v28 = vshrl.u32 %v432_v35, 16  ;;  %v459_v4 = vshrl.u32 %v454_v42, 16  ;;  %v6505_v23 = vmul.f32 %v5640_v32, %v5626_v26 }
 0x1b7   :  { %v2828_v44 = vsel %vm6435_vm7, %v6101_v36, %v2825_v21  ;;  %v446_v15 = vadd.s32 %v445_v24, %v435_v50  ;;  %v468_v8 = vadd.s32 %v467_v54, %v457_v9  ;;  %v6501_v7 = vsub.s32 32, %v546_v14 }
 0x1b8   :  { %v2830_v13 = vmul.f32 %v2828_v44, %v2828_v44  ;;  %v2846_v45 = vadd.s32 3, %v2829_v19  ;;  %v539_v10 = vand.u32 8388607, %v9597_v0  ;;  %v6511_v42 = vadd.s32 %v462_v6, %v458_v37 }
 0x1b9   :  { %v6509_v17 = vadd.s32 %v446_v15, %v437_v28  ;;  %v469_v58 = vadd.s32 %v468_v8, %v459_v4  ;;  %v470_v2 = vmul.u32 %v6383_v39, %v416_v41  ;;  %v6514_v52 = vshrl.u32 %v544_v49, 5 }
 0x1ba   :  { %v2831_v35 = vmul.f32 -0.001358992, %v2830_v13  ;;  %v2838_v46 = vmul.f32 -0.00019511016, %v2830_v13  ;;  %v552_v12 = vshll.u32 %v9617_v34, %v546_v14  ;;  %v553_v62 = vshrl.u32 %v9618_v56, %v6501_v7 }
 0x1bb   :  { %vm472_vm1 = vc.u32 %v6509_v17, %v6511_v42  ;;  %v473_v19 = vadd.s32 1, %v469_v58  ;;  %v556_v37 = vshrl.u32 %v9627_v61, %v6501_v7  ;;  %v550_v39 = vshrl.u32 %v9617_v34, %v6501_v7 }
 0x1bc   :  { %v2832_v40 = vadd.f32 0.041655596, %v2831_v35  ;;  %v2839_v6 = vadd.f32 0.008332121, %v2838_v46  ;;  %v555_v18 = vshll.u32 %v9618_v56, %v546_v14  ;;  %v558_v51 = vshll.u32 %v9627_v61, %v546_v14 }
 0x1bd   :  { %v474_v25 = vsel %vm472_vm1, %v473_v19, %v469_v58  ;;  %v559_v22 = vshrl.u32 %v9626_v16, %v6501_v7  ;;  %v561_v9 = vshll.u32 %v9626_v16, %v546_v14  ;;  %v562_v49 = vshrl.u32 %v9619_v55, %v6501_v7 }
 0x1be   :  { %v2833_v38 = vmul.f32 %v2832_v40, %v2830_v13  ;;  %v2840_v63 = vmul.f32 %v2839_v6, %v2830_v13  ;;  %v475_v3 = vadd.s32 %v474_v25, %v470_v2  ;;  %v549_v50 = vshll.u32 %v9613_v11, %v546_v14 }
 0x1bf   :  { %v6533_v24 = vor.u32 %v553_v62, %v552_v12  ;;  %v557_v54 = vor.u32 %v556_v37, %v555_v18  ;;  %v560_v21 = vor.u32 %v559_v22, %v558_v51  ;;  %v563_v15 = vor.u32 %v562_v49, %v561_v9  ;;  %v6570_v49 = vpop.permute.xlu2 %322 }
 0x1c0   :  { %v2834_v41 = vadd.f32 -0.4999988, %v2833_v38  ;;  %v2841_v28 = vadd.f32 -0.16666654, %v2840_v63  ;;  %v476_v4 = vadd.s32 536870912, %v475_v3  ;;  %v6537_v8 = vmul.f32 %v5642_v33, %v5626_v26 }
 0x1c1   :  { %v2847_v58 = vand.u32 3, %v2846_v45  ;;  %v540_v35 = vor.u32 8388608, %v539_v10  ;;  %v6539_v2 = vor.u32 %v550_v39, %v549_v50  ;;  %vm567_vm3 = vcmp.lt.s32.totalorder %v6514_v52, 4 }
 0x1c2   :  { %v2835_v46 = vmul.f32 %v2834_v41, %v2830_v13  ;;  %v2842_v19 = vmul.f32 %v2841_v28, %v2830_v13  ;;  %v6541_v40 = vshrl.u32 %v476_v4, 30  ;;  %vm564_vm4 = vcmp.lt.s32.totalorder %v6514_v52, 1 }
 0x1c3   :  { %vm566_vm5 = vcmp.lt.s32.totalorder %v6514_v52, 3  ;;  %v573_v14 = vsel %vm567_vm3, %v560_v21, 920167782  ;;  %v577_v26 = vsel %vm567_vm3, %v563_v15, 1326507024  ;;  %v576_v13 = vsel %vm564_vm4, %v6533_v24, %v557_v54 }
 0x1c4   :  { %v2836_v45 = vadd.f32 1.0, %v2835_v46  ;;  %v2843_v10 = vadd.f32 1.0, %v2842_v19  ;;  %v478_v12 = vshll.u32 %v6541_v40, 30  ;;  %v572_v62 = vsel %vm564_vm4, %v6539_v2, %v6533_v24 }
 0x1c5   :  { %v574_v37 = vsel %vm566_vm5, %v557_v54, %v573_v14  ;;  %v578_v6 = vsel %vm566_vm5, %v560_v21, %v577_v26  ;;  %v6562_v39 = vshll.u32 %v540_v35, 8  ;;  %vm565_vm6 = vcmp.lt.s32.totalorder %v6514_v52, 2 }
 0x1c6   :  { %v2844_v18 = vmul.f32 %v2843_v10, %v2828_v44  ;;  %v2853_v25 = vxor.u32 2147483648, %v2836_v45  ;;  %v479_v51 = vsub.s32 %v475_v3, %v478_v12  ;;  %vm2845_vm7 = vweird.f32 %v6101_v36 }
 0x1c7   :  { %vm2848_vm8 = vcmp.lt.s32.totalorder %v2847_v58, 2  ;;  %vm2849_vm9 = vcmp.eq.s32.totalorder %v2847_v58, 0  ;;  %v579_v22 = vsel %vm565_vm6, %v576_v13, %v578_v6  ;;  %v575_v63 = vsel %vm565_vm6, %v572_v62, %v574_v37 }
 0x1c8   :  { %v2850_v9 = vxor.u32 2147483648, %v2844_v18  ;;  %vm480_vm10 = vcmp.lt.s32.totalorder %v479_v51, 0  ;;  %v481_v38 = vsub.s32 0, %v479_v51  ;;  %vm2852_vm11 = vcmp.eq.s32.totalorder %v2847_v58, 2 }
 0x1c9   :  { %v581_v44 = vand.u32 65535, %v6562_v39  ;;  %v583_v3 = vand.u32 65535, %v579_v22  ;;  %v584_v50 = vshrl.u32 %v579_v22, 16  ;;  %v2854_v41 = vsel %vm2852_vm11, %v2853_v25, %v2844_v18 }
 0x1ca   :  { %v2851_v21 = vsel %vm2849_vm9, %v2836_v45, %v2850_v9  ;;  %v482_v28 = vsel %vm480_vm10, %v481_v38, %v479_v51  ;;  %v582_v4 = vshrl.u32 %v6562_v39, 16  ;;  %v606_v46 = vshrl.u32 %v575_v63, 16 }
 0x1cb   :  { %v2855_v15 = vsel %vm2848_vm8, %v2851_v21, %v2854_v41  ;;  %v483_v35 = vclz %v482_v28  ;;  %v6577_v19 = vadd.f32 %v6570_v49, %v6371_v43  ;;  %v586_v26 = vmul.u32 %v584_v50, %v581_v44 }
 0x1cc   :  { %v2856_v14 = vsel %vm2845_vm7, nan, %v2855_v15  ;;  %v587_v10 = vmul.u32 %v583_v3, %v582_v4  ;;  %v605_v12 = vand.u32 65535, %v575_v63  ;;  %v471_v45 = vadd.s32 %v6511_v42, %v6509_v17 }
 0x1cd   :  { %5352 = vst [vmem:[#allocation2 + $0x78] sm:$0xff] %v2856_v14  ;;  %v5389_v13 = vadd.s32 4294967294, %v483_v35  ;;  %v548_v58 = vshrl.u32 %v9613_v11, %v6501_v7  ;;  %v569_v62 = vsel %vm567_vm3, %v557_v54, 2102212464  ;;  %v501_v43 = vsub.s32 4, %v6541_v40 }
 0x1ce   :  { %v585_v37 = vmul.u32 %v583_v3, %v581_v44  ;;  %v588_v6 = vmul.u32 %v584_v50, %v582_v4  ;;  %v589_v36 = vshll.u32 %v586_v26, 16  ;;  %vm379_vm12 = vcmp.lt.s32.totalorder %v6336_v60, 0 }
 0x1cf   :  { %vm5390_vm14 = vcmp.lt.s32.totalorder %v5389_v13, 0  ;;  %v590_v18 = vshrl.u32 %v586_v26, 16  ;;  %v591_v25 = vshll.u32 %v587_v10, 16  ;;  %v608_v22 = vmul.u32 %v606_v46, %v581_v44 }
 0x1d0   :  { %v486_v9 = vsel %vm5390_vm14, 0, %v5389_v13  ;;  %vm593_vm13 = vc.u32 %v585_v37, %v589_v36  ;;  %v595_v17 = vadd.s32 %v589_v36, %v585_v37  ;;  %v609_v42 = vmul.u32 %v605_v12, %v582_v4 }
 0x1d1   :  { %v487_v38 = vsub.s32 32, %v486_v9  ;;  %v491_v7 = vsub.s32 4294967266, %v486_v9  ;;  %v594_v63 = vsel %vm593_vm13, 1, %v9623_v29  ;;  %v607_v54 = vmul.u32 %v605_v12, %v581_v44 }
 0x1d2   :  { %v596_v21 = vadd.s32 %v594_v63, %v588_v6  ;;  %vm597_vm15 = vc.u32 %v595_v17, %v591_v25  ;;  %v610_v3 = vmul.u32 %v606_v46, %v582_v4  ;;  %v611_v50 = vshll.u32 %v608_v22, 16 }
 0x1d3   :  { %v488_v41 = vshll.u32 %v479_v51, %v486_v9  ;;  %v489_v28 = vshrl.u32 %v471_v45, %v487_v38  ;;  %v492_v15 = vadd.s32 127, %v491_v7  ;;  %v598_v35 = vsel %vm597_vm15, 1, %v9623_v29 }
 0x1d4   :  { %v600_v14 = vadd.s32 %v598_v35, %v596_v21  ;;  %v613_v26 = vshll.u32 %v609_v42, 16  ;;  %vm615_vm0 = vc.u32 %v607_v54, %v611_v50  ;;  %v617_v13 = vadd.s32 %v611_v50, %v607_v54 }
 0x1d5   :  { %v490_v37 = vor.u32 %v489_v28, %v488_v41  ;;  %v493_v36 = vshll.u32 %v492_v15, 23  ;;  %v568_v0 = vsel %vm564_vm4, %v548_v58, %v6539_v2  ;;  %v616_v44 = vsel %vm615_vm0, 1, %v9623_v29 }
 0x1d6   :  { %v601_v12 = vadd.s32 %v600_v14, %v590_v18  ;;  %v618_v4 = vadd.s32 %v616_v44, %v610_v3  ;;  %vm619_vm2 = vc.u32 %v617_v13, %v613_v26  ;;  %v9599_v51 = vand.u32 2147483647, %v6577_v19 }
 0x1d7   :  { %v494_v46 = vor.u32 4788187, %v493_v36  ;;  %v570_v45 = vsel %vm566_vm5, %v6533_v24, %v569_v62  ;;  %v592_v6 = vshrl.u32 %v587_v10, 16  ;;  %v620_v25 = vsel %vm619_vm2, 1, %v9623_v29 }
 0x1d8   :  { %v502_v9 = vsel %vm379_vm12, %v501_v43, %v6541_v40  ;;  %v612_v2 = vshrl.u32 %v608_v22, 16  ;;  %v622_v58 = vadd.s32 %v620_v25, %v618_v4  ;;  %v3480_v18 = vand.u32 2139095040, %v6577_v19 }
 0x1d9   :  { %v495_v17 = vand.u32 2147483647, %v494_v46  ;;  %v497_v38 = vcvt.s32.f32 %v490_v37  ;;  %v602_v7 = vadd.s32 %v601_v12, %v592_v6  ;;  %v6606_v63 = vadd.f32 %v6570_v49, %v6374_v57 }
 0x1da   :  { %v614_v54 = vshrl.u32 %v609_v42, 16  ;;  %v623_v24 = vadd.s32 %v622_v58, %v612_v2  ;;  %v3481_v10 = vshrl.u32 %v3480_v18, 23  ;;  %v3484_v62 = vand.u32 8388607, %v9599_v51 }
 0x1db   :  { %vm6612_vm1 = vcmp.le.f32.partialorder %v377_v1, 0.7853982  ;;  %v498_v43 = vmul.f32 %v497_v38, %v495_v17  ;;  %v621_v22 = vadd.s32 %v617_v13, %v613_v26  ;;  %v571_v57 = vsel %vm565_vm6, %v568_v0, %v570_v45  ;;  %v6643_v45 = vpop.permute.xlu1 %161 }
 0x1dc   :  { %v504_v21 = vsel %vm6612_vm1, 0, %v502_v9  ;;  %v624_v49 = vadd.s32 %v623_v24, %v614_v54  ;;  %v5448_v42 = vadd.s32 4294967169, %v3481_v10  ;;  %v6622_v50 = vadd.f32 %v6505_v23, %v6387_v48 }
 0x1dd   :  { %v499_v3 = vxor.u32 2147483648, %v498_v43  ;;  %vm627_vm3 = vc.u32 %v602_v7, %v621_v22  ;;  %v6626_v1 = vadd.f32 %v6537_v8, %v6391_v27  ;;  %v3485_v28 = vor.u32 8388608, %v3484_v62 }
 0x1de   :  { %v628_v41 = vadd.s32 1, %v624_v49  ;;  %v3487_v15 = vadd.s32 1, %v5448_v42  ;;  %v3635_v35 = vand.u32 2139095040, %v6606_v63  ;;  %v625_v52 = vmul.u32 %v6562_v39, %v571_v57 }
 0x1df   :  { %v500_v0 = vsel %vm379_vm12, %v499_v3, %v498_v43  ;;  %v521_v26 = vadd.s32 3, %v504_v21  ;;  %v6635_v37 = vshll.u32 %v3485_v28, 8  ;;  %v6639_v39 = vmul.f32 %v5636_v30, %v5613_v20 }
 0x1e0   :  { %v503_v14 = vsel %vm6612_vm1, %v6336_v60, %v500_v0  ;;  %v629_v48 = vsel %vm627_vm3, %v628_v41, %v624_v49  ;;  %vm3488_vm4 = vcmp.gt.s32.totalorder %v3487_v15, 0  ;;  %v3636_v36 = vshrl.u32 %v3635_v35, 23 }
 0x1e1   :  { %v505_v23 = vmul.f32 %v503_v14, %v503_v14  ;;  %v630_v27 = vadd.s32 %v629_v48, %v625_v52  ;;  %v3489_v8 = vsel %vm3488_vm4, %v3487_v15, 0  ;;  %v6645_v9 = vand.u32 3, %v521_v26 }
 0x1e2   :  { %v3491_v13 = vand.u32 31, %v3489_v8  ;;  %v6647_v58 = vadd.s32 %v621_v22, %v602_v7  ;;  %v6650_v18 = vand.u32 65535, %v6635_v37  ;;  %v9598_v17 = vand.u32 2147483647, %v6606_v63 }
 0x1e3   :  { %v506_v44 = vmul.f32 -0.001358992, %v505_v23  ;;  %v513_v12 = vmul.f32 -0.00019511016, %v505_v23  ;;  %v631_v4 = vadd.s32 536870912, %v630_v27  ;;  %v5451_v38 = vadd.s32 4294967169, %v3636_v36 }
 0x1e4   :  { %v6641_v46 = vsub.s32 32, %v3491_v13  ;;  %vm534_vm5 = vcmp.lt.s32.totalorder %v6353_v5, 0  ;;  %v6654_v62 = vshrl.u32 %v3489_v8, 5  ;;  %v3494_v40 = vshll.u32 %v9613_v11, %v3491_v13 }
 0x1e5   :  { %v507_v6 = vadd.f32 0.041655596, %v506_v44  ;;  %v514_v25 = vadd.f32 0.008332121, %v513_v12  ;;  %v632_v2 = vshrl.u32 %v631_v4, 30  ;;  %vm527_vm6 = vcmp.eq.s32.totalorder %v6645_v9, 2 }
 0x1e6   :  { %v3495_v43 = vshrl.u32 %v9617_v34, %v6641_v46  ;;  %v3498_v7 = vshrl.u32 %v9618_v56, %v6641_v46  ;;  %v3504_v22 = vshrl.u32 %v9626_v16, %v6641_v46  ;;  %v3497_v42 = vshll.u32 %v9617_v34, %v3491_v13 }
 0x1e7   :  { %v508_v54 = vmul.f32 %v507_v6, %v505_v23  ;;  %v515_v24 = vmul.f32 %v514_v25, %v505_v23  ;;  %v633_v10 = vshll.u32 %v632_v2, 30  ;;  %vm524_vm7 = vcmp.eq.s32.totalorder %v6645_v9, 0 }
 0x1e8   :  { %v3500_v3 = vshll.u32 %v9618_v56, %v3491_v13  ;;  %v3501_v41 = vshrl.u32 %v9627_v61, %v6641_v46  ;;  %v3503_v28 = vshll.u32 %v9627_v61, %v3491_v13  ;;  %v3507_v15 = vshrl.u32 %v9619_v55, %v6641_v46 }
 0x1e9   :  { %v509_v21 = vadd.f32 -0.4999988, %v508_v54  ;;  %v516_v57 = vadd.f32 -0.16666654, %v515_v24  ;;  %v6664_v49 = vsub.s32 %v630_v27, %v633_v10  ;;  %vm523_vm8 = vcmp.lt.s32.totalorder %v6645_v9, 2  ;;  %v6683_v24 = vpop.permute.xlu1 %169 }
 0x1ea   :  { %vm520_vm10 = vweird.f32 %v6336_v60  ;;  %v656_v48 = vsub.s32 4, %v632_v2  ;;  %v3496_v26 = vor.u32 %v3495_v43, %v3494_v40  ;;  %v3499_v27 = vor.u32 %v3498_v7, %v3497_v42 }
 0x1eb   :  { %v510_v35 = vmul.f32 %v509_v21, %v505_v23  ;;  %v517_v0 = vmul.f32 %v516_v57, %v505_v23  ;;  %vm635_vm9 = vcmp.lt.s32.totalorder %v6664_v49, 0  ;;  %v636_v52 = vsub.s32 0, %v6664_v49 }
 0x1ec   :  { %v3505_v8 = vor.u32 %v3504_v22, %v3503_v28  ;;  %v3506_v4 = vshll.u32 %v9626_v16, %v3491_v13  ;;  %v3502_v23 = vor.u32 %v3501_v41, %v3500_v3  ;;  %v3527_v25 = vshrl.u32 %v6635_v37, 16 }
 0x1ed   :  { %v511_v36 = vadd.f32 1.0, %v510_v35  ;;  %v518_v44 = vadd.f32 1.0, %v517_v0  ;;  %v637_v12 = vsel %vm635_vm9, %v636_v52, %v6664_v49  ;;  %v6681_v54 = vadd.s32 1, %v5451_v38 }
 0x1ee   :  { %v638_v6 = vclz %v637_v12  ;;  %v9643_v40 = vand.u32 2147483647, %v6353_v5  ;;  %v3508_v7 = vor.u32 %v3507_v15, %v3506_v4  ;;  %vm3509_vm12 = vcmp.lt.s32.totalorder %v6654_v62, 1 }
 0x1ef   :  { %v519_v10 = vmul.f32 %v518_v44, %v503_v14  ;;  %v528_v21 = vxor.u32 2147483648, %v511_v36  ;;  %v6694_v22 = vsel %vm534_vm5, %v656_v48, %v632_v2  ;;  %vm3512_vm14 = vcmp.lt.s32.totalorder %v6654_v62, 4 }
 0x1f0   :  { %vm6687_vm11 = vcmp.le.f32.partialorder %v9643_v40, 0.7853982  ;;  %v5392_v13 = vadd.s32 4294967294, %v638_v6  ;;  %v3517_v14 = vsel %vm3509_vm12, %v3496_v26, %v3499_v27  ;;  %vm3510_vm13 = vcmp.lt.s32.totalorder %v6654_v62, 2 }
 0x1f1   :  { %v525_v38 = vxor.u32 2147483648, %v519_v10  ;;  %vm3511_vm15 = vcmp.lt.s32.totalorder %v6654_v62, 3  ;;  %v3518_v57 = vsel %vm3512_vm14, %v3505_v8, 920167782  ;;  %v529_v42 = vsel %vm527_vm6, %v528_v21, %v519_v10 }
 0x1f2   :  { %vm5393_vm0 = vcmp.lt.s32.totalorder %v5392_v13, 0  ;;  %v3519_v2 = vsel %vm3511_vm15, %v3502_v23, %v3518_v57  ;;  %v3521_v3 = vsel %vm3509_vm12, %v3499_v27, %v3502_v23  ;;  %v3522_v35 = vsel %vm3512_vm14, %v3508_v7, 1326507024 }
 0x1f3   :  { %v526_v41 = vsel %vm524_vm7, %v511_v36, %v525_v38  ;;  %v641_v28 = vsel %vm5393_vm0, 0, %v5392_v13  ;;  %v3520_v15 = vsel %vm3510_vm13, %v3517_v14, %v3519_v2  ;;  %v3514_v44 = vsel %vm3512_vm14, %v3502_v23, 2102212464 }
 0x1f4   :  { %v530_v0 = vsel %vm523_vm8, %v526_v41, %v529_v42  ;;  %v642_v52 = vsub.s32 32, %v641_v28  ;;  %v646_v48 = vsub.s32 4294967266, %v641_v28  ;;  %v3523_v36 = vsel %vm3511_vm15, %v3505_v8, %v3522_v35 }
 0x1f5   :  { %v531_v12 = vsel %vm520_vm10, nan, %v530_v0  ;;  %v3550_v4 = vand.u32 65535, %v3520_v15  ;;  %v3551_v6 = vshrl.u32 %v3520_v15, 16  ;;  %v643_v10 = vshll.u32 %v6664_v49, %v641_v28 }
 0x1f6   :  { %v644_v21 = vshrl.u32 %v6647_v58, %v642_v52  ;;  %v647_v40 = vadd.s32 127, %v646_v48  ;;  %5337 = vst [vmem:[#allocation2] sm:$0xff] %v531_v12  ;;  %v3524_v9 = vsel %vm3510_vm13, %v3521_v3, %v3523_v36  ;;  %v3493_v23 = vshrl.u32 %v9613_v11, %v6641_v46  ;;  %v6733_v58 = vpop.permute.xlu1 %181 }
 0x1f7   :  { %v3528_v7 = vand.u32 65535, %v3524_v9  ;;  %v3529_v60 = vshrl.u32 %v3524_v9, 16  ;;  %v3553_v13 = vmul.u32 %v3551_v6, %v6650_v18  ;;  %v659_v49 = vsel %vm6687_vm11, 0, %v6694_v22 }
 0x1f8   :  { %v645_v14 = vor.u32 %v644_v21, %v643_v10  ;;  %v648_v8 = vshll.u32 %v647_v40, 23  ;;  %v3554_v38 = vmul.u32 %v3550_v4, %v3527_v25  ;;  %v3513_v57 = vsel %vm3509_vm12, %v3493_v23, %v3496_v26 }
 0x1f9   :  { %v3515_v42 = vsel %vm3511_vm15, %v3499_v27, %v3514_v44  ;;  %v3531_v46 = vmul.u32 %v3529_v60, %v6650_v18  ;;  %v3532_v2 = vmul.u32 %v3528_v7, %v3527_v25  ;;  %v3552_v41 = vmul.u32 %v3550_v4, %v6650_v18 }
 0x1fa   :  { %v649_v3 = vor.u32 4788187, %v648_v8  ;;  %v3555_v28 = vmul.u32 %v3551_v6, %v3527_v25  ;;  %v3556_v15 = vshll.u32 %v3553_v13, 16  ;;  %v652_v35 = vcvt.s32.f32 %v645_v14 }
 0x1fb   :  { %v3530_v22 = vmul.u32 %v3528_v7, %v6650_v18  ;;  %v3533_v0 = vmul.u32 %v3529_v60, %v3527_v25  ;;  %v3534_v52 = vshll.u32 %v3531_v46, 16  ;;  %v3536_v12 = vshll.u32 %v3532_v2, 16 }
 0x1fc   :  { %v650_v48 = vand.u32 2147483647, %v649_v3  ;;  %v3558_v36 = vshll.u32 %v3554_v38, 16  ;;  %vm3560_vm2 = vc.u32 %v3552_v41, %v3556_v15  ;;  %v3562_v44 = vadd.s32 %v3556_v15, %v3552_v41 }
 0x1fd   :  { %vm3538_vm1 = vc.u32 %v3530_v22, %v3534_v52  ;;  %v3540_v26 = vadd.s32 %v3534_v52, %v3530_v22  ;;  %v3561_v27 = vsel %vm3560_vm2, 1, %v9623_v29  ;;  %vm3643_vm3 = vcmp.gt.s32.totalorder %v6681_v54, 0 }
 0x1fe   :  { %v653_v10 = vmul.f32 %v652_v35, %v650_v48  ;;  %v3539_v21 = vsel %vm3538_vm1, 1, %v9623_v29  ;;  %v3563_v4 = vadd.s32 %v3561_v27, %v3555_v28  ;;  %v3557_v18 = vshrl.u32 %v3553_v13, 16  ;;  %v6752_v15 = vpop.permute.xlu1 %193 }
 0x1ff   :  { %v3541_v6 = vadd.s32 %v3539_v21, %v3533_v0  ;;  %vm3542_vm4 = vc.u32 %v3540_v26, %v3536_v12  ;;  %vm3564_vm6 = vc.u32 %v3562_v44, %v3558_v36  ;;  %v3644_v23 = vsel %vm3643_vm3, %v6681_v54, 0  ;;  %9646 = vst [vmem:[#allocation16_spill] sm:$0xff] %v6752_v15 }
 0x200   :  { %v654_v25 = vxor.u32 2147483648, %v653_v10  ;;  %v3543_v40 = vsel %vm3542_vm4, 1, %v9623_v29  ;;  %v3565_v9 = vsel %vm3564_vm6, 1, %v9623_v29  ;;  %v3535_v7 = vshrl.u32 %v3531_v46, 16 }
 0x201   :  { %v3545_v60 = vadd.s32 %v3543_v40, %v3541_v6  ;;  %v3567_v14 = vadd.s32 %v3565_v9, %v3563_v4  ;;  %v3646_v8 = vand.u32 31, %v3644_v23  ;;  %v3516_v41 = vsel %vm3510_vm13, %v3513_v57, %v3515_v42 }
 0x202   :  { %v655_v3 = vsel %vm534_vm5, %v654_v25, %v653_v10  ;;  %v3537_v28 = vshrl.u32 %v3532_v2, 16  ;;  %v3559_v13 = vshrl.u32 %v3554_v38, 16  ;;  %v6761_v0 = vmul.f32 %v5640_v32, %v6683_v24 }
 0x203   :  { %v658_v35 = vsel %vm6687_vm11, %v6353_v5, %v655_v3  ;;  %v3546_v22 = vadd.s32 %v3545_v60, %v3535_v7  ;;  %v3568_v54 = vadd.s32 %v3567_v14, %v3557_v18  ;;  %v6757_v46 = vsub.s32 32, %v3646_v8 }
 0x204   :  { %v660_v52 = vmul.f32 %v658_v35, %v658_v35  ;;  %v676_v48 = vadd.s32 3, %v659_v49  ;;  %v3639_v62 = vand.u32 8388607, %v9598_v17  ;;  %v6767_v57 = vadd.s32 %v3562_v44, %v3558_v36 }
 0x205   :  { %v6765_v38 = vadd.s32 %v3546_v22, %v3537_v28  ;;  %v3569_v42 = vadd.s32 %v3568_v54, %v3559_v13  ;;  %v3570_v43 = vmul.u32 %v6635_v37, %v3516_v41  ;;  %v6770_v26 = vshrl.u32 %v3644_v23, 5 }
 0x206   :  { %v661_v2 = vmul.f32 -0.001358992, %v660_v52  ;;  %v668_v12 = vmul.f32 -0.00019511016, %v660_v52  ;;  %v3652_v27 = vshll.u32 %v9617_v34, %v3646_v8  ;;  %v3653_v10 = vshrl.u32 %v9618_v56, %v6757_v46 }
 0x207   :  { %vm3572_vm5 = vc.u32 %v6765_v38, %v6767_v57  ;;  %v3573_v49 = vadd.s32 1, %v3569_v42  ;;  %v3656_v36 = vshrl.u32 %v9627_v61, %v6757_v46  ;;  %v3650_v37 = vshrl.u32 %v9617_v34, %v6757_v46 }
 0x208   :  { %v662_v44 = vadd.f32 0.041655596, %v661_v2  ;;  %v669_v21 = vadd.f32 0.008332121, %v668_v12  ;;  %v3655_v4 = vshll.u32 %v9618_v56, %v3646_v8  ;;  %v3658_v18 = vshll.u32 %v9627_v61, %v3646_v8  ;;  %v6795_v12 = vpop.permute.xlu1 %205 }
 0x209   :  { %v3574_v6 = vsel %vm3572_vm5, %v3573_v49, %v3569_v42  ;;  %v3659_v25 = vshrl.u32 %v9626_v16, %v6757_v46  ;;  %v3661_v40 = vshll.u32 %v9626_v16, %v3646_v8  ;;  %v3662_v60 = vshrl.u32 %v9619_v55, %v6757_v46  ;;  %9647 = vst [vmem:[#allocation17_spill] sm:$0xff] %v6795_v12 }
 0x20a   :  { %v663_v9 = vmul.f32 %v662_v44, %v660_v52  ;;  %v670_v23 = vmul.f32 %v669_v21, %v660_v52  ;;  %v3575_v7 = vadd.s32 %v3574_v6, %v3570_v43  ;;  %v3649_v14 = vshll.u32 %v9613_v11, %v3646_v8 }
 0x20b   :  { %v6789_v3 = vor.u32 %v3653_v10, %v3652_v27  ;;  %v3657_v41 = vor.u32 %v3656_v36, %v3655_v4  ;;  %v3660_v28 = vor.u32 %v3659_v25, %v3658_v18  ;;  %v3663_v42 = vor.u32 %v3662_v60, %v3661_v40 }
 0x20c   :  { %v664_v13 = vadd.f32 -0.4999988, %v663_v9  ;;  %v671_v22 = vadd.f32 -0.16666654, %v670_v23  ;;  %v3576_v54 = vadd.s32 536870912, %v3575_v7  ;;  %v6793_v2 = vmul.f32 %v5642_v33, %v6683_v24 }
 0x20d   :  { %v677_v43 = vand.u32 3, %v676_v48  ;;  %v3640_v49 = vor.u32 8388608, %v3639_v62  ;;  %v6797_v44 = vor.u32 %v3650_v37, %v3649_v14  ;;  %vm3667_vm7 = vcmp.lt.s32.totalorder %v6770_v26, 4 }
 0x20e   :  { %v665_v21 = vmul.f32 %v664_v13, %v660_v52  ;;  %v672_v8 = vmul.f32 %v671_v22, %v660_v52  ;;  %v6799_v27 = vshrl.u32 %v3576_v54, 30  ;;  %vm3664_vm8 = vcmp.lt.s32.totalorder %v6770_v26, 1 }
 0x20f   :  { %vm3666_vm9 = vcmp.lt.s32.totalorder %v6770_v26, 3  ;;  %v3673_v24 = vsel %vm3667_vm7, %v3660_v28, 920167782  ;;  %v3677_v10 = vsel %vm3667_vm7, %v3663_v42, 1326507024  ;;  %v3676_v52 = vsel %vm3664_vm8, %v6789_v3, %v3657_v41 }
 0x210   :  { %v666_v48 = vadd.f32 1.0, %v665_v21  ;;  %v673_v62 = vadd.f32 1.0, %v672_v8  ;;  %v3578_v36 = vshll.u32 %v6799_v27, 30  ;;  %v3672_v37 = vsel %vm3664_vm8, %v6797_v44, %v6789_v3 }
 0x211   :  { %v3674_v4 = vsel %vm3666_vm9, %v3657_v41, %v3673_v24  ;;  %v3678_v6 = vsel %vm3666_vm9, %v3660_v28, %v3677_v10  ;;  %v6820_v18 = vshll.u32 %v3640_v49, 8  ;;  %vm3665_vm10 = vcmp.lt.s32.totalorder %v6770_v26, 2 }
 0x212   :  { %v674_v25 = vmul.f32 %v673_v62, %v658_v35  ;;  %v683_v40 = vxor.u32 2147483648, %v666_v48  ;;  %v3579_v9 = vsub.s32 %v3575_v7, %v3578_v36  ;;  %vm675_vm11 = vweird.f32 %v6353_v5  ;;  %v287_v62 = vpop.permute.xlu1 %286 }
 0x213   :  { %vm678_vm12 = vcmp.lt.s32.totalorder %v677_v43, 2  ;;  %vm679_vm14 = vcmp.eq.s32.totalorder %v677_v43, 0  ;;  %v3679_v23 = vsel %vm3665_vm10, %v3676_v52, %v3678_v6  ;;  %v3675_v28 = vsel %vm3665_vm10, %v3672_v37, %v3674_v4 }
 0x214   :  { %v680_v60 = vxor.u32 2147483648, %v674_v25  ;;  %vm3580_vm13 = vcmp.lt.s32.totalorder %v3579_v9, 0  ;;  %v3581_v14 = vsub.s32 0, %v3579_v9  ;;  %vm682_vm15 = vcmp.eq.s32.totalorder %v677_v43, 2 }
 0x215   :  { %v3681_v35 = vand.u32 65535, %v6820_v18  ;;  %v3683_v13 = vand.u32 65535, %v3679_v23  ;;  %v3684_v7 = vshrl.u32 %v3679_v23, 16  ;;  %v684_v54 = vsel %vm682_vm15, %v683_v40, %v674_v25 }
 0x216   :  { %v681_v22 = vsel %vm679_vm14, %v666_v48, %v680_v60  ;;  %v3582_v42 = vsel %vm3580_vm13, %v3581_v14, %v3579_v9  ;;  %v3682_v49 = vshrl.u32 %v6820_v18, 16  ;;  %v3648_v24 = vshrl.u32 %v9613_v11, %v6757_v46 }
 0x217   :  { %v685_v21 = vsel %vm678_vm12, %v681_v22, %v684_v54  ;;  %v3583_v8 = vclz %v3582_v42  ;;  %v3706_v10 = vshrl.u32 %v3675_v28, 16  ;;  %v3686_v43 = vmul.u32 %v3684_v7, %v3681_v35 }
 0x218   :  { %v686_v36 = vsel %vm675_vm11, nan, %v685_v21  ;;  %v3687_v52 = vmul.u32 %v3683_v13, %v3682_v49  ;;  %v3705_v37 = vand.u32 65535, %v3675_v28  ;;  %v3571_v48 = vadd.s32 %v6767_v57, %v6765_v38 }
 0x219   :  { %5338 = vst [vmem:[#allocation2 + $0x8] sm:$0xff] %v686_v36  ;;  %v5449_v4 = vadd.s32 4294967294, %v3583_v8  ;;  %v3601_v6 = vsub.s32 4, %v6799_v27  ;;  %v3669_v25 = vsel %vm3667_vm7, %v3657_v41, 2102212464  ;;  %v3685_v40 = vmul.u32 %v3683_v13, %v3681_v35 }
 0x21a   :  { %v3688_v46 = vmul.u32 %v3684_v7, %v3682_v49  ;;  %v3689_v23 = vshll.u32 %v3686_v43, 16  ;;  %v6840_v60 = vadd.f32 %v287_v62, %v6622_v50  ;;  %vm3479_vm0 = vcmp.lt.s32.totalorder %v6577_v19, 0 }
 0x21b   :  { %vm5450_vm2 = vcmp.lt.s32.totalorder %v5449_v4, 0  ;;  %v3690_v5 = vshrl.u32 %v3686_v43, 16  ;;  %v3691_v14 = vshll.u32 %v3687_v52, 16  ;;  %v3708_v28 = vmul.u32 %v3706_v10, %v3681_v35 }
 0x21c   :  { %v3586_v22 = vsel %vm5450_vm2, 0, %v5449_v4  ;;  %vm3693_vm1 = vc.u32 %v3685_v40, %v3689_v23  ;;  %v3695_v38 = vadd.s32 %v3689_v23, %v3685_v40  ;;  %v3709_v57 = vmul.u32 %v3705_v37, %v3682_v49 }
 0x21d   :  { %v3587_v54 = vsub.s32 32, %v3586_v22  ;;  %v3591_v42 = vsub.s32 4294967266, %v3586_v22  ;;  %v3694_v41 = vsel %vm3693_vm1, 1, %v9623_v29  ;;  %v3707_v13 = vmul.u32 %v3705_v37, %v3681_v35 }
 0x21e   :  { %v3696_v7 = vadd.s32 %v3694_v41, %v3688_v46  ;;  %vm3697_vm3 = vc.u32 %v3695_v38, %v3691_v14  ;;  %v3710_v21 = vmul.u32 %v3706_v10, %v3682_v49  ;;  %v3711_v50 = vshll.u32 %v3708_v28, 16 }
 0x21f   :  { %v3588_v8 = vshll.u32 %v3579_v9, %v3586_v22  ;;  %v3589_v36 = vshrl.u32 %v3571_v48, %v3587_v54  ;;  %v3592_v17 = vadd.s32 127, %v3591_v42  ;;  %v3698_v43 = vsel %vm3697_vm3, 1, %v9623_v29 }
 0x220   :  { %v3700_v51 = vadd.s32 %v3698_v43, %v3696_v7  ;;  %v3713_v12 = vshll.u32 %v3709_v57, 16  ;;  %vm3715_vm4 = vc.u32 %v3707_v13, %v3711_v50  ;;  %v3717_v4 = vadd.s32 %v3711_v50, %v3707_v13 }
 0x221   :  { %v3590_v40 = vor.u32 %v3589_v36, %v3588_v8  ;;  %v3593_v23 = vshll.u32 %v3592_v17, 23  ;;  %v3668_v15 = vsel %vm3664_vm8, %v3648_v24, %v6797_v44  ;;  %v3716_v35 = vsel %vm3715_vm4, 1, %v9623_v29 }
 0x222   :  { %v3670_v9 = vsel %vm3666_vm9, %v6789_v3, %v3669_v25  ;;  %v3701_v49 = vadd.s32 %v3700_v51, %v3690_v5  ;;  %v3718_v10 = vadd.s32 %v3716_v35, %v3710_v21  ;;  %vm3719_vm6 = vc.u32 %v3717_v4, %v3713_v12 }
 0x223   :  { %v3594_v37 = vor.u32 4788187, %v3593_v23  ;;  %v3692_v48 = vshrl.u32 %v3687_v52, 16  ;;  %v3720_v46 = vsel %vm3719_vm6, 1, %v9623_v29  ;;  %v687_v14 = vand.u32 2147483647, %v6840_v60 }
 0x224   :  { %v3602_v17 = vsel %vm3479_vm0, %v3601_v6, %v6799_v27  ;;  %v3712_v44 = vshrl.u32 %v3708_v28, 16  ;;  %v3722_v24 = vadd.s32 %v3720_v46, %v3718_v10  ;;  %v690_v22 = vand.u32 2139095040, %v6840_v60 }
 0x225   :  { %v3595_v38 = vand.u32 2147483647, %v3594_v37  ;;  %v3597_v54 = vcvt.s32.f32 %v3590_v40  ;;  %v3702_v3 = vadd.s32 %v3701_v49, %v3692_v48  ;;  %v694_v51 = vand.u32 8388607, %v687_v14 }
 0x226   :  { %v3714_v25 = vshrl.u32 %v3709_v57, 16  ;;  %v3723_v52 = vadd.s32 %v3722_v24, %v3712_v44  ;;  %v6861_v5 = vadd.f32 %v287_v62, %v6626_v1  ;;  %v691_v42 = vshrl.u32 %v690_v22, 23 }
 0x227   :  { %v127_v41 = vmul.f32 %v5638_v31, %v5613_v20  ;;  %v9648_v27 = vand.u32 2147483647, %v6577_v19  ;;  %v3598_v28 = vmul.f32 %v3597_v54, %v3595_v38  ;;  %v3721_v13 = vadd.s32 %v3717_v4, %v3713_v12 }
 0x228   :  { %v3671_v7 = vsel %vm3665_vm10, %v3668_v15, %v3670_v9  ;;  %v3724_v57 = vadd.s32 %v3723_v52, %v3714_v25  ;;  %v5394_v21 = vadd.s32 4294967169, %v691_v42  ;;  %v6875_v1 = vadd.f32 %v6761_v0, %v6639_v39 }
 0x229   :  { %vm6867_vm5 = vcmp.le.f32.partialorder %v9648_v27, 0.7853982  ;;  %v3599_v62 = vxor.u32 2147483648, %v3598_v28  ;;  %vm3727_vm7 = vc.u32 %v3702_v3, %v3721_v13  ;;  %v695_v50 = vor.u32 8388608, %v694_v51 }
 0x22a   :  { %v3604_v20 = vsel %vm6867_vm5, 0, %v3602_v17  ;;  %v3728_v8 = vadd.s32 1, %v3724_v57  ;;  %v697_v36 = vadd.s32 1, %v5394_v21  ;;  %v845_v43 = vand.u32 2139095040, %v6861_v5 }
 0x22b   :  { %v6881_v12 = vadd.f32 %v6793_v2, %v127_v41  ;;  %v3600_v15 = vsel %vm3479_vm0, %v3599_v62, %v3598_v28  ;;  %v3725_v26 = vmul.u32 %v6820_v18, %v3671_v7  ;;  %v3621_v40 = vadd.s32 3, %v3604_v20 }
 0x22c   :  { %v3603_v39 = vsel %vm6867_vm5, %v6577_v19, %v3600_v15  ;;  %v3729_v0 = vsel %vm3727_vm7, %v3728_v8, %v3724_v57  ;;  %vm698_vm8 = vcmp.gt.s32.totalorder %v697_v36, 0  ;;  %v6889_v49 = vshll.u32 %v695_v50, 8 }
 0x22d   :  { %v3605_v4 = vmul.f32 %v3603_v39, %v3603_v39  ;;  %v3730_v23 = vadd.s32 %v3729_v0, %v3725_v26  ;;  %v699_v35 = vsel %vm698_vm8, %v697_v36, 0  ;;  %v846_v2 = vshrl.u32 %v845_v43, 23 }
 0x22e   :  { %v701_v9 = vand.u32 31, %v699_v35  ;;  %v6893_v44 = vand.u32 3, %v3621_v40  ;;  %v6895_v22 = vadd.s32 %v3721_v13, %v3702_v3  ;;  %v6898_v38 = vand.u32 65535, %v6889_v49 }
 0x22f   :  { %v3606_v10 = vmul.f32 -0.001358992, %v3605_v4  ;;  %v3613_v37 = vmul.f32 -0.00019511016, %v3605_v4  ;;  %v3731_v48 = vadd.s32 536870912, %v3730_v23  ;;  %v5397_v51 = vadd.s32 4294967169, %v846_v2 }
 0x230   :  { %v6891_v46 = vsub.s32 32, %v701_v9  ;;  %v842_v54 = vand.u32 2147483647, %v6861_v5  ;;  %vm3634_vm9 = vcmp.lt.s32.totalorder %v6606_v63, 0  ;;  %v6902_v41 = vshrl.u32 %v699_v35, 5 }
 0x231   :  { %v3607_v18 = vadd.f32 0.041655596, %v3606_v10  ;;  %v3614_v17 = vadd.f32 0.008332121, %v3613_v37  ;;  %v3732_v24 = vshrl.u32 %v3731_v48, 30  ;;  %v704_v27 = vshll.u32 %v9613_v11, %v701_v9 }
 0x232   :  { %v705_v6 = vshrl.u32 %v9617_v34, %v6891_v46  ;;  %v708_v3 = vshrl.u32 %v9618_v56, %v6891_v46  ;;  %v714_v28 = vshrl.u32 %v9626_v16, %v6891_v46  ;;  %vm3627_vm10 = vcmp.eq.s32.totalorder %v6893_v44, 2 }
 0x233   :  { %v3608_v25 = vmul.f32 %v3607_v18, %v3605_v4  ;;  %v3615_v52 = vmul.f32 %v3614_v17, %v3605_v4  ;;  %v3733_v42 = vshll.u32 %v3732_v24, 30  ;;  %v707_v21 = vshll.u32 %v9617_v34, %v701_v9 }
 0x234   :  { %vm3624_vm11 = vcmp.eq.s32.totalorder %v6893_v44, 0  ;;  %v710_v62 = vshll.u32 %v9618_v56, %v701_v9  ;;  %v711_v20 = vshrl.u32 %v9627_v61, %v6891_v46  ;;  %v713_v50 = vshll.u32 %v9627_v61, %v701_v9 }
 0x235   :  { %v3609_v13 = vadd.f32 -0.4999988, %v3608_v25  ;;  %v3616_v7 = vadd.f32 -0.16666654, %v3615_v52  ;;  %v6912_v57 = vsub.s32 %v3730_v23, %v3733_v42  ;;  %v717_v8 = vshrl.u32 %v9619_v55, %v6891_v46 }
 0x236   :  { %vm3623_vm12 = vcmp.lt.s32.totalorder %v6893_v44, 2  ;;  %vm3620_vm13 = vweird.f32 %v6577_v19  ;;  %v3756_v26 = vsub.s32 4, %v3732_v24  ;;  %v706_v0 = vor.u32 %v705_v6, %v704_v27 }
 0x237   :  { %v3610_v36 = vmul.f32 %v3609_v13, %v3605_v4  ;;  %v3617_v43 = vmul.f32 %v3616_v7, %v3605_v4  ;;  %vm3735_vm14 = vcmp.lt.s32.totalorder %v6912_v57, 0  ;;  %v3736_v15 = vsub.s32 0, %v6912_v57 }
 0x238   :  { %v709_v40 = vor.u32 %v708_v3, %v707_v21  ;;  %v715_v23 = vor.u32 %v714_v28, %v713_v50  ;;  %v716_v37 = vshll.u32 %v9626_v16, %v701_v9  ;;  %v712_v4 = vor.u32 %v711_v20, %v710_v62 }
 0x239   :  { %v3611_v35 = vadd.f32 1.0, %v3610_v36  ;;  %v3618_v2 = vadd.f32 1.0, %v3617_v43  ;;  %v3737_v10 = vsel %vm3735_vm14, %v3736_v15, %v6912_v57  ;;  %v737_v18 = vshrl.u32 %v6889_v49, 16 }
 0x23a   :  { %v3738_v48 = vclz %v3737_v10  ;;  %v6929_v17 = vadd.s32 1, %v5397_v51  ;;  %v9651_v42 = vand.u32 2147483647, %v6606_v63  ;;  %v718_v6 = vor.u32 %v717_v8, %v716_v37 }
 0x23b   :  { %v3619_v25 = vmul.f32 %v3618_v2, %v3603_v39  ;;  %v3628_v52 = vxor.u32 2147483648, %v3611_v35  ;;  %vm719_vm0 = vcmp.lt.s32.totalorder %v6902_v41, 1  ;;  %v6940_v9 = vsel %vm3634_vm9, %v3756_v26, %v3732_v24 }
 0x23c   :  { %vm6933_vm15 = vcmp.le.f32.partialorder %v9651_v42, 0.7853982  ;;  %v5452_v3 = vadd.s32 4294967294, %v3738_v48  ;;  %vm722_vm2 = vcmp.lt.s32.totalorder %v6902_v41, 4  ;;  %v727_v39 = vsel %vm719_vm0, %v706_v0, %v709_v40 }
 0x23d   :  { %v3625_v51 = vxor.u32 2147483648, %v3619_v25  ;;  %vm720_vm1 = vcmp.lt.s32.totalorder %v6902_v41, 2  ;;  %vm721_vm3 = vcmp.lt.s32.totalorder %v6902_v41, 3  ;;  %v728_v28 = vsel %vm722_vm2, %v715_v23, 920167782 }
 0x23e   :  { %v3629_v13 = vsel %vm3627_vm10, %v3628_v52, %v3619_v25  ;;  %vm5453_vm4 = vcmp.lt.s32.totalorder %v5452_v3, 0  ;;  %v729_v24 = vsel %vm721_vm3, %v712_v4, %v728_v28  ;;  %v731_v7 = vsel %vm719_vm0, %v709_v40, %v712_v4 }
 0x23f   :  { %v3626_v21 = vsel %vm3624_vm11, %v3611_v35, %v3625_v51  ;;  %v3741_v62 = vsel %vm5453_vm4, 0, %v5452_v3  ;;  %v730_v20 = vsel %vm720_vm1, %v727_v39, %v729_v24  ;;  %v732_v50 = vsel %vm722_vm2, %v718_v6, 1326507024 }
 0x240   :  { %v3630_v8 = vsel %vm3623_vm12, %v3626_v21, %v3629_v13  ;;  %v3742_v36 = vsub.s32 32, %v3741_v62  ;;  %v3746_v43 = vsub.s32 4294967266, %v3741_v62  ;;  %v724_v15 = vsel %vm722_vm2, %v712_v4, 2102212464 }
 0x241   :  { %v3631_v26 = vsel %vm3620_vm13, nan, %v3630_v8  ;;  %v733_v35 = vsel %vm721_vm3, %v715_v23, %v732_v50  ;;  %v760_v2 = vand.u32 65535, %v730_v20  ;;  %v761_v10 = vshrl.u32 %v730_v20, 16 }
 0x242   :  { %v3743_v37 = vshll.u32 %v6912_v57, %v3741_v62  ;;  %v3744_v48 = vshrl.u32 %v6895_v22, %v3742_v36  ;;  %v3747_v25 = vadd.s32 127, %v3746_v43  ;;  %5357 = vst [vmem:[#allocation2 + $0xa0] sm:$0xff] %v3631_v26  ;;  %v734_v44 = vsel %vm720_vm1, %v731_v7, %v733_v35 }
 0x243   :  { %v703_v4 = vshrl.u32 %v9613_v11, %v6891_v46  ;;  %v738_v52 = vand.u32 65535, %v734_v44  ;;  %v739_v19 = vshrl.u32 %v734_v44, 16  ;;  %v763_v42 = vmul.u32 %v761_v10, %v6898_v38 }
 0x244   :  { %v3745_v6 = vor.u32 %v3744_v48, %v3743_v37  ;;  %v3748_v23 = vshll.u32 %v3747_v25, 23  ;;  %v3759_v57 = vsel %vm6933_vm15, 0, %v6940_v9  ;;  %v764_v3 = vmul.u32 %v760_v2, %v737_v18 }
 0x245   :  { %v723_v22 = vsel %vm719_vm0, %v703_v4, %v706_v0  ;;  %v725_v39 = vsel %vm721_vm3, %v709_v40, %v724_v15  ;;  %v741_v51 = vmul.u32 %v739_v19, %v6898_v38  ;;  %v742_v46 = vmul.u32 %v738_v52, %v737_v18 }
 0x246   :  { %v3749_v28 = vor.u32 4788187, %v3748_v23  ;;  %v762_v13 = vmul.u32 %v760_v2, %v6898_v38  ;;  %v765_v24 = vmul.u32 %v761_v10, %v737_v18  ;;  %v766_v7 = vshll.u32 %v763_v42, 16 }
 0x247   :  { %v3752_v21 = vcvt.s32.f32 %v3745_v6  ;;  %v740_v62 = vmul.u32 %v738_v52, %v6898_v38  ;;  %v743_v20 = vmul.u32 %v739_v19, %v737_v18  ;;  %v744_v9 = vshll.u32 %v741_v51, 16 }
 0x248   :  { %v3750_v50 = vand.u32 2147483647, %v3749_v28  ;;  %v746_v8 = vshll.u32 %v742_v46, 16  ;;  %v768_v36 = vshll.u32 %v764_v3, 16  ;;  %vm770_vm6 = vc.u32 %v762_v13, %v766_v7 }
 0x249   :  { %vm748_vm5 = vc.u32 %v740_v62, %v744_v9  ;;  %v750_v0 = vadd.s32 %v744_v9, %v740_v62  ;;  %v771_v40 = vsel %vm770_vm6, 1, %v9623_v29  ;;  %v772_v43 = vadd.s32 %v766_v7, %v762_v13 }
 0x24a   :  { %v3753_v15 = vmul.f32 %v3752_v21, %v3750_v50  ;;  %v749_v26 = vsel %vm748_vm5, 1, %v9623_v29  ;;  %v773_v35 = vadd.s32 %v771_v40, %v765_v24  ;;  %vm853_vm7 = vcmp.gt.s32.totalorder %v6929_v17, 0 }
 0x24b   :  { %v751_v2 = vadd.s32 %v749_v26, %v743_v20  ;;  %vm752_vm8 = vc.u32 %v750_v0, %v746_v8  ;;  %v767_v38 = vshrl.u32 %v763_v42, 16  ;;  %vm774_vm10 = vc.u32 %v772_v43, %v768_v36 }
 0x24c   :  { %v3754_v18 = vxor.u32 2147483648, %v3753_v15  ;;  %v753_v10 = vsel %vm752_vm8, 1, %v9623_v29  ;;  %v775_v37 = vsel %vm774_vm10, 1, %v9623_v29  ;;  %v854_v48 = vsel %vm853_vm7, %v6929_v17, 0 }
 0x24d   :  { %v745_v25 = vshrl.u32 %v741_v51, 16  ;;  %v755_v44 = vadd.s32 %v753_v10, %v751_v2  ;;  %v777_v4 = vadd.s32 %v775_v37, %v773_v35  ;;  %v856_v52 = vand.u32 31, %v854_v48 }
 0x24e   :  { %v3755_v19 = vsel %vm3634_vm9, %v3754_v18, %v3753_v15  ;;  %v726_v6 = vsel %vm720_vm1, %v723_v22, %v725_v39  ;;  %v747_v23 = vshrl.u32 %v742_v46, 16  ;;  %v769_v42 = vshrl.u32 %v764_v3, 16 }
 0x24f   :  { %v3758_v28 = vsel %vm6933_vm15, %v6606_v63, %v3755_v19  ;;  %v756_v13 = vadd.s32 %v755_v44, %v745_v25  ;;  %v778_v24 = vadd.s32 %v777_v4, %v767_v38  ;;  %v6999_v7 = vsub.s32 32, %v856_v52 }
 0x250   :  { %v3760_v17 = vmul.f32 %v3758_v28, %v3758_v28  ;;  %v3776_v51 = vadd.s32 3, %v3759_v57  ;;  %v849_v21 = vand.u32 8388607, %v842_v54  ;;  %v7005_v20 = vadd.s32 %v772_v43, %v768_v36 }
 0x251   :  { %v7003_v62 = vadd.s32 %v756_v13, %v747_v23  ;;  %v779_v41 = vadd.s32 %v778_v24, %v769_v42  ;;  %v780_v3 = vmul.u32 %v6889_v49, %v726_v6  ;;  %v7008_v27 = vshrl.u32 %v854_v48, 5 }
 0x252   :  { %v3761_v22 = vmul.f32 -0.001358992, %v3760_v17  ;;  %v3768_v39 = vmul.f32 -0.00019511016, %v3760_v17  ;;  %v862_v46 = vshll.u32 %v9617_v34, %v856_v52  ;;  %v863_v9 = vshrl.u32 %v9618_v56, %v6999_v7 }
 0x253   :  { %vm782_vm9 = vc.u32 %v7003_v62, %v7005_v20  ;;  %v783_v57 = vadd.s32 1, %v779_v41  ;;  %v866_v50 = vshrl.u32 %v9627_v61, %v6999_v7  ;;  %v860_v49 = vshrl.u32 %v9617_v34, %v6999_v7 }
 0x254   :  { %v3762_v8 = vadd.f32 0.041655596, %v3761_v22  ;;  %v3769_v36 = vadd.f32 0.008332121, %v3768_v39  ;;  %v865_v0 = vshll.u32 %v9618_v56, %v856_v52  ;;  %v868_v43 = vshll.u32 %v9627_v61, %v856_v52 }
 0x255   :  { %v784_v40 = vsel %vm782_vm9, %v783_v57, %v779_v41  ;;  %v869_v15 = vshrl.u32 %v9626_v16, %v6999_v7  ;;  %v871_v26 = vshll.u32 %v9626_v16, %v856_v52  ;;  %v872_v18 = vshrl.u32 %v9619_v55, %v6999_v7 }
 0x256   :  { %v3763_v35 = vmul.f32 %v3762_v8, %v3760_v17  ;;  %v3770_v2 = vmul.f32 %v3769_v36, %v3760_v17  ;;  %v785_v38 = vadd.s32 %v784_v40, %v780_v3  ;;  %v859_v10 = vshll.u32 %v9613_v11, %v856_v52 }
 0x257   :  { %v7027_v37 = vor.u32 %v863_v9, %v862_v46  ;;  %v867_v48 = vor.u32 %v866_v50, %v865_v0  ;;  %v870_v25 = vor.u32 %v869_v15, %v868_v43  ;;  %v873_v6 = vor.u32 %v872_v18, %v871_v26  ;;  %v7060_v26 = vpop.permute.xlu0 %302 }
 0x258   :  { %v3764_v44 = vadd.f32 -0.4999988, %v3763_v35  ;;  %v3771_v4 = vadd.f32 -0.16666654, %v3770_v2  ;;  %v786_v19 = vadd.s32 536870912, %v785_v38  ;;  %v3777_v23 = vand.u32 3, %v3776_v51 }
 0x259   :  { %v850_v42 = vor.u32 8388608, %v849_v21  ;;  %v7029_v13 = vor.u32 %v860_v49, %v859_v10  ;;  %vm877_vm11 = vcmp.lt.s32.totalorder %v7008_v27, 4  ;;  %vm874_vm12 = vcmp.lt.s32.totalorder %v7008_v27, 1 }
 0x25a   :  { %v3765_v24 = vmul.f32 %v3764_v44, %v3760_v17  ;;  %v3772_v41 = vmul.f32 %v3771_v4, %v3760_v17  ;;  %v7031_v3 = vshrl.u32 %v786_v19, 30  ;;  %vm876_vm14 = vcmp.lt.s32.totalorder %v7008_v27, 3 }
 0x25b   :  { %v883_v52 = vsel %vm877_vm11, %v870_v25, 920167782  ;;  %v887_v22 = vsel %vm877_vm11, %v873_v6, 1326507024  ;;  %v886_v17 = vsel %vm874_vm12, %v7027_v37, %v867_v48  ;;  %v882_v46 = vsel %vm874_vm12, %v7029_v13, %v7027_v37 }
 0x25c   :  { %v3766_v51 = vadd.f32 1.0, %v3765_v24  ;;  %v3773_v21 = vadd.f32 1.0, %v3772_v41  ;;  %v788_v39 = vshll.u32 %v7031_v3, 30  ;;  %v884_v57 = vsel %vm876_vm14, %v867_v48, %v883_v52 }
 0x25d   :  { %v888_v9 = vsel %vm876_vm14, %v870_v25, %v887_v22  ;;  %v7052_v50 = vshll.u32 %v850_v42, 8  ;;  %vm875_vm13 = vcmp.lt.s32.totalorder %v7008_v27, 2  ;;  %vm3775_vm15 = vweird.f32 %v6606_v63 }
 0x25e   :  { %v3774_v8 = vmul.f32 %v3773_v21, %v3758_v28  ;;  %v3783_v36 = vxor.u32 2147483648, %v3766_v51  ;;  %v789_v49 = vsub.s32 %v785_v38, %v788_v39  ;;  %vm3778_vm0 = vcmp.lt.s32.totalorder %v3777_v23, 2 }
 0x25f   :  { %vm3779_vm2 = vcmp.eq.s32.totalorder %v3777_v23, 0  ;;  %v889_v0 = vsel %vm875_vm13, %v886_v17, %v888_v9  ;;  %v885_v15 = vsel %vm875_vm13, %v882_v46, %v884_v57  ;;  %vm3782_vm3 = vcmp.eq.s32.totalorder %v3777_v23, 2 }
 0x260   :  { %v3780_v40 = vxor.u32 2147483648, %v3774_v8  ;;  %vm790_vm1 = vcmp.lt.s32.totalorder %v789_v49, 0  ;;  %v791_v43 = vsub.s32 0, %v789_v49  ;;  %v891_v28 = vand.u32 65535, %v7052_v50 }
 0x261   :  { %v893_v35 = vand.u32 65535, %v889_v0  ;;  %v894_v2 = vshrl.u32 %v889_v0, 16  ;;  %v3784_v18 = vsel %vm3782_vm3, %v3783_v36, %v3774_v8  ;;  %v892_v25 = vshrl.u32 %v7052_v50, 16 }
 0x262   :  { %v3781_v38 = vsel %vm3779_vm2, %v3766_v51, %v3780_v40  ;;  %v792_v10 = vsel %vm790_vm1, %v791_v43, %v789_v49  ;;  %v916_v19 = vshrl.u32 %v885_v15, 16  ;;  %v7067_v6 = vadd.f32 %v7060_v26, %v6875_v1 }
 0x263   :  { %v3785_v44 = vsel %vm3778_vm0, %v3781_v38, %v3784_v18  ;;  %v793_v4 = vclz %v792_v10  ;;  %v896_v24 = vmul.u32 %v894_v2, %v891_v28  ;;  %v897_v41 = vmul.u32 %v893_v35, %v892_v25 }
 0x264   :  { %v3786_v42 = vsel %vm3775_vm15, nan, %v3785_v44  ;;  %v915_v52 = vand.u32 65535, %v885_v15  ;;  %v781_v22 = vadd.s32 %v7005_v20, %v7003_v62  ;;  %v858_v23 = vshrl.u32 %v9613_v11, %v6999_v7 }
 0x265   :  { %5358 = vst [vmem:[#allocation2 + $0xa8] sm:$0xff] %v3786_v42  ;;  %v5395_v51 = vadd.s32 4294967294, %v793_v4  ;;  %v879_v21 = vsel %vm877_vm11, %v867_v48, 2102212464  ;;  %v811_v1 = vsub.s32 4, %v7031_v3  ;;  %v895_v39 = vmul.u32 %v893_v35, %v891_v28 }
 0x266   :  { %v898_v17 = vmul.u32 %v894_v2, %v892_v25  ;;  %v899_v63 = vshll.u32 %v896_v24, 16  ;;  %vm689_vm4 = vcmp.lt.s32.totalorder %v6840_v60, 0  ;;  %v900_v46 = vshrl.u32 %v896_v24, 16 }
 0x267   :  { %vm5396_vm6 = vcmp.lt.s32.totalorder %v5395_v51, 0  ;;  %v901_v57 = vshll.u32 %v897_v41, 16  ;;  %v918_v9 = vmul.u32 %v916_v19, %v891_v28  ;;  %v919_v20 = vmul.u32 %v915_v52, %v892_v25 }
 0x268   :  { %v796_v8 = vsel %vm5396_vm6, 0, %v5395_v51  ;;  %vm903_vm5 = vc.u32 %v895_v39, %v899_v63  ;;  %v905_v62 = vadd.s32 %v899_v63, %v895_v39  ;;  %v917_v48 = vmul.u32 %v915_v52, %v891_v28 }
 0x269   :  { %v797_v36 = vsub.s32 32, %v796_v8  ;;  %v801_v7 = vsub.s32 4294967266, %v796_v8  ;;  %v904_v0 = vsel %vm903_vm5, 1, %v9623_v29  ;;  %v920_v43 = vmul.u32 %v916_v19, %v892_v25 }
 0x26a   :  { %v906_v40 = vadd.s32 %v904_v0, %v898_v17  ;;  %vm907_vm7 = vc.u32 %v905_v62, %v901_v57  ;;  %v921_v15 = vshll.u32 %v918_v9, 16  ;;  %v798_v35 = vshll.u32 %v789_v49, %v796_v8 }
 0x26b   :  { %v799_v2 = vshrl.u32 %v781_v22, %v797_v36  ;;  %v802_v38 = vadd.s32 127, %v801_v7  ;;  %v908_v18 = vsel %vm907_vm7, 1, %v9623_v29  ;;  %v923_v44 = vshll.u32 %v919_v20, 16 }
 0x26c   :  { %v910_v10 = vadd.s32 %v908_v18, %v906_v40  ;;  %vm925_vm8 = vc.u32 %v917_v48, %v921_v15  ;;  %v927_v4 = vadd.s32 %v921_v15, %v917_v48  ;;  %v878_v51 = vsel %vm874_vm12, %v858_v23, %v7029_v13 }
 0x26d   :  { %v800_v42 = vor.u32 %v799_v2, %v798_v35  ;;  %v803_v24 = vshll.u32 %v802_v38, 23  ;;  %v926_v28 = vsel %vm925_vm8, 1, %v9623_v29  ;;  %v1927_v49 = vand.u32 2147483647, %v7067_v6 }
 0x26e   :  { %v911_v52 = vadd.s32 %v910_v10, %v900_v46  ;;  %v928_v25 = vadd.s32 %v926_v28, %v920_v43  ;;  %vm929_vm10 = vc.u32 %v927_v4, %v923_v44  ;;  %v880_v22 = vsel %vm876_vm14, %v7027_v37, %v879_v21 }
 0x26f   :  { %v804_v19 = vor.u32 4788187, %v803_v24  ;;  %v902_v39 = vshrl.u32 %v897_v41, 16  ;;  %v930_v17 = vsel %vm929_vm10, 1, %v9623_v29  ;;  %v812_v63 = vsel %vm689_vm4, %v811_v1, %v7031_v3 }
 0x270   :  { %v922_v13 = vshrl.u32 %v918_v9, 16  ;;  %v932_v23 = vadd.s32 %v930_v17, %v928_v25  ;;  %v1930_v46 = vand.u32 2139095040, %v7067_v6  ;;  %v807_v8 = vcvt.s32.f32 %v800_v42 }
 0x271   :  { %v805_v57 = vand.u32 2147483647, %v804_v19  ;;  %v912_v62 = vadd.s32 %v911_v52, %v902_v39  ;;  %v7096_v36 = vadd.f32 %v7060_v26, %v6881_v12  ;;  %v924_v7 = vshrl.u32 %v919_v20, 16 }
 0x272   :  { %v933_v37 = vadd.s32 %v932_v23, %v922_v13  ;;  %v1931_v41 = vshrl.u32 %v1930_v46, 23  ;;  %v1934_v21 = vand.u32 8388607, %v1927_v49  ;;  %v931_v48 = vadd.s32 %v927_v4, %v923_v44 }
 0x273   :  { %v808_v0 = vmul.f32 %v807_v8, %v805_v57  ;;  %vm7102_vm9 = vcmp.le.f32.partialorder %v687_v14, 0.7853982  ;;  %v881_v1 = vsel %vm875_vm13, %v878_v51, %v880_v22  ;;  %v2085_v35 = vand.u32 2139095040, %v7096_v36 }
 0x274   :  { %v934_v9 = vadd.s32 %v933_v37, %v924_v7  ;;  %v5418_v12 = vadd.s32 4294967169, %v1931_v41  ;;  %v814_v20 = vsel %vm7102_vm9, 0, %v812_v63  ;;  %vm937_vm11 = vc.u32 %v912_v62, %v931_v48 }
 0x275   :  { %v809_v26 = vxor.u32 2147483648, %v808_v0  ;;  %v1935_v43 = vor.u32 8388608, %v1934_v21  ;;  %v935_v2 = vmul.u32 %v7052_v50, %v881_v1  ;;  %v7116_v27 = vmul.f32 %v5636_v30, %v5939_v47 }
 0x276   :  { %v938_v40 = vadd.s32 1, %v934_v9  ;;  %v1937_v15 = vadd.s32 1, %v5418_v12  ;;  %v831_v44 = vadd.s32 3, %v814_v20  ;;  %v7127_v50 = vmul.f32 %v5636_v30, %v6073_v59 }
 0x277   :  { %v810_v14 = vsel %vm689_vm4, %v809_v26, %v808_v0  ;;  %v7129_v51 = vshll.u32 %v1935_v43, 8  ;;  %v2086_v28 = vshrl.u32 %v2085_v35, 23  ;;  %v7133_v52 = vmul.f32 %v5638_v31, %v6073_v59 }
 0x278   :  { %v7121_v38 = vsel %vm7102_vm9, %v6840_v60, %v810_v14  ;;  %v939_v18 = vsel %vm937_vm11, %v938_v40, %v934_v9  ;;  %vm1938_vm12 = vcmp.gt.s32.totalorder %v1937_v15, 0  ;;  %v7137_v39 = vmul.f32 %v5640_v32, %v6643_v45 }
 0x279   :  { %v815_v10 = vmul.f32 %v7121_v38, %v7121_v38  ;;  %v940_v4 = vadd.s32 %v939_v18, %v935_v2  ;;  %v1939_v42 = vsel %vm1938_vm12, %v1937_v15, 0  ;;  %v7141_v17 = vmul.f32 %v5642_v33, %v6643_v45 }
 0x27a   :  { %v1941_v24 = vand.u32 31, %v1939_v42  ;;  %v7145_v63 = vmul.f32 %v5640_v32, %v6303_v53  ;;  %v7149_v46 = vand.u32 3, %v831_v44  ;;  %v7151_v8 = vadd.s32 %v931_v48, %v912_v62 }
 0x27b   :  { %v816_v25 = vmul.f32 -0.001358992, %v815_v10  ;;  %v823_v19 = vmul.f32 -0.00019511016, %v815_v10  ;;  %v941_v22 = vadd.s32 536870912, %v940_v4  ;;  %v7154_v7 = vand.u32 65535, %v7129_v51 }
 0x27c   :  { %v7147_v13 = vsub.s32 32, %v1941_v24  ;;  %v2082_v37 = vand.u32 2147483647, %v7096_v36  ;;  %v5421_v45 = vadd.s32 4294967169, %v2086_v28  ;;  %vm844_vm14 = vcmp.lt.s32.totalorder %v6861_v5, 0 }
 0x27d   :  { %v817_v23 = vadd.f32 0.041655596, %v816_v25  ;;  %v824_v59 = vadd.f32 0.008332121, %v823_v19  ;;  %v942_v57 = vshrl.u32 %v941_v22, 30  ;;  %v7158_v3 = vshrl.u32 %v1939_v42, 5 }
 0x27e   :  { %v1944_v1 = vshll.u32 %v9613_v11, %v1941_v24  ;;  %v1945_v9 = vshrl.u32 %v9617_v34, %v7147_v13  ;;  %v1948_v62 = vshrl.u32 %v9618_v56, %v7147_v13  ;;  %v1954_v48 = vshrl.u32 %v9626_v16, %v7147_v13 }
 0x27f   :  { %v818_v41 = vmul.f32 %v817_v23, %v815_v10  ;;  %v825_v21 = vmul.f32 %v824_v59, %v815_v10  ;;  %v943_v0 = vshll.u32 %v942_v57, 30  ;;  %vm837_vm13 = vcmp.eq.s32.totalorder %v7149_v46, 2 }
 0x280   :  { %v1947_v40 = vshll.u32 %v9617_v34, %v1941_v24  ;;  %vm834_vm15 = vcmp.eq.s32.totalorder %v7149_v46, 0  ;;  %v1950_v43 = vshll.u32 %v9618_v56, %v1941_v24  ;;  %v1951_v15 = vshrl.u32 %v9627_v61, %v7147_v13 }
 0x281   :  { %v819_v12 = vadd.f32 -0.4999988, %v818_v41  ;;  %v826_v26 = vadd.f32 -0.16666654, %v825_v21  ;;  %v7168_v20 = vsub.s32 %v940_v4, %v943_v0  ;;  %v1953_v35 = vshll.u32 %v9627_v61, %v1941_v24 }
 0x282   :  { %v1957_v14 = vshrl.u32 %v9619_v55, %v7147_v13  ;;  %vm833_vm0 = vcmp.lt.s32.totalorder %v7149_v46, 2  ;;  %vm830_vm1 = vweird.f32 %v6840_v60  ;;  %v966_v4 = vsub.s32 4, %v942_v57 }
 0x283   :  { %v820_v2 = vmul.f32 %v819_v12, %v815_v10  ;;  %v827_v18 = vmul.f32 %v826_v26, %v815_v10  ;;  %vm945_vm2 = vcmp.lt.s32.totalorder %v7168_v20, 0  ;;  %v946_v44 = vsub.s32 0, %v7168_v20 }
 0x284   :  { %v1946_v42 = vor.u32 %v1945_v9, %v1944_v1  ;;  %v1949_v28 = vor.u32 %v1948_v62, %v1947_v40  ;;  %v1955_v25 = vor.u32 %v1954_v48, %v1953_v35  ;;  %v1956_v59 = vshll.u32 %v9626_v16, %v1941_v24 }
 0x285   :  { %v821_v19 = vadd.f32 1.0, %v820_v2  ;;  %v828_v22 = vadd.f32 1.0, %v827_v18  ;;  %v947_v23 = vsel %vm945_vm2, %v946_v44, %v7168_v20  ;;  %v1952_v10 = vor.u32 %v1951_v15, %v1950_v43 }
 0x286   :  { %v948_v41 = vclz %v947_v23  ;;  %v1977_v21 = vshrl.u32 %v7129_v51, 16  ;;  %v7185_v0 = vadd.s32 1, %v5421_v45  ;;  %vm7190_vm3 = vcmp.le.f32.partialorder %v842_v54, 0.7853982 }
 0x287   :  { %v829_v12 = vmul.f32 %v828_v22, %v7121_v38  ;;  %v838_v26 = vxor.u32 2147483648, %v821_v19  ;;  %v1958_v9 = vor.u32 %v1957_v14, %v1956_v59  ;;  %vm1959_vm4 = vcmp.lt.s32.totalorder %v7158_v3, 1 }
 0x288   :  { %v5398_v62 = vadd.s32 4294967294, %v948_v41  ;;  %v7197_v24 = vsel %vm844_vm14, %v966_v4, %v942_v57  ;;  %vm1962_vm6 = vcmp.lt.s32.totalorder %v7158_v3, 4  ;;  %v1967_v38 = vsel %vm1959_vm4, %v1946_v42, %v1949_v28 }
 0x289   :  { %v835_v45 = vxor.u32 2147483648, %v829_v12  ;;  %vm1960_vm5 = vcmp.lt.s32.totalorder %v7158_v3, 2  ;;  %vm1961_vm7 = vcmp.lt.s32.totalorder %v7158_v3, 3  ;;  %v1968_v54 = vsel %vm1962_vm6, %v1955_v25, 920167782 }
 0x28a   :  { %v839_v48 = vsel %vm837_vm13, %v838_v26, %v829_v12  ;;  %vm5399_vm8 = vcmp.lt.s32.totalorder %v5398_v62, 0  ;;  %v1969_v57 = vsel %vm1961_vm7, %v1952_v10, %v1968_v54  ;;  %v1971_v40 = vsel %vm1959_vm4, %v1949_v28, %v1952_v10 }
 0x28b   :  { %v836_v43 = vsel %vm834_vm15, %v821_v19, %v835_v45  ;;  %v951_v15 = vsel %vm5399_vm8, 0, %v5398_v62  ;;  %v1970_v35 = vsel %vm1960_vm5, %v1967_v38, %v1969_v57  ;;  %v1972_v14 = vsel %vm1962_vm6, %v1958_v9, 1326507024 }
 0x28c   :  { %v840_v2 = vsel %vm833_vm0, %v836_v43, %v839_v48  ;;  %v952_v18 = vsub.s32 32, %v951_v15  ;;  %v956_v44 = vsub.s32 4294967266, %v951_v15  ;;  %v1964_v4 = vsel %vm1962_vm6, %v1952_v10, 2102212464 }
 0x28d   :  { %v841_v22 = vsel %vm830_vm1, nan, %v840_v2  ;;  %v1973_v19 = vsel %vm1961_vm7, %v1955_v25, %v1972_v14  ;;  %v2000_v23 = vand.u32 65535, %v1970_v35  ;;  %v2001_v59 = vshrl.u32 %v1970_v35, 16 }
 0x28e   :  { %v953_v41 = vshll.u32 %v7168_v20, %v951_v15  ;;  %v954_v12 = vshrl.u32 %v7151_v8, %v952_v18  ;;  %v957_v26 = vadd.s32 127, %v956_v44  ;;  %5339 = vst [vmem:[#allocation2 + $0x10] sm:$0xff] %v841_v22  ;;  %v1974_v46 = vsel %vm1960_vm5, %v1971_v40, %v1973_v19 }
 0x28f   :  { %v1943_v10 = vshrl.u32 %v9613_v11, %v7147_v13  ;;  %v1978_v9 = vand.u32 65535, %v1974_v46  ;;  %v1979_v60 = vshrl.u32 %v1974_v46, 16  ;;  %v2003_v62 = vmul.u32 %v2001_v59, %v7154_v7 }
 0x290   :  { %v955_v38 = vor.u32 %v954_v12, %v953_v41  ;;  %v958_v25 = vshll.u32 %v957_v26, 23  ;;  %v969_v20 = vsel %vm7190_vm3, 0, %v7197_v24  ;;  %v2004_v45 = vmul.u32 %v2000_v23, %v1977_v21 }
 0x291   :  { %v1963_v8 = vsel %vm1959_vm4, %v1943_v10, %v1946_v42  ;;  %v1965_v54 = vsel %vm1961_vm7, %v1949_v28, %v1964_v4  ;;  %v1981_v48 = vmul.u32 %v1979_v60, %v7154_v7  ;;  %v1982_v13 = vmul.u32 %v1978_v9, %v1977_v21 }
 0x292   :  { %v959_v57 = vor.u32 4788187, %v958_v25  ;;  %v2002_v40 = vmul.u32 %v2000_v23, %v7154_v7  ;;  %v2005_v43 = vmul.u32 %v2001_v59, %v1977_v21  ;;  %v2006_v15 = vshll.u32 %v2003_v62, 16 }
 0x293   :  { %v962_v35 = vcvt.s32.f32 %v955_v38  ;;  %v1980_v14 = vmul.u32 %v1978_v9, %v7154_v7  ;;  %v1983_v2 = vmul.u32 %v1979_v60, %v1977_v21  ;;  %v1984_v24 = vshll.u32 %v1981_v48, 16 }
 0x294   :  { %v960_v18 = vand.u32 2147483647, %v959_v57  ;;  %v1986_v44 = vshll.u32 %v1982_v13, 16  ;;  %v2008_v22 = vshll.u32 %v2004_v45, 16  ;;  %vm2010_vm10 = vc.u32 %v2002_v40, %v2006_v15 }
 0x295   :  { %vm1988_vm9 = vc.u32 %v1980_v14, %v1984_v24  ;;  %v1990_v42 = vadd.s32 %v1984_v24, %v1980_v14  ;;  %v2011_v28 = vsel %vm2010_vm10, 1, %v9623_v29  ;;  %v2012_v4 = vadd.s32 %v2006_v15, %v2002_v40 }
 0x296   :  { %v963_v19 = vmul.f32 %v962_v35, %v960_v18  ;;  %v1989_v41 = vsel %vm1988_vm9, 1, %v9623_v29  ;;  %v2013_v23 = vadd.s32 %v2011_v28, %v2005_v43  ;;  %vm2093_vm11 = vcmp.gt.s32.totalorder %v7185_v0, 0 }
 0x297   :  { %v1991_v59 = vadd.s32 %v1989_v41, %v1983_v2  ;;  %vm1992_vm12 = vc.u32 %v1990_v42, %v1986_v44  ;;  %v2007_v7 = vshrl.u32 %v2003_v62, 16  ;;  %vm2014_vm13 = vc.u32 %v2012_v4, %v2008_v22 }
 0x298   :  { %v964_v21 = vxor.u32 2147483648, %v963_v19  ;;  %v1993_v12 = vsel %vm1992_vm12, 1, %v9623_v29  ;;  %v2015_v26 = vsel %vm2014_vm13, 1, %v9623_v29  ;;  %v2094_v46 = vsel %vm2093_vm11, %v7185_v0, 0 }
 0x299   :  { %v1985_v10 = vshrl.u32 %v1981_v48, 16  ;;  %v1995_v9 = vadd.s32 %v1993_v12, %v1991_v59  ;;  %v2017_v60 = vadd.s32 %v2015_v26, %v2013_v23  ;;  %v2096_v38 = vand.u32 31, %v2094_v46 }
 0x29a   :  { %v965_v25 = vsel %vm844_vm14, %v964_v21, %v963_v19  ;;  %v1966_v57 = vsel %vm1960_vm5, %v1963_v8, %v1965_v54  ;;  %v1987_v40 = vshrl.u32 %v1982_v13, 16  ;;  %v2009_v62 = vshrl.u32 %v2004_v45, 16 }
 0x29b   :  { %v968_v43 = vsel %vm7190_vm3, %v6861_v5, %v965_v25  ;;  %v1996_v15 = vadd.s32 %v1995_v9, %v1985_v10  ;;  %v2018_v35 = vadd.s32 %v2017_v60, %v2007_v7  ;;  %v7256_v14 = vsub.s32 32, %v2096_v38 }
 0x29c   :  { %v7260_v0 = vmul.f32 %v5642_v33, %v6303_v53  ;;  %v970_v48 = vmul.f32 %v968_v43, %v968_v43  ;;  %v986_v2 = vadd.s32 3, %v969_v20  ;;  %v2089_v3 = vand.u32 8388607, %v2082_v37 }
 0x29d   :  { %v7264_v8 = vadd.s32 %v1996_v15, %v1987_v40  ;;  %v7266_v45 = vadd.s32 %v2012_v4, %v2008_v22  ;;  %v2019_v54 = vadd.s32 %v2018_v35, %v2009_v62  ;;  %v2020_v1 = vmul.u32 %v7129_v51, %v1966_v57 }
 0x29e   :  { %v971_v13 = vmul.f32 -0.001358992, %v970_v48  ;;  %v978_v24 = vmul.f32 -0.00019511016, %v970_v48  ;;  %v7269_v18 = vshrl.u32 %v2094_v46, 5  ;;  %v2102_v44 = vshll.u32 %v9617_v34, %v2096_v38 }
 0x29f   :  { %vm2022_vm14 = vc.u32 %v7264_v8, %v7266_v45  ;;  %v2023_v53 = vadd.s32 1, %v2019_v54  ;;  %v2103_v20 = vshrl.u32 %v9618_v56, %v7256_v14  ;;  %v2106_v22 = vshrl.u32 %v9627_v61, %v7256_v14 }
 0x2a0   :  { %v972_v42 = vadd.f32 0.041655596, %v971_v13  ;;  %v979_v28 = vadd.f32 0.008332121, %v978_v24  ;;  %v2100_v51 = vshrl.u32 %v9617_v34, %v7256_v14  ;;  %v2105_v4 = vshll.u32 %v9618_v56, %v2096_v38 }
 0x2a1   :  { %v2024_v19 = vsel %vm2022_vm14, %v2023_v53, %v2019_v54  ;;  %v2108_v41 = vshll.u32 %v9627_v61, %v2096_v38  ;;  %v2109_v23 = vshrl.u32 %v9626_v16, %v7256_v14  ;;  %v2111_v59 = vshll.u32 %v9626_v16, %v2096_v38 }
 0x2a2   :  { %v973_v7 = vmul.f32 %v972_v42, %v970_v48  ;;  %v980_v21 = vmul.f32 %v979_v28, %v970_v48  ;;  %v2025_v12 = vadd.s32 %v2024_v19, %v2020_v1  ;;  %v2112_v26 = vshrl.u32 %v9619_v55, %v7256_v14 }
 0x2a3   :  { %v2099_v46 = vshll.u32 %v9613_v11, %v2096_v38  ;;  %v7288_v10 = vor.u32 %v2103_v20, %v2102_v44  ;;  %v2107_v9 = vor.u32 %v2106_v22, %v2105_v4  ;;  %v2110_v60 = vor.u32 %v2109_v23, %v2108_v41 }
 0x2a4   :  { %v974_v25 = vadd.f32 -0.4999988, %v973_v7  ;;  %v981_v57 = vadd.f32 -0.16666654, %v980_v21  ;;  %v2026_v40 = vadd.s32 536870912, %v2025_v12  ;;  %v2113_v62 = vor.u32 %v2112_v26, %v2111_v59 }
 0x2a5   :  { %v987_v15 = vand.u32 3, %v986_v2  ;;  %v2090_v35 = vor.u32 8388608, %v2089_v3  ;;  %v7290_v54 = vor.u32 %v2100_v51, %v2099_v46  ;;  %v275_v1 = vadd.f32 %v7145_v63, %v7127_v50 }
 0x2a6   :  { %v975_v13 = vmul.f32 %v974_v25, %v970_v48  ;;  %v982_v24 = vmul.f32 %v981_v57, %v970_v48  ;;  %v7294_v53 = vshrl.u32 %v2026_v40, 30  ;;  %vm2117_vm15 = vcmp.lt.s32.totalorder %v7269_v18, 4 }
 0x2a7   :  { %vm985_vm0 = vweird.f32 %v6861_v5  ;;  %vm2114_vm2 = vcmp.lt.s32.totalorder %v7269_v18, 1  ;;  %vm2116_vm1 = vcmp.lt.s32.totalorder %v7269_v18, 3  ;;  %v2123_v38 = vsel %vm2117_vm15, %v2110_v60, 920167782 }
 0x2a8   :  { %v2127_v2 = vsel %vm2117_vm15, %v2113_v62, 1326507024  ;;  %v976_v3 = vadd.f32 1.0, %v975_v13  ;;  %v983_v50 = vadd.f32 1.0, %v982_v24  ;;  %v2028_v63 = vshll.u32 %v7294_v53, 30 }
 0x2a9   :  { %v2126_v48 = vsel %vm2114_vm2, %v7288_v10, %v2107_v9  ;;  %v2122_v44 = vsel %vm2114_vm2, %v7290_v54, %v7288_v10  ;;  %v2124_v20 = vsel %vm2116_vm1, %v2107_v9, %v2123_v38  ;;  %v2128_v22 = vsel %vm2116_vm1, %v2110_v60, %v2127_v2 }
 0x2aa   :  { %v7316_v42 = vshll.u32 %v2090_v35, 8  ;;  %v984_v28 = vmul.f32 %v983_v50, %v968_v43  ;;  %v993_v51 = vxor.u32 2147483648, %v976_v3  ;;  %v2029_v4 = vsub.s32 %v2025_v12, %v2028_v63  ;;  %v7327_v43 = vpop.permute.xlu2 %334 }
 0x2ab   :  { %vm2115_vm3 = vcmp.lt.s32.totalorder %v7269_v18, 2  ;;  %vm988_vm4 = vcmp.lt.s32.totalorder %v987_v15, 2  ;;  %vm989_vm6 = vcmp.eq.s32.totalorder %v987_v15, 0  ;;  %v7323_v41 = vadd.f32 %v7260_v0, %v7133_v52 }
 0x2ac   :  { %v2129_v19 = vsel %vm2115_vm3, %v2126_v48, %v2128_v22  ;;  %v990_v23 = vxor.u32 2147483648, %v984_v28  ;;  %vm2030_vm5 = vcmp.lt.s32.totalorder %v2029_v4, 0  ;;  %v2031_v59 = vsub.s32 0, %v2029_v4 }
 0x2ad   :  { %v2125_v7 = vsel %vm2115_vm3, %v2122_v44, %v2124_v20  ;;  %vm992_vm7 = vcmp.eq.s32.totalorder %v987_v15, 2  ;;  %v2131_v21 = vand.u32 65535, %v7316_v42  ;;  %v2133_v12 = vand.u32 65535, %v2129_v19 }
 0x2ae   :  { %v2134_v26 = vshrl.u32 %v2129_v19, 16  ;;  %v991_v46 = vsel %vm989_vm6, %v976_v3, %v990_v23  ;;  %v994_v60 = vsel %vm992_vm7, %v993_v51, %v984_v28  ;;  %v2032_v25 = vsel %vm2030_vm5, %v2031_v59, %v2029_v4 }
 0x2af   :  { %v2132_v57 = vshrl.u32 %v7316_v42, 16  ;;  %v995_v52 = vsel %vm988_vm4, %v991_v46, %v994_v60  ;;  %v2033_v0 = vclz %v2032_v25  ;;  %v2156_v40 = vshrl.u32 %v2125_v7, 16 }
 0x2b0   :  { %v7333_v62 = vadd.f32 %v7327_v43, %v275_v1  ;;  %v996_v35 = vsel %vm985_vm0, nan, %v995_v52  ;;  %v2136_v13 = vmul.u32 %v2134_v26, %v2131_v21  ;;  %v2155_v38 = vand.u32 65535, %v2125_v7 }
 0x2b1   :  { %v2137_v24 = vmul.u32 %v2133_v12, %v2132_v57  ;;  %5340 = vst [vmem:[#allocation2 + $0x18] sm:$0xff] %v996_v35  ;;  %v2021_v2 = vadd.s32 %v7266_v45, %v7264_v8  ;;  %v5419_v3 = vadd.s32 4294967294, %v2033_v0  ;;  %v2098_v15 = vshrl.u32 %v9613_v11, %v7256_v14 }
 0x2b2   :  { %v2119_v50 = vsel %vm2117_vm15, %v2107_v9, 2102212464  ;;  %v2051_v1 = vsub.s32 4, %v7294_v53  ;;  %v2135_v63 = vmul.u32 %v2133_v12, %v2131_v21  ;;  %v2138_v48 = vmul.u32 %v2134_v26, %v2132_v57 }
 0x2b3   :  { %v2139_v5 = vshll.u32 %v2136_v13, 16  ;;  %vm1929_vm8 = vcmp.lt.s32.totalorder %v7067_v6, 0  ;;  %vm5420_vm10 = vcmp.lt.s32.totalorder %v5419_v3, 0  ;;  %v2140_v44 = vshrl.u32 %v2136_v13, 16 }
 0x2b4   :  { %v2141_v20 = vshll.u32 %v2137_v24, 16  ;;  %v2158_v22 = vmul.u32 %v2156_v40, %v2131_v21  ;;  %v2036_v28 = vsel %vm5420_vm10, 0, %v5419_v3  ;;  %v2159_v45 = vmul.u32 %v2155_v38, %v2132_v57 }
 0x2b5   :  { %vm2143_vm9 = vc.u32 %v2135_v63, %v2139_v5  ;;  %v2145_v8 = vadd.s32 %v2139_v5, %v2135_v63  ;;  %v2037_v51 = vsub.s32 32, %v2036_v28  ;;  %v2041_v14 = vsub.s32 4294967266, %v2036_v28 }
 0x2b6   :  { %v2144_v19 = vsel %vm2143_vm9, 1, %v9623_v29  ;;  %v2157_v9 = vmul.u32 %v2155_v38, %v2131_v21  ;;  %v2160_v59 = vmul.u32 %v2156_v40, %v2132_v57  ;;  %v2161_v7 = vshll.u32 %v2158_v22, 16 }
 0x2b7   :  { %v2146_v23 = vadd.s32 %v2144_v19, %v2138_v48  ;;  %vm2147_vm11 = vc.u32 %v2145_v8, %v2141_v20  ;;  %v2038_v12 = vshll.u32 %v2029_v4, %v2036_v28  ;;  %v2039_v26 = vshrl.u32 %v2021_v2, %v2037_v51 }
 0x2b8   :  { %v2042_v46 = vadd.s32 127, %v2041_v14  ;;  %v2148_v60 = vsel %vm2147_vm11, 1, %v9623_v29  ;;  %v2163_v52 = vshll.u32 %v2159_v45, 16  ;;  %vm2165_vm12 = vc.u32 %v2157_v9, %v2161_v7 }
 0x2b9   :  { %v2150_v25 = vadd.s32 %v2148_v60, %v2146_v23  ;;  %v2167_v0 = vadd.s32 %v2161_v7, %v2157_v9  ;;  %v2040_v35 = vor.u32 %v2039_v26, %v2038_v12  ;;  %v2118_v3 = vsel %vm2114_vm2, %v2098_v15, %v7290_v54 }
 0x2ba   :  { %v2043_v13 = vshll.u32 %v2042_v46, 23  ;;  %v2166_v21 = vsel %vm2165_vm12, 1, %v9623_v29  ;;  %v4407_v4 = vand.u32 2147483647, %v7333_v62  ;;  %v2120_v2 = vsel %vm2116_vm1, %v7288_v10, %v2119_v50 }
 0x2bb   :  { %v2151_v38 = vadd.s32 %v2150_v25, %v2140_v44  ;;  %v2168_v57 = vadd.s32 %v2166_v21, %v2160_v59  ;;  %vm2169_vm13 = vc.u32 %v2167_v0, %v2163_v52  ;;  %v2142_v63 = vshrl.u32 %v2137_v24, 16 }
 0x2bc   :  { %v2044_v40 = vor.u32 4788187, %v2043_v13  ;;  %v2170_v48 = vsel %vm2169_vm13, 1, %v9623_v29  ;;  %v2052_v5 = vsel %vm1929_vm8, %v2051_v1, %v7294_v53  ;;  %v2162_v54 = vshrl.u32 %v2158_v22, 16 }
 0x2bd   :  { %v2172_v15 = vadd.s32 %v2170_v48, %v2168_v57  ;;  %v4410_v44 = vand.u32 2139095040, %v7333_v62  ;;  %v2047_v28 = vcvt.s32.f32 %v2040_v35  ;;  %v2152_v8 = vadd.s32 %v2151_v38, %v2142_v63  ;;  %v9660_v57 = vld [vmem:[#allocation5_spill] sm:$0xff] }
 0x2be   :  { %v2045_v20 = vand.u32 2147483647, %v2044_v40  ;;  %v7362_v51 = vadd.f32 %v7327_v43, %v7323_v41  ;;  %v2164_v14 = vshrl.u32 %v2159_v45, 16  ;;  %v4414_v50 = vand.u32 8388607, %v4407_v4 }
 0x2bf   :  { %v2173_v10 = vadd.s32 %v2172_v15, %v2162_v54  ;;  %v4411_v24 = vshrl.u32 %v4410_v44, 23  ;;  %v123_v53 = vmul.f32 %v5638_v31, %v5939_v47  ;;  %vm7370_vm14 = vcmp.le.f32.partialorder %v1927_v49, 0.7853982 }
 0x2c0   :  { %v2048_v22 = vmul.f32 %v2047_v28, %v2045_v20  ;;  %v2171_v19 = vadd.s32 %v2167_v0, %v2163_v52  ;;  %v2054_v41 = vsel %vm7370_vm14, 0, %v2052_v5  ;;  %v2121_v43 = vsel %vm2115_vm3, %v2118_v3, %v2120_v2 }
 0x2c1   :  { %v2174_v45 = vadd.s32 %v2173_v10, %v2164_v14  ;;  %v5466_v9 = vadd.s32 4294967169, %v4411_v24  ;;  %v7380_v47 = vadd.f32 %v7137_v39, %v7116_v27  ;;  %v7383_v49 = vadd.f32 %v7141_v17, %v123_v53 }
 0x2c2   :  { %v2049_v23 = vxor.u32 2147483648, %v2048_v22  ;;  %vm2177_vm15 = vc.u32 %v2152_v8, %v2171_v19  ;;  %v4415_v7 = vor.u32 8388608, %v4414_v50  ;;  %v4565_v26 = vand.u32 2139095040, %v7362_v51 }
 0x2c3   :  { %v2178_v59 = vadd.s32 1, %v2174_v45  ;;  %v4417_v12 = vadd.s32 1, %v5466_v9  ;;  %v2175_v46 = vmul.u32 %v7316_v42, %v2121_v43  ;;  %v2071_v39 = vadd.s32 3, %v2054_v41 }
 0x2c4   :  { %v2050_v18 = vsel %vm1929_vm8, %v2049_v23, %v2048_v22  ;;  %v7392_v35 = vshll.u32 %v4415_v7, 8  ;;  %v4566_v13 = vshrl.u32 %v4565_v26, 23  ;;  %v7396_v42 = vmul.f32 %v5636_v30, %v9660_v57 }
 0x2c5   :  { %v2053_v60 = vsel %vm7370_vm14, %v7067_v6, %v2050_v18  ;;  %v2179_v25 = vsel %vm2177_vm15, %v2178_v59, %v2174_v45  ;;  %vm4418_vm0 = vcmp.gt.s32.totalorder %v4417_v12, 0  ;;  %v7400_v48 = vand.u32 3, %v2071_v39 }
 0x2c6   :  { %v2055_v27 = vmul.f32 %v2053_v60, %v2053_v60  ;;  %v2180_v17 = vadd.s32 %v2179_v25, %v2175_v46  ;;  %v4419_v52 = vsel %vm4418_vm0, %v4417_v12, 0  ;;  %v7402_v54 = vadd.s32 %v2171_v19, %v2152_v8 }
 0x2c7   :  { %v4421_v0 = vand.u32 31, %v4419_v52  ;;  %v7405_v15 = vand.u32 65535, %v7392_v35  ;;  %v4562_v44 = vand.u32 2147483647, %v7362_v51  ;;  %v5469_v20 = vadd.s32 4294967169, %v4566_v13 }
 0x2c8   :  { %v2056_v3 = vmul.f32 -0.001358992, %v2055_v27  ;;  %v2063_v21 = vmul.f32 -0.00019511016, %v2055_v27  ;;  %v2181_v38 = vadd.s32 536870912, %v2180_v17  ;;  %vm2084_vm2 = vcmp.lt.s32.totalorder %v7096_v36, 0 }
 0x2c9   :  { %v7398_v40 = vsub.s32 32, %v4421_v0  ;;  %v7409_v24 = vshrl.u32 %v4419_v52, 5  ;;  %v4424_v50 = vshll.u32 %v9613_v11, %v4421_v0  ;;  %vm2077_vm1 = vcmp.eq.s32.totalorder %v7400_v48, 2 }
 0x2ca   :  { %v2057_v2 = vadd.f32 0.041655596, %v2056_v3  ;;  %v2064_v63 = vadd.f32 0.008332121, %v2063_v21  ;;  %v2182_v5 = vshrl.u32 %v2181_v38, 30  ;;  %v4427_v43 = vshll.u32 %v9617_v34, %v4421_v0 }
 0x2cb   :  { %v4425_v53 = vshrl.u32 %v9617_v34, %v7398_v40  ;;  %v4428_v8 = vshrl.u32 %v9618_v56, %v7398_v40  ;;  %v4434_v1 = vshrl.u32 %v9626_v16, %v7398_v40  ;;  %vm2074_vm3 = vcmp.eq.s32.totalorder %v7400_v48, 0 }
 0x2cc   :  { %v2058_v28 = vmul.f32 %v2057_v2, %v2055_v27  ;;  %v2065_v14 = vmul.f32 %v2064_v63, %v2055_v27  ;;  %v2183_v10 = vshll.u32 %v2182_v5, 30  ;;  %v4430_v45 = vshll.u32 %v9618_v56, %v4421_v0 }
 0x2cd   :  { %v4431_v9 = vshrl.u32 %v9627_v61, %v7398_v40  ;;  %v4433_v23 = vshll.u32 %v9627_v61, %v4421_v0  ;;  %v4437_v59 = vshrl.u32 %v9619_v55, %v7398_v40  ;;  %vm2073_vm4 = vcmp.lt.s32.totalorder %v7400_v48, 2 }
 0x2ce   :  { %v2059_v22 = vadd.f32 -0.4999988, %v2058_v28  ;;  %v2066_v19 = vadd.f32 -0.16666654, %v2065_v14  ;;  %v7419_v41 = vsub.s32 %v2180_v17, %v2183_v10  ;;  %vm2070_vm5 = vweird.f32 %v7067_v6 }
 0x2cf   :  { %v2206_v18 = vsub.s32 4, %v2182_v5  ;;  %v4426_v46 = vor.u32 %v4425_v53, %v4424_v50  ;;  %v4429_v25 = vor.u32 %v4428_v8, %v4427_v43  ;;  %v4435_v39 = vor.u32 %v4434_v1, %v4433_v23 }
 0x2d0   :  { %v2060_v7 = vmul.f32 %v2059_v22, %v2055_v27  ;;  %v2067_v12 = vmul.f32 %v2066_v19, %v2055_v27  ;;  %vm2185_vm6 = vcmp.lt.s32.totalorder %v7419_v41, 0  ;;  %v2186_v26 = vsub.s32 0, %v7419_v41 }
 0x2d1   :  { %v4436_v3 = vshll.u32 %v9626_v16, %v4421_v0  ;;  %v4432_v27 = vor.u32 %v4431_v9, %v4430_v45  ;;  %v4457_v38 = vshrl.u32 %v7392_v35, 16  ;;  %v7436_v2 = vadd.s32 1, %v5469_v20 }
 0x2d2   :  { %v2061_v17 = vadd.f32 1.0, %v2060_v7  ;;  %v2068_v52 = vadd.f32 1.0, %v2067_v12  ;;  %v2187_v13 = vsel %vm2185_vm6, %v2186_v26, %v7419_v41  ;;  %vm7440_vm7 = vcmp.le.f32.partialorder %v2082_v37, 0.7853982 }
 0x2d3   :  { %v2188_v21 = vclz %v2187_v13  ;;  %v4438_v10 = vor.u32 %v4437_v59, %v4436_v3  ;;  %vm4439_vm8 = vcmp.lt.s32.totalorder %v7409_v24, 1  ;;  %v7447_v0 = vsel %vm2084_vm2, %v2206_v18, %v2182_v5 }
 0x2d4   :  { %v2069_v63 = vmul.f32 %v2068_v52, %v2053_v60  ;;  %v2078_v28 = vxor.u32 2147483648, %v2061_v17  ;;  %vm4442_vm10 = vcmp.lt.s32.totalorder %v7409_v24, 4  ;;  %v4447_v60 = vsel %vm4439_vm8, %v4426_v46, %v4429_v25 }
 0x2d5   :  { %v5422_v50 = vadd.s32 4294967294, %v2188_v21  ;;  %vm4440_vm9 = vcmp.lt.s32.totalorder %v7409_v24, 2  ;;  %vm4441_vm11 = vcmp.lt.s32.totalorder %v7409_v24, 3  ;;  %v4448_v37 = vsel %vm4442_vm10, %v4435_v39, 920167782 }
 0x2d6   :  { %v2075_v20 = vxor.u32 2147483648, %v2069_v63  ;;  %v2079_v53 = vsel %vm2077_vm1, %v2078_v28, %v2069_v63  ;;  %v4449_v5 = vsel %vm4441_vm11, %v4432_v27, %v4448_v37  ;;  %v4451_v8 = vsel %vm4439_vm8, %v4429_v25, %v4432_v27 }
 0x2d7   :  { %vm5423_vm12 = vcmp.lt.s32.totalorder %v5422_v50, 0  ;;  %v4450_v19 = vsel %vm4440_vm9, %v4447_v60, %v4449_v5  ;;  %v4452_v43 = vsel %vm4442_vm10, %v4438_v10, 1326507024  ;;  %v4444_v59 = vsel %vm4442_vm10, %v4432_v27, 2102212464 }
 0x2d8   :  { %v2076_v1 = vsel %vm2074_vm3, %v2061_v17, %v2075_v20  ;;  %v2191_v22 = vsel %vm5423_vm12, 0, %v5422_v50  ;;  %v4453_v12 = vsel %vm4441_vm11, %v4435_v39, %v4452_v43  ;;  %v4480_v26 = vand.u32 65535, %v4450_v19 }
 0x2d9   :  { %v2080_v45 = vsel %vm2073_vm4, %v2076_v1, %v2079_v53  ;;  %v2192_v9 = vsub.s32 32, %v2191_v22  ;;  %v2196_v23 = vsub.s32 4294967266, %v2191_v22  ;;  %v4481_v18 = vshrl.u32 %v4450_v19, 16 }
 0x2da   :  { %v2081_v7 = vsel %vm2070_vm5, nan, %v2080_v45  ;;  %v2193_v17 = vshll.u32 %v7419_v41, %v2191_v22  ;;  %v4454_v48 = vsel %vm4440_vm9, %v4451_v8, %v4453_v12  ;;  %v4423_v3 = vshrl.u32 %v9613_v11, %v7398_v40 }
 0x2db   :  { %v2194_v52 = vshrl.u32 %v7402_v54, %v2192_v9  ;;  %v2197_v13 = vadd.s32 127, %v2196_v23  ;;  %5347 = vst [vmem:[#allocation2 + $0x50] sm:$0xff] %v2081_v7  ;;  %v4458_v21 = vand.u32 65535, %v4454_v48  ;;  %v4459_v6 = vshrl.u32 %v4454_v48, 16 }
 0x2dc   :  { %v4483_v27 = vmul.u32 %v4481_v18, %v7405_v15  ;;  %v2209_v41 = vsel %vm7440_vm7, 0, %v7447_v0  ;;  %v4484_v28 = vmul.u32 %v4480_v26, %v4457_v38  ;;  %v4443_v54 = vsel %vm4439_vm8, %v4423_v3, %v4426_v46 }
 0x2dd   :  { %v2195_v63 = vor.u32 %v2194_v52, %v2193_v17  ;;  %v2198_v39 = vshll.u32 %v2197_v13, 23  ;;  %v4445_v10 = vsel %vm4441_vm11, %v4429_v25, %v4444_v59  ;;  %v4461_v50 = vmul.u32 %v4459_v6, %v7405_v15 }
 0x2de   :  { %v4462_v40 = vmul.u32 %v4458_v21, %v4457_v38  ;;  %v4482_v20 = vmul.u32 %v4480_v26, %v7405_v15  ;;  %v4485_v37 = vmul.u32 %v4481_v18, %v4457_v38  ;;  %v4486_v53 = vshll.u32 %v4483_v27, 16 }
 0x2df   :  { %v2199_v60 = vor.u32 4788187, %v2198_v39  ;;  %v2202_v5 = vcvt.s32.f32 %v2195_v63  ;;  %v4460_v8 = vmul.u32 %v4458_v21, %v7405_v15  ;;  %v4463_v1 = vmul.u32 %v4459_v6, %v4457_v38 }
 0x2e0   :  { %v4464_v0 = vshll.u32 %v4461_v50, 16  ;;  %v4466_v19 = vshll.u32 %v4462_v40, 16  ;;  %v4488_v43 = vshll.u32 %v4484_v28, 16  ;;  %vm4490_vm13 = vc.u32 %v4482_v20, %v4486_v53 }
 0x2e1   :  { %v2200_v22 = vand.u32 2147483647, %v2199_v60  ;;  %v4491_v25 = vsel %vm4490_vm13, 1, %v9623_v29  ;;  %v4492_v45 = vadd.s32 %v4486_v53, %v4482_v20  ;;  %vm4573_vm15 = vcmp.gt.s32.totalorder %v7436_v2, 0 }
 0x2e2   :  { %vm4468_vm14 = vc.u32 %v4460_v8, %v4464_v0  ;;  %v4470_v46 = vadd.s32 %v4464_v0, %v4460_v8  ;;  %v4493_v59 = vadd.s32 %v4491_v25, %v4485_v37  ;;  %v4487_v15 = vshrl.u32 %v4483_v27, 16 }
 0x2e3   :  { %v2203_v9 = vmul.f32 %v2202_v5, %v2200_v22  ;;  %v4469_v23 = vsel %vm4468_vm14, 1, %v9623_v29  ;;  %vm4494_vm1 = vc.u32 %v4492_v45, %v4488_v43  ;;  %v4574_v18 = vsel %vm4573_vm15, %v7436_v2, 0 }
 0x2e4   :  { %v4471_v7 = vadd.s32 %v4469_v23, %v4463_v1  ;;  %vm4472_vm0 = vc.u32 %v4470_v46, %v4466_v19  ;;  %v4495_v26 = vsel %vm4494_vm1, 1, %v9623_v29  ;;  %v4465_v17 = vshrl.u32 %v4461_v50, 16 }
 0x2e5   :  { %v2204_v38 = vxor.u32 2147483648, %v2203_v9  ;;  %v4473_v12 = vsel %vm4472_vm0, 1, %v9623_v29  ;;  %v4497_v13 = vadd.s32 %v4495_v26, %v4493_v59  ;;  %v4576_v48 = vand.u32 31, %v4574_v18 }
 0x2e6   :  { %v4475_v52 = vadd.s32 %v4473_v12, %v4471_v7  ;;  %v4446_v21 = vsel %vm4440_vm9, %v4443_v54, %v4445_v10  ;;  %v4467_v6 = vshrl.u32 %v4462_v40, 16  ;;  %v4489_v27 = vshrl.u32 %v4484_v28, 16 }
 0x2e7   :  { %v2205_v3 = vsel %vm2084_vm2, %v2204_v38, %v2203_v9  ;;  %v4498_v60 = vadd.s32 %v4497_v13, %v4487_v15  ;;  %v7506_v20 = vsub.s32 32, %v4576_v48  ;;  %v7510_v2 = vmul.f32 %v5640_v32, %v6733_v58 }
 0x2e8   :  { %v2208_v63 = vsel %vm7440_vm7, %v7096_v36, %v2205_v3  ;;  %v4476_v39 = vadd.s32 %v4475_v52, %v4465_v17  ;;  %v2226_v37 = vadd.s32 3, %v2209_v41  ;;  %v4569_v24 = vand.u32 8388607, %v4562_v44 }
 0x2e9   :  { %v2210_v50 = vmul.f32 %v2208_v63, %v2208_v63  ;;  %v7516_v28 = vadd.s32 %v4492_v45, %v4488_v43  ;;  %v4499_v10 = vadd.s32 %v4498_v60, %v4489_v27  ;;  %v4500_v14 = vmul.u32 %v7392_v35, %v4446_v21 }
 0x2ea   :  { %v7514_v54 = vadd.s32 %v4476_v39, %v4467_v6  ;;  %v7519_v5 = vshrl.u32 %v4574_v18, 5  ;;  %v4582_v8 = vshll.u32 %v9617_v34, %v4576_v48  ;;  %v4583_v1 = vshrl.u32 %v9618_v56, %v7506_v20 }
 0x2eb   :  { %v2211_v40 = vmul.f32 -0.001358992, %v2210_v50  ;;  %v2218_v53 = vmul.f32 -0.00019511016, %v2210_v50  ;;  %v4503_v41 = vadd.s32 1, %v4499_v10  ;;  %v4586_v0 = vshrl.u32 %v9627_v61, %v7506_v20 }
 0x2ec   :  { %vm4502_vm2 = vc.u32 %v7514_v54, %v7516_v28  ;;  %v4580_v35 = vshrl.u32 %v9617_v34, %v7506_v20  ;;  %v4585_v43 = vshll.u32 %v9618_v56, %v4576_v48  ;;  %v4588_v25 = vshll.u32 %v9627_v61, %v4576_v48 }
 0x2ed   :  { %v2212_v22 = vadd.f32 0.041655596, %v2211_v40  ;;  %v2219_v19 = vadd.f32 0.008332121, %v2218_v53  ;;  %v4504_v46 = vsel %vm4502_vm2, %v4503_v41, %v4499_v10  ;;  %v4589_v45 = vshrl.u32 %v9626_v16, %v7506_v20 }
 0x2ee   :  { %v4591_v9 = vshll.u32 %v9626_v16, %v4576_v48  ;;  %v4505_v7 = vadd.s32 %v4504_v46, %v4500_v14  ;;  %v4592_v15 = vshrl.u32 %v9619_v55, %v7506_v20  ;;  %v4579_v38 = vshll.u32 %v9613_v11, %v4576_v48 }
 0x2ef   :  { %v2213_v23 = vmul.f32 %v2212_v22, %v2210_v50  ;;  %v2220_v59 = vmul.f32 %v2219_v19, %v2210_v50  ;;  %v7538_v12 = vor.u32 %v4583_v1, %v4582_v8  ;;  %v4587_v26 = vor.u32 %v4586_v0, %v4585_v43 }
 0x2f0   :  { %v4590_v18 = vor.u32 %v4589_v45, %v4588_v25  ;;  %v4506_v13 = vadd.s32 536870912, %v4505_v7  ;;  %v4593_v3 = vor.u32 %v4592_v15, %v4591_v9  ;;  %v7542_v21 = vmul.f32 %v5642_v33, %v6733_v58  ;;  %v7575_v45 = vpop.permute.xlu1 %294 }
 0x2f1   :  { %v2214_v17 = vadd.f32 -0.4999988, %v2213_v23  ;;  %v2221_v52 = vadd.f32 -0.16666654, %v2220_v59  ;;  %v2227_v6 = vand.u32 3, %v2226_v37  ;;  %v4570_v27 = vor.u32 8388608, %v4569_v24 }
 0x2f2   :  { %v7544_v39 = vor.u32 %v4580_v35, %v4579_v38  ;;  %v7546_v14 = vshrl.u32 %v4506_v13, 30  ;;  %vm4597_vm3 = vcmp.lt.s32.totalorder %v7519_v5, 4  ;;  %vm4594_vm4 = vcmp.lt.s32.totalorder %v7519_v5, 1 }
 0x2f3   :  { %v2215_v60 = vmul.f32 %v2214_v17, %v2210_v50  ;;  %v2222_v10 = vmul.f32 %v2221_v52, %v2210_v50  ;;  %vm4596_vm6 = vcmp.lt.s32.totalorder %v7519_v5, 3  ;;  %v4603_v48 = vsel %vm4597_vm3, %v4590_v18, 920167782 }
 0x2f4   :  { %v4607_v58 = vsel %vm4597_vm3, %v4593_v3, 1326507024  ;;  %v4508_v40 = vshll.u32 %v7546_v14, 30  ;;  %v4606_v50 = vsel %vm4594_vm4, %v7538_v12, %v4587_v26  ;;  %v4602_v53 = vsel %vm4594_vm4, %v7544_v39, %v7538_v12 }
 0x2f5   :  { %v2216_v37 = vadd.f32 1.0, %v2215_v60  ;;  %v2223_v24 = vadd.f32 1.0, %v2222_v10  ;;  %v4604_v8 = vsel %vm4596_vm6, %v4587_v26, %v4603_v48  ;;  %v4608_v41 = vsel %vm4596_vm6, %v4590_v18, %v4607_v58 }
 0x2f6   :  { %v7567_v1 = vshll.u32 %v4570_v27, 8  ;;  %v4509_v19 = vsub.s32 %v4505_v7, %v4508_v40  ;;  %vm4595_vm5 = vcmp.lt.s32.totalorder %v7519_v5, 2  ;;  %vm2225_vm7 = vweird.f32 %v7096_v36 }
 0x2f7   :  { %v2224_v0 = vmul.f32 %v2223_v24, %v2208_v63  ;;  %v2233_v22 = vxor.u32 2147483648, %v2216_v37  ;;  %vm2228_vm8 = vcmp.lt.s32.totalorder %v2227_v6, 2  ;;  %vm2229_vm10 = vcmp.eq.s32.totalorder %v2227_v6, 0 }
 0x2f8   :  { %v4609_v35 = vsel %vm4595_vm5, %v4606_v50, %v4608_v41  ;;  %vm4510_vm9 = vcmp.lt.s32.totalorder %v4509_v19, 0  ;;  %v4511_v46 = vsub.s32 0, %v4509_v19  ;;  %v4605_v25 = vsel %vm4595_vm5, %v4602_v53, %v4604_v8 }
 0x2f9   :  { %v2230_v43 = vxor.u32 2147483648, %v2224_v0  ;;  %vm2232_vm11 = vcmp.eq.s32.totalorder %v2227_v6, 2  ;;  %v4611_v63 = vand.u32 65535, %v7567_v1  ;;  %v4613_v9 = vand.u32 65535, %v4609_v35 }
 0x2fa   :  { %v4614_v23 = vshrl.u32 %v4609_v35, 16  ;;  %v2234_v7 = vsel %vm2232_vm11, %v2233_v22, %v2224_v0  ;;  %v4512_v15 = vsel %vm4510_vm9, %v4511_v46, %v4509_v19  ;;  %v4612_v38 = vshrl.u32 %v7567_v1, 16 }
 0x2fb   :  { %v2231_v59 = vsel %vm2229_vm10, %v2216_v37, %v2230_v43  ;;  %v4513_v17 = vclz %v4512_v15  ;;  %v4636_v52 = vshrl.u32 %v4605_v25, 16  ;;  %v7582_v13 = vadd.f32 %v7575_v45, %v7380_v47 }
 0x2fc   :  { %v2235_v18 = vsel %vm2228_vm8, %v2231_v59, %v2234_v7  ;;  %v4616_v27 = vmul.u32 %v4614_v23, %v4611_v63  ;;  %v4617_v60 = vmul.u32 %v4613_v9, %v4612_v38  ;;  %v4635_v10 = vand.u32 65535, %v4605_v25 }
 0x2fd   :  { %v2236_v3 = vsel %vm2225_vm7, nan, %v2235_v18  ;;  %v4501_v48 = vadd.s32 %v7516_v28, %v7514_v54  ;;  %v5467_v58 = vadd.s32 4294967294, %v4513_v17  ;;  %v4578_v6 = vshrl.u32 %v9613_v11, %v7506_v20 }
 0x2fe   :  { %5348 = vst [vmem:[#allocation2 + $0x58] sm:$0xff] %v2236_v3  ;;  %v4599_v37 = vsel %vm4597_vm3, %v4587_v26, 2102212464  ;;  %v4531_v47 = vsub.s32 4, %v7546_v14  ;;  %v4615_v24 = vmul.u32 %v4613_v9, %v4611_v63  ;;  %v4618_v40 = vmul.u32 %v4614_v23, %v4612_v38 }
 0x2ff   :  { %v4619_v36 = vshll.u32 %v4616_v27, 16  ;;  %vm4409_vm12 = vcmp.lt.s32.totalorder %v7333_v62, 0  ;;  %vm5468_vm13 = vcmp.lt.s32.totalorder %v5467_v58, 0  ;;  %v4620_v50 = vshrl.u32 %v4616_v27, 16 }
 0x300   :  { %v4621_v53 = vshll.u32 %v4617_v60, 16  ;;  %v4638_v8 = vmul.u32 %v4636_v52, %v4611_v63  ;;  %v4516_v41 = vsel %vm5468_vm13, 0, %v5467_v58  ;;  %v4639_v28 = vmul.u32 %v4635_v10, %v4612_v38 }
 0x301   :  { %vm4623_vm14 = vc.u32 %v4615_v24, %v4619_v36  ;;  %v4625_v54 = vadd.s32 %v4619_v36, %v4615_v24  ;;  %v4517_v0 = vsub.s32 32, %v4516_v41  ;;  %v4521_v20 = vsub.s32 4294967266, %v4516_v41 }
 0x302   :  { %v4624_v22 = vsel %vm4623_vm14, 1, %v9623_v29  ;;  %v4637_v26 = vmul.u32 %v4635_v10, %v4611_v63  ;;  %v4640_v43 = vmul.u32 %v4636_v52, %v4612_v38  ;;  %v4641_v46 = vshll.u32 %v4638_v8, 16 }
 0x303   :  { %v4626_v35 = vadd.s32 %v4624_v22, %v4618_v40  ;;  %vm4627_vm15 = vc.u32 %v4625_v54, %v4621_v53  ;;  %v4518_v25 = vshll.u32 %v4509_v19, %v4516_v41  ;;  %v4519_v9 = vshrl.u32 %v4501_v48, %v4517_v0 }
 0x304   :  { %v4522_v23 = vadd.s32 127, %v4521_v20  ;;  %v4628_v59 = vsel %vm4627_vm15, 1, %v9623_v29  ;;  %v4643_v15 = vshll.u32 %v4639_v28, 16  ;;  %vm4645_vm0 = vc.u32 %v4637_v26, %v4641_v46 }
 0x305   :  { %v4630_v7 = vadd.s32 %v4628_v59, %v4626_v35  ;;  %v4647_v18 = vadd.s32 %v4641_v46, %v4637_v26  ;;  %v4520_v17 = vor.u32 %v4519_v9, %v4518_v25  ;;  %v4598_v27 = vsel %vm4594_vm4, %v4578_v6, %v7544_v39 }
 0x306   :  { %v4523_v3 = vshll.u32 %v4522_v23, 23  ;;  %v4646_v63 = vsel %vm4645_vm0, 1, %v9623_v29  ;;  %v1307_v19 = vand.u32 2147483647, %v7582_v13  ;;  %v4600_v48 = vsel %vm4596_vm6, %v7538_v12, %v4599_v37 }
 0x307   :  { %v4631_v10 = vadd.s32 %v4630_v7, %v4620_v50  ;;  %v4648_v38 = vadd.s32 %v4646_v63, %v4640_v43  ;;  %vm4649_vm1 = vc.u32 %v4647_v18, %v4643_v15  ;;  %v4622_v58 = vshrl.u32 %v4617_v60, 16 }
 0x308   :  { %v4524_v52 = vor.u32 4788187, %v4523_v3  ;;  %v4650_v24 = vsel %vm4649_vm1, 1, %v9623_v29  ;;  %v4532_v40 = vsel %vm4409_vm12, %v4531_v47, %v7546_v14  ;;  %v4642_v39 = vshrl.u32 %v4638_v8, 16 }
 0x309   :  { %v4652_v6 = vadd.s32 %v4650_v24, %v4648_v38  ;;  %v1310_v36 = vand.u32 2139095040, %v7582_v13  ;;  %v4527_v53 = vcvt.s32.f32 %v4520_v17  ;;  %v4632_v41 = vadd.s32 %v4631_v10, %v4622_v58  ;;  %v9665_v10 = vld [vmem:[#allocation8_spill] sm:$0xff] }
 0x30a   :  { %v4525_v50 = vand.u32 2147483647, %v4524_v52  ;;  %v7611_v54 = vadd.f32 %v7575_v45, %v7383_v49  ;;  %v4644_v0 = vshrl.u32 %v4639_v28, 16  ;;  %v1314_v37 = vand.u32 8388607, %v1307_v19 }
 0x30b   :  { %v4653_v12 = vadd.s32 %v4652_v6, %v4642_v39  ;;  %v1311_v60 = vshrl.u32 %v1310_v36, 23  ;;  %v133_v14 = vmul.f32 %v5638_v31, %v9660_v57  ;;  %vm7619_vm2 = vcmp.le.f32.partialorder %v4407_v4, 0.7853982 }
 0x30c   :  { %v4528_v8 = vmul.f32 %v4527_v53, %v4525_v50  ;;  %v4651_v20 = vadd.s32 %v4647_v18, %v4643_v15  ;;  %v4534_v49 = vsel %vm7619_vm2, 0, %v4532_v40  ;;  %v4601_v45 = vsel %vm4595_vm5, %v4598_v27, %v4600_v48 }
 0x30d   :  { %v4654_v28 = vadd.s32 %v4653_v12, %v4644_v0  ;;  %v5406_v22 = vadd.s32 4294967169, %v1311_v60  ;;  %v7629_v57 = vadd.f32 %v7510_v2, %v7396_v42  ;;  %v7632_v4 = vadd.f32 %v7542_v21, %v133_v14 }
 0x30e   :  { %v4529_v26 = vxor.u32 2147483648, %v4528_v8  ;;  %vm4657_vm3 = vc.u32 %v4632_v41, %v4651_v20  ;;  %v1315_v43 = vor.u32 8388608, %v1314_v37  ;;  %v1465_v25 = vand.u32 2139095040, %v7611_v54 }
 0x30f   :  { %v4658_v35 = vadd.s32 1, %v4654_v28  ;;  %v1317_v46 = vadd.s32 1, %v5406_v22  ;;  %v4655_v9 = vmul.u32 %v7567_v1, %v4601_v45  ;;  %v4551_v2 = vadd.s32 3, %v4534_v49 }
 0x310   :  { %v4530_v5 = vsel %vm4409_vm12, %v4529_v26, %v4528_v8  ;;  %v7641_v18 = vshll.u32 %v1315_v43, 8  ;;  %v1466_v17 = vshrl.u32 %v1465_v25, 23  ;;  %v7645_v1 = vmul.f32 %v5636_v30, %v9665_v10 }
 0x311   :  { %v4533_v23 = vsel %vm7619_vm2, %v7333_v62, %v4530_v5  ;;  %v4659_v59 = vsel %vm4657_vm3, %v4658_v35, %v4654_v28  ;;  %vm1318_vm4 = vcmp.gt.s32.totalorder %v1317_v46, 0  ;;  %v7649_v58 = vand.u32 3, %v4551_v2 }
 0x312   :  { %v4535_v42 = vmul.f32 %v4533_v23, %v4533_v23  ;;  %v4660_v21 = vadd.s32 %v4659_v59, %v4655_v9  ;;  %v1319_v7 = vsel %vm1318_vm4, %v1317_v46, 0  ;;  %v7651_v40 = vadd.s32 %v4651_v20, %v4632_v41 }
 0x313   :  { %v1321_v15 = vand.u32 31, %v1319_v7  ;;  %v7654_v39 = vand.u32 65535, %v7641_v18  ;;  %v1462_v6 = vand.u32 2147483647, %v7611_v54  ;;  %v5409_v36 = vadd.s32 4294967169, %v1466_v17 }
 0x314   :  { %v4536_v3 = vmul.f32 -0.001358992, %v4535_v42  ;;  %v4543_v27 = vmul.f32 -0.00019511016, %v4535_v42  ;;  %v4661_v63 = vadd.s32 536870912, %v4660_v21  ;;  %vm4564_vm6 = vcmp.lt.s32.totalorder %v7362_v51, 0 }
 0x315   :  { %v7647_v38 = vsub.s32 32, %v1321_v15  ;;  %v7658_v12 = vshrl.u32 %v1319_v7, 5  ;;  %v1324_v60 = vshll.u32 %v9613_v11, %v1321_v15  ;;  %vm4557_vm5 = vcmp.eq.s32.totalorder %v7649_v58, 2 }
 0x316   :  { %v4537_v52 = vadd.f32 0.041655596, %v4536_v3  ;;  %v4544_v48 = vadd.f32 0.008332121, %v4543_v27  ;;  %v4662_v24 = vshrl.u32 %v4661_v63, 30  ;;  %v1327_v49 = vshll.u32 %v9617_v34, %v1321_v15 }
 0x317   :  { %v1325_v37 = vshrl.u32 %v9617_v34, %v7647_v38  ;;  %v1328_v41 = vshrl.u32 %v9618_v56, %v7647_v38  ;;  %v1334_v14 = vshrl.u32 %v9626_v16, %v7647_v38  ;;  %vm4554_vm7 = vcmp.eq.s32.totalorder %v7649_v58, 0 }
 0x318   :  { %v4538_v50 = vmul.f32 %v4537_v52, %v4535_v42  ;;  %v4545_v53 = vmul.f32 %v4544_v48, %v4535_v42  ;;  %v4663_v0 = vshll.u32 %v4662_v24, 30  ;;  %v1330_v45 = vshll.u32 %v9618_v56, %v1321_v15 }
 0x319   :  { %v1331_v28 = vshrl.u32 %v9627_v61, %v7647_v38  ;;  %v1333_v22 = vshll.u32 %v9627_v61, %v1321_v15  ;;  %v1337_v26 = vshrl.u32 %v9619_v55, %v7647_v38  ;;  %vm4553_vm8 = vcmp.lt.s32.totalorder %v7649_v58, 2 }
 0x31a   :  { %v4539_v47 = vadd.f32 -0.4999988, %v4538_v50  ;;  %v4546_v8 = vadd.f32 -0.16666654, %v4545_v53  ;;  %v7668_v20 = vsub.s32 %v4660_v21, %v4663_v0  ;;  %vm4550_vm9 = vweird.f32 %v7333_v62 }
 0x31b   :  { %v4686_v25 = vsub.s32 4, %v4662_v24  ;;  %v1326_v5 = vor.u32 %v1325_v37, %v1324_v60  ;;  %v1329_v9 = vor.u32 %v1328_v41, %v1327_v49  ;;  %v1335_v59 = vor.u32 %v1334_v14, %v1333_v22 }
 0x31c   :  { %v4540_v35 = vmul.f32 %v4539_v47, %v4535_v42  ;;  %v4547_v43 = vmul.f32 %v4546_v8, %v4535_v42  ;;  %vm4665_vm10 = vcmp.lt.s32.totalorder %v7668_v20, 0  ;;  %v4666_v46 = vsub.s32 0, %v7668_v20 }
 0x31d   :  { %v1336_v17 = vshll.u32 %v9626_v16, %v1321_v15  ;;  %v1332_v42 = vor.u32 %v1331_v28, %v1330_v45  ;;  %v1357_v27 = vshrl.u32 %v7641_v18, 16  ;;  %v7685_v63 = vadd.s32 1, %v5409_v36 }
 0x31e   :  { %v4541_v2 = vadd.f32 1.0, %v4540_v35  ;;  %v4548_v21 = vadd.f32 1.0, %v4547_v43  ;;  %v4667_v7 = vsel %vm4665_vm10, %v4666_v46, %v7668_v20  ;;  %vm7689_vm11 = vcmp.le.f32.partialorder %v4562_v44, 0.7853982 }
 0x31f   :  { %v4668_v3 = vclz %v4667_v7  ;;  %v1338_v53 = vor.u32 %v1337_v26, %v1336_v17  ;;  %vm1339_vm12 = vcmp.lt.s32.totalorder %v7658_v12, 1  ;;  %v7696_v15 = vsel %vm4564_vm6, %v4686_v25, %v4662_v24 }
 0x320   :  { %v4549_v52 = vmul.f32 %v4548_v21, %v4533_v23  ;;  %v4558_v48 = vxor.u32 2147483648, %v4541_v2  ;;  %vm1342_vm13 = vcmp.lt.s32.totalorder %v7658_v12, 4  ;;  %v1347_v23 = vsel %vm1339_vm12, %v1326_v5, %v1329_v9 }
 0x321   :  { %v5470_v0 = vadd.s32 4294967294, %v4668_v3  ;;  %vm1340_vm14 = vcmp.lt.s32.totalorder %v7658_v12, 2  ;;  %vm1341_vm15 = vcmp.lt.s32.totalorder %v7658_v12, 3  ;;  %v1348_v44 = vsel %vm1342_vm13, %v1335_v59, 920167782 }
 0x322   :  { %v4555_v36 = vxor.u32 2147483648, %v4549_v52  ;;  %v4559_v60 = vsel %vm4557_vm5, %v4558_v48, %v4549_v52  ;;  %v1349_v24 = vsel %vm1341_vm15, %v1332_v42, %v1348_v44  ;;  %v1351_v37 = vsel %vm1339_vm12, %v1329_v9, %v1332_v42 }
 0x323   :  { %vm5471_vm0 = vcmp.lt.s32.totalorder %v5470_v0, 0  ;;  %v1350_v47 = vsel %vm1340_vm14, %v1347_v23, %v1349_v24  ;;  %v1352_v8 = vsel %vm1342_vm13, %v1338_v53, 1326507024  ;;  %v1344_v22 = vsel %vm1342_vm13, %v1332_v42, 2102212464 }
 0x324   :  { %v4556_v41 = vsel %vm4554_vm7, %v4541_v2, %v4555_v36  ;;  %v4671_v14 = vsel %vm5471_vm0, 0, %v5470_v0  ;;  %v1353_v35 = vsel %vm1341_vm15, %v1335_v59, %v1352_v8  ;;  %v1380_v43 = vand.u32 65535, %v1350_v47 }
 0x325   :  { %v4560_v49 = vsel %vm4553_vm8, %v4556_v41, %v4559_v60  ;;  %v4672_v45 = vsub.s32 32, %v4671_v14  ;;  %v4676_v28 = vsub.s32 4294967266, %v4671_v14  ;;  %v1381_v46 = vshrl.u32 %v1350_v47, 16 }
 0x326   :  { %v4561_v26 = vsel %vm4550_vm9, nan, %v4560_v49  ;;  %v4673_v25 = vshll.u32 %v7668_v20, %v4671_v14  ;;  %v1354_v58 = vsel %vm1340_vm14, %v1351_v37, %v1353_v35  ;;  %v1323_v7 = vshrl.u32 %v9613_v11, %v7647_v38 }
 0x327   :  { %v4674_v2 = vshrl.u32 %v7651_v40, %v4672_v45  ;;  %v4677_v21 = vadd.s32 127, %v4676_v28  ;;  %5363 = vst [vmem:[#allocation2 + $0xd0] sm:$0xff] %v4561_v26  ;;  %v1358_v17 = vand.u32 65535, %v1354_v58  ;;  %v1359_v62 = vshrl.u32 %v1354_v58, 16 }
 0x328   :  { %v1383_v3 = vmul.u32 %v1381_v46, %v7654_v39  ;;  %v4689_v20 = vsel %vm7689_vm11, 0, %v7696_v15  ;;  %v1384_v52 = vmul.u32 %v1380_v43, %v1357_v27  ;;  %v1343_v40 = vsel %vm1339_vm12, %v1323_v7, %v1326_v5 }
 0x329   :  { %v4675_v42 = vor.u32 %v4674_v2, %v4673_v25  ;;  %v4678_v59 = vshll.u32 %v4677_v21, 23  ;;  %v1345_v48 = vsel %vm1341_vm15, %v1329_v9, %v1344_v22  ;;  %v1361_v53 = vmul.u32 %v1359_v62, %v7654_v39 }
 0x32a   :  { %v1362_v38 = vmul.u32 %v1358_v17, %v1357_v27  ;;  %v1382_v23 = vmul.u32 %v1380_v43, %v7654_v39  ;;  %v1385_v36 = vmul.u32 %v1381_v46, %v1357_v27  ;;  %v1386_v44 = vshll.u32 %v1383_v3, 16 }
 0x32b   :  { %v4679_v0 = vor.u32 4788187, %v4678_v59  ;;  %v4682_v60 = vcvt.s32.f32 %v4675_v42  ;;  %v1360_v24 = vmul.u32 %v1358_v17, %v7654_v39  ;;  %v1363_v37 = vmul.u32 %v1359_v62, %v1357_v27 }
 0x32c   :  { %v1364_v15 = vshll.u32 %v1361_v53, 16  ;;  %v1366_v14 = vshll.u32 %v1362_v38, 16  ;;  %v1388_v47 = vshll.u32 %v1384_v52, 16  ;;  %vm1390_vm1 = vc.u32 %v1382_v23, %v1386_v44 }
 0x32d   :  { %v4680_v41 = vand.u32 2147483647, %v4679_v0  ;;  %v1391_v9 = vsel %vm1390_vm1, 1, %v9623_v29  ;;  %v1392_v8 = vadd.s32 %v1386_v44, %v1382_v23  ;;  %vm1473_vm3 = vcmp.gt.s32.totalorder %v7685_v63, 0 }
 0x32e   :  { %vm1368_vm2 = vc.u32 %v1360_v24, %v1364_v15  ;;  %v1370_v5 = vadd.s32 %v1364_v15, %v1360_v24  ;;  %v1393_v28 = vadd.s32 %v1391_v9, %v1385_v36  ;;  %v1387_v39 = vshrl.u32 %v1383_v3, 16 }
 0x32f   :  { %v4683_v49 = vmul.f32 %v4682_v60, %v4680_v41  ;;  %v1369_v45 = vsel %vm1368_vm2, 1, %v9623_v29  ;;  %vm1394_vm5 = vc.u32 %v1392_v8, %v1388_v47  ;;  %v1474_v43 = vsel %vm1473_vm3, %v7685_v63, 0  ;;  %v9668_v63 = vld [vmem:[#allocation10_spill] sm:$0xff] }
 0x330   :  { %v1371_v22 = vadd.s32 %v1369_v45, %v1363_v37  ;;  %vm1372_vm4 = vc.u32 %v1370_v5, %v1366_v14  ;;  %v1395_v35 = vsel %vm1394_vm5, 1, %v9623_v29  ;;  %v1365_v46 = vshrl.u32 %v1361_v53, 16 }
 0x331   :  { %v4684_v27 = vxor.u32 2147483648, %v4683_v49  ;;  %v1373_v26 = vsel %vm1372_vm4, 1, %v9623_v29  ;;  %v1397_v2 = vadd.s32 %v1395_v35, %v1393_v28  ;;  %v1476_v21 = vand.u32 31, %v1474_v43 }
 0x332   :  { %v1375_v25 = vadd.s32 %v1373_v26, %v1371_v22  ;;  %v1346_v7 = vsel %vm1340_vm14, %v1343_v40, %v1345_v48  ;;  %v1367_v17 = vshrl.u32 %v1362_v38, 16  ;;  %v1389_v62 = vshrl.u32 %v1384_v52, 16 }
 0x333   :  { %v4685_v58 = vsel %vm4564_vm6, %v4684_v27, %v4683_v49  ;;  %v1398_v59 = vadd.s32 %v1397_v2, %v1387_v39  ;;  %v7755_v0 = vsub.s32 32, %v1476_v21  ;;  %v7759_v53 = vmul.f32 %v5640_v32, %v9668_v63 }
 0x334   :  { %v4688_v3 = vsel %vm7689_vm11, %v7362_v51, %v4685_v58  ;;  %v1376_v42 = vadd.s32 %v1375_v25, %v1365_v46  ;;  %v4706_v36 = vadd.s32 3, %v4689_v20  ;;  %v1469_v12 = vand.u32 8388607, %v1462_v6 }
 0x335   :  { %v4690_v23 = vmul.f32 %v4688_v3, %v4688_v3  ;;  %v7765_v52 = vadd.s32 %v1392_v8, %v1388_v47  ;;  %v1399_v48 = vadd.s32 %v1398_v59, %v1389_v62  ;;  %v1400_v50 = vmul.u32 %v7641_v18, %v1346_v7 }
 0x336   :  { %v7763_v40 = vadd.s32 %v1376_v42, %v1367_v17  ;;  %v7768_v60 = vshrl.u32 %v1474_v43, 5  ;;  %v1482_v24 = vshll.u32 %v9617_v34, %v1476_v21  ;;  %v1483_v37 = vshrl.u32 %v9618_v56, %v7755_v0 }
 0x337   :  { %v4691_v38 = vmul.f32 -0.001358992, %v4690_v23  ;;  %v4698_v44 = vmul.f32 -0.00019511016, %v4690_v23  ;;  %v1403_v20 = vadd.s32 1, %v1399_v48  ;;  %v1486_v15 = vshrl.u32 %v9627_v61, %v7755_v0 }
 0x338   :  { %vm1402_vm6 = vc.u32 %v7763_v40, %v7765_v52  ;;  %v1480_v18 = vshrl.u32 %v9617_v34, %v7755_v0  ;;  %v1485_v47 = vshll.u32 %v9618_v56, %v1476_v21  ;;  %v1488_v9 = vshll.u32 %v9627_v61, %v1476_v21 }
 0x339   :  { %v4692_v41 = vadd.f32 0.041655596, %v4691_v38  ;;  %v4699_v14 = vadd.f32 0.008332121, %v4698_v44  ;;  %v1404_v5 = vsel %vm1402_vm6, %v1403_v20, %v1399_v48  ;;  %v1489_v8 = vshrl.u32 %v9626_v16, %v7755_v0 }
 0x33a   :  { %v1491_v49 = vshll.u32 %v9626_v16, %v1476_v21  ;;  %v1405_v22 = vadd.s32 %v1404_v5, %v1400_v50  ;;  %v1492_v39 = vshrl.u32 %v9619_v55, %v7755_v0  ;;  %v1479_v27 = vshll.u32 %v9613_v11, %v1476_v21 }
 0x33b   :  { %v4693_v45 = vmul.f32 %v4692_v41, %v4690_v23  ;;  %v4700_v28 = vmul.f32 %v4699_v14, %v4690_v23  ;;  %v7787_v26 = vor.u32 %v1483_v37, %v1482_v24  ;;  %v1487_v35 = vor.u32 %v1486_v15, %v1485_v47 }
 0x33c   :  { %v1490_v43 = vor.u32 %v1489_v8, %v1488_v9  ;;  %v1406_v2 = vadd.s32 536870912, %v1405_v22  ;;  %v1493_v58 = vor.u32 %v1492_v39, %v1491_v49  ;;  %v7791_v7 = vmul.f32 %v5642_v33, %v9668_v63  ;;  %v7824_v8 = vpop.permute.xlu0 %314 }
 0x33d   :  { %v4694_v46 = vadd.f32 -0.4999988, %v4693_v45  ;;  %v4701_v25 = vadd.f32 -0.16666654, %v4700_v28  ;;  %v4707_v17 = vand.u32 3, %v4706_v36  ;;  %v1470_v62 = vor.u32 8388608, %v1469_v12 }
 0x33e   :  { %v7793_v42 = vor.u32 %v1480_v18, %v1479_v27  ;;  %v7795_v50 = vshrl.u32 %v1406_v2, 30  ;;  %vm1497_vm7 = vcmp.lt.s32.totalorder %v7768_v60, 4  ;;  %vm1494_vm8 = vcmp.lt.s32.totalorder %v7768_v60, 1 }
 0x33f   :  { %v4695_v59 = vmul.f32 %v4694_v46, %v4690_v23  ;;  %v4702_v48 = vmul.f32 %v4701_v25, %v4690_v23  ;;  %vm1496_vm10 = vcmp.lt.s32.totalorder %v7768_v60, 3  ;;  %v1503_v21 = vsel %vm1497_vm7, %v1490_v43, 920167782 }
 0x340   :  { %v1507_v63 = vsel %vm1497_vm7, %v1493_v58, 1326507024  ;;  %v1408_v38 = vshll.u32 %v7795_v50, 30  ;;  %v1506_v23 = vsel %vm1494_vm8, %v7787_v26, %v1487_v35  ;;  %v1502_v44 = vsel %vm1494_vm8, %v7793_v42, %v7787_v26 }
 0x341   :  { %v4696_v36 = vadd.f32 1.0, %v4695_v59  ;;  %v4703_v12 = vadd.f32 1.0, %v4702_v48  ;;  %v1504_v24 = vsel %vm1496_vm10, %v1487_v35, %v1503_v21  ;;  %v1508_v20 = vsel %vm1496_vm10, %v1490_v43, %v1507_v63 }
 0x342   :  { %v7816_v37 = vshll.u32 %v1470_v62, 8  ;;  %v1409_v14 = vsub.s32 %v1405_v22, %v1408_v38  ;;  %vm1495_vm9 = vcmp.lt.s32.totalorder %v7768_v60, 2  ;;  %vm4705_vm11 = vweird.f32 %v7362_v51 }
 0x343   :  { %v4704_v15 = vmul.f32 %v4703_v12, %v4688_v3  ;;  %v4713_v41 = vxor.u32 2147483648, %v4696_v36  ;;  %vm4708_vm12 = vcmp.lt.s32.totalorder %v4707_v17, 2  ;;  %vm4709_vm13 = vcmp.eq.s32.totalorder %v4707_v17, 0 }
 0x344   :  { %v1509_v18 = vsel %vm1495_vm9, %v1506_v23, %v1508_v20  ;;  %vm1410_vm14 = vcmp.lt.s32.totalorder %v1409_v14, 0  ;;  %v1411_v5 = vsub.s32 0, %v1409_v14  ;;  %v1505_v9 = vsel %vm1495_vm9, %v1502_v44, %v1504_v24 }
 0x345   :  { %v4710_v47 = vxor.u32 2147483648, %v4704_v15  ;;  %vm4712_vm15 = vcmp.eq.s32.totalorder %v4707_v17, 2  ;;  %v1511_v3 = vand.u32 65535, %v7816_v37  ;;  %v1513_v49 = vand.u32 65535, %v1509_v18 }
 0x346   :  { %v1514_v45 = vshrl.u32 %v1509_v18, 16  ;;  %v4714_v22 = vsel %vm4712_vm15, %v4713_v41, %v4704_v15  ;;  %v1412_v39 = vsel %vm1410_vm14, %v1411_v5, %v1409_v14  ;;  %v1512_v27 = vshrl.u32 %v7816_v37, 16 }
 0x347   :  { %v4711_v28 = vsel %vm4709_vm13, %v4696_v36, %v4710_v47  ;;  %v1413_v46 = vclz %v1412_v39  ;;  %v1536_v25 = vshrl.u32 %v1505_v9, 16  ;;  %v7831_v2 = vadd.f32 %v7824_v8, %v7629_v57 }
 0x348   :  { %v4715_v43 = vsel %vm4708_vm12, %v4711_v28, %v4714_v22  ;;  %v1516_v62 = vmul.u32 %v1514_v45, %v1511_v3  ;;  %v1517_v59 = vmul.u32 %v1513_v49, %v1512_v27  ;;  %v1535_v48 = vand.u32 65535, %v1505_v9 }
 0x349   :  { %v4716_v58 = vsel %vm4705_vm11, nan, %v4715_v43  ;;  %v1401_v21 = vadd.s32 %v7765_v52, %v7763_v40  ;;  %v5407_v63 = vadd.s32 4294967294, %v1413_v46  ;;  %v1478_v17 = vshrl.u32 %v9613_v11, %v7755_v0 }
 0x34a   :  { %5364 = vst [vmem:[#allocation2 + $0xd8] sm:$0xff] %v4716_v58  ;;  %v1499_v36 = vsel %vm1497_vm7, %v1487_v35, 2102212464  ;;  %v1431_v57 = vsub.s32 4, %v7795_v50  ;;  %v1515_v12 = vmul.u32 %v1513_v49, %v1511_v3  ;;  %v1518_v38 = vmul.u32 %v1514_v45, %v1512_v27 }
 0x34b   :  { %v1519_v51 = vshll.u32 %v1516_v62, 16  ;;  %vm1309_vm0 = vcmp.lt.s32.totalorder %v7582_v13, 0  ;;  %vm5408_vm1 = vcmp.lt.s32.totalorder %v5407_v63, 0  ;;  %v1520_v23 = vshrl.u32 %v1516_v62, 16 }
 0x34c   :  { %v1521_v44 = vshll.u32 %v1517_v59, 16  ;;  %v1538_v24 = vmul.u32 %v1536_v25, %v1511_v3  ;;  %v1416_v20 = vsel %vm5408_vm1, 0, %v5407_v63  ;;  %v1539_v52 = vmul.u32 %v1535_v48, %v1512_v27 }
 0x34d   :  { %vm1523_vm2 = vc.u32 %v1515_v12, %v1519_v51  ;;  %v1525_v40 = vadd.s32 %v1519_v51, %v1515_v12  ;;  %v1417_v15 = vsub.s32 32, %v1416_v20  ;;  %v1421_v0 = vsub.s32 4294967266, %v1416_v20 }
 0x34e   :  { %v1524_v41 = vsel %vm1523_vm2, 1, %v9623_v29  ;;  %v1537_v35 = vmul.u32 %v1535_v48, %v1511_v3  ;;  %v1540_v47 = vmul.u32 %v1536_v25, %v1512_v27  ;;  %v1541_v5 = vshll.u32 %v1538_v24, 16 }
 0x34f   :  { %v1526_v18 = vadd.s32 %v1524_v41, %v1518_v38  ;;  %vm1527_vm3 = vc.u32 %v1525_v40, %v1521_v44  ;;  %v1418_v9 = vshll.u32 %v1409_v14, %v1416_v20  ;;  %v1419_v49 = vshrl.u32 %v1401_v21, %v1417_v15 }
 0x350   :  { %v1422_v45 = vadd.s32 127, %v1421_v0  ;;  %v1528_v28 = vsel %vm1527_vm3, 1, %v9623_v29  ;;  %v1543_v39 = vshll.u32 %v1539_v52, 16  ;;  %vm1545_vm4 = vc.u32 %v1537_v35, %v1541_v5 }
 0x351   :  { %v1530_v22 = vadd.s32 %v1528_v28, %v1526_v18  ;;  %v1547_v43 = vadd.s32 %v1541_v5, %v1537_v35  ;;  %v1420_v46 = vor.u32 %v1419_v49, %v1418_v9  ;;  %v1498_v62 = vsel %vm1494_vm8, %v1478_v17, %v7793_v42 }
 0x352   :  { %v1423_v58 = vshll.u32 %v1422_v45, 23  ;;  %v1546_v3 = vsel %vm1545_vm4, 1, %v9623_v29  ;;  %v2857_v14 = vand.u32 2147483647, %v7831_v2  ;;  %v1500_v21 = vsel %vm1496_vm10, %v7787_v26, %v1499_v36 }
 0x353   :  { %v1531_v48 = vadd.s32 %v1530_v22, %v1520_v23  ;;  %v1548_v27 = vadd.s32 %v1546_v3, %v1540_v47  ;;  %vm1549_vm5 = vc.u32 %v1547_v43, %v1543_v39  ;;  %v1522_v63 = vshrl.u32 %v1517_v59, 16 }
 0x354   :  { %v1424_v25 = vor.u32 4788187, %v1423_v58  ;;  %v1550_v12 = vsel %vm1549_vm5, 1, %v9623_v29  ;;  %v1432_v38 = vsel %vm1309_vm0, %v1431_v57, %v7795_v50  ;;  %v1542_v42 = vshrl.u32 %v1538_v24, 16 }
 0x355   :  { %v1552_v17 = vadd.s32 %v1550_v12, %v1548_v27  ;;  %v2860_v51 = vand.u32 2139095040, %v7831_v2  ;;  %v1427_v44 = vcvt.s32.f32 %v1420_v46  ;;  %v1532_v20 = vadd.s32 %v1531_v48, %v1522_v63 }
 0x356   :  { %v1425_v23 = vand.u32 2147483647, %v1424_v25  ;;  %v7860_v40 = vadd.f32 %v7824_v8, %v7632_v4  ;;  %v1544_v15 = vshrl.u32 %v1539_v52, 16  ;;  %v2864_v36 = vand.u32 8388607, %v2857_v14 }
 0x357   :  { %v1553_v26 = vadd.s32 %v1552_v17, %v1542_v42  ;;  %v2861_v59 = vshrl.u32 %v2860_v51, 23  ;;  %v129_v50 = vmul.f32 %v5638_v31, %v9665_v10  ;;  %vm7868_vm6 = vcmp.le.f32.partialorder %v1307_v19, 0.7853982 }
 0x358   :  { %v1428_v24 = vmul.f32 %v1427_v44, %v1425_v23  ;;  %v1551_v0 = vadd.s32 %v1547_v43, %v1543_v39  ;;  %v1434_v4 = vsel %vm7868_vm6, 0, %v1432_v38  ;;  %v1501_v8 = vsel %vm1495_vm9, %v1498_v62, %v1500_v21 }
 0x359   :  { %v1554_v52 = vadd.s32 %v1553_v26, %v1544_v15  ;;  %v5436_v41 = vadd.s32 4294967169, %v2861_v59  ;;  %v7878_v10 = vadd.f32 %v7759_v53, %v7645_v1  ;;  %v7881_v19 = vadd.f32 %v7791_v7, %v129_v50 }
 0x35a   :  { %v1429_v35 = vxor.u32 2147483648, %v1428_v24  ;;  %vm1557_vm7 = vc.u32 %v1532_v20, %v1551_v0  ;;  %v2865_v47 = vor.u32 8388608, %v2864_v36  ;;  %v3015_v9 = vand.u32 2139095040, %v7860_v40 }
 0x35b   :  { %v1558_v18 = vadd.s32 1, %v1554_v52  ;;  %v2867_v5 = vadd.s32 1, %v5436_v41  ;;  %v1555_v49 = vmul.u32 %v7816_v37, %v1501_v8  ;;  %v1451_v53 = vadd.s32 3, %v1434_v4 }
 0x35c   :  { %v1430_v60 = vsel %vm1309_vm0, %v1429_v35, %v1428_v24  ;;  %v7890_v43 = vshll.u32 %v2865_v47, 8  ;;  %v3016_v46 = vshrl.u32 %v3015_v9, 23  ;;  %v7896_v63 = vadd.s32 %v1551_v0, %v1532_v20 }
 0x35d   :  { %v1433_v45 = vsel %vm7868_vm6, %v7582_v13, %v1430_v60  ;;  %v1559_v28 = vsel %vm1557_vm7, %v1558_v18, %v1554_v52  ;;  %vm2868_vm8 = vcmp.gt.s32.totalorder %v2867_v5, 0  ;;  %v7894_v25 = vand.u32 3, %v1451_v53 }
 0x35e   :  { %v1435_v1 = vmul.f32 %v1433_v45, %v1433_v45  ;;  %v1560_v7 = vadd.s32 %v1559_v28, %v1555_v49  ;;  %v2869_v22 = vsel %vm2868_vm8, %v2867_v5, 0  ;;  %v7899_v12 = vand.u32 65535, %v7890_v43 }
 0x35f   :  { %v2871_v39 = vand.u32 31, %v2869_v22  ;;  %v3012_v38 = vand.u32 2147483647, %v7860_v40  ;;  %v5439_v42 = vadd.s32 4294967169, %v3016_v46  ;;  %vm1464_vm10 = vcmp.lt.s32.totalorder %v7611_v54, 0 }
 0x360   :  { %v1436_v58 = vmul.f32 -0.001358992, %v1435_v1  ;;  %v1443_v62 = vmul.f32 -0.00019511016, %v1435_v1  ;;  %v1561_v3 = vadd.s32 536870912, %v1560_v7  ;;  %v7903_v44 = vshrl.u32 %v2869_v22, 5 }
 0x361   :  { %v7892_v48 = vsub.s32 32, %v2871_v39  ;;  %v2874_v15 = vshll.u32 %v9613_v11, %v2871_v39  ;;  %vm1457_vm9 = vcmp.eq.s32.totalorder %v7894_v25, 2  ;;  %v2877_v24 = vshll.u32 %v9617_v34, %v2871_v39 }
 0x362   :  { %v1437_v37 = vadd.f32 0.041655596, %v1436_v58  ;;  %v1444_v27 = vadd.f32 0.008332121, %v1443_v62  ;;  %v1562_v21 = vshrl.u32 %v1561_v3, 30  ;;  %vm1454_vm11 = vcmp.eq.s32.totalorder %v7894_v25, 0 }
 0x363   :  { %v2875_v26 = vshrl.u32 %v9617_v34, %v7892_v48  ;;  %v2878_v20 = vshrl.u32 %v9618_v56, %v7892_v48  ;;  %v2884_v59 = vshrl.u32 %v9626_v16, %v7892_v48  ;;  %v2880_v0 = vshll.u32 %v9618_v56, %v2871_v39 }
 0x364   :  { %v1438_v17 = vmul.f32 %v1437_v37, %v1435_v1  ;;  %v1445_v51 = vmul.f32 %v1444_v27, %v1435_v1  ;;  %v1563_v23 = vshll.u32 %v1562_v21, 30  ;;  %v2881_v4 = vshrl.u32 %v9627_v61, %v7892_v48 }
 0x365   :  { %v2883_v8 = vshll.u32 %v9627_v61, %v2871_v39  ;;  %v2887_v52 = vshrl.u32 %v9619_v55, %v7892_v48  ;;  %vm1453_vm12 = vcmp.lt.s32.totalorder %v7894_v25, 2  ;;  %vm1450_vm14 = vweird.f32 %v7582_v13 }
 0x366   :  { %v1439_v36 = vadd.f32 -0.4999988, %v1438_v17  ;;  %v1446_v50 = vadd.f32 -0.16666654, %v1445_v51  ;;  %v7913_v57 = vsub.s32 %v1560_v7, %v1563_v23  ;;  %v1586_v47 = vsub.s32 4, %v1562_v21 }
 0x367   :  { %v2876_v5 = vor.u32 %v2875_v26, %v2874_v15  ;;  %v2879_v9 = vor.u32 %v2878_v20, %v2877_v24  ;;  %v2885_v60 = vor.u32 %v2884_v59, %v2883_v8  ;;  %v2886_v7 = vshll.u32 %v9626_v16, %v2871_v39 }
 0x368   :  { %v1440_v41 = vmul.f32 %v1439_v36, %v1435_v1  ;;  %v1447_v35 = vmul.f32 %v1446_v50, %v1435_v1  ;;  %vm1565_vm13 = vcmp.lt.s32.totalorder %v7913_v57, 0  ;;  %v1566_v18 = vsub.s32 0, %v7913_v57 }
 0x369   :  { %v2882_v1 = vor.u32 %v2881_v4, %v2880_v0  ;;  %v2907_v46 = vshrl.u32 %v7890_v43, 16  ;;  %v7930_v58 = vadd.s32 1, %v5439_v42  ;;  %vm7934_vm15 = vcmp.le.f32.partialorder %v1462_v6, 0.7853982 }
 0x36a   :  { %v1441_v49 = vadd.f32 1.0, %v1440_v41  ;;  %v1448_v28 = vadd.f32 1.0, %v1447_v35  ;;  %v1567_v53 = vsel %vm1565_vm13, %v1566_v18, %v7913_v57  ;;  %v2888_v27 = vor.u32 %v2887_v52, %v2886_v7 }
 0x36b   :  { %v1568_v22 = vclz %v1567_v53  ;;  %vm2889_vm0 = vcmp.lt.s32.totalorder %v7903_v44, 1  ;;  %v7941_v39 = vsel %vm1464_vm10, %v1586_v47, %v1562_v21  ;;  %vm2892_vm1 = vcmp.lt.s32.totalorder %v7903_v44, 4 }
 0x36c   :  { %v1449_v62 = vmul.f32 %v1448_v28, %v1433_v45  ;;  %v1458_v3 = vxor.u32 2147483648, %v1441_v49  ;;  %v2897_v45 = vsel %vm2889_vm0, %v2876_v5, %v2879_v9  ;;  %vm2890_vm2 = vcmp.lt.s32.totalorder %v7903_v44, 2 }
 0x36d   :  { %v5410_v17 = vadd.s32 4294967294, %v1568_v22  ;;  %vm2891_vm3 = vcmp.lt.s32.totalorder %v7903_v44, 3  ;;  %v2898_v6 = vsel %vm2892_vm1, %v2885_v60, 920167782  ;;  %v2901_v23 = vsel %vm2889_vm0, %v2879_v9, %v2882_v1 }
 0x36e   :  { %v1455_v42 = vxor.u32 2147483648, %v1449_v62  ;;  %v1459_v51 = vsel %vm1457_vm9, %v1458_v3, %v1449_v62  ;;  %v2899_v21 = vsel %vm2891_vm3, %v2882_v1, %v2898_v6  ;;  %v2902_v59 = vsel %vm2892_vm1, %v2888_v27, 1326507024 }
 0x36f   :  { %vm5411_vm4 = vcmp.lt.s32.totalorder %v5410_v17, 0  ;;  %v2900_v20 = vsel %vm2890_vm2, %v2897_v45, %v2899_v21  ;;  %v2894_v0 = vsel %vm2892_vm1, %v2882_v1, 2102212464  ;;  %v2903_v8 = vsel %vm2891_vm3, %v2885_v60, %v2902_v59 }
 0x370   :  { %v1456_v15 = vsel %vm1454_vm11, %v1441_v49, %v1455_v42  ;;  %v1571_v26 = vsel %vm5411_vm4, 0, %v5410_v17  ;;  %v2930_v52 = vand.u32 65535, %v2900_v20  ;;  %v2931_v41 = vshrl.u32 %v2900_v20, 16 }
 0x371   :  { %v1460_v36 = vsel %vm1453_vm12, %v1456_v15, %v1459_v51  ;;  %v1572_v50 = vsub.s32 32, %v1571_v26  ;;  %v1576_v24 = vsub.s32 4294967266, %v1571_v26  ;;  %v1573_v35 = vshll.u32 %v7913_v57, %v1571_v26 }
 0x372   :  { %v1461_v4 = vsel %vm1450_vm14, nan, %v1460_v36  ;;  %v2904_v25 = vsel %vm2890_vm2, %v2901_v23, %v2903_v8  ;;  %v2873_v49 = vshrl.u32 %v9613_v11, %v7892_v48  ;;  %v2933_v53 = vmul.u32 %v2931_v41, %v7899_v12 }
 0x373   :  { %v1574_v18 = vshrl.u32 %v7896_v63, %v1572_v50  ;;  %v1577_v47 = vadd.s32 127, %v1576_v24  ;;  %5343 = vst [vmem:[#allocation2 + $0x30] sm:$0xff] %v1461_v4  ;;  %v2908_v28 = vand.u32 65535, %v2904_v25  ;;  %v2909_v13 = vshrl.u32 %v2904_v25, 16 }
 0x374   :  { %v1589_v57 = vsel %vm7934_vm15, 0, %v7941_v39  ;;  %v2934_v22 = vmul.u32 %v2930_v52, %v2907_v46  ;;  %v2893_v63 = vsel %vm2889_vm0, %v2873_v49, %v2876_v5  ;;  %v2895_v1 = vsel %vm2891_vm3, %v2879_v9, %v2894_v0 }
 0x375   :  { %v1575_v7 = vor.u32 %v1574_v18, %v1573_v35  ;;  %v1578_v60 = vshll.u32 %v1577_v47, 23  ;;  %v2911_v62 = vmul.u32 %v2909_v13, %v7899_v12  ;;  %v2912_v48 = vmul.u32 %v2908_v28, %v2907_v46 }
 0x376   :  { %v2932_v27 = vmul.u32 %v2930_v52, %v7899_v12  ;;  %v2935_v17 = vmul.u32 %v2931_v41, %v2907_v46  ;;  %v2936_v45 = vshll.u32 %v2933_v53, 16  ;;  %v2910_v6 = vmul.u32 %v2908_v28, %v7899_v12 }
 0x377   :  { %v1579_v3 = vor.u32 4788187, %v1578_v60  ;;  %v1582_v42 = vcvt.s32.f32 %v1575_v7  ;;  %v2913_v51 = vmul.u32 %v2909_v13, %v2907_v46  ;;  %v2914_v39 = vshll.u32 %v2911_v62, 16 }
 0x378   :  { %v2916_v23 = vshll.u32 %v2912_v48, 16  ;;  %v2938_v15 = vshll.u32 %v2934_v22, 16  ;;  %vm2940_vm5 = vc.u32 %v2932_v27, %v2936_v45  ;;  %v2942_v26 = vadd.s32 %v2936_v45, %v2932_v27 }
 0x379   :  { %v1580_v21 = vand.u32 2147483647, %v1579_v3  ;;  %vm2918_vm6 = vc.u32 %v2910_v6, %v2914_v39  ;;  %v2920_v5 = vadd.s32 %v2914_v39, %v2910_v6  ;;  %v2941_v9 = vsel %vm2940_vm5, 1, %v9623_v29 }
 0x37a   :  { %v2919_v59 = vsel %vm2918_vm6, 1, %v9623_v29  ;;  %v2943_v36 = vadd.s32 %v2941_v9, %v2935_v17  ;;  %vm3023_vm7 = vcmp.gt.s32.totalorder %v7930_v58, 0  ;;  %v2937_v12 = vshrl.u32 %v2933_v53, 16 }
 0x37b   :  { %v1583_v20 = vmul.f32 %v1582_v42, %v1580_v21  ;;  %v2921_v50 = vadd.s32 %v2919_v59, %v2913_v51  ;;  %vm2922_vm8 = vc.u32 %v2920_v5, %v2916_v23  ;;  %vm2944_vm9 = vc.u32 %v2942_v26, %v2938_v15 }
 0x37c   :  { %v2923_v24 = vsel %vm2922_vm8, 1, %v9623_v29  ;;  %v2945_v0 = vsel %vm2944_vm9, 1, %v9623_v29  ;;  %v3024_v4 = vsel %vm3023_vm7, %v7930_v58, 0  ;;  %v2915_v8 = vshrl.u32 %v2911_v62, 16 }
 0x37d   :  { %v1584_v46 = vxor.u32 2147483648, %v1583_v20  ;;  %v2925_v52 = vadd.s32 %v2923_v24, %v2921_v50  ;;  %v2947_v41 = vadd.s32 %v2945_v0, %v2943_v36  ;;  %v3026_v35 = vand.u32 31, %v3024_v4 }
 0x37e   :  { %v2896_v47 = vsel %vm2890_vm2, %v2893_v63, %v2895_v1  ;;  %v2917_v25 = vshrl.u32 %v2912_v48, 16  ;;  %v2939_v49 = vshrl.u32 %v2934_v22, 16  ;;  %v1606_v60 = vadd.s32 3, %v1589_v57 }
 0x37f   :  { %v1585_v18 = vsel %vm1464_vm10, %v1584_v46, %v1583_v20  ;;  %v2926_v13 = vadd.s32 %v2925_v52, %v2915_v8  ;;  %v2948_v53 = vadd.s32 %v2947_v41, %v2937_v12  ;;  %v8000_v7 = vsub.s32 32, %v3026_v35 }
 0x380   :  { %v1588_v28 = vsel %vm7934_vm15, %v7611_v54, %v1585_v18  ;;  %v3019_v62 = vand.u32 8388607, %v3012_v38  ;;  %v8006_v27 = vadd.s32 %v2942_v26, %v2938_v15  ;;  %v2950_v22 = vmul.u32 %v7890_v43, %v2896_v47 }
 0x381   :  { %v1590_v58 = vmul.f32 %v1588_v28, %v1588_v28  ;;  %v8004_v3 = vadd.s32 %v2926_v13, %v2917_v25  ;;  %v2949_v44 = vadd.s32 %v2948_v53, %v2939_v49  ;;  %v8009_v37 = vshrl.u32 %v3024_v4, 5 }
 0x382   :  { %v3032_v48 = vshll.u32 %v9617_v34, %v3026_v35  ;;  %v3033_v17 = vshrl.u32 %v9618_v56, %v8000_v7  ;;  %v3036_v45 = vshrl.u32 %v9627_v61, %v8000_v7  ;;  %v3030_v43 = vshrl.u32 %v9617_v34, %v8000_v7 }
 0x383   :  { %v1591_v63 = vmul.f32 -0.001358992, %v1590_v58  ;;  %v1598_v1 = vmul.f32 -0.00019511016, %v1590_v58  ;;  %vm2952_vm10 = vc.u32 %v8004_v3, %v8006_v27  ;;  %v2953_v57 = vadd.s32 1, %v2949_v44 }
 0x384   :  { %v3035_v51 = vshll.u32 %v9618_v56, %v3026_v35  ;;  %v3038_v21 = vshll.u32 %v9627_v61, %v3026_v35  ;;  %v3039_v23 = vshrl.u32 %v9626_v16, %v8000_v7  ;;  %v3041_v15 = vshll.u32 %v9626_v16, %v3026_v35 }
 0x385   :  { %v1592_v42 = vadd.f32 0.041655596, %v1591_v63  ;;  %v1599_v6 = vadd.f32 0.008332121, %v1598_v1  ;;  %v2954_v39 = vsel %vm2952_vm10, %v2953_v57, %v2949_v44  ;;  %v3042_v20 = vshrl.u32 %v9619_v55, %v8000_v7 }
 0x386   :  { %v2955_v26 = vadd.s32 %v2954_v39, %v2950_v22  ;;  %v3029_v59 = vshll.u32 %v9613_v11, %v3026_v35  ;;  %v8028_v36 = vor.u32 %v3033_v17, %v3032_v48  ;;  %v3037_v50 = vor.u32 %v3036_v45, %v3035_v51 }
 0x387   :  { %v1593_v5 = vmul.f32 %v1592_v42, %v1590_v58  ;;  %v1600_v9 = vmul.f32 %v1599_v6, %v1590_v58  ;;  %v3040_v12 = vor.u32 %v3039_v23, %v3038_v21  ;;  %v3043_v4 = vor.u32 %v3042_v20, %v3041_v15 }
 0x388   :  { %v2956_v0 = vadd.s32 536870912, %v2955_v26  ;;  %v1607_v8 = vand.u32 3, %v1606_v60  ;;  %v3020_v52 = vor.u32 8388608, %v3019_v62  ;;  %v8030_v41 = vor.u32 %v3030_v43, %v3029_v59  ;;  %v307_v59 = vpop.permute.xlu1 %306 }
 0x389   :  { %v1594_v46 = vadd.f32 -0.4999988, %v1593_v5  ;;  %v1601_v24 = vadd.f32 -0.16666654, %v1600_v9  ;;  %vm3047_vm11 = vcmp.lt.s32.totalorder %v8009_v37, 4  ;;  %vm3044_vm12 = vcmp.lt.s32.totalorder %v8009_v37, 1 }
 0x38a   :  { %v8032_v25 = vshrl.u32 %v2956_v0, 30  ;;  %vm3046_vm13 = vcmp.lt.s32.totalorder %v8009_v37, 3  ;;  %v3053_v35 = vsel %vm3047_vm11, %v3040_v12, 920167782  ;;  %v3057_v49 = vsel %vm3047_vm11, %v3043_v4, 1326507024 }
 0x38b   :  { %v1595_v18 = vmul.f32 %v1594_v46, %v1590_v58  ;;  %v1602_v47 = vmul.f32 %v1601_v24, %v1590_v58  ;;  %v3056_v58 = vsel %vm3044_vm12, %v8028_v36, %v3037_v50  ;;  %v3052_v62 = vsel %vm3044_vm12, %v8030_v41, %v8028_v36 }
 0x38c   :  { %v2958_v60 = vshll.u32 %v8032_v25, 30  ;;  %v3054_v44 = vsel %vm3046_vm13, %v3037_v50, %v3053_v35  ;;  %v3058_v22 = vsel %vm3046_vm13, %v3040_v12, %v3057_v49  ;;  %v8053_v63 = vshll.u32 %v3020_v52, 8 }
 0x38d   :  { %v1596_v13 = vadd.f32 1.0, %v1595_v18  ;;  %v1603_v53 = vadd.f32 1.0, %v1602_v47  ;;  %vm3045_vm14 = vcmp.lt.s32.totalorder %v8009_v37, 2  ;;  %vm1605_vm15 = vweird.f32 %v7611_v54 }
 0x38e   :  { %v2959_v57 = vsub.s32 %v2955_v26, %v2958_v60  ;;  %vm1608_vm0 = vcmp.lt.s32.totalorder %v1607_v8, 2  ;;  %vm1609_vm1 = vcmp.eq.s32.totalorder %v1607_v8, 0  ;;  %v3059_v17 = vsel %vm3045_vm14, %v3056_v58, %v3058_v22 }
 0x38f   :  { %v1604_v1 = vmul.f32 %v1603_v53, %v1588_v28  ;;  %v1613_v48 = vxor.u32 2147483648, %v1596_v13  ;;  %v3055_v6 = vsel %vm3045_vm14, %v3052_v62, %v3054_v44  ;;  %vm1612_vm3 = vcmp.eq.s32.totalorder %v1607_v8, 2 }
 0x390   :  { %vm2960_vm2 = vcmp.lt.s32.totalorder %v2959_v57, 0  ;;  %v2961_v42 = vsub.s32 0, %v2959_v57  ;;  %v3061_v28 = vand.u32 65535, %v8053_v63  ;;  %v3063_v43 = vand.u32 65535, %v3059_v17 }
 0x391   :  { %v1610_v45 = vxor.u32 2147483648, %v1604_v1  ;;  %v3064_v51 = vshrl.u32 %v3059_v17, 16  ;;  %v1614_v21 = vsel %vm1612_vm3, %v1613_v48, %v1604_v1  ;;  %v3062_v15 = vshrl.u32 %v8053_v63, 16 }
 0x392   :  { %v2962_v23 = vsel %vm2960_vm2, %v2961_v42, %v2959_v57  ;;  %v3028_v26 = vshrl.u32 %v9613_v11, %v8000_v7  ;;  %v3086_v20 = vshrl.u32 %v3055_v6, 16  ;;  %v3085_v0 = vand.u32 65535, %v3055_v6 }
 0x393   :  { %v1611_v39 = vsel %vm1609_vm1, %v1596_v13, %v1610_v45  ;;  %v2963_v9 = vclz %v2962_v23  ;;  %v3066_v46 = vmul.u32 %v3064_v51, %v3061_v28  ;;  %v3067_v24 = vmul.u32 %v3063_v43, %v3062_v15 }
 0x394   :  { %v1615_v5 = vsel %vm1608_vm0, %v1611_v39, %v1614_v21  ;;  %v2951_v4 = vadd.s32 %v8006_v27, %v8004_v3  ;;  %v2981_v52 = vsub.s32 4, %v8032_v25  ;;  %v3049_v18 = vsel %vm3047_vm11, %v3037_v50, 2102212464 }
 0x395   :  { %v1616_v12 = vsel %vm1605_vm15, nan, %v1615_v5  ;;  %v5437_v8 = vadd.s32 4294967294, %v2963_v9  ;;  %v3065_v47 = vmul.u32 %v3063_v43, %v3061_v28  ;;  %v3068_v7 = vmul.u32 %v3064_v51, %v3062_v15 }
 0x396   :  { %5344 = vst [vmem:[#allocation2 + $0x38] sm:$0xff] %v1616_v12  ;;  %v3069_v35 = vshll.u32 %v3066_v46, 16  ;;  %v8073_v49 = vadd.f32 %v307_v59, %v7878_v10  ;;  %vm2859_vm4 = vcmp.lt.s32.totalorder %v7831_v2, 0  ;;  %v3070_v54 = vshrl.u32 %v3066_v46, 16 }
 0x397   :  { %vm5438_vm5 = vcmp.lt.s32.totalorder %v5437_v8, 0  ;;  %v3071_v13 = vshll.u32 %v3067_v24, 16  ;;  %v3088_v53 = vmul.u32 %v3086_v20, %v3061_v28  ;;  %v3089_v27 = vmul.u32 %v3085_v0, %v3062_v15 }
 0x398   :  { %v2966_v60 = vsel %vm5438_vm5, 0, %v5437_v8  ;;  %vm3073_vm6 = vc.u32 %v3065_v47, %v3069_v35  ;;  %v3075_v3 = vadd.s32 %v3069_v35, %v3065_v47  ;;  %v3087_v44 = vmul.u32 %v3085_v0, %v3061_v28 }
 0x399   :  { %v2967_v58 = vsub.s32 32, %v2966_v60  ;;  %v2971_v62 = vsub.s32 4294967266, %v2966_v60  ;;  %v3074_v50 = vsel %vm3073_vm6, 1, %v9623_v29  ;;  %v3090_v1 = vmul.u32 %v3086_v20, %v3062_v15 }
 0x39a   :  { %v3076_v22 = vadd.s32 %v3074_v50, %v3068_v7  ;;  %vm3077_vm7 = vc.u32 %v3075_v3, %v3071_v13  ;;  %v3091_v10 = vshll.u32 %v3088_v53, 16  ;;  %v2968_v48 = vshll.u32 %v2959_v57, %v2966_v60 }
 0x39b   :  { %v2969_v17 = vshrl.u32 %v2951_v4, %v2967_v58  ;;  %v2972_v45 = vadd.s32 127, %v2971_v62  ;;  %v3078_v42 = vsel %vm3077_vm7, 1, %v9623_v29  ;;  %v3093_v43 = vshll.u32 %v3089_v27, 16 }
 0x39c   :  { %v3080_v6 = vadd.s32 %v3078_v42, %v3076_v22  ;;  %vm3095_vm8 = vc.u32 %v3087_v44, %v3091_v10  ;;  %v3097_v51 = vadd.s32 %v3091_v10, %v3087_v44  ;;  %v3048_v23 = vsel %vm3044_vm12, %v3028_v26, %v8030_v41  ;;  %v9675_v22 = vld [vmem:[#allocation6_spill] sm:$0xff] }
 0x39d   :  { %v2970_v39 = vor.u32 %v2969_v17, %v2968_v48  ;;  %v2973_v21 = vshll.u32 %v2972_v45, 23  ;;  %v3096_v28 = vsel %vm3095_vm8, 1, %v9623_v29  ;;  %v3050_v57 = vsel %vm3046_vm13, %v8028_v36, %v3049_v18 }
 0x39e   :  { %v3081_v15 = vadd.s32 %v3080_v6, %v3070_v54  ;;  %v3098_v5 = vadd.s32 %v3096_v28, %v3090_v1  ;;  %vm3099_vm9 = vc.u32 %v3097_v51, %v3093_v43  ;;  %v3072_v20 = vshrl.u32 %v3067_v24, 16 }
 0x39f   :  { %v2974_v9 = vor.u32 4788187, %v2973_v21  ;;  %v3100_v12 = vsel %vm3099_vm9, 1, %v9623_v29  ;;  %v2237_v46 = vand.u32 2147483647, %v8073_v49  ;;  %v2982_v0 = vsel %vm2859_vm4, %v2981_v52, %v8032_v25 }
 0x3a0   :  { %v3092_v41 = vshrl.u32 %v3088_v53, 16  ;;  %v3102_v26 = vadd.s32 %v3100_v12, %v3098_v5  ;;  %v2240_v4 = vand.u32 2139095040, %v8073_v49  ;;  %v2977_v47 = vcvt.s32.f32 %v2970_v39  ;;  %v9676_v39 = vld [vmem:[#allocation9_spill] sm:$0xff] }
 0x3a1   :  { %v2975_v8 = vand.u32 2147483647, %v2974_v9  ;;  %v3082_v36 = vadd.s32 %v3081_v15, %v3072_v20  ;;  %v3094_v18 = vshrl.u32 %v3089_v27, 16  ;;  %v8092_v35 = vadd.f32 %v307_v59, %v7881_v19  ;;  %v9677_v15 = vld [vmem:[#allocation12_spill] sm:$0xff] }
 0x3a2   :  { %v3103_v7 = vadd.s32 %v3102_v26, %v3092_v41  ;;  %v2241_v24 = vshrl.u32 %v2240_v4, 23  ;;  %v2244_v54 = vand.u32 8388607, %v2237_v46  ;;  %v3101_v60 = vadd.s32 %v3097_v51, %v3093_v43  ;;  %v9678_v20 = vld [vmem:[#allocation16_spill] sm:$0xff] }
 0x3a3   :  { %v2978_v13 = vmul.f32 %v2977_v47, %v2975_v8  ;;  %vm8098_vm10 = vcmp.le.f32.partialorder %v2857_v14, 0.7853982  ;;  %v3051_v52 = vsel %vm3045_vm14, %v3048_v23, %v3050_v57  ;;  %v2395_v50 = vand.u32 2139095040, %v8092_v35 }
 0x3a4   :  { %v3104_v53 = vadd.s32 %v3103_v7, %v3094_v18  ;;  %v5424_v3 = vadd.s32 4294967169, %v2241_v24  ;;  %v2984_v19 = vsel %vm8098_vm10, 0, %v2982_v0  ;;  %vm3107_vm11 = vc.u32 %v3082_v36, %v3101_v60 }
 0x3a5   :  { %v2979_v27 = vxor.u32 2147483648, %v2978_v13  ;;  %v2245_v58 = vor.u32 8388608, %v2244_v54  ;;  %v3105_v44 = vmul.u32 %v8053_v63, %v3051_v52  ;;  %v8112_v37 = vmul.f32 %v5636_v30, %v9675_v22 }
 0x3a6   :  { %v3108_v59 = vadd.s32 1, %v3104_v53  ;;  %v2247_v62 = vadd.s32 1, %v5424_v3  ;;  %v3001_v17 = vadd.s32 3, %v2984_v19  ;;  %v8123_v63 = vmul.f32 %v5638_v31, %v9675_v22 }
 0x3a7   :  { %v2980_v14 = vsel %vm2859_vm4, %v2979_v27, %v2978_v13  ;;  %v8125_v43 = vshll.u32 %v2245_v58, 8  ;;  %v2396_v51 = vshrl.u32 %v2395_v50, 23  ;;  %v8129_v21 = vmul.f32 %v5636_v30, %v9676_v39 }
 0x3a8   :  { %v8117_v1 = vsel %vm8098_vm10, %v7831_v2, %v2980_v14  ;;  %v3109_v10 = vsel %vm3107_vm11, %v3108_v59, %v3104_v53  ;;  %vm2248_vm12 = vcmp.gt.s32.totalorder %v2247_v62, 0  ;;  %v8133_v5 = vmul.f32 %v5640_v32, %v9677_v15 }
 0x3a9   :  { %v2985_v48 = vmul.f32 %v8117_v1, %v8117_v1  ;;  %v3110_v45 = vadd.s32 %v3109_v10, %v3105_v44  ;;  %v2249_v42 = vsel %vm2248_vm12, %v2247_v62, 0  ;;  %v8137_v9 = vmul.f32 %v5642_v33, %v9677_v15 }
 0x3aa   :  { %v2251_v6 = vand.u32 31, %v2249_v42  ;;  %v8141_v12 = vmul.f32 %v5640_v32, %v9678_v20  ;;  %v8145_v4 = vand.u32 3, %v3001_v17  ;;  %v8147_v47 = vadd.s32 %v3101_v60, %v3082_v36 }
 0x3ab   :  { %v2986_v23 = vmul.f32 -0.001358992, %v2985_v48  ;;  %v2993_v28 = vmul.f32 -0.00019511016, %v2985_v48  ;;  %v3111_v57 = vadd.s32 536870912, %v3110_v45  ;;  %v8150_v18 = vand.u32 65535, %v8125_v43 }
 0x3ac   :  { %v8143_v0 = vsub.s32 32, %v2251_v6  ;;  %v2392_v7 = vand.u32 2147483647, %v8092_v35  ;;  %v5427_v24 = vadd.s32 4294967169, %v2396_v51  ;;  %vm3014_vm13 = vcmp.lt.s32.totalorder %v7860_v40, 0 }
 0x3ad   :  { %v2987_v41 = vadd.f32 0.041655596, %v2986_v23  ;;  %v2994_v26 = vadd.f32 0.008332121, %v2993_v28  ;;  %v3112_v8 = vshrl.u32 %v3111_v57, 30  ;;  %v8154_v52 = vshrl.u32 %v2249_v42, 5 }
 0x3ae   :  { %v2254_v53 = vshll.u32 %v9613_v11, %v2251_v6  ;;  %v2255_v3 = vshrl.u32 %v9617_v34, %v8143_v0  ;;  %v2258_v36 = vshrl.u32 %v9618_v56, %v8143_v0  ;;  %v2264_v60 = vshrl.u32 %v9626_v16, %v8143_v0 }
 0x3af   :  { %v2988_v54 = vmul.f32 %v2987_v41, %v2985_v48  ;;  %v2995_v13 = vmul.f32 %v2994_v26, %v2985_v48  ;;  %v3113_v25 = vshll.u32 %v3112_v8, 30  ;;  %vm3007_vm14 = vcmp.eq.s32.totalorder %v8145_v4, 2 }
 0x3b0   :  { %v2257_v58 = vshll.u32 %v9617_v34, %v2251_v6  ;;  %vm3004_vm15 = vcmp.eq.s32.totalorder %v8145_v4, 0  ;;  %v2260_v62 = vshll.u32 %v9618_v56, %v2251_v6  ;;  %v2261_v50 = vshrl.u32 %v9627_v61, %v8143_v0 }
 0x3b1   :  { %v2989_v27 = vadd.f32 -0.4999988, %v2988_v54  ;;  %v2996_v19 = vadd.f32 -0.16666654, %v2995_v13  ;;  %v8164_v59 = vsub.s32 %v3110_v45, %v3113_v25  ;;  %v2263_v14 = vshll.u32 %v9627_v61, %v2251_v6 }
 0x3b2   :  { %v2267_v44 = vshrl.u32 %v9619_v55, %v8143_v0  ;;  %vm3003_vm0 = vcmp.lt.s32.totalorder %v8145_v4, 2  ;;  %vm3000_vm2 = vweird.f32 %v7831_v2  ;;  %v3136_v45 = vsub.s32 4, %v3112_v8 }
 0x3b3   :  { %v2990_v22 = vmul.f32 %v2989_v27, %v2985_v48  ;;  %v2997_v10 = vmul.f32 %v2996_v19, %v2985_v48  ;;  %vm3115_vm1 = vcmp.lt.s32.totalorder %v8164_v59, 0  ;;  %v3116_v17 = vsub.s32 0, %v8164_v59 }
 0x3b4   :  { %v2256_v42 = vor.u32 %v2255_v3, %v2254_v53  ;;  %v2259_v51 = vor.u32 %v2258_v36, %v2257_v58  ;;  %v2265_v23 = vor.u32 %v2264_v60, %v2263_v14  ;;  %v2266_v41 = vshll.u32 %v9626_v16, %v2251_v6 }
 0x3b5   :  { %v2991_v28 = vadd.f32 1.0, %v2990_v22  ;;  %v2998_v57 = vadd.f32 1.0, %v2997_v10  ;;  %v3117_v15 = vsel %vm3115_vm1, %v3116_v17, %v8164_v59  ;;  %v2262_v48 = vor.u32 %v2261_v50, %v2260_v62 }
 0x3b6   :  { %v3118_v26 = vclz %v3117_v15  ;;  %v2287_v54 = vshrl.u32 %v8125_v43, 16  ;;  %v8181_v13 = vadd.s32 1, %v5427_v24  ;;  %vm8186_vm3 = vcmp.le.f32.partialorder %v3012_v38, 0.7853982 }
 0x3b7   :  { %v2999_v25 = vmul.f32 %v2998_v57, %v8117_v1  ;;  %v3008_v27 = vxor.u32 2147483648, %v2991_v28  ;;  %v2268_v3 = vor.u32 %v2267_v44, %v2266_v41  ;;  %vm2269_vm4 = vcmp.lt.s32.totalorder %v8154_v52, 1 }
 0x3b8   :  { %v5440_v36 = vadd.s32 4294967294, %v3118_v26  ;;  %v8193_v6 = vsel %vm3014_vm13, %v3136_v45, %v3112_v8  ;;  %vm2272_vm5 = vcmp.lt.s32.totalorder %v8154_v52, 4  ;;  %v2277_v1 = vsel %vm2269_vm4, %v2256_v42, %v2259_v51 }
 0x3b9   :  { %v3005_v24 = vxor.u32 2147483648, %v2999_v25  ;;  %vm2270_vm6 = vcmp.lt.s32.totalorder %v8154_v52, 2  ;;  %vm2271_vm7 = vcmp.lt.s32.totalorder %v8154_v52, 3  ;;  %v2278_v38 = vsel %vm2272_vm5, %v2265_v23, 920167782 }
 0x3ba   :  { %v3009_v60 = vsel %vm3007_vm14, %v3008_v27, %v2999_v25  ;;  %vm5441_vm8 = vcmp.lt.s32.totalorder %v5440_v36, 0  ;;  %v2279_v8 = vsel %vm2271_vm7, %v2262_v48, %v2278_v38  ;;  %v2281_v19 = vsel %vm2269_vm4, %v2259_v51, %v2262_v48 }
 0x3bb   :  { %v3006_v58 = vsel %vm3004_vm15, %v2991_v28, %v3005_v24  ;;  %v3121_v62 = vsel %vm5441_vm8, 0, %v5440_v36  ;;  %v2280_v50 = vsel %vm2270_vm6, %v2277_v1, %v2279_v8  ;;  %v2282_v14 = vsel %vm2272_vm5, %v2268_v3, 1326507024 }
 0x3bc   :  { %v3010_v44 = vsel %vm3003_vm0, %v3006_v58, %v3009_v60  ;;  %v3122_v22 = vsub.s32 32, %v3121_v62  ;;  %v3126_v10 = vsub.s32 4294967266, %v3121_v62  ;;  %v2274_v17 = vsel %vm2272_vm5, %v2262_v48, 2102212464 }
 0x3bd   :  { %v3011_v45 = vsel %vm3000_vm2, nan, %v3010_v44  ;;  %v2283_v28 = vsel %vm2271_vm7, %v2265_v23, %v2282_v14  ;;  %v2310_v57 = vand.u32 65535, %v2280_v50  ;;  %v2311_v15 = vshrl.u32 %v2280_v50, 16 }
 0x3be   :  { %v3123_v41 = vshll.u32 %v8164_v59, %v3121_v62  ;;  %v3124_v26 = vshrl.u32 %v8147_v47, %v3122_v22  ;;  %v3127_v25 = vadd.s32 127, %v3126_v10  ;;  %5353 = vst [vmem:[#allocation2 + $0x80] sm:$0xff] %v3011_v45  ;;  %v2284_v4 = vsel %vm2270_vm6, %v2281_v19, %v2283_v28 }
 0x3bf   :  { %v2253_v48 = vshrl.u32 %v9613_v11, %v8143_v0  ;;  %v2288_v27 = vand.u32 65535, %v2284_v4  ;;  %v2289_v2 = vshrl.u32 %v2284_v4, 16  ;;  %v2313_v3 = vmul.u32 %v2311_v15, %v8150_v18 }
 0x3c0   :  { %v3125_v36 = vor.u32 %v3124_v26, %v3123_v41  ;;  %v3128_v23 = vshll.u32 %v3127_v25, 23  ;;  %v3139_v59 = vsel %vm8186_vm3, 0, %v8193_v6  ;;  %v2314_v1 = vmul.u32 %v2310_v57, %v2287_v54 }
 0x3c1   :  { %v2273_v47 = vsel %vm2269_vm4, %v2253_v48, %v2256_v42  ;;  %v2275_v24 = vsel %vm2271_vm7, %v2259_v51, %v2274_v17  ;;  %v2291_v38 = vmul.u32 %v2289_v2, %v8150_v18  ;;  %v2292_v0 = vmul.u32 %v2288_v27, %v2287_v54 }
 0x3c2   :  { %v3129_v60 = vor.u32 4788187, %v3128_v23  ;;  %v2312_v8 = vmul.u32 %v2310_v57, %v8150_v18  ;;  %v2315_v19 = vmul.u32 %v2311_v15, %v2287_v54  ;;  %v2316_v58 = vshll.u32 %v2313_v3, 16 }
 0x3c3   :  { %v3132_v62 = vcvt.s32.f32 %v3125_v36  ;;  %v2290_v50 = vmul.u32 %v2288_v27, %v8150_v18  ;;  %v2293_v14 = vmul.u32 %v2289_v2, %v2287_v54  ;;  %v2294_v6 = vshll.u32 %v2291_v38, 16 }
 0x3c4   :  { %v3130_v44 = vand.u32 2147483647, %v3129_v60  ;;  %v2296_v22 = vshll.u32 %v2292_v0, 16  ;;  %v2318_v10 = vshll.u32 %v2314_v1, 16  ;;  %vm2320_vm9 = vc.u32 %v2312_v8, %v2316_v58 }
 0x3c5   :  { %vm2298_vm10 = vc.u32 %v2290_v50, %v2294_v6  ;;  %v2300_v42 = vadd.s32 %v2294_v6, %v2290_v50  ;;  %v2321_v51 = vsel %vm2320_vm9, 1, %v9623_v29  ;;  %v2322_v17 = vadd.s32 %v2316_v58, %v2312_v8 }
 0x3c6   :  { %v3133_v45 = vmul.f32 %v3132_v62, %v3130_v44  ;;  %v2299_v28 = vsel %vm2298_vm10, 1, %v9623_v29  ;;  %v2323_v57 = vadd.s32 %v2321_v51, %v2315_v19  ;;  %vm2403_vm11 = vcmp.gt.s32.totalorder %v8181_v13, 0 }
 0x3c7   :  { %v2301_v15 = vadd.s32 %v2299_v28, %v2293_v14  ;;  %vm2302_vm12 = vc.u32 %v2300_v42, %v2296_v22  ;;  %v2317_v18 = vshrl.u32 %v2313_v3, 16  ;;  %vm2324_vm14 = vc.u32 %v2322_v17, %v2318_v10 }
 0x3c8   :  { %v3134_v54 = vxor.u32 2147483648, %v3133_v45  ;;  %v2303_v41 = vsel %vm2302_vm12, 1, %v9623_v29  ;;  %v2325_v26 = vsel %vm2324_vm14, 1, %v9623_v29  ;;  %v2404_v25 = vsel %vm2403_vm11, %v8181_v13, 0 }
 0x3c9   :  { %v2295_v4 = vshrl.u32 %v2291_v38, 16  ;;  %v2305_v48 = vadd.s32 %v2303_v41, %v2301_v15  ;;  %v2327_v27 = vadd.s32 %v2325_v26, %v2323_v57  ;;  %v2406_v2 = vand.u32 31, %v2404_v25 }
 0x3ca   :  { %v3135_v36 = vsel %vm3014_vm13, %v3134_v54, %v3133_v45  ;;  %v2276_v23 = vsel %vm2270_vm6, %v2273_v47, %v2275_v24  ;;  %v2297_v60 = vshrl.u32 %v2292_v0, 16  ;;  %v2319_v3 = vshrl.u32 %v2314_v1, 16 }
 0x3cb   :  { %v3138_v8 = vsel %vm8186_vm3, %v7860_v40, %v3135_v36  ;;  %v2306_v19 = vadd.s32 %v2305_v48, %v2295_v4  ;;  %v2328_v58 = vadd.s32 %v2327_v27, %v2317_v18  ;;  %v8252_v62 = vsub.s32 32, %v2406_v2 }
 0x3cc   :  { %v8256_v13 = vmul.f32 %v5642_v33, %v9678_v20  ;;  %v3140_v38 = vmul.f32 %v3138_v8, %v3138_v8  ;;  %v3156_v50 = vadd.s32 3, %v3139_v59  ;;  %v2399_v52 = vand.u32 8388607, %v2392_v7 }
 0x3cd   :  { %v8260_v47 = vadd.s32 %v2306_v19, %v2297_v60  ;;  %v8262_v1 = vadd.s32 %v2322_v17, %v2318_v10  ;;  %v2329_v24 = vadd.s32 %v2328_v58, %v2319_v3  ;;  %v2330_v53 = vmul.u32 %v8125_v43, %v2276_v23 }
 0x3ce   :  { %v3141_v0 = vmul.f32 -0.001358992, %v3140_v38  ;;  %v3148_v14 = vmul.f32 -0.00019511016, %v3140_v38  ;;  %v8265_v6 = vshrl.u32 %v2404_v25, 5  ;;  %v2412_v44 = vshll.u32 %v9617_v34, %v2406_v2 }
 0x3cf   :  { %vm2332_vm13 = vc.u32 %v8260_v47, %v8262_v1  ;;  %v2333_v20 = vadd.s32 1, %v2329_v24  ;;  %v2413_v59 = vshrl.u32 %v9618_v56, %v8252_v62  ;;  %v2416_v22 = vshrl.u32 %v9627_v61, %v8252_v62 }
 0x3d0   :  { %v3142_v10 = vadd.f32 0.041655596, %v3141_v0  ;;  %v3149_v42 = vadd.f32 0.008332121, %v3148_v14  ;;  %v2410_v43 = vshrl.u32 %v9617_v34, %v8252_v62  ;;  %v2415_v51 = vshll.u32 %v9618_v56, %v2406_v2 }
 0x3d1   :  { %v2334_v17 = vsel %vm2332_vm13, %v2333_v20, %v2329_v24  ;;  %v2418_v45 = vshll.u32 %v9627_v61, %v2406_v2  ;;  %v2419_v28 = vshrl.u32 %v9626_v16, %v8252_v62  ;;  %v2421_v57 = vshll.u32 %v9626_v16, %v2406_v2 }
 0x3d2   :  { %v3143_v15 = vmul.f32 %v3142_v10, %v3140_v38  ;;  %v3150_v18 = vmul.f32 %v3149_v42, %v3140_v38  ;;  %v2335_v54 = vadd.s32 %v2334_v17, %v2330_v53  ;;  %v2422_v41 = vshrl.u32 %v9619_v55, %v8252_v62 }
 0x3d3   :  { %v2409_v26 = vshll.u32 %v9613_v11, %v2406_v2  ;;  %v8284_v25 = vor.u32 %v2413_v59, %v2412_v44  ;;  %v2417_v4 = vor.u32 %v2416_v22, %v2415_v51  ;;  %v2420_v48 = vor.u32 %v2419_v28, %v2418_v45 }
 0x3d4   :  { %v3144_v27 = vadd.f32 -0.4999988, %v3143_v15  ;;  %v3151_v36 = vadd.f32 -0.16666654, %v3150_v18  ;;  %v2336_v23 = vadd.s32 536870912, %v2335_v54  ;;  %v2423_v60 = vor.u32 %v2422_v41, %v2421_v57 }
 0x3d5   :  { %v3157_v3 = vand.u32 3, %v3156_v50  ;;  %v2400_v19 = vor.u32 8388608, %v2399_v52  ;;  %v8286_v58 = vor.u32 %v2410_v43, %v2409_v26  ;;  %v271_v24 = vadd.f32 %v8141_v12, %v8112_v37 }
 0x3d6   :  { %v3145_v53 = vmul.f32 %v3144_v27, %v3140_v38  ;;  %v3152_v0 = vmul.f32 %v3151_v36, %v3140_v38  ;;  %v8290_v14 = vshrl.u32 %v2336_v23, 30  ;;  %vm2427_vm15 = vcmp.lt.s32.totalorder %v8265_v6, 4 }
 0x3d7   :  { %vm3155_vm0 = vweird.f32 %v7860_v40  ;;  %vm2424_vm1 = vcmp.lt.s32.totalorder %v8265_v6, 1  ;;  %vm2426_vm2 = vcmp.lt.s32.totalorder %v8265_v6, 3  ;;  %v2433_v2 = vsel %vm2427_vm15, %v2420_v48, 920167782 }
 0x3d8   :  { %v2437_v50 = vsel %vm2427_vm15, %v2423_v60, 1326507024  ;;  %v3146_v52 = vadd.f32 1.0, %v3145_v53  ;;  %v3153_v37 = vadd.f32 1.0, %v3152_v0  ;;  %v2338_v12 = vshll.u32 %v8290_v14, 30 }
 0x3d9   :  { %v2436_v38 = vsel %vm2424_vm1, %v8284_v25, %v2417_v4  ;;  %v2432_v44 = vsel %vm2424_vm1, %v8286_v58, %v8284_v25  ;;  %v2434_v20 = vsel %vm2426_vm2, %v2417_v4, %v2433_v2  ;;  %v2438_v59 = vsel %vm2426_vm2, %v2420_v48, %v2437_v50 }
 0x3da   :  { %v8312_v22 = vshll.u32 %v2400_v19, 8  ;;  %v3154_v10 = vmul.f32 %v3153_v37, %v3138_v8  ;;  %v3163_v42 = vxor.u32 2147483648, %v3146_v52  ;;  %v2339_v43 = vsub.s32 %v2335_v54, %v2338_v12  ;;  %v8323_v8 = vpop.permute.xlu0 %326 }
 0x3db   :  { %vm2425_vm3 = vcmp.lt.s32.totalorder %v8265_v6, 2  ;;  %vm3158_vm4 = vcmp.lt.s32.totalorder %v3157_v3, 2  ;;  %vm3159_vm5 = vcmp.eq.s32.totalorder %v3157_v3, 0  ;;  %v8319_v17 = vadd.f32 %v8256_v13, %v8123_v63 }
 0x3dc   :  { %v2439_v51 = vsel %vm2425_vm3, %v2436_v38, %v2438_v59  ;;  %v3160_v45 = vxor.u32 2147483648, %v3154_v10  ;;  %vm2340_vm6 = vcmp.lt.s32.totalorder %v2339_v43, 0  ;;  %v2341_v28 = vsub.s32 0, %v2339_v43 }
 0x3dd   :  { %v2435_v57 = vsel %vm2425_vm3, %v2432_v44, %v2434_v20  ;;  %vm3162_vm7 = vcmp.eq.s32.totalorder %v3157_v3, 2  ;;  %v2441_v15 = vand.u32 65535, %v8312_v22  ;;  %v2443_v18 = vand.u32 65535, %v2439_v51 }
 0x3de   :  { %v2444_v54 = vshrl.u32 %v2439_v51, 16  ;;  %v3161_v41 = vsel %vm3159_vm5, %v3146_v52, %v3160_v45  ;;  %v3164_v26 = vsel %vm3162_vm7, %v3163_v42, %v3154_v10  ;;  %v2342_v48 = vsel %vm2340_vm6, %v2341_v28, %v2339_v43 }
 0x3df   :  { %v2442_v27 = vshrl.u32 %v8312_v22, 16  ;;  %v3165_v63 = vsel %vm3158_vm4, %v3161_v41, %v3164_v26  ;;  %v2343_v13 = vclz %v2342_v48  ;;  %v2466_v36 = vshrl.u32 %v2435_v57, 16 }
 0x3e0   :  { %v8329_v23 = vadd.f32 %v8323_v8, %v271_v24  ;;  %v3166_v60 = vsel %vm3155_vm0, nan, %v3165_v63  ;;  %v2446_v19 = vmul.u32 %v2444_v54, %v2441_v15  ;;  %v2465_v0 = vand.u32 65535, %v2435_v57 }
 0x3e1   :  { %v2447_v53 = vmul.u32 %v2443_v18, %v2442_v27  ;;  %5354 = vst [vmem:[#allocation2 + $0x88] sm:$0xff] %v3166_v60  ;;  %v2331_v2 = vadd.s32 %v8262_v1, %v8260_v47  ;;  %v5425_v50 = vadd.s32 4294967294, %v2343_v13  ;;  %v2408_v3 = vshrl.u32 %v9613_v11, %v8252_v62 }
 0x3e2   :  { %v2429_v52 = vsel %vm2427_vm15, %v2417_v4, 2102212464  ;;  %v2361_v24 = vsub.s32 4, %v8290_v14  ;;  %v2445_v37 = vmul.u32 %v2443_v18, %v2441_v15  ;;  %v2448_v12 = vmul.u32 %v2444_v54, %v2442_v27 }
 0x3e3   :  { %v2449_v40 = vshll.u32 %v2446_v19, 16  ;;  %vm2239_vm8 = vcmp.lt.s32.totalorder %v8073_v49, 0  ;;  %vm5426_vm9 = vcmp.lt.s32.totalorder %v5425_v50, 0  ;;  %v2450_v38 = vshrl.u32 %v2446_v19, 16 }
 0x3e4   :  { %v2451_v44 = vshll.u32 %v2447_v53, 16  ;;  %v2468_v20 = vmul.u32 %v2466_v36, %v2441_v15  ;;  %v2346_v59 = vsel %vm5426_vm9, 0, %v5425_v50  ;;  %v2469_v1 = vmul.u32 %v2465_v0, %v2442_v27 }
 0x3e5   :  { %vm2453_vm10 = vc.u32 %v2445_v37, %v2449_v40  ;;  %v2455_v47 = vadd.s32 %v2449_v40, %v2445_v37  ;;  %v2347_v10 = vsub.s32 32, %v2346_v59  ;;  %v2351_v62 = vsub.s32 4294967266, %v2346_v59 }
 0x3e6   :  { %v2454_v42 = vsel %vm2453_vm10, 1, %v9623_v29  ;;  %v2467_v4 = vmul.u32 %v2465_v0, %v2441_v15  ;;  %v2470_v45 = vmul.u32 %v2466_v36, %v2442_v27  ;;  %v2471_v28 = vshll.u32 %v2468_v20, 16 }
 0x3e7   :  { %v2456_v51 = vadd.s32 %v2454_v42, %v2448_v12  ;;  %vm2457_vm11 = vc.u32 %v2455_v47, %v2451_v44  ;;  %v2348_v57 = vshll.u32 %v2339_v43, %v2346_v59  ;;  %v2349_v18 = vshrl.u32 %v2331_v2, %v2347_v10 }
 0x3e8   :  { %v2352_v54 = vadd.s32 127, %v2351_v62  ;;  %v2458_v41 = vsel %vm2457_vm11, 1, %v9623_v29  ;;  %v2473_v48 = vshll.u32 %v2469_v1, 16  ;;  %vm2475_vm12 = vc.u32 %v2467_v4, %v2471_v28 }
 0x3e9   :  { %v2460_v26 = vadd.s32 %v2458_v41, %v2456_v51  ;;  %v2477_v63 = vadd.s32 %v2471_v28, %v2467_v4  ;;  %v2350_v13 = vor.u32 %v2349_v18, %v2348_v57  ;;  %v2428_v19 = vsel %vm2424_vm1, %v2408_v3, %v8286_v58 }
 0x3ea   :  { %v2353_v60 = vshll.u32 %v2352_v54, 23  ;;  %v2476_v15 = vsel %vm2475_vm12, 1, %v9623_v29  ;;  %v3787_v43 = vand.u32 2147483647, %v8329_v23  ;;  %v2430_v2 = vsel %vm2426_vm2, %v8284_v25, %v2429_v52 }
 0x3eb   :  { %v2461_v0 = vadd.s32 %v2460_v26, %v2450_v38  ;;  %v2478_v27 = vadd.s32 %v2476_v15, %v2470_v45  ;;  %vm2479_vm14 = vc.u32 %v2477_v63, %v2473_v48  ;;  %v2452_v50 = vshrl.u32 %v2447_v53, 16 }
 0x3ec   :  { %v2354_v36 = vor.u32 4788187, %v2353_v60  ;;  %v2480_v37 = vsel %vm2479_vm14, 1, %v9623_v29  ;;  %v2362_v12 = vsel %vm2239_vm8, %v2361_v24, %v8290_v14  ;;  %v2472_v58 = vshrl.u32 %v2468_v20, 16 }
 0x3ed   :  { %v2482_v3 = vadd.s32 %v2480_v37, %v2478_v27  ;;  %v3790_v40 = vand.u32 2139095040, %v8329_v23  ;;  %v2357_v44 = vcvt.s32.f32 %v2350_v13  ;;  %v2462_v59 = vadd.s32 %v2461_v0, %v2452_v50 }
 0x3ee   :  { %v2355_v38 = vand.u32 2147483647, %v2354_v36  ;;  %v8358_v47 = vadd.f32 %v8323_v8, %v8319_v17  ;;  %v2474_v10 = vshrl.u32 %v2469_v1, 16  ;;  %v3794_v52 = vand.u32 8388607, %v3787_v43 }
 0x3ef   :  { %v2483_v25 = vadd.s32 %v2482_v3, %v2472_v58  ;;  %v3791_v53 = vshrl.u32 %v3790_v40, 23  ;;  %v135_v14 = vmul.f32 %v5638_v31, %v9676_v39  ;;  %vm8366_vm13 = vcmp.le.f32.partialorder %v2237_v46, 0.7853982 }
 0x3f0   :  { %v2358_v20 = vmul.f32 %v2357_v44, %v2355_v38  ;;  %v2481_v62 = vadd.s32 %v2477_v63, %v2473_v48  ;;  %v2364_v17 = vsel %vm8366_vm13, 0, %v2362_v12  ;;  %v2431_v8 = vsel %vm2425_vm3, %v2428_v19, %v2430_v2 }
 0x3f1   :  { %v2484_v1 = vadd.s32 %v2483_v25, %v2474_v10  ;;  %v5454_v42 = vadd.s32 4294967169, %v3791_v53  ;;  %v8376_v39 = vadd.f32 %v8133_v5, %v8129_v21  ;;  %v8379_v46 = vadd.f32 %v8137_v9, %v135_v14 }
 0x3f2   :  { %v2359_v4 = vxor.u32 2147483648, %v2358_v20  ;;  %vm2487_vm15 = vc.u32 %v2462_v59, %v2481_v62  ;;  %v3795_v45 = vor.u32 8388608, %v3794_v52  ;;  %v3945_v57 = vand.u32 2139095040, %v8358_v47 }
 0x3f3   :  { %v2488_v51 = vadd.s32 1, %v2484_v1  ;;  %v3797_v28 = vadd.s32 1, %v5454_v42  ;;  %v2485_v18 = vmul.u32 %v8312_v22, %v2431_v8  ;;  %v2381_v5 = vadd.s32 3, %v2364_v17 }
 0x3f4   :  { %v2360_v6 = vsel %vm2239_vm8, %v2359_v4, %v2358_v20  ;;  %v8388_v63 = vshll.u32 %v3795_v45, 8  ;;  %v3946_v13 = vshrl.u32 %v3945_v57, 23  ;;  %v8394_v50 = vadd.s32 %v2481_v62, %v2462_v59 }
 0x3f5   :  { %v2363_v54 = vsel %vm8366_vm13, %v8073_v49, %v2360_v6  ;;  %v2489_v41 = vsel %vm2487_vm15, %v2488_v51, %v2484_v1  ;;  %vm3798_vm0 = vcmp.gt.s32.totalorder %v3797_v28, 0  ;;  %v8392_v36 = vand.u32 3, %v2381_v5 }
 0x3f6   :  { %v2365_v21 = vmul.f32 %v2363_v54, %v2363_v54  ;;  %v2490_v9 = vadd.s32 %v2489_v41, %v2485_v18  ;;  %v3799_v26 = vsel %vm3798_vm0, %v3797_v28, 0  ;;  %v8397_v37 = vand.u32 65535, %v8388_v63 }
 0x3f7   :  { %v3801_v48 = vand.u32 31, %v3799_v26  ;;  %v3942_v12 = vand.u32 2147483647, %v8358_v47  ;;  %v5457_v58 = vadd.s32 4294967169, %v3946_v13  ;;  %vm2394_vm1 = vcmp.lt.s32.totalorder %v8092_v35, 0 }
 0x3f8   :  { %v2366_v60 = vmul.f32 -0.001358992, %v2365_v21  ;;  %v2373_v19 = vmul.f32 -0.00019511016, %v2365_v21  ;;  %v2491_v15 = vadd.s32 536870912, %v2490_v9  ;;  %v8401_v44 = vshrl.u32 %v3799_v26, 5 }
 0x3f9   :  { %v8390_v0 = vsub.s32 32, %v3801_v48  ;;  %v3804_v10 = vshll.u32 %v9613_v11, %v3801_v48  ;;  %vm2387_vm2 = vcmp.eq.s32.totalorder %v8392_v36, 2  ;;  %v3807_v20 = vshll.u32 %v9617_v34, %v3801_v48 }
 0x3fa   :  { %v2367_v22 = vadd.f32 0.041655596, %v2366_v60  ;;  %v2374_v27 = vadd.f32 0.008332121, %v2373_v19  ;;  %v2492_v2 = vshrl.u32 %v2491_v15, 30  ;;  %vm2384_vm3 = vcmp.eq.s32.totalorder %v8392_v36, 0 }
 0x3fb   :  { %v3805_v25 = vshrl.u32 %v9617_v34, %v8390_v0  ;;  %v3808_v59 = vshrl.u32 %v9618_v56, %v8390_v0  ;;  %v3814_v53 = vshrl.u32 %v9626_v16, %v8390_v0  ;;  %v3810_v62 = vshll.u32 %v9618_v56, %v3801_v48 }
 0x3fc   :  { %v2368_v3 = vmul.f32 %v2367_v22, %v2365_v21  ;;  %v2375_v40 = vmul.f32 %v2374_v27, %v2365_v21  ;;  %v2493_v38 = vshll.u32 %v2492_v2, 30  ;;  %v3811_v17 = vshrl.u32 %v9627_v61, %v8390_v0 }
 0x3fd   :  { %v3813_v8 = vshll.u32 %v9627_v61, %v3801_v48  ;;  %v3817_v1 = vshrl.u32 %v9619_v55, %v8390_v0  ;;  %vm2383_vm4 = vcmp.lt.s32.totalorder %v8392_v36, 2  ;;  %vm2380_vm6 = vweird.f32 %v8073_v49 }
 0x3fe   :  { %v2369_v52 = vadd.f32 -0.4999988, %v2368_v3  ;;  %v2376_v14 = vadd.f32 -0.16666654, %v2375_v40  ;;  %v8411_v24 = vsub.s32 %v2490_v9, %v2493_v38  ;;  %v2516_v45 = vsub.s32 4, %v2492_v2 }
 0x3ff   :  { %v3806_v28 = vor.u32 %v3805_v25, %v3804_v10  ;;  %v3809_v57 = vor.u32 %v3808_v59, %v3807_v20  ;;  %v3815_v6 = vor.u32 %v3814_v53, %v3813_v8  ;;  %v3816_v9 = vshll.u32 %v9626_v16, %v3801_v48 }
 0x400   :  { %v2370_v42 = vmul.f32 %v2369_v52, %v2365_v21  ;;  %v2377_v4 = vmul.f32 %v2376_v14, %v2365_v21  ;;  %vm2495_vm5 = vcmp.lt.s32.totalorder %v8411_v24, 0  ;;  %v2496_v51 = vsub.s32 0, %v8411_v24 }
 0x401   :  { %v3812_v21 = vor.u32 %v3811_v17, %v3810_v62  ;;  %v3837_v13 = vshrl.u32 %v8388_v63, 16  ;;  %v8428_v60 = vadd.s32 1, %v5457_v58  ;;  %vm8432_vm7 = vcmp.le.f32.partialorder %v2392_v7, 0.7853982 }
 0x402   :  { %v2371_v18 = vadd.f32 1.0, %v2370_v42  ;;  %v2378_v41 = vadd.f32 1.0, %v2377_v4  ;;  %v2497_v5 = vsel %vm2495_vm5, %v2496_v51, %v8411_v24  ;;  %v3818_v27 = vor.u32 %v3817_v1, %v3816_v9 }
 0x403   :  { %v2498_v26 = vclz %v2497_v5  ;;  %vm3819_vm8 = vcmp.lt.s32.totalorder %v8401_v44, 1  ;;  %v8439_v48 = vsel %vm2394_vm1, %v2516_v45, %v2492_v2  ;;  %vm3822_vm9 = vcmp.lt.s32.totalorder %v8401_v44, 4 }
 0x404   :  { %v2379_v19 = vmul.f32 %v2378_v41, %v2363_v54  ;;  %v2388_v15 = vxor.u32 2147483648, %v2371_v18  ;;  %v3827_v54 = vsel %vm3819_vm8, %v3806_v28, %v3809_v57  ;;  %vm3820_vm10 = vcmp.lt.s32.totalorder %v8401_v44, 2 }
 0x405   :  { %v5428_v3 = vadd.s32 4294967294, %v2498_v26  ;;  %vm3821_vm11 = vcmp.lt.s32.totalorder %v8401_v44, 3  ;;  %v3828_v7 = vsel %vm3822_vm9, %v3815_v6, 920167782  ;;  %v3831_v38 = vsel %vm3819_vm8, %v3809_v57, %v3812_v21 }
 0x406   :  { %v2385_v58 = vxor.u32 2147483648, %v2379_v19  ;;  %v2389_v40 = vsel %vm2387_vm2, %v2388_v15, %v2379_v19  ;;  %v3829_v2 = vsel %vm3821_vm11, %v3812_v21, %v3828_v7  ;;  %v3832_v53 = vsel %vm3822_vm9, %v3818_v27, 1326507024 }
 0x407   :  { %vm5429_vm12 = vcmp.lt.s32.totalorder %v5428_v3, 0  ;;  %v3830_v59 = vsel %vm3820_vm10, %v3827_v54, %v3829_v2  ;;  %v3824_v62 = vsel %vm3822_vm9, %v3812_v21, 2102212464  ;;  %v3833_v8 = vsel %vm3821_vm11, %v3815_v6, %v3832_v53 }
 0x408   :  { %v2386_v10 = vsel %vm2384_vm3, %v2371_v18, %v2385_v58  ;;  %v2501_v25 = vsel %vm5429_vm12, 0, %v5428_v3  ;;  %v3860_v1 = vand.u32 65535, %v3830_v59  ;;  %v3861_v42 = vshrl.u32 %v3830_v59, 16 }
 0x409   :  { %v2390_v52 = vsel %vm2383_vm4, %v2386_v10, %v2389_v40  ;;  %v2502_v14 = vsub.s32 32, %v2501_v25  ;;  %v2506_v20 = vsub.s32 4294967266, %v2501_v25  ;;  %v2503_v4 = vshll.u32 %v8411_v24, %v2501_v25 }
 0x40a   :  { %v2391_v17 = vsel %vm2380_vm6, nan, %v2390_v52  ;;  %v3834_v36 = vsel %vm3820_vm10, %v3831_v38, %v3833_v8  ;;  %v3803_v18 = vshrl.u32 %v9613_v11, %v8390_v0  ;;  %v3863_v5 = vmul.u32 %v3861_v42, %v8397_v37 }
 0x40b   :  { %v2504_v51 = vshrl.u32 %v8394_v50, %v2502_v14  ;;  %v2507_v45 = vadd.s32 127, %v2506_v20  ;;  %5349 = vst [vmem:[#allocation2 + $0x60] sm:$0xff] %v2391_v17  ;;  %v3838_v41 = vand.u32 65535, %v3834_v36  ;;  %v3839_v49 = vshrl.u32 %v3834_v36, 16 }
 0x40c   :  { %v2519_v24 = vsel %vm8432_vm7, 0, %v8439_v48  ;;  %v3864_v26 = vmul.u32 %v3860_v1, %v3837_v13  ;;  %v3823_v50 = vsel %vm3819_vm8, %v3803_v18, %v3806_v28  ;;  %v3825_v21 = vsel %vm3821_vm11, %v3809_v57, %v3824_v62 }
 0x40d   :  { %v2505_v9 = vor.u32 %v2504_v51, %v2503_v4  ;;  %v2508_v6 = vshll.u32 %v2507_v45, 23  ;;  %v3841_v19 = vmul.u32 %v3839_v49, %v8397_v37  ;;  %v3842_v0 = vmul.u32 %v3838_v41, %v3837_v13 }
 0x40e   :  { %v3862_v27 = vmul.u32 %v3860_v1, %v8397_v37  ;;  %v3865_v3 = vmul.u32 %v3861_v42, %v3837_v13  ;;  %v3866_v54 = vshll.u32 %v3863_v5, 16  ;;  %v3840_v7 = vmul.u32 %v3838_v41, %v8397_v37 }
 0x40f   :  { %v2509_v15 = vor.u32 4788187, %v2508_v6  ;;  %v2512_v58 = vcvt.s32.f32 %v2505_v9  ;;  %v3843_v40 = vmul.u32 %v3839_v49, %v3837_v13  ;;  %v3844_v48 = vshll.u32 %v3841_v19, 16 }
 0x410   :  { %v3846_v38 = vshll.u32 %v3842_v0, 16  ;;  %v3868_v10 = vshll.u32 %v3864_v26, 16  ;;  %vm3870_vm14 = vc.u32 %v3862_v27, %v3866_v54  ;;  %v3872_v25 = vadd.s32 %v3866_v54, %v3862_v27 }
 0x411   :  { %v2510_v2 = vand.u32 2147483647, %v2509_v15  ;;  %vm3848_vm13 = vc.u32 %v3840_v7, %v3844_v48  ;;  %v3850_v28 = vadd.s32 %v3844_v48, %v3840_v7  ;;  %v3871_v57 = vsel %vm3870_vm14, 1, %v9623_v29 }
 0x412   :  { %v3849_v53 = vsel %vm3848_vm13, 1, %v9623_v29  ;;  %v3873_v52 = vadd.s32 %v3871_v57, %v3865_v3  ;;  %vm3953_vm15 = vcmp.gt.s32.totalorder %v8428_v60, 0  ;;  %v3867_v37 = vshrl.u32 %v3863_v5, 16 }
 0x413   :  { %v2513_v59 = vmul.f32 %v2512_v58, %v2510_v2  ;;  %v3851_v14 = vadd.s32 %v3849_v53, %v3843_v40  ;;  %vm3852_vm0 = vc.u32 %v3850_v28, %v3846_v38  ;;  %vm3874_vm2 = vc.u32 %v3872_v25, %v3868_v10 }
 0x414   :  { %v3853_v20 = vsel %vm3852_vm0, 1, %v9623_v29  ;;  %v3875_v62 = vsel %vm3874_vm2, 1, %v9623_v29  ;;  %v3954_v17 = vsel %vm3953_vm15, %v8428_v60, 0  ;;  %v3845_v8 = vshrl.u32 %v3841_v19, 16 }
 0x415   :  { %v2514_v13 = vxor.u32 2147483648, %v2513_v59  ;;  %v3855_v1 = vadd.s32 %v3853_v20, %v3851_v14  ;;  %v3877_v42 = vadd.s32 %v3875_v62, %v3873_v52  ;;  %v3956_v4 = vand.u32 31, %v3954_v17 }
 0x416   :  { %v3826_v45 = vsel %vm3820_vm10, %v3823_v50, %v3825_v21  ;;  %v3847_v36 = vshrl.u32 %v3842_v0, 16  ;;  %v3869_v18 = vshrl.u32 %v3864_v26, 16  ;;  %v2536_v6 = vadd.s32 3, %v2519_v24 }
 0x417   :  { %v2515_v51 = vsel %vm2394_vm1, %v2514_v13, %v2513_v59  ;;  %v3856_v49 = vadd.s32 %v3855_v1, %v3845_v8  ;;  %v3878_v5 = vadd.s32 %v3877_v42, %v3867_v37  ;;  %v8498_v9 = vsub.s32 32, %v3956_v4 }
 0x418   :  { %v2518_v41 = vsel %vm8432_vm7, %v8092_v35, %v2515_v51  ;;  %v3949_v19 = vand.u32 8388607, %v3942_v12  ;;  %v8504_v27 = vadd.s32 %v3872_v25, %v3868_v10  ;;  %v3880_v26 = vmul.u32 %v8388_v63, %v3826_v45 }
 0x419   :  { %v2520_v60 = vmul.f32 %v2518_v41, %v2518_v41  ;;  %v8502_v15 = vadd.s32 %v3856_v49, %v3847_v36  ;;  %v3879_v44 = vadd.s32 %v3878_v5, %v3869_v18  ;;  %v8507_v22 = vshrl.u32 %v3954_v17, 5 }
 0x41a   :  { %v3962_v0 = vshll.u32 %v9617_v34, %v3956_v4  ;;  %v3963_v3 = vshrl.u32 %v9618_v56, %v8498_v9  ;;  %v3966_v54 = vshrl.u32 %v9627_v61, %v8498_v9  ;;  %v3960_v63 = vshrl.u32 %v9617_v34, %v8498_v9 }
 0x41b   :  { %v2521_v50 = vmul.f32 -0.001358992, %v2520_v60  ;;  %v2528_v21 = vmul.f32 -0.00019511016, %v2520_v60  ;;  %vm3882_vm1 = vc.u32 %v8502_v15, %v8504_v27  ;;  %v3883_v24 = vadd.s32 1, %v3879_v44 }
 0x41c   :  { %v3965_v40 = vshll.u32 %v9618_v56, %v3956_v4  ;;  %v3968_v2 = vshll.u32 %v9627_v61, %v3956_v4  ;;  %v3969_v38 = vshrl.u32 %v9626_v16, %v8498_v9  ;;  %v3971_v10 = vshll.u32 %v9626_v16, %v3956_v4 }
 0x41d   :  { %v2522_v58 = vadd.f32 0.041655596, %v2521_v50  ;;  %v2529_v7 = vadd.f32 0.008332121, %v2528_v21  ;;  %v3884_v48 = vsel %vm3882_vm1, %v3883_v24, %v3879_v44  ;;  %v3972_v59 = vshrl.u32 %v9619_v55, %v8498_v9 }
 0x41e   :  { %v3885_v25 = vadd.s32 %v3884_v48, %v3880_v26  ;;  %v3959_v53 = vshll.u32 %v9613_v11, %v3956_v4  ;;  %v8526_v52 = vor.u32 %v3963_v3, %v3962_v0  ;;  %v3967_v14 = vor.u32 %v3966_v54, %v3965_v40 }
 0x41f   :  { %v2523_v28 = vmul.f32 %v2522_v58, %v2520_v60  ;;  %v2530_v57 = vmul.f32 %v2529_v7, %v2520_v60  ;;  %v3970_v37 = vor.u32 %v3969_v38, %v3968_v2  ;;  %v3973_v17 = vor.u32 %v3972_v59, %v3971_v10 }
 0x420   :  { %v3886_v62 = vadd.s32 536870912, %v3885_v25  ;;  %v2537_v8 = vand.u32 3, %v2536_v6  ;;  %v3950_v1 = vor.u32 8388608, %v3949_v19  ;;  %v8528_v42 = vor.u32 %v3960_v63, %v3959_v53  ;;  %v319_v53 = vpop.permute.xlu1 %318 }
 0x421   :  { %v2524_v13 = vadd.f32 -0.4999988, %v2523_v28  ;;  %v2531_v20 = vadd.f32 -0.16666654, %v2530_v57  ;;  %vm3977_vm3 = vcmp.lt.s32.totalorder %v8507_v22, 4  ;;  %vm3974_vm4 = vcmp.lt.s32.totalorder %v8507_v22, 1 }
 0x422   :  { %v8530_v36 = vshrl.u32 %v3886_v62, 30  ;;  %vm3976_vm5 = vcmp.lt.s32.totalorder %v8507_v22, 3  ;;  %v3983_v4 = vsel %vm3977_vm3, %v3970_v37, 920167782  ;;  %v3987_v18 = vsel %vm3977_vm3, %v3973_v17, 1326507024 }
 0x423   :  { %v2525_v51 = vmul.f32 %v2524_v13, %v2520_v60  ;;  %v2532_v45 = vmul.f32 %v2531_v20, %v2520_v60  ;;  %v3986_v60 = vsel %vm3974_vm4, %v8526_v52, %v3967_v14  ;;  %v3982_v19 = vsel %vm3974_vm4, %v8528_v42, %v8526_v52 }
 0x424   :  { %v3888_v6 = vshll.u32 %v8530_v36, 30  ;;  %v3984_v44 = vsel %vm3976_vm5, %v3967_v14, %v3983_v4  ;;  %v3988_v26 = vsel %vm3976_vm5, %v3970_v37, %v3987_v18  ;;  %v8551_v50 = vshll.u32 %v3950_v1, 8 }
 0x425   :  { %v2526_v49 = vadd.f32 1.0, %v2525_v51  ;;  %v2533_v5 = vadd.f32 1.0, %v2532_v45  ;;  %vm3975_vm6 = vcmp.lt.s32.totalorder %v8507_v22, 2  ;;  %vm2535_vm7 = vweird.f32 %v8092_v35 }
 0x426   :  { %v3889_v24 = vsub.s32 %v3885_v25, %v3888_v6  ;;  %vm2538_vm8 = vcmp.lt.s32.totalorder %v2537_v8, 2  ;;  %vm2539_vm9 = vcmp.eq.s32.totalorder %v2537_v8, 0  ;;  %v3989_v3 = vsel %vm3975_vm6, %v3986_v60, %v3988_v26 }
 0x427   :  { %v2534_v21 = vmul.f32 %v2533_v5, %v2518_v41  ;;  %v2543_v0 = vxor.u32 2147483648, %v2526_v49  ;;  %v3985_v7 = vsel %vm3975_vm6, %v3982_v19, %v3984_v44  ;;  %vm2542_vm11 = vcmp.eq.s32.totalorder %v2537_v8, 2 }
 0x428   :  { %vm3890_vm10 = vcmp.lt.s32.totalorder %v3889_v24, 0  ;;  %v3891_v58 = vsub.s32 0, %v3889_v24  ;;  %v3991_v41 = vand.u32 65535, %v8551_v50  ;;  %v3993_v63 = vand.u32 65535, %v3989_v3 }
 0x429   :  { %v2540_v54 = vxor.u32 2147483648, %v2534_v21  ;;  %v3994_v40 = vshrl.u32 %v3989_v3, 16  ;;  %v2544_v2 = vsel %vm2542_vm11, %v2543_v0, %v2534_v21  ;;  %v3992_v10 = vshrl.u32 %v8551_v50, 16 }
 0x42a   :  { %v3892_v38 = vsel %vm3890_vm10, %v3891_v58, %v3889_v24  ;;  %v3958_v25 = vshrl.u32 %v9613_v11, %v8498_v9  ;;  %v4016_v59 = vshrl.u32 %v3985_v7, 16  ;;  %v4015_v62 = vand.u32 65535, %v3985_v7 }
 0x42b   :  { %v2541_v48 = vsel %vm2539_vm9, %v2526_v49, %v2540_v54  ;;  %v3893_v57 = vclz %v3892_v38  ;;  %v3996_v13 = vmul.u32 %v3994_v40, %v3991_v41  ;;  %v3997_v20 = vmul.u32 %v3993_v63, %v3992_v10 }
 0x42c   :  { %v2545_v28 = vsel %vm2538_vm8, %v2541_v48, %v2544_v2  ;;  %v3881_v17 = vadd.s32 %v8504_v27, %v8502_v15  ;;  %v3911_v1 = vsub.s32 4, %v8530_v36  ;;  %v3979_v51 = vsel %vm3977_vm3, %v3967_v14, 2102212464 }
 0x42d   :  { %v2546_v37 = vsel %vm2535_vm7, nan, %v2545_v28  ;;  %v5455_v8 = vadd.s32 4294967294, %v3893_v57  ;;  %v3995_v45 = vmul.u32 %v3993_v63, %v3991_v41  ;;  %v3998_v9 = vmul.u32 %v3994_v40, %v3992_v10 }
 0x42e   :  { %5350 = vst [vmem:[#allocation2 + $0x68] sm:$0xff] %v2546_v37  ;;  %v3999_v4 = vshll.u32 %v3996_v13, 16  ;;  %v8571_v18 = vadd.f32 %v319_v53, %v8376_v39  ;;  %vm3789_vm12 = vcmp.lt.s32.totalorder %v8329_v23, 0  ;;  %v4000_v35 = vshrl.u32 %v3996_v13, 16 }
 0x42f   :  { %vm5456_vm14 = vcmp.lt.s32.totalorder %v5455_v8, 0  ;;  %v4001_v49 = vshll.u32 %v3997_v20, 16  ;;  %v4018_v5 = vmul.u32 %v4016_v59, %v3991_v41  ;;  %v4019_v27 = vmul.u32 %v4015_v62, %v3992_v10 }
 0x430   :  { %v3896_v6 = vsel %vm5456_vm14, 0, %v5455_v8  ;;  %vm4003_vm13 = vc.u32 %v3995_v45, %v3999_v4  ;;  %v4005_v15 = vadd.s32 %v3999_v4, %v3995_v45  ;;  %v4017_v44 = vmul.u32 %v4015_v62, %v3991_v41 }
 0x431   :  { %v3897_v60 = vsub.s32 32, %v3896_v6  ;;  %v3901_v19 = vsub.s32 4294967266, %v3896_v6  ;;  %v4004_v14 = vsel %vm4003_vm13, 1, %v9623_v29  ;;  %v4020_v21 = vmul.u32 %v4016_v59, %v3992_v10 }
 0x432   :  { %v4006_v26 = vadd.s32 %v4004_v14, %v3998_v9  ;;  %vm4007_vm15 = vc.u32 %v4005_v15, %v4001_v49  ;;  %v4021_v39 = vshll.u32 %v4018_v5, 16  ;;  %v3898_v0 = vshll.u32 %v3889_v24, %v3896_v6 }
 0x433   :  { %v3899_v3 = vshrl.u32 %v3881_v17, %v3897_v60  ;;  %v3902_v54 = vadd.s32 127, %v3901_v19  ;;  %v4008_v58 = vsel %vm4007_vm15, 1, %v9623_v29  ;;  %v4023_v63 = vshll.u32 %v4019_v27, 16 }
 0x434   :  { %v4010_v7 = vadd.s32 %v4008_v58, %v4006_v26  ;;  %vm4025_vm0 = vc.u32 %v4017_v44, %v4021_v39  ;;  %v4027_v40 = vadd.s32 %v4021_v39, %v4017_v44  ;;  %v3978_v38 = vsel %vm3974_vm4, %v3958_v25, %v8528_v42  ;;  %v9687_v26 = vld [vmem:[#allocation7_spill] sm:$0xff] }
 0x435   :  { %v3900_v48 = vor.u32 %v3899_v3, %v3898_v0  ;;  %v3903_v2 = vshll.u32 %v3902_v54, 23  ;;  %v4026_v41 = vsel %vm4025_vm0, 1, %v9623_v29  ;;  %v3980_v24 = vsel %vm3976_vm5, %v8526_v52, %v3979_v51 }
 0x436   :  { %v4011_v10 = vadd.s32 %v4010_v7, %v4000_v35  ;;  %v4028_v28 = vadd.s32 %v4026_v41, %v4020_v21  ;;  %vm4029_vm2 = vc.u32 %v4027_v40, %v4023_v63  ;;  %v4002_v59 = vshrl.u32 %v3997_v20, 16 }
 0x437   :  { %v3904_v57 = vor.u32 4788187, %v3903_v2  ;;  %v4030_v37 = vsel %vm4029_vm2, 1, %v9623_v29  ;;  %v3167_v13 = vand.u32 2147483647, %v8571_v18  ;;  %v3912_v62 = vsel %vm3789_vm12, %v3911_v1, %v8530_v36 }
 0x438   :  { %v4022_v42 = vshrl.u32 %v4018_v5, 16  ;;  %v4032_v25 = vadd.s32 %v4030_v37, %v4028_v28  ;;  %v3170_v17 = vand.u32 2139095040, %v8571_v18  ;;  %v3907_v45 = vcvt.s32.f32 %v3900_v48  ;;  %v9688_v48 = vld [vmem:[#allocation11_spill] sm:$0xff] }
 0x439   :  { %v3905_v8 = vand.u32 2147483647, %v3904_v57  ;;  %v4012_v52 = vadd.s32 %v4011_v10, %v4002_v59  ;;  %v4024_v51 = vshrl.u32 %v4019_v27, 16  ;;  %v8590_v4 = vadd.f32 %v319_v53, %v8379_v46  ;;  %v9689_v10 = vld [vmem:[#allocation14_spill] sm:$0xff]  ;;  %v9690_v59 = vld [vmem:[#allocation17_spill] sm:$0xff] }
 0x43a   :  { %v4033_v9 = vadd.s32 %v4032_v25, %v4022_v42  ;;  %v3171_v20 = vshrl.u32 %v3170_v17, 23  ;;  %v3174_v35 = vand.u32 8388607, %v3167_v13  ;;  %v4031_v6 = vadd.s32 %v4027_v40, %v4023_v63 }
 0x43b   :  { %v3908_v49 = vmul.f32 %v3907_v45, %v3905_v8  ;;  %vm8596_vm1 = vcmp.le.f32.partialorder %v3787_v43, 0.7853982  ;;  %v3981_v1 = vsel %vm3975_vm6, %v3978_v38, %v3980_v24  ;;  %v3325_v14 = vand.u32 2139095040, %v8590_v4 }
 0x43c   :  { %v4034_v5 = vadd.s32 %v4033_v9, %v4024_v51  ;;  %v5442_v15 = vadd.s32 4294967169, %v3171_v20  ;;  %v3914_v46 = vsel %vm8596_vm1, 0, %v3912_v62  ;;  %vm4037_vm3 = vc.u32 %v4012_v52, %v4031_v6 }
 0x43d   :  { %v3909_v27 = vxor.u32 2147483648, %v3908_v49  ;;  %v3175_v60 = vor.u32 8388608, %v3174_v35  ;;  %v4035_v44 = vmul.u32 %v8551_v50, %v3981_v1  ;;  %v8610_v22 = vmul.f32 %v5636_v30, %v9687_v26 }
 0x43e   :  { %v4038_v53 = vadd.s32 1, %v4034_v5  ;;  %v3177_v19 = vadd.s32 1, %v5442_v15  ;;  %v3931_v3 = vadd.s32 3, %v3914_v46  ;;  %v8621_v50 = vmul.f32 %v5638_v31, %v9687_v26 }
 0x43f   :  { %v3910_v43 = vsel %vm3789_vm12, %v3909_v27, %v3908_v49  ;;  %v8623_v63 = vshll.u32 %v3175_v60, 8  ;;  %v3326_v40 = vshrl.u32 %v3325_v14, 23  ;;  %v8627_v2 = vmul.f32 %v5636_v30, %v9688_v48 }
 0x440   :  { %v8615_v21 = vsel %vm8596_vm1, %v8329_v23, %v3910_v43  ;;  %v4039_v39 = vsel %vm4037_vm3, %v4038_v53, %v4034_v5  ;;  %vm3178_vm4 = vcmp.gt.s32.totalorder %v3177_v19, 0  ;;  %v8631_v28 = vmul.f32 %v5640_v32, %v9689_v10 }
 0x441   :  { %v3915_v0 = vmul.f32 %v8615_v21, %v8615_v21  ;;  %v4040_v54 = vadd.s32 %v4039_v39, %v4035_v44  ;;  %v3179_v58 = vsel %vm3178_vm4, %v3177_v19, 0  ;;  %v8635_v57 = vmul.f32 %v5642_v33, %v9689_v10 }
 0x442   :  { %v3181_v7 = vand.u32 31, %v3179_v58  ;;  %v8639_v37 = vmul.f32 %v5640_v32, %v9690_v59  ;;  %v8643_v17 = vand.u32 3, %v3931_v3  ;;  %v8645_v45 = vadd.s32 %v4031_v6, %v4012_v52 }
 0x443   :  { %v3916_v38 = vmul.f32 -0.001358992, %v3915_v0  ;;  %v3923_v41 = vmul.f32 -0.00019511016, %v3915_v0  ;;  %v4041_v24 = vadd.s32 536870912, %v4040_v54  ;;  %v8648_v51 = vand.u32 65535, %v8623_v63 }
 0x444   :  { %v8641_v62 = vsub.s32 32, %v3181_v7  ;;  %v3322_v9 = vand.u32 2147483647, %v8590_v4  ;;  %v5445_v20 = vadd.s32 4294967169, %v3326_v40  ;;  %vm3944_vm5 = vcmp.lt.s32.totalorder %v8358_v47, 0 }
 0x445   :  { %v3917_v42 = vadd.f32 0.041655596, %v3916_v38  ;;  %v3924_v25 = vadd.f32 0.008332121, %v3923_v41  ;;  %v4042_v8 = vshrl.u32 %v4041_v24, 30  ;;  %v8652_v1 = vshrl.u32 %v3179_v58, 5 }
 0x446   :  { %v3184_v5 = vshll.u32 %v9613_v11, %v3181_v7  ;;  %v3185_v15 = vshrl.u32 %v9617_v34, %v8641_v62  ;;  %v3188_v52 = vshrl.u32 %v9618_v56, %v8641_v62  ;;  %v3194_v6 = vshrl.u32 %v9626_v16, %v8641_v62 }
 0x447   :  { %v3918_v35 = vmul.f32 %v3917_v42, %v3915_v0  ;;  %v3925_v49 = vmul.f32 %v3924_v25, %v3915_v0  ;;  %v4043_v36 = vshll.u32 %v4042_v8, 30  ;;  %vm3937_vm6 = vcmp.eq.s32.totalorder %v8643_v17, 2 }
 0x448   :  { %v3187_v60 = vshll.u32 %v9617_v34, %v3181_v7  ;;  %vm3934_vm7 = vcmp.eq.s32.totalorder %v8643_v17, 0  ;;  %v3190_v19 = vshll.u32 %v9618_v56, %v3181_v7  ;;  %v3191_v14 = vshrl.u32 %v9627_v61, %v8641_v62 }
 0x449   :  { %v3919_v27 = vadd.f32 -0.4999988, %v3918_v35  ;;  %v3926_v46 = vadd.f32 -0.16666654, %v3925_v49  ;;  %v8662_v53 = vsub.s32 %v4040_v54, %v4043_v36  ;;  %v3193_v43 = vshll.u32 %v9627_v61, %v3181_v7 }
 0x44a   :  { %v3197_v44 = vshrl.u32 %v9619_v55, %v8641_v62  ;;  %vm3933_vm8 = vcmp.lt.s32.totalorder %v8643_v17, 2  ;;  %vm3930_vm10 = vweird.f32 %v8329_v23  ;;  %v4066_v54 = vsub.s32 4, %v4042_v8 }
 0x44b   :  { %v3920_v26 = vmul.f32 %v3919_v27, %v3915_v0  ;;  %v3927_v39 = vmul.f32 %v3926_v46, %v3915_v0  ;;  %vm4045_vm9 = vcmp.lt.s32.totalorder %v8662_v53, 0  ;;  %v4046_v3 = vsub.s32 0, %v8662_v53 }
 0x44c   :  { %v3186_v58 = vor.u32 %v3185_v15, %v3184_v5  ;;  %v3189_v40 = vor.u32 %v3188_v52, %v3187_v60  ;;  %v3195_v38 = vor.u32 %v3194_v6, %v3193_v43  ;;  %v3196_v42 = vshll.u32 %v9626_v16, %v3181_v7 }
 0x44d   :  { %v3921_v41 = vadd.f32 1.0, %v3920_v26  ;;  %v3928_v24 = vadd.f32 1.0, %v3927_v39  ;;  %v4047_v10 = vsel %vm4045_vm9, %v4046_v3, %v8662_v53  ;;  %v3192_v0 = vor.u32 %v3191_v14, %v3190_v19 }
 0x44e   :  { %v4048_v25 = vclz %v4047_v10  ;;  %v3217_v35 = vshrl.u32 %v8623_v63, 16  ;;  %v8679_v49 = vadd.s32 1, %v5445_v20  ;;  %vm8684_vm11 = vcmp.le.f32.partialorder %v3942_v12, 0.7853982 }
 0x44f   :  { %v3929_v36 = vmul.f32 %v3928_v24, %v8615_v21  ;;  %v3938_v27 = vxor.u32 2147483648, %v3921_v41  ;;  %v3198_v15 = vor.u32 %v3197_v44, %v3196_v42  ;;  %vm3199_vm12 = vcmp.lt.s32.totalorder %v8652_v1, 1 }
 0x450   :  { %v5458_v52 = vadd.s32 4294967294, %v4048_v25  ;;  %v8691_v7 = vsel %vm3944_vm5, %v4066_v54, %v4042_v8  ;;  %vm3202_vm14 = vcmp.lt.s32.totalorder %v8652_v1, 4  ;;  %v3207_v21 = vsel %vm3199_vm12, %v3186_v58, %v3189_v40 }
 0x451   :  { %v3935_v20 = vxor.u32 2147483648, %v3929_v36  ;;  %vm3200_vm13 = vcmp.lt.s32.totalorder %v8652_v1, 2  ;;  %vm3201_vm15 = vcmp.lt.s32.totalorder %v8652_v1, 3  ;;  %v3208_v12 = vsel %vm3202_vm14, %v3195_v38, 920167782 }
 0x452   :  { %v3939_v6 = vsel %vm3937_vm6, %v3938_v27, %v3929_v36  ;;  %vm5459_vm0 = vcmp.lt.s32.totalorder %v5458_v52, 0  ;;  %v3209_v8 = vsel %vm3201_vm15, %v3192_v0, %v3208_v12  ;;  %v3211_v46 = vsel %vm3199_vm12, %v3189_v40, %v3192_v0 }
 0x453   :  { %v3936_v60 = vsel %vm3934_vm7, %v3921_v41, %v3935_v20  ;;  %v4051_v19 = vsel %vm5459_vm0, 0, %v5458_v52  ;;  %v3210_v14 = vsel %vm3200_vm13, %v3207_v21, %v3209_v8  ;;  %v3212_v43 = vsel %vm3202_vm14, %v3198_v15, 1326507024 }
 0x454   :  { %v3940_v44 = vsel %vm3933_vm8, %v3936_v60, %v3939_v6  ;;  %v4052_v26 = vsub.s32 32, %v4051_v19  ;;  %v4056_v39 = vsub.s32 4294967266, %v4051_v19  ;;  %v3204_v3 = vsel %vm3202_vm14, %v3192_v0, 2102212464 }
 0x455   :  { %v3941_v54 = vsel %vm3930_vm10, nan, %v3940_v44  ;;  %v3213_v41 = vsel %vm3201_vm15, %v3195_v38, %v3212_v43  ;;  %v3240_v24 = vand.u32 65535, %v3210_v14  ;;  %v3241_v10 = vshrl.u32 %v3210_v14, 16 }
 0x456   :  { %v4053_v42 = vshll.u32 %v8662_v53, %v4051_v19  ;;  %v4054_v25 = vshrl.u32 %v8645_v45, %v4052_v26  ;;  %v4057_v36 = vadd.s32 127, %v4056_v39  ;;  %5359 = vst [vmem:[#allocation2 + $0xb0] sm:$0xff] %v3941_v54  ;;  %v3214_v17 = vsel %vm3200_vm13, %v3211_v46, %v3213_v41 }
 0x457   :  { %v3183_v0 = vshrl.u32 %v9613_v11, %v8641_v62  ;;  %v3218_v27 = vand.u32 65535, %v3214_v17  ;;  %v3219_v23 = vshrl.u32 %v3214_v17, 16  ;;  %v3243_v15 = vmul.u32 %v3241_v10, %v8648_v51 }
 0x458   :  { %v4055_v52 = vor.u32 %v4054_v25, %v4053_v42  ;;  %v4058_v38 = vshll.u32 %v4057_v36, 23  ;;  %v4069_v53 = vsel %vm8684_vm11, 0, %v8691_v7  ;;  %v3244_v21 = vmul.u32 %v3240_v24, %v3217_v35 }
 0x459   :  { %v3203_v45 = vsel %vm3199_vm12, %v3183_v0, %v3186_v58  ;;  %v3205_v20 = vsel %vm3201_vm15, %v3189_v40, %v3204_v3  ;;  %v3221_v12 = vmul.u32 %v3219_v23, %v8648_v51  ;;  %v3222_v62 = vmul.u32 %v3218_v27, %v3217_v35 }
 0x45a   :  { %v4059_v6 = vor.u32 4788187, %v4058_v38  ;;  %v3242_v8 = vmul.u32 %v3240_v24, %v8648_v51  ;;  %v3245_v46 = vmul.u32 %v3241_v10, %v3217_v35  ;;  %v3246_v60 = vshll.u32 %v3243_v15, 16 }
 0x45b   :  { %v4062_v19 = vcvt.s32.f32 %v4055_v52  ;;  %v3220_v14 = vmul.u32 %v3218_v27, %v8648_v51  ;;  %v3223_v43 = vmul.u32 %v3219_v23, %v3217_v35  ;;  %v3224_v7 = vshll.u32 %v3221_v12, 16 }
 0x45c   :  { %v4060_v44 = vand.u32 2147483647, %v4059_v6  ;;  %v3226_v26 = vshll.u32 %v3222_v62, 16  ;;  %v3248_v39 = vshll.u32 %v3244_v21, 16  ;;  %vm3250_vm2 = vc.u32 %v3242_v8, %v3246_v60 }
 0x45d   :  { %vm3228_vm1 = vc.u32 %v3220_v14, %v3224_v7  ;;  %v3230_v58 = vadd.s32 %v3224_v7, %v3220_v14  ;;  %v3251_v40 = vsel %vm3250_vm2, 1, %v9623_v29  ;;  %v3252_v3 = vadd.s32 %v3246_v60, %v3242_v8 }
 0x45e   :  { %v4063_v54 = vmul.f32 %v4062_v19, %v4060_v44  ;;  %v3229_v41 = vsel %vm3228_vm1, 1, %v9623_v29  ;;  %v3253_v24 = vadd.s32 %v3251_v40, %v3245_v46  ;;  %vm3333_vm3 = vcmp.gt.s32.totalorder %v8679_v49, 0 }
 0x45f   :  { %v3231_v10 = vadd.s32 %v3229_v41, %v3223_v43  ;;  %vm3232_vm4 = vc.u32 %v3230_v58, %v3226_v26  ;;  %v3247_v51 = vshrl.u32 %v3243_v15, 16  ;;  %vm3254_vm6 = vc.u32 %v3252_v3, %v3248_v39 }
 0x460   :  { %v4064_v35 = vxor.u32 2147483648, %v4063_v54  ;;  %v3233_v42 = vsel %vm3232_vm4, 1, %v9623_v29  ;;  %v3255_v25 = vsel %vm3254_vm6, 1, %v9623_v29  ;;  %v3334_v36 = vsel %vm3333_vm3, %v8679_v49, 0 }
 0x461   :  { %v3225_v17 = vshrl.u32 %v3221_v12, 16  ;;  %v3235_v0 = vadd.s32 %v3233_v42, %v3231_v10  ;;  %v3257_v27 = vadd.s32 %v3255_v25, %v3253_v24  ;;  %v3336_v23 = vand.u32 31, %v3334_v36 }
 0x462   :  { %v4065_v52 = vsel %vm3944_vm5, %v4064_v35, %v4063_v54  ;;  %v3206_v38 = vsel %vm3200_vm13, %v3203_v45, %v3205_v20  ;;  %v3227_v6 = vshrl.u32 %v3222_v62, 16  ;;  %v3249_v15 = vshrl.u32 %v3244_v21, 16 }
 0x463   :  { %v4068_v8 = vsel %vm8684_vm11, %v8358_v47, %v4065_v52  ;;  %v3236_v46 = vadd.s32 %v3235_v0, %v3225_v17  ;;  %v3258_v60 = vadd.s32 %v3257_v27, %v3247_v51  ;;  %v8750_v19 = vsub.s32 32, %v3336_v23 }
 0x464   :  { %v8754_v49 = vmul.f32 %v5642_v33, %v9690_v59  ;;  %v4070_v12 = vmul.f32 %v4068_v8, %v4068_v8  ;;  %v4086_v14 = vadd.s32 3, %v4069_v53  ;;  %v3329_v1 = vand.u32 8388607, %v3322_v9 }
 0x465   :  { %v8758_v45 = vadd.s32 %v3236_v46, %v3227_v6  ;;  %v8760_v21 = vadd.s32 %v3252_v3, %v3248_v39  ;;  %v3259_v20 = vadd.s32 %v3258_v60, %v3249_v15  ;;  %v3260_v5 = vmul.u32 %v8623_v63, %v3206_v38 }
 0x466   :  { %v4071_v62 = vmul.f32 -0.001358992, %v4070_v12  ;;  %v4078_v43 = vmul.f32 -0.00019511016, %v4070_v12  ;;  %v8763_v7 = vshrl.u32 %v3334_v36, 5  ;;  %v3342_v44 = vshll.u32 %v9617_v34, %v3336_v23 }
 0x467   :  { %vm3262_vm5 = vc.u32 %v8758_v45, %v8760_v21  ;;  %v3263_v59 = vadd.s32 1, %v3259_v20  ;;  %v3343_v53 = vshrl.u32 %v9618_v56, %v8750_v19  ;;  %v3346_v26 = vshrl.u32 %v9627_v61, %v8750_v19 }
 0x468   :  { %v4072_v39 = vadd.f32 0.041655596, %v4071_v62  ;;  %v4079_v58 = vadd.f32 0.008332121, %v4078_v43  ;;  %v3340_v63 = vshrl.u32 %v9617_v34, %v8750_v19  ;;  %v3345_v40 = vshll.u32 %v9618_v56, %v3336_v23 }
 0x469   :  { %v3264_v3 = vsel %vm3262_vm5, %v3263_v59, %v3259_v20  ;;  %v3348_v54 = vshll.u32 %v9627_v61, %v3336_v23  ;;  %v3349_v41 = vshrl.u32 %v9626_v16, %v8750_v19  ;;  %v3351_v24 = vshll.u32 %v9626_v16, %v3336_v23 }
 0x46a   :  { %v4073_v10 = vmul.f32 %v4072_v39, %v4070_v12  ;;  %v4080_v51 = vmul.f32 %v4079_v58, %v4070_v12  ;;  %v3265_v35 = vadd.s32 %v3264_v3, %v3260_v5  ;;  %v3352_v42 = vshrl.u32 %v9619_v55, %v8750_v19 }
 0x46b   :  { %v3339_v25 = vshll.u32 %v9613_v11, %v3336_v23  ;;  %v8782_v36 = vor.u32 %v3343_v53, %v3342_v44  ;;  %v3347_v17 = vor.u32 %v3346_v26, %v3345_v40  ;;  %v3350_v0 = vor.u32 %v3349_v41, %v3348_v54 }
 0x46c   :  { %v4074_v27 = vadd.f32 -0.4999988, %v4073_v10  ;;  %v4081_v52 = vadd.f32 -0.16666654, %v4080_v51  ;;  %v3266_v38 = vadd.s32 536870912, %v3265_v35  ;;  %v3353_v6 = vor.u32 %v3352_v42, %v3351_v24 }
 0x46d   :  { %v4087_v15 = vand.u32 3, %v4086_v14  ;;  %v3330_v46 = vor.u32 8388608, %v3329_v1  ;;  %v8784_v60 = vor.u32 %v3340_v63, %v3339_v25  ;;  %v277_v20 = vadd.f32 %v8639_v37, %v8610_v22 }
 0x46e   :  { %v4075_v5 = vmul.f32 %v4074_v27, %v4070_v12  ;;  %v4082_v62 = vmul.f32 %v4081_v52, %v4070_v12  ;;  %v8788_v43 = vshrl.u32 %v3266_v38, 30  ;;  %vm3357_vm7 = vcmp.lt.s32.totalorder %v8763_v7, 4 }
 0x46f   :  { %vm4085_vm8 = vweird.f32 %v8358_v47  ;;  %vm3354_vm9 = vcmp.lt.s32.totalorder %v8763_v7, 1  ;;  %vm3356_vm10 = vcmp.lt.s32.totalorder %v8763_v7, 3  ;;  %v3363_v23 = vsel %vm3357_vm7, %v3350_v0, 920167782 }
 0x470   :  { %v3367_v14 = vsel %vm3357_vm7, %v3353_v6, 1326507024  ;;  %v4076_v1 = vadd.f32 1.0, %v4075_v5  ;;  %v4083_v22 = vadd.f32 1.0, %v4082_v62  ;;  %v3268_v37 = vshll.u32 %v8788_v43, 30 }
 0x471   :  { %v3366_v12 = vsel %vm3354_vm9, %v8782_v36, %v3347_v17  ;;  %v3362_v44 = vsel %vm3354_vm9, %v8784_v60, %v8782_v36  ;;  %v3364_v59 = vsel %vm3356_vm10, %v3347_v17, %v3363_v23  ;;  %v3368_v53 = vsel %vm3356_vm10, %v3350_v0, %v3367_v14 }
 0x472   :  { %v8810_v26 = vshll.u32 %v3330_v46, 8  ;;  %v4084_v39 = vmul.f32 %v4083_v22, %v4068_v8  ;;  %v4093_v58 = vxor.u32 2147483648, %v4076_v1  ;;  %v3269_v63 = vsub.s32 %v3265_v35, %v3268_v37  ;;  %v8821_v8 = vpop.permute.xlu0 %338 }
 0x473   :  { %vm3355_vm11 = vcmp.lt.s32.totalorder %v8763_v7, 2  ;;  %vm4088_vm12 = vcmp.lt.s32.totalorder %v4087_v15, 2  ;;  %vm4089_vm14 = vcmp.eq.s32.totalorder %v4087_v15, 0  ;;  %v8817_v3 = vadd.f32 %v8754_v49, %v8621_v50 }
 0x474   :  { %v3369_v40 = vsel %vm3355_vm11, %v3366_v12, %v3368_v53  ;;  %v4090_v54 = vxor.u32 2147483648, %v4084_v39  ;;  %vm3270_vm13 = vcmp.lt.s32.totalorder %v3269_v63, 0  ;;  %v3271_v41 = vsub.s32 0, %v3269_v63 }
 0x475   :  { %v3365_v24 = vsel %vm3355_vm11, %v3362_v44, %v3364_v59  ;;  %vm4092_vm15 = vcmp.eq.s32.totalorder %v4087_v15, 2  ;;  %v3371_v10 = vand.u32 65535, %v8810_v26  ;;  %v3373_v51 = vand.u32 65535, %v3369_v40 }
 0x476   :  { %v3374_v35 = vshrl.u32 %v3369_v40, 16  ;;  %v4091_v42 = vsel %vm4089_vm14, %v4076_v1, %v4090_v54  ;;  %v4094_v25 = vsel %vm4092_vm15, %v4093_v58, %v4084_v39  ;;  %v3272_v0 = vsel %vm3270_vm13, %v3271_v41, %v3269_v63 }
 0x477   :  { %v3372_v27 = vshrl.u32 %v8810_v26, 16  ;;  %v4095_v50 = vsel %vm4088_vm12, %v4091_v42, %v4094_v25  ;;  %v3273_v49 = vclz %v3272_v0  ;;  %v3396_v52 = vshrl.u32 %v3365_v24, 16 }
 0x478   :  { %v8827_v38 = vadd.f32 %v8821_v8, %v277_v20  ;;  %v4096_v6 = vsel %vm4085_vm8, nan, %v4095_v50  ;;  %v3376_v46 = vmul.u32 %v3374_v35, %v3371_v10  ;;  %v3395_v62 = vand.u32 65535, %v3365_v24 }
 0x479   :  { %v3377_v5 = vmul.u32 %v3373_v51, %v3372_v27  ;;  %5360 = vst [vmem:[#allocation2 + $0xb8] sm:$0xff] %v4096_v6  ;;  %v3261_v23 = vadd.s32 %v8760_v21, %v8758_v45  ;;  %v5443_v14 = vadd.s32 4294967294, %v3273_v49  ;;  %v3338_v15 = vshrl.u32 %v9613_v11, %v8750_v19 }
 0x47a   :  { %v3359_v1 = vsel %vm3357_vm7, %v3347_v17, 2102212464  ;;  %v3291_v20 = vsub.s32 4, %v8788_v43  ;;  %v3375_v22 = vmul.u32 %v3373_v51, %v3371_v10  ;;  %v3378_v37 = vmul.u32 %v3374_v35, %v3372_v27 }
 0x47b   :  { %v3379_v47 = vshll.u32 %v3376_v46, 16  ;;  %vm3169_vm0 = vcmp.lt.s32.totalorder %v8571_v18, 0  ;;  %vm5444_vm2 = vcmp.lt.s32.totalorder %v5443_v14, 0  ;;  %v3380_v12 = vshrl.u32 %v3376_v46, 16 }
 0x47c   :  { %v3381_v44 = vshll.u32 %v3377_v5, 16  ;;  %v3398_v59 = vmul.u32 %v3396_v52, %v3371_v10  ;;  %v3276_v53 = vsel %vm5444_vm2, 0, %v5443_v14  ;;  %v3399_v21 = vmul.u32 %v3395_v62, %v3372_v27 }
 0x47d   :  { %vm3383_vm1 = vc.u32 %v3375_v22, %v3379_v47  ;;  %v3385_v45 = vadd.s32 %v3379_v47, %v3375_v22  ;;  %v3277_v39 = vsub.s32 32, %v3276_v53  ;;  %v3281_v19 = vsub.s32 4294967266, %v3276_v53 }
 0x47e   :  { %v3384_v58 = vsel %vm3383_vm1, 1, %v9623_v29  ;;  %v3397_v17 = vmul.u32 %v3395_v62, %v3371_v10  ;;  %v3400_v54 = vmul.u32 %v3396_v52, %v3372_v27  ;;  %v3401_v41 = vshll.u32 %v3398_v59, 16 }
 0x47f   :  { %v3386_v40 = vadd.s32 %v3384_v58, %v3378_v37  ;;  %vm3387_vm3 = vc.u32 %v3385_v45, %v3381_v44  ;;  %v3278_v24 = vshll.u32 %v3269_v63, %v3276_v53  ;;  %v3279_v51 = vshrl.u32 %v3261_v23, %v3277_v39 }
 0x480   :  { %v3282_v35 = vadd.s32 127, %v3281_v19  ;;  %v3388_v42 = vsel %vm3387_vm3, 1, %v9623_v29  ;;  %v3403_v0 = vshll.u32 %v3399_v21, 16  ;;  %vm3405_vm4 = vc.u32 %v3397_v17, %v3401_v41 }
 0x481   :  { %v3390_v25 = vadd.s32 %v3388_v42, %v3386_v40  ;;  %v3407_v50 = vadd.s32 %v3401_v41, %v3397_v17  ;;  %v3280_v49 = vor.u32 %v3279_v51, %v3278_v24  ;;  %v3358_v46 = vsel %vm3354_vm9, %v3338_v15, %v8784_v60 }
 0x482   :  { %v3283_v6 = vshll.u32 %v3282_v35, 23  ;;  %v3406_v10 = vsel %vm3405_vm4, 1, %v9623_v29  ;;  %v4717_v63 = vand.u32 2147483647, %v8827_v38  ;;  %v3360_v23 = vsel %vm3356_vm10, %v8782_v36, %v3359_v1 }
 0x483   :  { %v3391_v62 = vadd.s32 %v3390_v25, %v3380_v12  ;;  %v3408_v27 = vadd.s32 %v3406_v10, %v3400_v54  ;;  %vm3409_vm6 = vc.u32 %v3407_v50, %v3403_v0  ;;  %v3382_v14 = vshrl.u32 %v3377_v5, 16 }
 0x484   :  { %v3284_v52 = vor.u32 4788187, %v3283_v6  ;;  %v3410_v22 = vsel %vm3409_vm6, 1, %v9623_v29  ;;  %v3292_v37 = vsel %vm3169_vm0, %v3291_v20, %v8788_v43  ;;  %v3402_v60 = vshrl.u32 %v3398_v59, 16 }
 0x485   :  { %v3412_v15 = vadd.s32 %v3410_v22, %v3408_v27  ;;  %v4720_v47 = vand.u32 2139095040, %v8827_v38  ;;  %v3287_v44 = vcvt.s32.f32 %v3280_v49  ;;  %v3392_v53 = vadd.s32 %v3391_v62, %v3382_v14  ;;  %v9695_v62 = vld [vmem:[#allocation13_spill] sm:$0xff]  ;;  %v9696_v27 = vld [vmem:[#allocation15_spill] sm:$0xff] }
 0x486   :  { %v3285_v12 = vand.u32 2147483647, %v3284_v52  ;;  %v8856_v45 = vadd.f32 %v8821_v8, %v8817_v3  ;;  %v3404_v39 = vshrl.u32 %v3399_v21, 16  ;;  %v4724_v1 = vand.u32 8388607, %v4717_v63 }
 0x487   :  { %v3413_v36 = vadd.s32 %v3412_v15, %v3402_v60  ;;  %v4721_v5 = vshrl.u32 %v4720_v47, 23  ;;  %v141_v43 = vmul.f32 %v5638_v31, %v9688_v48  ;;  %vm8864_vm5 = vcmp.le.f32.partialorder %v3167_v13, 0.7853982 }
 0x488   :  { %v3288_v59 = vmul.f32 %v3287_v44, %v3285_v12  ;;  %v3411_v19 = vadd.s32 %v3407_v50, %v3403_v0  ;;  %v3294_v3 = vsel %vm8864_vm5, 0, %v3292_v37  ;;  %v3361_v8 = vsel %vm3355_vm11, %v3358_v46, %v3360_v23 }
 0x489   :  { %v3414_v21 = vadd.s32 %v3413_v36, %v3404_v39  ;;  %v5472_v58 = vadd.s32 4294967169, %v4721_v5  ;;  %v8874_v48 = vadd.f32 %v8631_v28, %v8627_v2  ;;  %v8877_v13 = vadd.f32 %v8635_v57, %v141_v43 }
 0x48a   :  { %v3289_v17 = vxor.u32 2147483648, %v3288_v59  ;;  %vm3417_vm7 = vc.u32 %v3392_v53, %v3411_v19  ;;  %v4725_v54 = vor.u32 8388608, %v4724_v1  ;;  %v4875_v24 = vand.u32 2139095040, %v8856_v45 }
 0x48b   :  { %v3418_v40 = vadd.s32 1, %v3414_v21  ;;  %v4727_v41 = vadd.s32 1, %v5472_v58  ;;  %v3415_v51 = vmul.u32 %v8810_v26, %v3361_v8  ;;  %v3311_v42 = vadd.s32 3, %v3294_v3 }
 0x48c   :  { %v3290_v7 = vsel %vm3169_vm0, %v3289_v17, %v3288_v59  ;;  %v8886_v50 = vshll.u32 %v4725_v54, 8  ;;  %v4876_v49 = vshrl.u32 %v4875_v24, 23  ;;  %v8890_v26 = vmul.f32 %v5636_v30, %v9695_v62 }
 0x48d   :  { %v3293_v35 = vsel %vm8864_vm5, %v8571_v18, %v3290_v7  ;;  %v3419_v2 = vsel %vm3417_vm7, %v3418_v40, %v3414_v21  ;;  %vm4728_vm8 = vcmp.gt.s32.totalorder %v4727_v41, 0  ;;  %v8894_v52 = vmul.f32 %v5640_v32, %v9696_v27 }
 0x48e   :  { %v3295_v28 = vmul.f32 %v3293_v35, %v3293_v35  ;;  %v3420_v57 = vadd.s32 %v3419_v2, %v3415_v51  ;;  %v4729_v25 = vsel %vm4728_vm8, %v4727_v41, 0  ;;  %v8896_v23 = vand.u32 3, %v3311_v42 }
 0x48f   :  { %v4731_v0 = vand.u32 31, %v4729_v25  ;;  %vm3324_vm9 = vcmp.lt.s32.totalorder %v8590_v4, 0  ;;  %v8899_v60 = vadd.s32 %v3411_v19, %v3392_v53  ;;  %v8901_v47 = vshrl.u32 %v4729_v25, 5 }
 0x490   :  { %v3296_v6 = vmul.f32 -0.001358992, %v3295_v28  ;;  %v3303_v46 = vmul.f32 -0.00019511016, %v3295_v28  ;;  %v3421_v10 = vadd.s32 536870912, %v3420_v57  ;;  %v8904_v12 = vand.u32 65535, %v8886_v50 }
 0x491   :  { %v4732_v14 = vsub.s32 32, %v4731_v0  ;;  %v8907_v30 = vshrl.u32 %v8886_v50, 16  ;;  %v8909_v32 = vadd.s32 4294967169, %v4876_v49  ;;  %v4734_v5 = vshll.u32 %v9613_v11, %v4731_v0 }
 0x492   :  { %v3297_v22 = vadd.f32 0.041655596, %v3296_v6  ;;  %v3304_v37 = vadd.f32 0.008332121, %v3303_v46  ;;  %v3422_v15 = vshrl.u32 %v3421_v10, 30  ;;  %v4737_v53 = vshll.u32 %v9617_v34, %v4731_v0 }
 0x493   :  { %v4735_v1 = vshrl.u32 %v9617_v34, %v4732_v14  ;;  %v4738_v43 = vshrl.u32 %v9618_v56, %v4732_v14  ;;  %v4741_v20 = vshrl.u32 %v9627_v61, %v4732_v14  ;;  %vm3317_vm10 = vcmp.eq.s32.totalorder %v8896_v23, 2 }
 0x494   :  { %v3298_v44 = vmul.f32 %v3297_v22, %v3295_v28  ;;  %v3305_v39 = vmul.f32 %v3304_v37, %v3295_v28  ;;  %v3423_v36 = vshll.u32 %v3422_v15, 30  ;;  %v4744_v8 = vshrl.u32 %v9626_v16, %v4732_v14 }
 0x495   :  { %vm3314_vm11 = vcmp.eq.s32.totalorder %v8896_v23, 0  ;;  %v3446_v21 = vsub.s32 4, %v3422_v15  ;;  %v4740_v58 = vshll.u32 %v9618_v56, %v4731_v0  ;;  %v4743_v17 = vshll.u32 %v9627_v61, %v4731_v0 }
 0x496   :  { %v3299_v59 = vadd.f32 -0.4999988, %v3298_v44  ;;  %v3306_v19 = vadd.f32 -0.16666654, %v3305_v39  ;;  %v8917_v3 = vsub.s32 %v3420_v57, %v3423_v36  ;;  %v4747_v40 = vshrl.u32 %v9619_v55, %v4732_v14 }
 0x497   :  { %vm3313_vm12 = vcmp.lt.s32.totalorder %v8896_v23, 2  ;;  %vm3310_vm13 = vweird.f32 %v8571_v18  ;;  %v4736_v7 = vor.u32 %v4735_v1, %v4734_v5  ;;  %v4739_v51 = vor.u32 %v4738_v43, %v4737_v53 }
 0x498   :  { %v3300_v54 = vmul.f32 %v3299_v59, %v3295_v28  ;;  %v3307_v41 = vmul.f32 %v3306_v19, %v3295_v28  ;;  %vm3425_vm14 = vcmp.lt.s32.totalorder %v8917_v3, 0  ;;  %v3426_v24 = vsub.s32 0, %v8917_v3 }
 0x499   :  { %v4742_v42 = vor.u32 %v4741_v20, %v4740_v58  ;;  %v4746_v2 = vshll.u32 %v9626_v16, %v4731_v0  ;;  %v4745_v6 = vor.u32 %v4744_v8, %v4743_v17  ;;  %v8932_v28 = vsel %vm3324_vm9, %v3446_v21, %v3422_v15 }
 0x49a   :  { %v3301_v57 = vadd.f32 1.0, %v3300_v54  ;;  %v3308_v25 = vadd.f32 1.0, %v3307_v41  ;;  %v3427_v49 = vsel %vm3425_vm14, %v3426_v24, %v8917_v3  ;;  %v4733_v10 = vshrl.u32 %v9613_v11, %v4732_v14 }
 0x49b   :  { %v3428_v46 = vclz %v3427_v49  ;;  %v4748_v22 = vor.u32 %v4747_v40, %v4746_v2  ;;  %vm4749_vm15 = vcmp.lt.s32.totalorder %v8901_v47, 1  ;;  %vm4750_vm0 = vcmp.lt.s32.totalorder %v8901_v47, 2 }
 0x49c   :  { %v3309_v37 = vmul.f32 %v3308_v25, %v3293_v35  ;;  %v3318_v44 = vxor.u32 2147483648, %v3301_v57  ;;  %vm8939_vm2 = vcmp.le.f32.partialorder %v3322_v9, 0.7853982  ;;  %vm4751_vm1 = vcmp.lt.s32.totalorder %v8901_v47, 3 }
 0x49d   :  { %v5446_v39 = vadd.s32 4294967294, %v3428_v46  ;;  %vm4752_vm3 = vcmp.lt.s32.totalorder %v8901_v47, 4  ;;  %v4757_v15 = vsel %vm4749_vm15, %v4736_v7, %v4739_v51  ;;  %v4753_v36 = vsel %vm4749_vm15, %v4733_v10, %v4736_v7 }
 0x49e   :  { %v3315_v14 = vxor.u32 2147483648, %v3309_v37  ;;  %v4754_v35 = vsel %vm4752_vm3, %v4742_v42, 2102212464  ;;  %v4758_v5 = vsel %vm4752_vm3, %v4745_v6, 920167782  ;;  %v3319_v1 = vsel %vm3317_vm10, %v3318_v44, %v3309_v37 }
 0x49f   :  { %vm5447_vm4 = vcmp.lt.s32.totalorder %v5446_v39, 0  ;;  %v4759_v9 = vsel %vm4751_vm1, %v4742_v42, %v4758_v5  ;;  %v4761_v53 = vsel %vm4749_vm15, %v4739_v51, %v4742_v42  ;;  %v4762_v19 = vsel %vm4752_vm3, %v4748_v22, 1326507024 }
 0x4a0   :  { %v3316_v43 = vsel %vm3314_vm11, %v3301_v57, %v3315_v14  ;;  %v3431_v20 = vsel %vm5447_vm4, 0, %v5446_v39  ;;  %v4760_v59 = vsel %vm4750_vm0, %v4757_v15, %v4759_v9  ;;  %v4755_v17 = vsel %vm4751_vm1, %v4739_v51, %v4754_v35 }
 0x4a1   :  { %v3320_v8 = vsel %vm3313_vm12, %v3316_v43, %v3319_v1  ;;  %v3432_v21 = vsub.s32 32, %v3431_v20  ;;  %v3436_v58 = vsub.s32 4294967266, %v3431_v20  ;;  %v4763_v54 = vsel %vm4751_vm1, %v4745_v6, %v4762_v19 }
 0x4a2   :  { %v3321_v40 = vsel %vm3310_vm13, nan, %v3320_v8  ;;  %v4790_v41 = vand.u32 65535, %v4760_v59  ;;  %v4791_v24 = vshrl.u32 %v4760_v59, 16  ;;  %v3433_v7 = vshll.u32 %v8917_v3, %v3431_v20 }
 0x4a3   :  { %v3434_v42 = vshrl.u32 %v8899_v60, %v3432_v21  ;;  %v3437_v2 = vadd.s32 127, %v3436_v58  ;;  %5355 = vst [vmem:[#allocation2 + $0x90] sm:$0xff] %v3321_v40  ;;  %v4764_v23 = vsel %vm4750_vm0, %v4761_v53, %v4763_v54  ;;  %v4872_v18 = vand.u32 2147483647, %v8856_v45 }
 0x4a4   :  { %v4768_v57 = vand.u32 65535, %v4764_v23  ;;  %v4769_v25 = vshrl.u32 %v4764_v23, 16  ;;  %v4793_v51 = vmul.u32 %v4791_v24, %v8904_v12  ;;  %v4794_v6 = vmul.u32 %v4790_v41, %v8907_v30 }
 0x4a5   :  { %v3435_v49 = vor.u32 %v3434_v42, %v3433_v7  ;;  %v3438_v46 = vshll.u32 %v3437_v2, 23  ;;  %v4882_v10 = vadd.s32 1, %v8909_v32  ;;  %v3449_v60 = vsel %vm8939_vm2, 0, %v8932_v28 }
 0x4a6   :  { %v8974_v3 = vsel %vm4750_vm0, %v4753_v36, %v4755_v17  ;;  %v4771_v22 = vmul.u32 %v4769_v25, %v8904_v12  ;;  %v4772_v37 = vmul.u32 %v4768_v57, %v8907_v30  ;;  %v4792_v39 = vmul.u32 %v4790_v41, %v8904_v12 }
 0x4a7   :  { %v3439_v44 = vor.u32 4788187, %v3438_v46  ;;  %v4795_v15 = vmul.u32 %v4791_v24, %v8907_v30  ;;  %v4796_v14 = vshll.u32 %v4793_v51, 16  ;;  %v3442_v35 = vcvt.s32.f32 %v3435_v49 }
 0x4a8   :  { %v4770_v32 = vmul.u32 %v4768_v57, %v8904_v12  ;;  %v4773_v5 = vmul.u32 %v4769_v25, %v8907_v30  ;;  %v4774_v28 = vshll.u32 %v4771_v22, 16  ;;  %v4776_v47 = vshll.u32 %v4772_v37, 16 }
 0x4a9   :  { %v3440_v1 = vand.u32 2147483647, %v3439_v44  ;;  %v4798_v36 = vshll.u32 %v4794_v6, 16  ;;  %vm4800_vm6 = vc.u32 %v4792_v39, %v4796_v14  ;;  %v4802_v43 = vadd.s32 %v4796_v14, %v4792_v39 }
 0x4aa   :  { %vm4778_vm5 = vc.u32 %v4770_v32, %v4774_v28  ;;  %v4780_v9 = vadd.s32 %v4774_v28, %v4770_v32  ;;  %v4801_v53 = vsel %vm4800_vm6, 1, %v9623_v29  ;;  %vm4883_vm7 = vcmp.gt.s32.totalorder %v4882_v10, 0 }
 0x4ab   :  { %v3443_v20 = vmul.f32 %v3442_v35, %v3440_v1  ;;  %v4779_v59 = vsel %vm4778_vm5, 1, %v9623_v29  ;;  %v4803_v19 = vadd.s32 %v4801_v53, %v4795_v15  ;;  %v4797_v12 = vshrl.u32 %v4793_v51, 16 }
 0x4ac   :  { %v4781_v8 = vadd.s32 %v4779_v59, %v4773_v5  ;;  %vm4782_vm8 = vc.u32 %v4780_v9, %v4776_v47  ;;  %vm4804_vm10 = vc.u32 %v4802_v43, %v4798_v36  ;;  %v4884_v17 = vsel %vm4883_vm7, %v4882_v10, 0 }
 0x4ad   :  { %v3444_v30 = vxor.u32 2147483648, %v3443_v20  ;;  %v4783_v21 = vsel %vm4782_vm8, 1, %v9623_v29  ;;  %v4805_v58 = vsel %vm4804_vm10, 1, %v9623_v29  ;;  %v4775_v40 = vshrl.u32 %v4771_v22, 16 }
 0x4ae   :  { %v4785_v54 = vadd.s32 %v4783_v21, %v4781_v8  ;;  %v4807_v41 = vadd.s32 %v4805_v58, %v4803_v19  ;;  %v4886_v24 = vand.u32 31, %v4884_v17  ;;  %v4777_v42 = vshrl.u32 %v4772_v37, 16 }
 0x4af   :  { %v3445_v7 = vsel %vm3324_vm9, %v3444_v30, %v3443_v20  ;;  %v4799_v2 = vshrl.u32 %v4794_v6, 16  ;;  %v8990_v23 = vadd.f32 %v8894_v52, %v8890_v26  ;;  %v8999_v46 = vmul.f32 %v5638_v31, %v9695_v62 }
 0x4b0   :  { %v3448_v57 = vsel %vm8939_vm2, %v8590_v4, %v3445_v7  ;;  %v4786_v25 = vadd.s32 %v4785_v54, %v4775_v40  ;;  %v4808_v51 = vadd.s32 %v4807_v41, %v4797_v12  ;;  %v8995_v49 = vsub.s32 32, %v4886_v24 }
 0x4b1   :  { %v3450_v10 = vmul.f32 %v3448_v57, %v3448_v57  ;;  %v3466_v22 = vadd.s32 3, %v3449_v60  ;;  %v4879_v6 = vand.u32 8388607, %v4872_v18  ;;  %v9005_v26 = vadd.s32 %v4802_v43, %v4798_v36 }
 0x4b2   :  { %v9003_v37 = vadd.s32 %v4786_v25, %v4777_v42  ;;  %v4809_v52 = vadd.s32 %v4808_v51, %v4799_v2  ;;  %v4810_v0 = vmul.u32 %v8886_v50, %v8974_v3  ;;  %v9009_v15 = vshrl.u32 %v4884_v17, 5 }
 0x4b3   :  { %v3451_v44 = vmul.f32 -0.001358992, %v3450_v10  ;;  %v3458_v39 = vmul.f32 -0.00019511016, %v3450_v10  ;;  %v4892_v31 = vshll.u32 %v9617_v34, %v4886_v24  ;;  %v4893_v60 = vshrl.u32 %v9618_v56, %v8995_v49 }
 0x4b4   :  { %vm4812_vm9 = vc.u32 %v9003_v37, %v9005_v26  ;;  %v4813_v62 = vadd.s32 1, %v4809_v52  ;;  %v4896_v14 = vshrl.u32 %v9627_v61, %v8995_v49  ;;  %v4890_v50 = vshrl.u32 %v9617_v34, %v8995_v49 }
 0x4b5   :  { %v3452_v35 = vadd.f32 0.041655596, %v3451_v44  ;;  %v3459_v32 = vadd.f32 0.008332121, %v3458_v39  ;;  %v4895_v3 = vshll.u32 %v9618_v56, %v4886_v24  ;;  %v4898_v28 = vshll.u32 %v9627_v61, %v4886_v24 }
 0x4b6   :  { %v4814_v5 = vsel %vm4812_vm9, %v4813_v62, %v4809_v52  ;;  %v4899_v1 = vshrl.u32 %v9626_v16, %v8995_v49  ;;  %v4901_v47 = vshll.u32 %v9626_v16, %v4886_v24  ;;  %v4902_v43 = vshrl.u32 %v9619_v55, %v8995_v49 }
 0x4b7   :  { %v3453_v36 = vmul.f32 %v3452_v35, %v3450_v10  ;;  %v3460_v9 = vmul.f32 %v3459_v32, %v3450_v10  ;;  %v4815_v53 = vadd.s32 %v4814_v5, %v4810_v0  ;;  %v4889_v20 = vshll.u32 %v9613_v11, %v4886_v24 }
 0x4b8   :  { %v9028_v59 = vor.u32 %v4893_v60, %v4892_v31  ;;  %v4897_v19 = vor.u32 %v4896_v14, %v4895_v3  ;;  %v4900_v8 = vor.u32 %v4899_v1, %v4898_v28  ;;  %v4903_v58 = vor.u32 %v4902_v43, %v4901_v47  ;;  %v331_v43 = vpop.permute.xlu1 %330 }
 0x4b9   :  { %v3454_v12 = vadd.f32 -0.4999988, %v3453_v36  ;;  %v3461_v30 = vadd.f32 -0.16666654, %v3460_v9  ;;  %v4816_v21 = vadd.s32 536870912, %v4815_v53  ;;  %v9032_v17 = vmul.f32 %v5642_v33, %v9696_v27 }
 0x4ba   :  { %v3467_v40 = vand.u32 3, %v3466_v22  ;;  %v4880_v54 = vor.u32 8388608, %v4879_v6  ;;  %v9034_v41 = vor.u32 %v4890_v50, %v4889_v20  ;;  %vm4907_vm11 = vcmp.lt.s32.totalorder %v9009_v15, 4 }
 0x4bb   :  { %v3455_v7 = vmul.f32 %v3454_v12, %v3450_v10  ;;  %v3462_v42 = vmul.f32 %v3461_v30, %v3450_v10  ;;  %v9036_v2 = vshrl.u32 %v4816_v21, 30  ;;  %vm4904_vm12 = vcmp.lt.s32.totalorder %v9009_v15, 1 }
 0x4bc   :  { %vm4906_vm14 = vcmp.lt.s32.totalorder %v9009_v15, 3  ;;  %v4913_v24 = vsel %vm4907_vm11, %v4900_v8, 920167782  ;;  %v4917_v33 = vsel %vm4907_vm11, %v4903_v58, 1326507024  ;;  %v4916_v10 = vsel %vm4904_vm12, %v9028_v59, %v4897_v19 }
 0x4bd   :  { %v3456_v27 = vadd.f32 1.0, %v3455_v7  ;;  %v3463_v25 = vadd.f32 1.0, %v3462_v42  ;;  %v4818_v51 = vshll.u32 %v9036_v2, 30  ;;  %v4912_v22 = vsel %vm4904_vm12, %v9034_v41, %v9028_v59 }
 0x4be   :  { %v4914_v6 = vsel %vm4906_vm14, %v4897_v19, %v4913_v24  ;;  %v4918_v52 = vsel %vm4906_vm14, %v4900_v8, %v4917_v33  ;;  %v9057_v0 = vshll.u32 %v4880_v54, 8  ;;  %vm4905_vm13 = vcmp.lt.s32.totalorder %v9009_v15, 2 }
 0x4bf   :  { %v3464_v44 = vmul.f32 %v3463_v25, %v3448_v57  ;;  %v3473_v39 = vxor.u32 2147483648, %v3456_v27  ;;  %v4819_v31 = vsub.s32 %v4815_v53, %v4818_v51  ;;  %vm3465_vm15 = vweird.f32 %v8590_v4 }
 0x4c0   :  { %vm3468_vm0 = vcmp.lt.s32.totalorder %v3467_v40, 2  ;;  %vm3469_vm2 = vcmp.eq.s32.totalorder %v3467_v40, 0  ;;  %v4919_v62 = vsel %vm4905_vm13, %v4916_v10, %v4918_v52  ;;  %v4915_v35 = vsel %vm4905_vm13, %v4912_v22, %v4914_v6 }
 0x4c1   :  { %v3470_v60 = vxor.u32 2147483648, %v3464_v44  ;;  %vm4820_vm1 = vcmp.lt.s32.totalorder %v4819_v31, 0  ;;  %v4821_v14 = vsub.s32 0, %v4819_v31  ;;  %vm3472_vm3 = vcmp.eq.s32.totalorder %v3467_v40, 2 }
 0x4c2   :  { %v4921_v57 = vand.u32 65535, %v9057_v0  ;;  %v4923_v32 = vand.u32 65535, %v4919_v62  ;;  %v4924_v50 = vshrl.u32 %v4919_v62, 16  ;;  %v3474_v5 = vsel %vm3472_vm3, %v3473_v39, %v3464_v44 }
 0x4c3   :  { %v3471_v3 = vsel %vm3469_vm2, %v3456_v27, %v3470_v60  ;;  %v4822_v28 = vsel %vm4820_vm1, %v4821_v14, %v4819_v31  ;;  %v4922_v1 = vshrl.u32 %v9057_v0, 16  ;;  %v4888_v9 = vshrl.u32 %v9613_v11, %v8995_v49 }
 0x4c4   :  { %v3475_v47 = vsel %vm3468_vm0, %v3471_v3, %v3474_v5  ;;  %v4823_v36 = vclz %v4822_v28  ;;  %v4946_v53 = vshrl.u32 %v4915_v35, 16  ;;  %v4926_v8 = vmul.u32 %v4924_v50, %v4921_v57 }
 0x4c5   :  { %v3476_v20 = vsel %vm3465_vm15, nan, %v3475_v47  ;;  %v4927_v12 = vmul.u32 %v4923_v32, %v4922_v1  ;;  %v4945_v30 = vand.u32 65535, %v4915_v35  ;;  %v4811_v21 = vadd.s32 %v9005_v26, %v9003_v37 }
 0x4c6   :  { %5356 = vst [vmem:[#allocation2 + $0x98] sm:$0xff] %v3476_v20  ;;  %v5473_v58 = vadd.s32 4294967294, %v4823_v36  ;;  %v4841_v40 = vsub.s32 4, %v9036_v2  ;;  %v4909_v54 = vsel %vm4907_vm11, %v4897_v19, 2102212464  ;;  %v4925_v7 = vmul.u32 %v4923_v32, %v4921_v57 }
 0x4c7   :  { %v4928_v49 = vmul.u32 %v4924_v50, %v4922_v1  ;;  %v4929_v42 = vshll.u32 %v4926_v8, 16  ;;  %v9077_v24 = vadd.f32 %v331_v43, %v8874_v48  ;;  %vm4719_vm4 = vcmp.lt.s32.totalorder %v8827_v38, 0 }
 0x4c8   :  { %vm5474_vm6 = vcmp.lt.s32.totalorder %v5473_v58, 0  ;;  %v4930_v4 = vshrl.u32 %v4926_v8, 16  ;;  %v4931_v33 = vshll.u32 %v4927_v12, 16  ;;  %v4948_v27 = vmul.u32 %v4946_v53, %v4921_v57 }
 0x4c9   :  { %v4826_v25 = vsel %vm5474_vm6, 0, %v5473_v58  ;;  %vm4933_vm5 = vc.u32 %v4925_v7, %v4929_v42  ;;  %v4935_v37 = vadd.s32 %v4929_v42, %v4925_v7  ;;  %v4949_v26 = vmul.u32 %v4945_v30, %v4922_v1 }
 0x4ca   :  { %v4827_v51 = vsub.s32 32, %v4826_v25  ;;  %v4831_v10 = vsub.s32 4294967266, %v4826_v25  ;;  %v4934_v19 = vsel %vm4933_vm5, 1, %v9623_v29  ;;  %v4947_v22 = vmul.u32 %v4945_v30, %v4921_v57 }
 0x4cb   :  { %v4936_v6 = vadd.s32 %v4934_v19, %v4928_v49  ;;  %vm4937_vm7 = vc.u32 %v4935_v37, %v4931_v33  ;;  %v4950_v52 = vmul.u32 %v4946_v53, %v4922_v1  ;;  %v4951_v48 = vshll.u32 %v4948_v27, 16 }
 0x4cc   :  { %v4828_v44 = vshll.u32 %v4819_v31, %v4826_v25  ;;  %v4829_v39 = vshrl.u32 %v4811_v21, %v4827_v51  ;;  %v4832_v62 = vadd.s32 127, %v4831_v10  ;;  %v4938_v60 = vsel %vm4937_vm7, 1, %v9623_v29 }
 0x4cd   :  { %v4940_v14 = vadd.s32 %v4938_v60, %v4936_v6  ;;  %v4953_v35 = vshll.u32 %v4949_v26, 16  ;;  %vm4955_vm8 = vc.u32 %v4947_v22, %v4951_v48  ;;  %v4957_v32 = vadd.s32 %v4951_v48, %v4947_v22 }
 0x4ce   :  { %v4830_v50 = vor.u32 %v4829_v39, %v4828_v44  ;;  %v4833_v3 = vshll.u32 %v4832_v62, 23  ;;  %v4908_v5 = vsel %vm4904_vm12, %v4888_v9, %v9034_v41  ;;  %v4956_v57 = vsel %vm4955_vm8, 1, %v9623_v29 }
 0x4cf   :  { %v4910_v31 = vsel %vm4906_vm14, %v9028_v59, %v4909_v54  ;;  %v4941_v28 = vadd.s32 %v4940_v14, %v4930_v4  ;;  %v4958_v1 = vadd.s32 %v4956_v57, %v4950_v52  ;;  %vm4959_vm10 = vc.u32 %v4957_v32, %v4953_v35 }
 0x4d0   :  { %v4834_v47 = vor.u32 4788187, %v4833_v3  ;;  %v4932_v36 = vshrl.u32 %v4927_v12, 16  ;;  %v4960_v53 = vsel %vm4959_vm10, 1, %v9623_v29  ;;  %v4097_v20 = vand.u32 2147483647, %v9077_v24 }
 0x4d1   :  { %v4842_v8 = vsel %vm4719_vm4, %v4841_v40, %v9036_v2  ;;  %v4952_v41 = vshrl.u32 %v4948_v27, 16  ;;  %v4962_v9 = vadd.s32 %v4960_v53, %v4958_v1  ;;  %v4100_v30 = vand.u32 2139095040, %v9077_v24 }
 0x4d2   :  { %v4835_v21 = vand.u32 2147483647, %v4834_v47  ;;  %v4837_v58 = vcvt.s32.f32 %v4830_v50  ;;  %v4942_v59 = vadd.s32 %v4941_v28, %v4932_v36  ;;  %v4954_v54 = vshrl.u32 %v4949_v26, 16 }
 0x4d3   :  { %v4963_v7 = vadd.s32 %v4962_v9, %v4952_v41  ;;  %v9096_v49 = vadd.f32 %v331_v43, %v8877_v13  ;;  %v4101_v12 = vshrl.u32 %v4100_v30, 23  ;;  %v4104_v42 = vand.u32 8388607, %v4097_v20 }
 0x4d4   :  { %vm9102_vm9 = vcmp.le.f32.partialorder %v4717_v63, 0.7853982  ;;  %v4838_v40 = vmul.f32 %v4837_v58, %v4835_v21  ;;  %v4961_v4 = vadd.s32 %v4957_v32, %v4953_v35  ;;  %v4911_v33 = vsel %vm4905_vm13, %v4908_v5, %v4910_v31 }
 0x4d5   :  { %v4964_v27 = vadd.s32 %v4963_v7, %v4954_v54  ;;  %v5460_v25 = vadd.s32 4294967169, %v4101_v12  ;;  %v9110_v13 = vadd.f32 %v9032_v17, %v8999_v46  ;;  %v4844_v37 = vsel %vm9102_vm9, 0, %v4842_v8 }
 0x4d6   :  { %v4839_v43 = vxor.u32 2147483648, %v4838_v40  ;;  %vm4967_vm11 = vc.u32 %v4942_v59, %v4961_v4  ;;  %v4105_v26 = vor.u32 8388608, %v4104_v42  ;;  %v4255_v10 = vand.u32 2139095040, %v9096_v49 }
 0x4d7   :  { %v4968_v63 = vadd.s32 1, %v4964_v27  ;;  %v4107_v51 = vadd.s32 1, %v5460_v25  ;;  %v4965_v19 = vmul.u32 %v9057_v0, %v4911_v33  ;;  %v4861_v6 = vadd.s32 3, %v4844_v37 }
 0x4d8   :  { %v4840_v15 = vsel %vm4719_vm4, %v4839_v43, %v4838_v40  ;;  %v9121_v39 = vshll.u32 %v4105_v26, 8  ;;  %v4256_v62 = vshrl.u32 %v4255_v10, 23  ;;  %v9127_v57 = vadd.s32 %v4961_v4, %v4942_v59 }
 0x4d9   :  { %v4843_v46 = vsel %vm9102_vm9, %v8827_v38, %v4840_v15  ;;  %v4969_v17 = vsel %vm4967_vm11, %v4968_v63, %v4964_v27  ;;  %vm4108_vm12 = vcmp.gt.s32.totalorder %v4107_v51, 0  ;;  %v9125_v3 = vand.u32 3, %v4861_v6 }
 0x4da   :  { %v4845_v22 = vmul.f32 %v4843_v46, %v4843_v46  ;;  %v4970_v52 = vadd.s32 %v4969_v17, %v4965_v19  ;;  %v4109_v48 = vsel %vm4108_vm12, %v4107_v51, 0  ;;  %v9130_v31 = vand.u32 65535, %v9121_v39 }
 0x4db   :  { %v4111_v44 = vand.u32 31, %v4109_v48  ;;  %v4252_v28 = vand.u32 2147483647, %v9096_v49  ;;  %v5463_v1 = vadd.s32 4294967169, %v4256_v62  ;;  %vm4874_vm14 = vcmp.lt.s32.totalorder %v8856_v45, 0 }
 0x4dc   :  { %v4846_v60 = vmul.f32 -0.001358992, %v4845_v22  ;;  %v4853_v14 = vmul.f32 -0.00019511016, %v4845_v22  ;;  %v4971_v35 = vadd.s32 536870912, %v4970_v52  ;;  %v9134_v8 = vshrl.u32 %v4109_v48, 5 }
 0x4dd   :  { %v9123_v32 = vsub.s32 32, %v4111_v44  ;;  %v4114_v41 = vshll.u32 %v9613_v11, %v4111_v44  ;;  %vm4867_vm13 = vcmp.eq.s32.totalorder %v9125_v3, 2  ;;  %v4117_v7 = vshll.u32 %v9617_v34, %v4111_v44 }
 0x4de   :  { %v4847_v0 = vadd.f32 0.041655596, %v4846_v60  ;;  %v4854_v50 = vadd.f32 0.008332121, %v4853_v14  ;;  %v4972_v5 = vshrl.u32 %v4971_v35, 30  ;;  %vm4864_vm15 = vcmp.eq.s32.totalorder %v9125_v3, 0 }
 0x4df   :  { %v4115_v9 = vshrl.u32 %v9617_v34, %v9123_v32  ;;  %v4118_v30 = vshrl.u32 %v9618_v56, %v9123_v32  ;;  %v4124_v21 = vshrl.u32 %v9626_v16, %v9123_v32  ;;  %v4120_v12 = vshll.u32 %v9618_v56, %v4111_v44 }
 0x4e0   :  { %v4848_v47 = vmul.f32 %v4847_v0, %v4845_v22  ;;  %v4855_v36 = vmul.f32 %v4854_v50, %v4845_v22  ;;  %v4973_v53 = vshll.u32 %v4972_v5, 30  ;;  %v4121_v42 = vshrl.u32 %v9627_v61, %v9123_v32 }
 0x4e1   :  { %v4123_v2 = vshll.u32 %v9627_v61, %v4111_v44  ;;  %v4127_v40 = vshrl.u32 %v9619_v55, %v9123_v32  ;;  %vm4863_vm0 = vcmp.lt.s32.totalorder %v9125_v3, 2  ;;  %vm4860_vm1 = vweird.f32 %v8827_v38 }
 0x4e2   :  { %v4849_v58 = vadd.f32 -0.4999988, %v4848_v47  ;;  %v4856_v59 = vadd.f32 -0.16666654, %v4855_v36  ;;  %v9144_v54 = vsub.s32 %v4970_v52, %v4973_v53  ;;  %v4996_v25 = vsub.s32 4, %v4972_v5 }
 0x4e3   :  { %v4116_v43 = vor.u32 %v4115_v9, %v4114_v41  ;;  %v4119_v37 = vor.u32 %v4118_v30, %v4117_v7  ;;  %v4125_v63 = vor.u32 %v4124_v21, %v4123_v2  ;;  %v4126_v15 = vshll.u32 %v9626_v16, %v4111_v44 }
 0x4e4   :  { %v4850_v4 = vmul.f32 %v4849_v58, %v4845_v22  ;;  %v4857_v33 = vmul.f32 %v4856_v59, %v4845_v22  ;;  %vm4975_vm2 = vcmp.lt.s32.totalorder %v9144_v54, 0  ;;  %v4976_v27 = vsub.s32 0, %v9144_v54 }
 0x4e5   :  { %v4122_v17 = vor.u32 %v4121_v42, %v4120_v12  ;;  %v4147_v22 = vshrl.u32 %v9121_v39, 16  ;;  %v9161_v6 = vadd.s32 1, %v5463_v1  ;;  %vm9165_vm3 = vcmp.le.f32.partialorder %v4872_v18, 0.7853982 }
 0x4e6   :  { %v4851_v26 = vadd.f32 1.0, %v4850_v4  ;;  %v4858_v51 = vadd.f32 1.0, %v4857_v33  ;;  %v4977_v10 = vsel %vm4975_vm2, %v4976_v27, %v9144_v54  ;;  %v4128_v60 = vor.u32 %v4127_v40, %v4126_v15 }
 0x4e7   :  { %v4978_v19 = vclz %v4977_v10  ;;  %vm4129_vm4 = vcmp.lt.s32.totalorder %v9134_v8, 1  ;;  %v9172_v44 = vsel %vm4874_vm14, %v4996_v25, %v4972_v5  ;;  %vm4132_vm6 = vcmp.lt.s32.totalorder %v9134_v8, 4 }
 0x4e8   :  { %v4859_v52 = vmul.f32 %v4858_v51, %v4843_v46  ;;  %v4868_v48 = vxor.u32 2147483648, %v4851_v26  ;;  %v4137_v46 = vsel %vm4129_vm4, %v4116_v43, %v4119_v37  ;;  %vm4130_vm5 = vcmp.lt.s32.totalorder %v9134_v8, 2 }
 0x4e9   :  { %v5476_v14 = vadd.s32 4294967294, %v4978_v19  ;;  %vm4131_vm7 = vcmp.lt.s32.totalorder %v9134_v8, 3  ;;  %v4138_v18 = vsel %vm4132_vm6, %v4125_v63, 920167782  ;;  %v4141_v5 = vsel %vm4129_vm4, %v4119_v37, %v4122_v17 }
 0x4ea   :  { %v4865_v35 = vxor.u32 2147483648, %v4859_v52  ;;  %v4869_v0 = vsel %vm4867_vm13, %v4868_v48, %v4859_v52  ;;  %v4139_v50 = vsel %vm4131_vm7, %v4122_v17, %v4138_v18  ;;  %v4142_v53 = vsel %vm4132_vm6, %v4128_v60, 1326507024 }
 0x4eb   :  { %vm5477_vm8 = vcmp.lt.s32.totalorder %v5476_v14, 0  ;;  %v4140_v36 = vsel %vm4130_vm5, %v4137_v46, %v4139_v50  ;;  %v4134_v21 = vsel %vm4132_vm6, %v4122_v17, 2102212464  ;;  %v4143_v59 = vsel %vm4131_vm7, %v4125_v63, %v4142_v53 }
 0x4ec   :  { %v4866_v1 = vsel %vm4864_vm15, %v4851_v26, %v4865_v35  ;;  %v4981_v47 = vsel %vm5477_vm8, 0, %v5476_v14  ;;  %v4170_v7 = vand.u32 65535, %v4140_v36  ;;  %v4171_v12 = vshrl.u32 %v4140_v36, 16 }
 0x4ed   :  { %v4870_v41 = vsel %vm4863_vm0, %v4866_v1, %v4869_v0  ;;  %v4982_v9 = vsub.s32 32, %v4981_v47  ;;  %v4986_v30 = vsub.s32 4294967266, %v4981_v47  ;;  %v4983_v42 = vshll.u32 %v9144_v54, %v4981_v47 }
 0x4ee   :  { %v4871_v58 = vsel %vm4860_vm1, nan, %v4870_v41  ;;  %v4144_v3 = vsel %vm4130_vm5, %v4141_v5, %v4143_v59  ;;  %v4113_v4 = vshrl.u32 %v9613_v11, %v9123_v32  ;;  %v4173_v27 = vmul.u32 %v4171_v12, %v9130_v31 }
 0x4ef   :  { %v4984_v2 = vshrl.u32 %v9127_v57, %v4982_v9  ;;  %v4987_v40 = vadd.s32 127, %v4986_v30  ;;  %5365 = vst [vmem:[#allocation2 + $0xe0] sm:$0xff] %v4871_v58  ;;  %v4148_v33 = vand.u32 65535, %v4144_v3  ;;  %v4149_v38 = vshrl.u32 %v4144_v3, 16 }
 0x4f0   :  { %v4999_v54 = vsel %vm9165_vm3, 0, %v9172_v44  ;;  %v4174_v26 = vmul.u32 %v4170_v7, %v4147_v22  ;;  %v4133_v57 = vsel %vm4129_vm4, %v4113_v4, %v4116_v43  ;;  %v4135_v51 = vsel %vm4131_vm7, %v4119_v37, %v4134_v21 }
 0x4f1   :  { %v4985_v25 = vor.u32 %v4984_v2, %v4983_v42  ;;  %v4988_v63 = vshll.u32 %v4987_v40, 23  ;;  %v4151_v10 = vmul.u32 %v4149_v38, %v9130_v31  ;;  %v4152_v32 = vmul.u32 %v4148_v33, %v4147_v22 }
 0x4f2   :  { %v4172_v19 = vmul.u32 %v4170_v7, %v9130_v31  ;;  %v4175_v17 = vmul.u32 %v4171_v12, %v4147_v22  ;;  %v4176_v52 = vshll.u32 %v4173_v27, 16  ;;  %v4150_v60 = vmul.u32 %v4148_v33, %v9130_v31 }
 0x4f3   :  { %v4989_v15 = vor.u32 4788187, %v4988_v63  ;;  %v4992_v48 = vcvt.s32.f32 %v4985_v25  ;;  %v4153_v14 = vmul.u32 %v4149_v38, %v4147_v22  ;;  %v4154_v44 = vshll.u32 %v4151_v10, 16 }
 0x4f4   :  { %v4156_v35 = vshll.u32 %v4152_v32, 16  ;;  %v4178_v18 = vshll.u32 %v4174_v26, 16  ;;  %vm4180_vm10 = vc.u32 %v4172_v19, %v4176_v52  ;;  %v4182_v0 = vadd.s32 %v4176_v52, %v4172_v19 }
 0x4f5   :  { %v4990_v46 = vand.u32 2147483647, %v4989_v15  ;;  %vm4158_vm9 = vc.u32 %v4150_v60, %v4154_v44  ;;  %v4160_v43 = vadd.s32 %v4154_v44, %v4150_v60  ;;  %v4181_v37 = vsel %vm4180_vm10, 1, %v9623_v29 }
 0x4f6   :  { %v4159_v5 = vsel %vm4158_vm9, 1, %v9623_v29  ;;  %v4183_v1 = vadd.s32 %v4181_v37, %v4175_v17  ;;  %vm4263_vm11 = vcmp.gt.s32.totalorder %v9161_v6, 0  ;;  %v4177_v31 = vshrl.u32 %v4173_v27, 16 }
 0x4f7   :  { %v4993_v50 = vmul.f32 %v4992_v48, %v4990_v46  ;;  %v4161_v47 = vadd.s32 %v4159_v5, %v4153_v14  ;;  %vm4162_vm12 = vc.u32 %v4160_v43, %v4156_v35  ;;  %vm4184_vm13 = vc.u32 %v4182_v0, %v4178_v18 }
 0x4f8   :  { %v4163_v36 = vsel %vm4162_vm12, 1, %v9623_v29  ;;  %v4185_v53 = vsel %vm4184_vm13, 1, %v9623_v29  ;;  %v4264_v41 = vsel %vm4263_vm11, %v9161_v6, 0  ;;  %v4155_v9 = vshrl.u32 %v4151_v10, 16 }
 0x4f9   :  { %v4994_v22 = vxor.u32 2147483648, %v4993_v50  ;;  %v4165_v30 = vadd.s32 %v4163_v36, %v4161_v47  ;;  %v4187_v21 = vadd.s32 %v4185_v53, %v4183_v1  ;;  %v4266_v58 = vand.u32 31, %v4264_v41 }
 0x4fa   :  { %v4136_v7 = vsel %vm4130_vm5, %v4133_v57, %v4135_v51  ;;  %v4157_v12 = vshrl.u32 %v4152_v32, 16  ;;  %v4179_v42 = vshrl.u32 %v4174_v26, 16  ;;  %v5016_v33 = vadd.s32 3, %v4999_v54 }
 0x4fb   :  { %v4995_v59 = vsel %vm4874_vm14, %v4994_v22, %v4993_v50  ;;  %v4166_v40 = vadd.s32 %v4165_v30, %v4155_v9  ;;  %v4188_v3 = vadd.s32 %v4187_v21, %v4177_v31  ;;  %v9231_v4 = vsub.s32 32, %v4266_v58 }
 0x4fc   :  { %v4998_v2 = vsel %vm9165_vm3, %v8856_v45, %v4995_v59  ;;  %v4259_v38 = vand.u32 8388607, %v4252_v28  ;;  %v9237_v25 = vadd.s32 %v4182_v0, %v4178_v18  ;;  %v4190_v63 = vmul.u32 %v9121_v39, %v4136_v7 }
 0x4fd   :  { %v5000_v6 = vmul.f32 %v4998_v2, %v4998_v2  ;;  %v9235_v27 = vadd.s32 %v4166_v40, %v4157_v12  ;;  %v4189_v8 = vadd.s32 %v4188_v3, %v4179_v42  ;;  %v9240_v62 = vshrl.u32 %v4264_v41, 5 }
 0x4fe   :  { %v4272_v51 = vshll.u32 %v9617_v34, %v4266_v58  ;;  %v4273_v10 = vshrl.u32 %v9618_v56, %v9231_v4  ;;  %v4276_v32 = vshrl.u32 %v9627_v61, %v9231_v4  ;;  %v4270_v39 = vshrl.u32 %v9617_v34, %v9231_v4 }
 0x4ff   :  { %v5001_v26 = vmul.f32 -0.001358992, %v5000_v6  ;;  %v5008_v57 = vmul.f32 -0.00019511016, %v5000_v6  ;;  %vm4192_vm14 = vc.u32 %v9235_v27, %v9237_v25  ;;  %v4193_v54 = vadd.s32 1, %v4189_v8 }
 0x500   :  { %v4275_v17 = vshll.u32 %v9618_v56, %v4266_v58  ;;  %v4278_v48 = vshll.u32 %v9627_v61, %v4266_v58  ;;  %v4279_v60 = vshrl.u32 %v9626_v16, %v9231_v4  ;;  %v4281_v14 = vshll.u32 %v9626_v16, %v4266_v58 }
 0x501   :  { %v5002_v15 = vadd.f32 0.041655596, %v5001_v26  ;;  %v5009_v19 = vadd.f32 0.008332121, %v5008_v57  ;;  %v4194_v52 = vsel %vm4192_vm14, %v4193_v54, %v4189_v8  ;;  %v4282_v18 = vshrl.u32 %v9619_v55, %v9231_v4 }
 0x502   :  { %v4195_v35 = vadd.s32 %v4194_v52, %v4190_v63  ;;  %v4269_v43 = vshll.u32 %v9613_v11, %v4266_v58  ;;  %v9259_v37 = vor.u32 %v4273_v10, %v4272_v51  ;;  %v4277_v0 = vor.u32 %v4276_v32, %v4275_v17 }
 0x503   :  { %v5003_v44 = vmul.f32 %v5002_v15, %v5000_v6  ;;  %v5010_v46 = vmul.f32 %v5009_v19, %v5000_v6  ;;  %v4280_v50 = vor.u32 %v4279_v60, %v4278_v48  ;;  %v4283_v31 = vor.u32 %v4282_v18, %v4281_v14 }
 0x504   :  { %v4196_v47 = vadd.s32 536870912, %v4195_v35  ;;  %v5017_v22 = vand.u32 3, %v5016_v33  ;;  %v4260_v36 = vor.u32 8388608, %v4259_v38  ;;  %v9261_v53 = vor.u32 %v4270_v39, %v4269_v43 }
 0x505   :  { %v5004_v5 = vadd.f32 -0.4999988, %v5003_v44  ;;  %v5011_v1 = vadd.f32 -0.16666654, %v5010_v46  ;;  %vm4287_vm15 = vcmp.lt.s32.totalorder %v9240_v62, 4  ;;  %vm4284_vm0 = vcmp.lt.s32.totalorder %v9240_v62, 1  ;;  %v343_v44 = vpop.permute.xlu1 %342 }
 0x506   :  { %v9263_v30 = vshrl.u32 %v4196_v47, 30  ;;  %vm4286_vm2 = vcmp.lt.s32.totalorder %v9240_v62, 3  ;;  %v4293_v21 = vsel %vm4287_vm15, %v4280_v50, 920167782  ;;  %v4297_v58 = vsel %vm4287_vm15, %v4283_v31, 1326507024 }
 0x507   :  { %v5005_v41 = vmul.f32 %v5004_v5, %v5000_v6  ;;  %v5012_v9 = vmul.f32 %v5011_v1, %v5000_v6  ;;  %v4296_v42 = vsel %vm4284_vm0, %v9259_v37, %v4277_v0  ;;  %v4292_v40 = vsel %vm4284_vm0, %v9261_v53, %v9259_v37 }
 0x508   :  { %v4198_v12 = vshll.u32 %v9263_v30, 30  ;;  %v4294_v3 = vsel %vm4286_vm2, %v4277_v0, %v4293_v21  ;;  %v4298_v6 = vsel %vm4286_vm2, %v4280_v50, %v4297_v58  ;;  %v9284_v33 = vshll.u32 %v4260_v36, 8 }
 0x509   :  { %v5006_v59 = vadd.f32 1.0, %v5005_v41  ;;  %v5013_v7 = vadd.f32 1.0, %v5012_v9  ;;  %vm4285_vm1 = vcmp.lt.s32.totalorder %v9240_v62, 2  ;;  %vm5015_vm3 = vweird.f32 %v8856_v45 }
 0x50a   :  { %v4199_v63 = vsub.s32 %v4195_v35, %v4198_v12  ;;  %vm5018_vm4 = vcmp.lt.s32.totalorder %v5017_v22, 2  ;;  %vm5019_vm6 = vcmp.eq.s32.totalorder %v5017_v22, 0  ;;  %v4299_v26 = vsel %vm4285_vm1, %v4296_v42, %v4298_v6 }
 0x50b   :  { %v5014_v38 = vmul.f32 %v5013_v7, %v4998_v2  ;;  %v5023_v8 = vxor.u32 2147483648, %v5006_v59  ;;  %v4295_v54 = vsel %vm4285_vm1, %v4292_v40, %v4294_v3  ;;  %vm5022_vm7 = vcmp.eq.s32.totalorder %v5017_v22, 2 }
 0x50c   :  { %vm4200_vm5 = vcmp.lt.s32.totalorder %v4199_v63, 0  ;;  %v4201_v51 = vsub.s32 0, %v4199_v63  ;;  %v4301_v2 = vand.u32 65535, %v9284_v33  ;;  %v4303_v10 = vand.u32 65535, %v4299_v26 }
 0x50d   :  { %v5020_v57 = vxor.u32 2147483648, %v5014_v38  ;;  %v4304_v32 = vshrl.u32 %v4299_v26, 16  ;;  %v5024_v19 = vsel %vm5022_vm7, %v5023_v8, %v5014_v38  ;;  %v4302_v17 = vshrl.u32 %v9284_v33, 16 }
 0x50e   :  { %v4202_v39 = vsel %vm4200_vm5, %v4201_v51, %v4199_v63  ;;  %v4268_v60 = vshrl.u32 %v9613_v11, %v9231_v4  ;;  %v4326_v14 = vshrl.u32 %v4295_v54, 16  ;;  %v4325_v43 = vand.u32 65535, %v4295_v54 }
 0x50f   :  { %v5021_v15 = vsel %vm5019_vm6, %v5006_v59, %v5020_v57  ;;  %v4203_v48 = vclz %v4202_v39  ;;  %v4306_v35 = vmul.u32 %v4304_v32, %v4301_v2  ;;  %v4307_v18 = vmul.u32 %v4303_v10, %v4302_v17 }
 0x510   :  { %v5025_v52 = vsel %vm5018_vm4, %v5021_v15, %v5024_v19  ;;  %v4191_v50 = vadd.s32 %v9237_v25, %v9235_v27  ;;  %v4221_v1 = vsub.s32 4, %v9263_v30  ;;  %v4289_v47 = vsel %vm4287_vm15, %v4277_v0, 2102212464 }
 0x511   :  { %v5026_v46 = vsel %vm5015_vm3, nan, %v5025_v52  ;;  %v5461_v5 = vadd.s32 4294967294, %v4203_v48  ;;  %v4305_v31 = vmul.u32 %v4303_v10, %v4301_v2  ;;  %v4308_v4 = vmul.u32 %v4304_v32, %v4302_v17 }
 0x512   :  { %5366 = vst [vmem:[#allocation2 + $0xe8] sm:$0xff] %v5026_v46  ;;  %v4309_v22 = vshll.u32 %v4306_v35, 16  ;;  %v9304_v36 = vadd.f32 %v343_v44, %v8990_v23  ;;  %vm4099_vm8 = vcmp.lt.s32.totalorder %v9077_v24, 0  ;;  %v4310_v45 = vshrl.u32 %v4306_v35, 16 }
 0x513   :  { %vm5462_vm10 = vcmp.lt.s32.totalorder %v5461_v5, 0  ;;  %v4311_v41 = vshll.u32 %v4307_v18, 16  ;;  %v4328_v9 = vmul.u32 %v4326_v14, %v4301_v2  ;;  %v4329_v25 = vmul.u32 %v4325_v43, %v4302_v17 }
 0x514   :  { %v4206_v21 = vsel %vm5462_vm10, 0, %v5461_v5  ;;  %vm4313_vm9 = vc.u32 %v4305_v31, %v4309_v22  ;;  %v4315_v27 = vadd.s32 %v4309_v22, %v4305_v31  ;;  %v4327_v7 = vmul.u32 %v4325_v43, %v4301_v2 }
 0x515   :  { %v4207_v58 = vsub.s32 32, %v4206_v21  ;;  %v4211_v59 = vsub.s32 4294967266, %v4206_v21  ;;  %v4314_v0 = vsel %vm4313_vm9, 1, %v9623_v29  ;;  %v4330_v42 = vmul.u32 %v4326_v14, %v4302_v17 }
 0x516   :  { %v4316_v12 = vadd.s32 %v4314_v0, %v4308_v4  ;;  %vm4317_vm11 = vc.u32 %v4315_v27, %v4311_v41  ;;  %v4331_v23 = vshll.u32 %v4328_v9, 16  ;;  %v4208_v40 = vshll.u32 %v4199_v63, %v4206_v21 }
 0x517   :  { %v4209_v3 = vshrl.u32 %v4191_v50, %v4207_v58  ;;  %v4212_v6 = vadd.s32 127, %v4211_v59  ;;  %v4318_v38 = vsel %vm4317_vm11, 1, %v9623_v29  ;;  %v4333_v26 = vshll.u32 %v4329_v25, 16 }
 0x518   :  { %v4320_v8 = vadd.s32 %v4318_v38, %v4316_v12  ;;  %vm4335_vm12 = vc.u32 %v4327_v7, %v4331_v23  ;;  %v4337_v57 = vadd.s32 %v4331_v23, %v4327_v7  ;;  %v4288_v10 = vsel %vm4284_vm0, %v4268_v60, %v9261_v53 }
 0x519   :  { %v4210_v51 = vor.u32 %v4209_v3, %v4208_v40  ;;  %v4213_v54 = vshll.u32 %v4212_v6, 23  ;;  %v4336_v2 = vsel %vm4335_vm12, 1, %v9623_v29  ;;  %v4290_v63 = vsel %vm4286_vm2, %v9259_v37, %v4289_v47 }
 0x51a   :  { %v4321_v32 = vadd.s32 %v4320_v8, %v4310_v45  ;;  %v4338_v15 = vadd.s32 %v4336_v2, %v4330_v42  ;;  %vm4339_vm13 = vc.u32 %v4337_v57, %v4333_v26  ;;  %v4312_v39 = vshrl.u32 %v4307_v18, 16 }
 0x51b   :  { %v4214_v19 = vor.u32 4788187, %v4213_v54  ;;  %v4340_v17 = vsel %vm4339_vm13, 1, %v9623_v29  ;;  %v5027_v52 = vand.u32 2147483647, %v9304_v36  ;;  %v4222_v48 = vsel %vm4099_vm8, %v4221_v1, %v9263_v30 }
 0x51c   :  { %v4332_v53 = vshrl.u32 %v4328_v9, 16  ;;  %v4342_v60 = vadd.s32 %v4340_v17, %v4338_v15  ;;  %v5030_v14 = vand.u32 2139095040, %v9304_v36  ;;  %v4217_v35 = vcvt.s32.f32 %v4210_v51 }
 0x51d   :  { %v4215_v46 = vand.u32 2147483647, %v4214_v19  ;;  %v4322_v37 = vadd.s32 %v4321_v32, %v4312_v39  ;;  %v4334_v43 = vshrl.u32 %v4329_v25, 16  ;;  %v9323_v5 = vadd.f32 %v343_v44, %v9110_v13 }
 0x51e   :  { %v4343_v50 = vadd.s32 %v4342_v60, %v4332_v53  ;;  %v5031_v18 = vshrl.u32 %v5030_v14, 23  ;;  %v5034_v47 = vand.u32 8388607, %v5027_v52  ;;  %v4341_v4 = vadd.s32 %v4337_v57, %v4333_v26 }
 0x51f   :  { %v4218_v31 = vmul.f32 %v4217_v35, %v4215_v46  ;;  %vm9329_vm14 = vcmp.le.f32.partialorder %v4097_v20, 0.7853982  ;;  %v4291_v1 = vsel %vm4285_vm1, %v4288_v10, %v4290_v63  ;;  %v5185_v27 = vand.u32 2139095040, %v9323_v5 }
 0x520   :  { %v4344_v22 = vadd.s32 %v4343_v50, %v4334_v43  ;;  %v5478_v45 = vadd.s32 4294967169, %v5031_v18  ;;  %v4224_v13 = vsel %vm9329_vm14, 0, %v4222_v48  ;;  %vm4347_vm15 = vc.u32 %v4322_v37, %v4341_v4 }
 0x521   :  { %v4219_v41 = vxor.u32 2147483648, %v4218_v31  ;;  %v5035_v9 = vor.u32 8388608, %v5034_v47  ;;  %v4345_v25 = vmul.u32 %v9284_v33, %v4291_v1  ;;  %v4241_v0 = vadd.s32 3, %v4224_v13 }
 0x522   :  { %v4348_v44 = vadd.s32 1, %v4344_v22  ;;  %v5037_v21 = vadd.s32 1, %v5478_v45  ;;  %v5186_v40 = vshrl.u32 %v5185_v27, 23  ;;  %v9350_v54 = vadd.s32 %v4341_v4, %v4322_v37 }
 0x523   :  { %v4220_v20 = vsel %vm4099_vm8, %v4219_v41, %v4218_v31  ;;  %v9344_v23 = vshll.u32 %v5035_v9, 8  ;;  %v9348_v57 = vand.u32 3, %v4241_v0  ;;  %v5182_v2 = vand.u32 2147483647, %v9323_v5 }
 0x524   :  { %v4223_v62 = vsel %vm9329_vm14, %v9077_v24, %v4220_v20  ;;  %v4349_v58 = vsel %vm4347_vm15, %v4348_v44, %v4344_v22  ;;  %vm5038_vm0 = vcmp.gt.s32.totalorder %v5037_v21, 0  ;;  %v5481_v63 = vadd.s32 4294967169, %v5186_v40 }
 0x525   :  { %v4225_v59 = vmul.f32 %v4223_v62, %v4223_v62  ;;  %v4350_v7 = vadd.s32 %v4349_v58, %v4345_v25  ;;  %v5039_v12 = vsel %vm5038_vm0, %v5037_v21, 0  ;;  %v9353_v10 = vand.u32 65535, %v9344_v23 }
 0x526   :  { %v5041_v42 = vand.u32 31, %v5039_v12  ;;  %vm4254_vm2 = vcmp.lt.s32.totalorder %v9096_v49, 0  ;;  %v9357_v39 = vshrl.u32 %v5039_v12, 5  ;;  %vm4247_vm1 = vcmp.eq.s32.totalorder %v9348_v57, 2 }
 0x527   :  { %v4226_v3 = vmul.f32 -0.001358992, %v4225_v59  ;;  %v4233_v6 = vmul.f32 -0.00019511016, %v4225_v59  ;;  %v4351_v38 = vadd.s32 536870912, %v4350_v7  ;;  %vm4244_vm3 = vcmp.eq.s32.totalorder %v9348_v57, 0 }
 0x528   :  { %v9346_v8 = vsub.s32 32, %v5041_v42  ;;  %v5044_v17 = vshll.u32 %v9613_v11, %v5041_v42  ;;  %v5047_v37 = vshll.u32 %v9617_v34, %v5041_v42  ;;  %v5050_v43 = vshll.u32 %v9618_v56, %v5041_v42 }
 0x529   :  { %v4227_v33 = vadd.f32 0.041655596, %v4226_v3  ;;  %v4234_v26 = vadd.f32 0.008332121, %v4233_v6  ;;  %v4352_v51 = vshrl.u32 %v4351_v38, 30  ;;  %v5053_v18 = vshll.u32 %v9627_v61, %v5041_v42 }
 0x52a   :  { %v5045_v48 = vshrl.u32 %v9617_v34, %v9346_v8  ;;  %v5048_v53 = vshrl.u32 %v9618_v56, %v9346_v8  ;;  %v5054_v60 = vshrl.u32 %v9626_v16, %v9346_v8  ;;  %v5051_v50 = vshrl.u32 %v9627_v61, %v9346_v8 }
 0x52b   :  { %v4228_v32 = vmul.f32 %v4227_v33, %v4225_v59  ;;  %v4235_v15 = vmul.f32 %v4234_v26, %v4225_v59  ;;  %v4353_v19 = vshll.u32 %v4352_v51, 30  ;;  %v5057_v47 = vshrl.u32 %v9619_v55, %v9346_v8 }
 0x52c   :  { %vm4243_vm4 = vcmp.lt.s32.totalorder %v9348_v57, 2  ;;  %vm4240_vm5 = vweird.f32 %v9077_v24  ;;  %v4376_v1 = vsub.s32 4, %v4352_v51  ;;  %v5046_v22 = vor.u32 %v5045_v48, %v5044_v17 }
 0x52d   :  { %v4229_v14 = vadd.f32 -0.4999988, %v4228_v32  ;;  %v4236_v46 = vadd.f32 -0.16666654, %v4235_v15  ;;  %v9367_v35 = vsub.s32 %v4350_v7, %v4353_v19  ;;  %v5049_v45 = vor.u32 %v5048_v53, %v5047_v37 }
 0x52e   :  { %v5055_v41 = vor.u32 %v5054_v60, %v5053_v18  ;;  %v5056_v21 = vshll.u32 %v9626_v16, %v5041_v42  ;;  %v5052_v20 = vor.u32 %v5051_v50, %v5050_v43  ;;  %v5077_v25 = vshrl.u32 %v9344_v23, 16 }
 0x52f   :  { %v4230_v31 = vmul.f32 %v4229_v14, %v4225_v59  ;;  %v4237_v4 = vmul.f32 %v4236_v46, %v4225_v59  ;;  %vm4355_vm6 = vcmp.lt.s32.totalorder %v9367_v35, 0  ;;  %v4356_v30 = vsub.s32 0, %v9367_v35 }
 0x530   :  { %v9384_v58 = vadd.s32 1, %v5481_v63  ;;  %vm9388_vm7 = vcmp.le.f32.partialorder %v4252_v28, 0.7853982  ;;  %v5058_v12 = vor.u32 %v5057_v47, %v5056_v21  ;;  %vm5059_vm8 = vcmp.lt.s32.totalorder %v9357_v39, 1 }
 0x531   :  { %v4231_v13 = vadd.f32 1.0, %v4230_v31  ;;  %v4238_v44 = vadd.f32 1.0, %v4237_v4  ;;  %v4357_v9 = vsel %vm4355_vm6, %v4356_v30, %v9367_v35  ;;  %v9395_v42 = vsel %vm4254_vm2, %v4376_v1, %v4352_v51 }
 0x532   :  { %v4358_v27 = vclz %v4357_v9  ;;  %vm5062_vm10 = vcmp.lt.s32.totalorder %v9357_v39, 4  ;;  %vm5060_vm9 = vcmp.lt.s32.totalorder %v9357_v39, 2  ;;  %vm5061_vm11 = vcmp.lt.s32.totalorder %v9357_v39, 3 }
 0x533   :  { %v4239_v59 = vmul.f32 %v4238_v44, %v4223_v62  ;;  %v4248_v0 = vxor.u32 2147483648, %v4231_v13  ;;  %v5067_v62 = vsel %vm5059_vm8, %v5046_v22, %v5049_v45  ;;  %v5068_v28 = vsel %vm5062_vm10, %v5055_v41, 920167782 }
 0x534   :  { %v5464_v40 = vadd.s32 4294967294, %v4358_v27  ;;  %v5069_v38 = vsel %vm5061_vm11, %v5052_v20, %v5068_v28  ;;  %v5071_v33 = vsel %vm5059_vm8, %v5049_v45, %v5052_v20  ;;  %v5072_v32 = vsel %vm5062_vm10, %v5058_v12, 1326507024 }
 0x535   :  { %v4245_v3 = vxor.u32 2147483648, %v4239_v59  ;;  %v4249_v6 = vsel %vm4247_vm1, %v4248_v0, %v4239_v59  ;;  %v5070_v63 = vsel %vm5060_vm9, %v5067_v62, %v5069_v38  ;;  %v5064_v48 = vsel %vm5062_vm10, %v5052_v20, 2102212464 }
 0x536   :  { %vm5465_vm12 = vcmp.lt.s32.totalorder %v5464_v40, 0  ;;  %v5073_v60 = vsel %vm5061_vm11, %v5055_v41, %v5072_v32  ;;  %v5100_v14 = vand.u32 65535, %v5070_v63  ;;  %v5101_v46 = vshrl.u32 %v5070_v63, 16 }
 0x537   :  { %v4246_v26 = vsel %vm4244_vm3, %v4231_v13, %v4245_v3  ;;  %v4361_v51 = vsel %vm5465_vm12, 0, %v5464_v40  ;;  %v5074_v57 = vsel %vm5060_vm9, %v5071_v33, %v5073_v60  ;;  %v5043_v18 = vshrl.u32 %v9613_v11, %v9346_v8 }
 0x538   :  { %v4250_v15 = vsel %vm4243_vm4, %v4246_v26, %v4249_v6  ;;  %v4362_v19 = vsub.s32 32, %v4361_v51  ;;  %v4366_v17 = vsub.s32 4294967266, %v4361_v51  ;;  %v4363_v37 = vshll.u32 %v9367_v35, %v4361_v51 }
 0x539   :  { %v4251_v53 = vsel %vm4240_vm5, nan, %v4250_v15  ;;  %v5078_v47 = vand.u32 65535, %v5074_v57  ;;  %v5079_v24 = vshrl.u32 %v5074_v57, 16  ;;  %v5103_v31 = vmul.u32 %v5101_v46, %v9353_v10 }
 0x53a   :  { %v4364_v43 = vshrl.u32 %v9350_v54, %v4362_v19  ;;  %v4367_v50 = vadd.s32 127, %v4366_v17  ;;  %5361 = vst [vmem:[#allocation2 + $0xc0] sm:$0xff] %v4251_v53  ;;  %v4379_v35 = vsel %vm9388_vm7, 0, %v9395_v42  ;;  %v5104_v1 = vmul.u32 %v5100_v14, %v5077_v25 }
 0x53b   :  { %v5063_v54 = vsel %vm5059_vm8, %v5043_v18, %v5046_v22  ;;  %v5065_v41 = vsel %vm5061_vm11, %v5049_v45, %v5064_v48  ;;  %v5081_v13 = vmul.u32 %v5079_v24, %v9353_v10  ;;  %v5082_v8 = vmul.u32 %v5078_v47, %v5077_v25 }
 0x53c   :  { %v4365_v4 = vor.u32 %v4364_v43, %v4363_v37  ;;  %v4368_v30 = vshll.u32 %v4367_v50, 23  ;;  %v5102_v9 = vmul.u32 %v5100_v14, %v9353_v10  ;;  %v5105_v21 = vmul.u32 %v5101_v46, %v5077_v25 }
 0x53d   :  { %v5106_v27 = vshll.u32 %v5103_v31, 16  ;;  %v5080_v59 = vmul.u32 %v5078_v47, %v9353_v10  ;;  %v5083_v0 = vmul.u32 %v5079_v24, %v5077_v25  ;;  %v5084_v12 = vshll.u32 %v5081_v13, 16 }
 0x53e   :  { %v4369_v44 = vor.u32 4788187, %v4368_v30  ;;  %v4372_v20 = vcvt.s32.f32 %v4365_v4  ;;  %v5086_v42 = vshll.u32 %v5082_v8, 16  ;;  %v5108_v62 = vshll.u32 %v5104_v1, 16 }
 0x53f   :  { %vm5110_vm13 = vc.u32 %v5102_v9, %v5106_v27  ;;  %vm5088_vm14 = vc.u32 %v5080_v59, %v5084_v12  ;;  %v5090_v22 = vadd.s32 %v5084_v12, %v5080_v59  ;;  %v5112_v3 = vadd.s32 %v5106_v27, %v5102_v9 }
 0x540   :  { %v4370_v40 = vand.u32 2147483647, %v4369_v44  ;;  %v5111_v45 = vsel %vm5110_vm13, 1, %v9623_v29  ;;  %v5089_v6 = vsel %vm5088_vm14, 1, %v9623_v29  ;;  %vm5193_vm15 = vcmp.gt.s32.totalorder %v9384_v58, 0 }
 0x541   :  { %v5113_v38 = vadd.s32 %v5111_v45, %v5105_v21  ;;  %v5091_v33 = vadd.s32 %v5089_v6, %v5083_v0  ;;  %vm5092_vm0 = vc.u32 %v5090_v22, %v5086_v42  ;;  %v5107_v10 = vshrl.u32 %v5103_v31, 16 }
 0x542   :  { %v4373_v28 = vmul.f32 %v4372_v20, %v4370_v40  ;;  %vm5114_vm1 = vc.u32 %v5112_v3, %v5108_v62  ;;  %v5093_v26 = vsel %vm5092_vm0, 1, %v9623_v29  ;;  %v5194_v63 = vsel %vm5193_vm15, %v9384_v58, 0 }
 0x543   :  { %v5115_v51 = vsel %vm5114_vm1, 1, %v9623_v29  ;;  %v5085_v32 = vshrl.u32 %v5081_v13, 16  ;;  %v5095_v15 = vadd.s32 %v5093_v26, %v5091_v33  ;;  %v5196_v17 = vand.u32 31, %v5194_v63 }
 0x544   :  { %v4374_v25 = vxor.u32 2147483648, %v4373_v28  ;;  %v5117_v19 = vadd.s32 %v5115_v51, %v5113_v38  ;;  %v5066_v53 = vsel %vm5060_vm9, %v5063_v54, %v5065_v41  ;;  %v5087_v60 = vshrl.u32 %v5082_v8, 16 }
 0x545   :  { %v5109_v14 = vshrl.u32 %v5104_v1, 16  ;;  %v5096_v37 = vadd.s32 %v5095_v15, %v5085_v32  ;;  %v9454_v50 = vsub.s32 32, %v5196_v17  ;;  %v4396_v57 = vadd.s32 3, %v4379_v35 }
 0x546   :  { %v4375_v48 = vsel %vm4254_vm2, %v4374_v25, %v4373_v28  ;;  %v5118_v43 = vadd.s32 %v5117_v19, %v5107_v10  ;;  %v5189_v18 = vand.u32 8388607, %v5182_v2  ;;  %v9460_v24 = vadd.s32 %v5112_v3, %v5108_v62 }
 0x547   :  { %v4378_v46 = vsel %vm9388_vm7, %v9096_v49, %v4375_v48  ;;  %v9458_v47 = vadd.s32 %v5096_v37, %v5087_v60  ;;  %v5120_v31 = vmul.u32 %v9344_v23, %v5066_v53  ;;  %v9463_v7 = vshrl.u32 %v5194_v63, 5 }
 0x548   :  { %v4380_v58 = vmul.f32 %v4378_v46, %v4378_v46  ;;  %v5119_v39 = vadd.s32 %v5118_v43, %v5109_v14  ;;  %v5202_v1 = vshll.u32 %v9617_v34, %v5196_v17  ;;  %v5203_v54 = vshrl.u32 %v9618_v56, %v9454_v50 }
 0x549   :  { %vm5122_vm2 = vc.u32 %v9458_v47, %v9460_v24  ;;  %v5206_v41 = vshrl.u32 %v9627_v61, %v9454_v50  ;;  %v5200_v23 = vshrl.u32 %v9617_v34, %v9454_v50  ;;  %v5205_v44 = vshll.u32 %v9618_v56, %v5196_v17 }
 0x54a   :  { %v4381_v4 = vmul.f32 -0.001358992, %v4380_v58  ;;  %v4388_v30 = vmul.f32 -0.00019511016, %v4380_v58  ;;  %v5123_v35 = vadd.s32 1, %v5119_v39  ;;  %v5208_v21 = vshll.u32 %v9627_v61, %v5196_v17 }
 0x54b   :  { %v5209_v27 = vshrl.u32 %v9626_v16, %v9454_v50  ;;  %v5211_v20 = vshll.u32 %v9626_v16, %v5196_v17  ;;  %v5212_v40 = vshrl.u32 %v9619_v55, %v9454_v50  ;;  %v5199_v42 = vshll.u32 %v9613_v11, %v5196_v17 }
 0x54c   :  { %v4382_v13 = vadd.f32 0.041655596, %v4381_v4  ;;  %v4389_v8 = vadd.f32 0.008332121, %v4388_v30  ;;  %v5124_v9 = vsel %vm5122_vm2, %v5123_v35, %v5119_v39  ;;  %v9482_v62 = vor.u32 %v5203_v54, %v5202_v1 }
 0x54d   :  { %v5125_v12 = vadd.s32 %v5124_v9, %v5120_v31  ;;  %v9484_v34 = vor.u32 %v5206_v41, %v5205_v44  ;;  %v5210_v56 = vor.u32 %v5209_v27, %v5208_v21  ;;  %v5213_v3 = vor.u32 %v5212_v40, %v5211_v20 }
 0x54e   :  { %v4383_v59 = vmul.f32 %v4382_v13, %v4380_v58  ;;  %v4390_v0 = vmul.f32 %v4389_v8, %v4380_v58  ;;  %v4397_v28 = vand.u32 3, %v4396_v57  ;;  %v5190_v6 = vor.u32 8388608, %v5189_v18 }
 0x54f   :  { %v5126_v45 = vadd.s32 536870912, %v5125_v12  ;;  %v9486_v16 = vor.u32 %v5200_v23, %v5199_v42  ;;  %vm5217_vm3 = vcmp.lt.s32.totalorder %v9463_v7, 4  ;;  %vm5214_vm4 = vcmp.lt.s32.totalorder %v9463_v7, 1 }
 0x550   :  { %v4384_v22 = vadd.f32 -0.4999988, %v4383_v59  ;;  %v4391_v61 = vadd.f32 -0.16666654, %v4390_v0  ;;  %vm5216_vm6 = vcmp.lt.s32.totalorder %v9463_v7, 3  ;;  %v5226_v32 = vsel %vm5214_vm4, %v9482_v62, %v9484_v34 }
 0x551   :  { %v9488_v10 = vshrl.u32 %v5126_v45, 30  ;;  %v5223_v55 = vsel %vm5217_vm3, %v5210_v56, 920167782  ;;  %v5227_v25 = vsel %vm5217_vm3, %v5213_v3, 1326507024  ;;  %v5222_v15 = vsel %vm5214_vm4, %v9486_v16, %v9482_v62 }
 0x552   :  { %v4385_v38 = vmul.f32 %v4384_v22, %v4380_v58  ;;  %v4392_v33 = vmul.f32 %v4391_v61, %v4380_v58  ;;  %v5224_v19 = vsel %vm5216_vm6, %v9484_v34, %v5223_v55  ;;  %v5228_v17 = vsel %vm5216_vm6, %v5210_v56, %v5227_v25 }
 0x553   :  { %v5128_v63 = vshll.u32 %v9488_v10, 30  ;;  %v9511_v48 = vshll.u32 %v5190_v6, 8  ;;  %vm5215_vm5 = vcmp.lt.s32.totalorder %v9463_v7, 2  ;;  %vm4398_vm7 = vcmp.lt.s32.totalorder %v4397_v28, 2 }
 0x554   :  { %v4386_v26 = vadd.f32 1.0, %v4385_v38  ;;  %v4393_v51 = vadd.f32 1.0, %v4392_v33  ;;  %vm4399_vm8 = vcmp.eq.s32.totalorder %v4397_v28, 0  ;;  %v5229_v37 = vsel %vm5215_vm5, %v5226_v32, %v5228_v17 }
 0x555   :  { %v5129_v14 = vsub.s32 %v5125_v12, %v5128_v63  ;;  %v5225_v57 = vsel %vm5215_vm5, %v5222_v15, %v5224_v19  ;;  %vm4402_vm9 = vcmp.eq.s32.totalorder %v4397_v28, 2  ;;  %v5231_v18 = vand.u32 65535, %v9511_v48 }
 0x556   :  { %v4394_v53 = vmul.f32 %v4393_v51, %v4378_v46  ;;  %v4403_v60 = vxor.u32 2147483648, %v4386_v26  ;;  %v5233_v39 = vand.u32 65535, %v5229_v37  ;;  %v5234_v46 = vshrl.u32 %v5229_v37, 16 }
 0x557   :  { %vm5130_vm10 = vcmp.lt.s32.totalorder %v5129_v14, 0  ;;  %v5131_v58 = vsub.s32 0, %v5129_v14  ;;  %v5232_v1 = vshrl.u32 %v9511_v48, 16  ;;  %vm4395_vm11 = vweird.f32 %v9096_v49 }
 0x558   :  { %v4400_v43 = vxor.u32 2147483648, %v4394_v53  ;;  %v4404_v4 = vsel %vm4402_vm9, %v4403_v60, %v4394_v53  ;;  %v5256_v41 = vshrl.u32 %v5225_v57, 16  ;;  %v5236_v8 = vmul.u32 %v5234_v46, %v5231_v18 }
 0x559   :  { %v5132_v30 = vsel %vm5130_vm10, %v5131_v58, %v5129_v14  ;;  %v5237_v23 = vmul.u32 %v5233_v39, %v5232_v1  ;;  %v5255_v44 = vand.u32 65535, %v5225_v57  ;;  %v5121_v21 = vadd.s32 %v9460_v24, %v9458_v47 }
 0x55a   :  { %v4401_v31 = vsel %vm4399_vm8, %v4386_v26, %v4400_v43  ;;  %v5133_v54 = vclz %v5132_v30  ;;  %v5235_v27 = vmul.u32 %v5233_v39, %v5231_v18  ;;  %v5238_v20 = vmul.u32 %v5234_v46, %v5232_v1 }
 0x55b   :  { %v4405_v35 = vsel %vm4398_vm7, %v4401_v31, %v4404_v4  ;;  %v5239_v59 = vshll.u32 %v5236_v8, 16  ;;  %v5240_v0 = vshrl.u32 %v5236_v8, 16  ;;  %v5241_v12 = vshll.u32 %v5237_v23, 16 }
 0x55c   :  { %v4406_v13 = vsel %vm4395_vm11, nan, %v4405_v35  ;;  %v5479_v9 = vadd.s32 4294967294, %v5133_v54  ;;  %v5258_v49 = vmul.u32 %v5256_v41, %v5231_v18  ;;  %v5259_v56 = vmul.u32 %v5255_v44, %v5232_v1 }
 0x55d   :  { %5362 = vst [vmem:[#allocation2 + $0xc8] sm:$0xff] %v4406_v13  ;;  %vm5243_vm13 = vc.u32 %v5235_v27, %v5239_v59  ;;  %v5245_v42 = vadd.s32 %v5239_v59, %v5235_v27  ;;  %v5257_v3 = vmul.u32 %v5255_v44, %v5231_v18  ;;  %v5260_v6 = vmul.u32 %v5256_v41, %v5232_v1 }
 0x55e   :  { %vm5480_vm12 = vcmp.lt.s32.totalorder %v5479_v9, 0  ;;  %v5244_v45 = vsel %vm5243_vm13, 1, %v9623_v29  ;;  %v5261_v47 = vshll.u32 %v5258_v49, 16  ;;  %v5263_v26 = vshll.u32 %v5259_v56, 16 }
 0x55f   :  { %v5136_v40 = vsel %vm5480_vm12, 0, %v5479_v9  ;;  %v5246_v28 = vadd.s32 %v5244_v45, %v5238_v20  ;;  %vm5247_vm14 = vc.u32 %v5245_v42, %v5241_v12  ;;  %v5198_v15 = vshrl.u32 %v9613_v11, %v9454_v50 }
 0x560   :  { %v5137_v22 = vsub.s32 32, %v5136_v40  ;;  %v5141_v61 = vsub.s32 4294967266, %v5136_v40  ;;  %v5138_v24 = vshll.u32 %v5129_v14, %v5136_v40  ;;  %v5248_v55 = vsel %vm5247_vm14, 1, %v9623_v29 }
 0x561   :  { %v5250_v25 = vadd.s32 %v5248_v55, %v5246_v28  ;;  %vm5265_vm15 = vc.u32 %v5257_v3, %v5261_v47  ;;  %v5267_v51 = vadd.s32 %v5261_v47, %v5257_v3  ;;  %v5219_v17 = vsel %vm5217_vm3, %v9484_v34, 2102212464 }
 0x562   :  { %v5139_v38 = vshrl.u32 %v5121_v21, %v5137_v22  ;;  %v5142_v33 = vadd.s32 127, %v5141_v61  ;;  %v5266_v19 = vsel %vm5265_vm15, 1, %v9623_v29  ;;  %v5242_v37 = vshrl.u32 %v5237_v23, 16 }
 0x563   :  { %v5251_v53 = vadd.s32 %v5250_v25, %v5240_v0  ;;  %v5268_v60 = vadd.s32 %v5266_v19, %v5260_v6  ;;  %vm5269_vm0 = vc.u32 %v5267_v51, %v5263_v26  ;;  %v5218_v58 = vsel %vm5214_vm4, %v5198_v15, %v9486_v16 }
 0x564   :  { %v5140_v63 = vor.u32 %v5139_v38, %v5138_v24  ;;  %v5143_v32 = vshll.u32 %v5142_v33, 23  ;;  %v5270_v43 = vsel %vm5269_vm0, 1, %v9623_v29  ;;  %v5262_v57 = vshrl.u32 %v5258_v49, 16 }
 0x565   :  { %v5272_v18 = vadd.s32 %v5270_v43, %v5268_v60  ;;  %v5220_v39 = vsel %vm5216_vm6, %v9482_v62, %v5219_v17  ;;  %v5252_v34 = vadd.s32 %v5251_v53, %v5242_v37  ;;  %v5264_v46 = vshrl.u32 %v5259_v56, 16 }
 0x566   :  { %v5144_v14 = vor.u32 4788187, %v5143_v32  ;;  %v5147_v50 = vcvt.s32.f32 %v5140_v63  ;;  %v5271_v30 = vadd.s32 %v5267_v51, %v5263_v26  ;;  %v5221_v29 = vsel %vm5215_vm5, %v5218_v58, %v5220_v39 }
 0x567   :  { %v5273_v31 = vadd.s32 %v5272_v18, %v5262_v57  ;;  %vm5029_vm2 = vcmp.lt.s32.totalorder %v9304_v36, 0  ;;  %vm9544_vm3 = vcmp.le.f32.partialorder %v5027_v52, 0.7853982  ;;  %v5275_v41 = vmul.u32 %v9511_v48, %v5221_v29 }
 0x568   :  { %v5145_v11 = vand.u32 2147483647, %v5144_v14  ;;  %vm5277_vm1 = vc.u32 %v5252_v34, %v5271_v30  ;;  %v5151_v13 = vsub.s32 4, %v9488_v10  ;;  %vm5170_vm6 = vweird.f32 %v9304_v36 }
 0x569   :  { %v5274_v1 = vadd.s32 %v5273_v31, %v5264_v46  ;;  %v5276_v19 = vadd.s32 %v5271_v30, %v5252_v34  ;;  %vm5184_vm9 = vcmp.lt.s32.totalorder %v9323_v5, 0  ;;  %vm5183_vm11 = vcmp.le.f32.partialorder %v5182_v2, 0.7853982 }
 0x56a   :  { %v5148_v4 = vmul.f32 %v5147_v50, %v5145_v11  ;;  %v5152_v52 = vsel %vm5029_vm2, %v5151_v13, %v9488_v10  ;;  %vm5325_vm15 = vweird.f32 %v9323_v5 }
 0x56b   :  { %v5278_v16 = vadd.s32 1, %v5274_v1  ;;  %v5154_v48 = vsel %vm9544_vm3, 0, %v5152_v52 }
 0x56c   :  { %v5149_v35 = vxor.u32 2147483648, %v5148_v4  ;;  %v5171_v61 = vadd.s32 3, %v5154_v48 }
 0x56d   :  { %v5279_v8 = vsel %vm5277_vm1, %v5278_v16, %v5274_v1 }
 0x56e   :  { %v5150_v62 = vsel %vm5029_vm2, %v5149_v35, %v5148_v4  ;;  %v5280_v44 = vadd.s32 %v5279_v8, %v5275_v41  ;;  %v5172_v24 = vand.u32 3, %v5171_v61 }
 0x56f   :  { %v5153_v7 = vsel %vm9544_vm3, %v9304_v36, %v5150_v62 }
 0x570   :  { %v5155_v23 = vmul.f32 %v5153_v7, %v5153_v7  ;;  %v5281_v27 = vadd.s32 536870912, %v5280_v44  ;;  %vm5174_vm5 = vcmp.eq.s32.totalorder %v5172_v24, 0  ;;  %vm5177_vm7 = vcmp.eq.s32.totalorder %v5172_v24, 2 }
 0x571   :  { %vm5173_vm10 = vcmp.lt.s32.totalorder %v5172_v24, 2 }
 0x572   :  { %v5156_v9 = vmul.f32 -0.001358992, %v5155_v23  ;;  %v5163_v21 = vmul.f32 -0.00019511016, %v5155_v23  ;;  %v5282_v0 = vshrl.u32 %v5281_v27, 30 }
 0x574   :  { %v5157_v20 = vadd.f32 0.041655596, %v5156_v9  ;;  %v5164_v59 = vadd.f32 0.008332121, %v5163_v21  ;;  %v5283_v40 = vshll.u32 %v5282_v0, 30  ;;  %v5306_v46 = vsub.s32 4, %v5282_v0 }
 0x576   :  { %v5158_v12 = vmul.f32 %v5157_v20, %v5155_v23  ;;  %v5165_v49 = vmul.f32 %v5164_v59, %v5155_v23  ;;  %v5284_v22 = vsub.s32 %v5280_v44, %v5283_v40  ;;  %v5307_v1 = vsel %vm5184_vm9, %v5306_v46, %v5282_v0 }
 0x577   :  { %v5309_v54 = vsel %vm5183_vm11, 0, %v5307_v1 }
 0x578   :  { %v5159_v42 = vadd.f32 -0.4999988, %v5158_v12  ;;  %v5166_v56 = vadd.f32 -0.16666654, %v5165_v49  ;;  %vm5285_vm4 = vcmp.lt.s32.totalorder %v5284_v22, 0  ;;  %v5286_v28 = vsub.s32 0, %v5284_v22 }
 0x579   :  { %v5326_v8 = vadd.s32 3, %v5309_v54 }
 0x57a   :  { %v5160_v45 = vmul.f32 %v5159_v42, %v5155_v23  ;;  %v5167_v3 = vmul.f32 %v5166_v56, %v5155_v23  ;;  %v5287_v10 = vsel %vm5285_vm4, %v5286_v28, %v5284_v22 }
 0x57b   :  { %v5288_v38 = vclz %v5287_v10  ;;  %v5327_v21 = vand.u32 3, %v5326_v8 }
 0x57c   :  { %v5161_v6 = vadd.f32 1.0, %v5160_v45  ;;  %v5168_v47 = vadd.f32 1.0, %v5167_v3 }
 0x57d   :  { %v5482_v25 = vadd.s32 4294967294, %v5288_v38  ;;  %vm5329_vm12 = vcmp.eq.s32.totalorder %v5327_v21, 0  ;;  %vm5332_vm13 = vcmp.eq.s32.totalorder %v5327_v21, 2  ;;  %vm5328_vm14 = vcmp.lt.s32.totalorder %v5327_v21, 2 }
 0x57e   :  { %v5169_v33 = vmul.f32 %v5168_v47, %v5153_v7  ;;  %v5178_v55 = vxor.u32 2147483648, %v5161_v6 }
 0x57f   :  { %vm5483_vm8 = vcmp.lt.s32.totalorder %v5482_v25, 0 }
 0x580   :  { %v5175_v26 = vxor.u32 2147483648, %v5169_v33  ;;  %v5179_v63 = vsel %vm5177_vm7, %v5178_v55, %v5169_v33  ;;  %v5291_v32 = vsel %vm5483_vm8, 0, %v5482_v25 }
 0x581   :  { %v5292_v17 = vsub.s32 32, %v5291_v32  ;;  %v5296_v53 = vsub.s32 4294967266, %v5291_v32  ;;  %v5293_v14 = vshll.u32 %v5284_v22, %v5291_v32 }
 0x582   :  { %v5176_v51 = vsel %vm5174_vm5, %v5161_v6, %v5175_v26 }
 0x583   :  { %v5180_v15 = vsel %vm5173_vm10, %v5176_v51, %v5179_v63  ;;  %v5294_v37 = vshrl.u32 %v5276_v19, %v5292_v17  ;;  %v5297_v43 = vadd.s32 127, %v5296_v53 }
 0x584   :  { %v5181_v60 = vsel %vm5170_vm6, nan, %v5180_v15 }
 0x585   :  { %5367 = vst [vmem:[#allocation2 + $0xf0] sm:$0xff] %v5181_v60  ;;  %v5295_v58 = vor.u32 %v5294_v37, %v5293_v14  ;;  %v5298_v57 = vshll.u32 %v5297_v43, 23 }
 0x587   :  { %v5299_v18 = vor.u32 4788187, %v5298_v57  ;;  %v5302_v11 = vcvt.s32.f32 %v5295_v58 }
 0x589   :  { %v5300_v36 = vand.u32 2147483647, %v5299_v18 }
 0x58b   :  { %v5303_v50 = vmul.f32 %v5302_v11, %v5300_v36 }
 0x58d   :  { %v5304_v39 = vxor.u32 2147483648, %v5303_v50 }
 0x58f   :  { %v5305_v34 = vsel %vm5184_vm9, %v5304_v39, %v5303_v50 }
 0x590   :  { %v5308_v31 = vsel %vm5183_vm11, %v9323_v5, %v5305_v34 }
 0x591   :  { %v5310_v4 = vmul.f32 %v5308_v31, %v5308_v31 }
 0x593   :  { %v5311_v30 = vmul.f32 -0.001358992, %v5310_v4  ;;  %v5318_v29 = vmul.f32 -0.00019511016, %v5310_v4 }
 0x595   :  { %v5312_v35 = vadd.f32 0.041655596, %v5311_v30  ;;  %v5319_v16 = vadd.f32 0.008332121, %v5318_v29 }
 0x597   :  { %v5313_v62 = vmul.f32 %v5312_v35, %v5310_v4  ;;  %v5320_v41 = vmul.f32 %v5319_v16, %v5310_v4 }
 0x599   :  { %v5314_v13 = vadd.f32 -0.4999988, %v5313_v62  ;;  %v5321_v7 = vadd.f32 -0.16666654, %v5320_v41 }
 0x59b   :  { %v5315_v23 = vmul.f32 %v5314_v13, %v5310_v4  ;;  %v5322_v44 = vmul.f32 %v5321_v7, %v5310_v4 }
 0x59d   :  { %v5316_v9 = vadd.f32 1.0, %v5315_v23  ;;  %v5323_v2 = vadd.f32 1.0, %v5322_v44 }
 0x59f   :  { %v5324_v27 = vmul.f32 %v5323_v2, %v5308_v31  ;;  %v5333_v52 = vxor.u32 2147483648, %v5316_v9 }
 0x5a1   :  { %v5330_v20 = vxor.u32 2147483648, %v5324_v27  ;;  %v5334_v0 = vsel %vm5332_vm13, %v5333_v52, %v5324_v27 }
 0x5a3   :  { %v5331_v59 = vsel %vm5329_vm12, %v5316_v9, %v5330_v20 }
 0x5a4   :  { %v5335_v48 = vsel %vm5328_vm14, %v5331_v59, %v5334_v0 }
 0x5a5   :  { %v5336_v12 = vsel %vm5325_vm15, nan, %v5335_v48 }
 0x5a6   :  { %5368 = vst [vmem:[#allocation2 + $0xf8] sm:$0xff] %v5336_v12 }
 0x5a7   :  { %5381 = dma.vmem_to_hbm [thread:$0]  %s5374_s16, 4096, %s5376_s19, [#allocation3], %s5541_s20, %s5541_s20, %s5542_s21  }
 0x5a8   :  { %5529 = dma.done.wait [#allocation3], 4096  }
 0x5a9   :  { %5530 = vsyncadd [#allocation3], 4294963200 }
 0x5aa   :  { %5386 = vsyncpa [#allocation3], 1 }

</bundles_post_ra>
